<compile_context>
chip_gen: v7x
topology: tpu7x:2x2x1
jax: 0.10.0
libtpu: 0.0.40
codegen_flags: <defaults>
</compile_context>

<pallas_src>
import functools

import jax
import jax.numpy as jnp
import numpy as np
from jax import lax
from jax.experimental import pallas as pl
from jax.experimental.pallas import tpu as pltpu

LANES = 256            # lane width of one column-parity block (14*16 and 7*32, zero-padded)


def _pick_tb(batch):
    """Batch-tile size: as large as possible (MXU fill / per-step overhead amortization),
    a multiple of 16 (bf16 sublane tile), and keeping >= 2 grid steps when the batch
    allows so the v7x dual-TC 'parallel' split has work for both cores."""
    for tb in (64, 32, 16):
        if batch >= 2 * tb:
            return tb
    return 16


# ---------------------------------------------------------------------------
# Fused kernel: conv1+pool -> conv2+pool -> linear, one batch tile per grid step.
# ---------------------------------------------------------------------------
def _fused_net_kernel(tb, x_ref, t1_ref, t2_ref, t3_ref, b1_ref, b2_ref, b3_ref,
                      o_ref, y1p_ref, y2_ref):
    f32 = jnp.float32
    bf16 = jnp.bfloat16

    # ---- layer 1: conv1 as ONE K=256 Toeplitz matmul (all 4 row phases packed in N) ----
    # x_ref[0] : (7*tb, 256) bf16, lanes = (4d+phi)*32 + col  (holds input row 4m+4d+phi)
    # t1_ref   : (256, 2048) bf16, out lanes = rho*512 + beta*256 + j*16 + c
    acc1 = jnp.dot(x_ref[0], t1_ref[...], preferred_element_type=f32)     # (7*tb, 2048)

    zero_rows = jnp.zeros((tb, LANES), bf16)
    for a in range(2):                         # pooled-row parity: y1 row i = 2m + a
        r_even = acc1[:, (2 * a) * 2 * LANES:(2 * a + 1) * 2 * LANES]      # conv rows 4m+2a
        r_odd = acc1[:, (2 * a + 1) * 2 * LANES:(2 * a + 2) * 2 * LANES]   # conv rows 4m+2a+1
        m_rows = jnp.maximum(r_even, r_odd)                                # 2x2 pool (rows)
        m_cols = jnp.maximum(m_rows[:, 0:LANES], m_rows[:, LANES:2 * LANES])  # pool (cols)
        y1a = jnp.maximum(m_cols + b1_ref[...], 0.0).astype(bf16)          # bias + ReLU
        y1p_ref[a, 0:tb, :] = zero_rows                                    # pad row (m = -1)
        y1p_ref[a, tb:8 * tb, :] = y1a                                     # m = 0..6
        y1p_ref[a, 8 * tb:9 * tb, :] = zero_rows                           # pad row (m = 7)

    # ---- layer 2: conv2 (K=256 Toeplitz matmuls) + bias + ReLU + 2x2 pool ----
    def conv2_rows(planes, drs):
        acc = None
        for kh in range(5):
            slab = y1p_ref[planes[kh], drs[kh] * tb:(drs[kh] + 7) * tb, :]   # (7*tb, 256)
            part = jnp.dot(slab, t2_ref[kh], preferred_element_type=f32)
            acc = part if acc is None else acc + part
        return acc                                                          # (7*tb, 512)

    ev = conv2_rows((0, 1, 0, 1, 0), (0, 0, 1, 1, 2))      # conv2 output rows 2*i
    od = conv2_rows((1, 0, 1, 0, 1), (0, 1, 1, 2, 2))      # conv2 output rows 2*i + 1
    m2 = jnp.maximum(ev, od)
    mc2 = jnp.maximum(m2[:, 0:LANES], m2[:, LANES:2 * LANES])
    y2 = jnp.maximum(mc2 + b2_ref[...], 0.0).astype(bf16)                   # (7*tb, 256)

    # ---- linear: lane-dense (tb, 7*256) relayout + single K=1792 matmul ----
    for ih in range(7):
        y2_ref[:, ih * LANES:(ih + 1) * LANES] = y2[ih * tb:(ih + 1) * tb, :]
    o_ref[...] = (jnp.dot(y2_ref[...], t3_ref[...], preferred_element_type=f32)
                  + b3_ref[...])                                            # (tb, 128) lane-dense


# ---------------------------------------------------------------------------
# Weight conversion: PyTorch layouts -> lane-dense bf16 Toeplitz matrices (init-time).
# ---------------------------------------------------------------------------
def build_kernel_params(w1, b1, w2, b2, w3, b3):
    w1 = np.asarray(w1, np.float32)   # (16, 1, 5, 5)   (co, ci, kh, kw)
    w2 = np.asarray(w2, np.float32)   # (32, 16, 5, 5)
    w3 = np.asarray(w3, np.float32)   # (10, 1568)
    b1 = np.asarray(b1, np.float32)
    b2 = np.asarray(b2, np.float32)
    b3 = np.asarray(b3, np.float32)

    # T1big[(4d+phi)*32 + w, rho*512 + beta*256 + j*16 + c] = w1[c, 0, 4d+phi-rho, w-2j-beta]
    t1big = np.zeros((256, 4 * 2 * LANES), np.float32)
    for k8 in range(8):                       # k8 = 4d + phi  (input row = 4m + k8)
        for rho in range(4):                  # conv1 output row = 4m + rho
            kh = k8 - rho
            if 0 <= kh <= 4:
                for beta in range(2):
                    for j in range(14):
                        for kw in range(5):
                            w = 2 * j + beta + kw
                            col = rho * 512 + beta * LANES + j * 16
                            t1big[k8 * 32 + w, col:col + 16] = w1[:, 0, kh, kw]

    # T2[kh, j*16 + ci, beta*256 + jp*32 + co] = w2[co, ci, kh, j - 2jp - beta + 2]
    t2 = np.zeros((5, LANES, 2 * LANES), np.float32)
    for kh in range(5):
        for beta in range(2):
            for jp in range(7):
                for kw in range(5):
                    j = 2 * jp + beta + kw - 2
                    if 0 <= j <= 13:
                        base = beta * LANES + jp * 32
                        t2[kh, j * 16:(j + 1) * 16, base:base + 32] = w2[:, :, kh, kw].T

    # T3big[ih*256 + jp*32 + co, k] = w3[k, co*49 + ih*7 + jp]   (PyTorch x.view(B,-1) order)
    w3r = w3.reshape(10, 32, 7, 7)
    t3big = np.zeros((7 * LANES, 128), np.float32)
    for ih in range(7):
        for jp in range(7):
            t3big[ih * LANES + jp * 32: ih * LANES + (jp + 1) * 32, 0:10] = w3r[:, :, ih, jp].T

    b1row = np.zeros((1, LANES), np.float32)
    for j in range(14):
        b1row[0, j * 16:(j + 1) * 16] = b1
    b2row = np.zeros((1, LANES), np.float32)
    for jp in range(7):
        b2row[0, jp * 32:(jp + 1) * 32] = b2
    b3row = np.zeros((1, 128), np.float32)
    b3row[0, 0:10] = b3

    # bf16 matmul operands (MXU-native), f32 biases (added to f32 accumulators).
    return (jnp.asarray(t1big, jnp.bfloat16),
            jnp.asarray(t2, jnp.bfloat16),
            jnp.asarray(t3big, jnp.bfloat16),
            jnp.asarray(b1row), jnp.asarray(b2row), jnp.asarray(b3row))


def init_raw_params(key):
    k1, k2, k3, k4, k5, k6 = jax.random.split(key, 6)
    # Deterministic synthetic parameters in the PyTorch layouts.
    w1 = jax.random.normal(k1, (16, 1, 5, 5), jnp.float32) * 0.1
    b1 = jax.random.normal(k2, (16,), jnp.float32) * 0.1
    w2 = jax.random.normal(k3, (32, 16, 5, 5), jnp.float32) * 0.05
    b2 = jax.random.normal(k4, (32,), jnp.float32) * 0.05
    w3 = jax.random.normal(k5, (10, 32 * 7 * 7), jnp.float32) * 0.02
    b3 = jax.random.normal(k6, (10,), jnp.float32) * 0.02
    return w1, b1, w2, b2, w3, b3


# ---------------------------------------------------------------------------
# Pure-JAX reference (f32) for a correctness check of the fused kernel.
# ---------------------------------------------------------------------------
def reference_forward(x, w1, b1, w2, b2, w3, b3):
    dn = ("NCHW", "OIHW", "NCHW")
    y = lax.conv_general_dilated(x, w1, (1, 1), ((2, 2), (2, 2)), dimension_numbers=dn)
    y = jnp.maximum(y + b1[None, :, None, None], 0.0)
    y = lax.reduce_window(y, -jnp.inf, lax.max, (1, 1, 2, 2), (1, 1, 2, 2), "VALID")
    y = lax.conv_general_dilated(y, w2, (1, 1), ((2, 2), (2, 2)), dimension_numbers=dn)
    y = jnp.maximum(y + b2[None, :, None, None], 0.0)
    y = lax.reduce_window(y, -jnp.inf, lax.max, (1, 1, 2, 2), (1, 1, 2, 2), "VALID")
    y = y.reshape(y.shape[0], -1)
    return y @ w3.T + b3


# ---------------------------------------------------------------------------
# Forward pass
# ---------------------------------------------------------------------------
@jax.jit
def net_forward(x_nchw, params):
    t1big, t2, t3big, b1row, b2row, b3row = params
    batch = x_nchw.shape[0]
    tb = _pick_tb(batch)
    nb = (batch + tb - 1) // tb
    bp = nb * tb

    # Zero-pad 28x28 -> 32x32 (conv pad=2), pad batch to a multiple of tb, then build the
    # lane-dense conv1 LHS: row = m*tb + b (m = 0..6), lanes = k8*32 + col (k8 = 0..7),
    # holding zero-padded input row 4m + k8.  ~7 KB/image of f32; whole relayout is host-side.
    x = x_nchw[:, 0, :, :]
    x = jnp.pad(x, ((0, bp - batch), (2, 2), (2, 2)))                       # (bp, 32, 32)
    rows_idx = 4 * np.arange(7)[:, None] + np.arange(8)[None, :]            # (7, 8): 4m + k8
    xg = x[:, rows_idx, :].reshape(bp, 7, 8 * 32).astype(jnp.bfloat16)      # (bp, 7, 256)
    x_lhs = jnp.transpose(xg.reshape(nb, tb, 7, 8 * 32),
                          (0, 2, 1, 3)).reshape(nb, 7 * tb, 8 * 32)         # (nb, 7*tb, 256)

    kernel = functools.partial(_fused_net_kernel, tb)
    out = pl.pallas_call(
        kernel,
        out_shape=jax.ShapeDtypeStruct((bp, 128), jnp.float32),
        grid_spec=pltpu.PrefetchScalarGridSpec(
            num_scalar_prefetch=0,
            grid=(nb,),
            in_specs=[
                pl.BlockSpec((1, 7 * tb, 256), lambda i: (i, 0, 0)),        # conv1 LHS tile
                pl.BlockSpec((256, 2048), lambda i: (0, 0)),                # T1big (resident)
                pl.BlockSpec((5, LANES, 2 * LANES), lambda i: (0, 0, 0)),   # T2 (resident)
                pl.BlockSpec((7 * LANES, 128), lambda i: (0, 0)),           # T3big (resident)
                pl.BlockSpec((1, LANES), lambda i: (0, 0)),                 # bias1
                pl.BlockSpec((1, LANES), lambda i: (0, 0)),                 # bias2
                pl.BlockSpec((1, 128), lambda i: (0, 0)),                   # bias3 (padded)
            ],
            out_specs=pl.BlockSpec((tb, 128), lambda i: (i, 0)),
            scratch_shapes=[
                pltpu.VMEM((2, 9 * tb, LANES), jnp.bfloat16),  # y1 (row-parity, zero-pad rows)
                pltpu.VMEM((tb, 7 * LANES), jnp.bfloat16),     # y2 lane-dense for the linear
            ],
        ),
        compiler_params=pltpu.CompilerParams(
            dimension_semantics=("parallel",),
            vmem_limit_bytes=48 * 1024 * 1024,
        ),
    )(x_lhs, t1big, t2, t3big, b1row, b2row, b3row)

    return out[:batch, :10]


if __name__ == "__main__":
    key = jax.random.PRNGKey(0)
    k_param, k_x = jax.random.split(key)
    raw = init_raw_params(k_param)
    params = build_kernel_params(*raw)
    # Fashion-MNIST shaped input implied by Linear(32*7*7, 10): (B, 1, 28, 28)
    x = jax.random.normal(k_x, (2, 1, 28, 28), jnp.float32)
    out = net_forward(x, params)
    jax.block_until_ready(out)
    assert out.shape == (2, 10) and out.dtype == jnp.float32
    ref = reference_forward(x, *raw)
    np.testing.assert_allclose(np.asarray(out), np.asarray(ref), atol=1e-1, rtol=5e-2)
    print("KERNEL_OK")
</pallas_src>

<mosaic_0001>
module attributes {stable_mosaic.version = 11 : i64} {
  func.func @_fused_net_kernel(%arg0: i32, %arg1: memref<1x112x256xbf16, #tpu.memory_space<vmem>>, %arg2: memref<256x2048xbf16, #tpu.memory_space<vmem>>, %arg3: memref<5x256x512xbf16, #tpu.memory_space<vmem>>, %arg4: memref<1792x128xbf16, #tpu.memory_space<vmem>>, %arg5: memref<1x256xf32, #tpu.memory_space<vmem>>, %arg6: memref<1x256xf32, #tpu.memory_space<vmem>>, %arg7: memref<1x128xf32, #tpu.memory_space<vmem>>, %arg8: memref<16x128xf32, #tpu.memory_space<vmem>>, %arg9: memref<2x144x256xbf16, #tpu.memory_space<vmem>>, %arg10: memref<16x1792xbf16, #tpu.memory_space<vmem>>) attributes {dimension_semantics = [#tpu.dimension_semantics<parallel>], iteration_bounds = array<i64: 1>, scalar_prefetch = 0 : i64, scratch_operands = 2 : i64, tpu.core_type = #tpu.core_type<tc>, window_params = [{transform_indices = @transform_0, window_bounds = array<i64: 1, 112, 256>}, {pipeline_mode = #tpu.pipeline_mode<synchronous>, transform_indices = @transform_1, window_bounds = array<i64: 256, 2048>}, {pipeline_mode = #tpu.pipeline_mode<synchronous>, transform_indices = @transform_2, window_bounds = array<i64: 5, 256, 512>}, {pipeline_mode = #tpu.pipeline_mode<synchronous>, transform_indices = @transform_3, window_bounds = array<i64: 1792, 128>}, {pipeline_mode = #tpu.pipeline_mode<synchronous>, transform_indices = @transform_4, window_bounds = array<i64: 1, 256>}, {pipeline_mode = #tpu.pipeline_mode<synchronous>, transform_indices = @transform_5, window_bounds = array<i64: 1, 256>}, {pipeline_mode = #tpu.pipeline_mode<synchronous>, transform_indices = @transform_6, window_bounds = array<i64: 1, 128>}, {transform_indices = @transform_7, window_bounds = array<i64: 16, 128>}]} {
    %c0 = arith.constant 0 : index
    %c0_0 = arith.constant 0 : index
    %c0_1 = arith.constant 0 : index
    %0 = vector.load %arg1[%c0, %c0_0, %c0_1] : memref<1x112x256xbf16, #tpu.memory_space<vmem>>, vector<1x112x256xbf16>
    %1 = vector.shape_cast %0 : vector<1x112x256xbf16> to vector<112x256xbf16>
    %c0_2 = arith.constant 0 : index
    %c0_3 = arith.constant 0 : index
    %2 = vector.load %arg2[%c0_2, %c0_3] : memref<256x2048xbf16, #tpu.memory_space<vmem>>, vector<256x2048xbf16>
    %cst = arith.constant dense<0.000000e+00> : vector<112x2048xf32>
    %3 = tpu.matmul %1, %2, %cst {dimension_numbers = #tpu.dot_dimension_numbers<[1], [0], [0], [1], [0, 0, 1, 1], [], []>} : vector<112x256xbf16>, vector<256x2048xbf16>, vector<112x2048xf32> -> vector<112x2048xf32>
    %cst_4 = arith.constant 0.000000e+00 : bf16
    %4 = vector.broadcast %cst_4 : bf16 to vector<16x256xbf16>
    %5 = vector.extract_strided_slice %3 {offsets = [0, 0], sizes = [112, 512], strides = [1, 1]} : vector<112x2048xf32> to vector<112x512xf32>
    %6 = vector.extract_strided_slice %3 {offsets = [0, 512], sizes = [112, 512], strides = [1, 1]} : vector<112x2048xf32> to vector<112x512xf32>
    %7 = arith.maximumf %5, %6 : vector<112x512xf32>
    %8 = vector.extract_strided_slice %7 {offsets = [0, 0], sizes = [112, 256], strides = [1, 1]} : vector<112x512xf32> to vector<112x256xf32>
    %9 = vector.extract_strided_slice %7 {offsets = [0, 256], sizes = [112, 256], strides = [1, 1]} : vector<112x512xf32> to vector<112x256xf32>
    %10 = arith.maximumf %8, %9 : vector<112x256xf32>
    %c0_5 = arith.constant 0 : index
    %c0_6 = arith.constant 0 : index
    %11 = vector.load %arg5[%c0_5, %c0_6] : memref<1x256xf32, #tpu.memory_space<vmem>>, vector<1x256xf32>
    %12 = vector.broadcast %11 : vector<1x256xf32> to vector<112x256xf32>
    %13 = arith.addf %10, %12 : vector<112x256xf32>
    %cst_7 = arith.constant 0.000000e+00 : f32
    %14 = vector.broadcast %cst_7 : f32 to vector<112x256xf32>
    %15 = arith.maximumf %13, %14 : vector<112x256xf32>
    %16 = arith.truncf %15 : vector<112x256xf32> to vector<112x256xbf16>
    %c0_8 = arith.constant 0 : index
    %c0_9 = arith.constant 0 : index
    %c0_10 = arith.constant 0 : index
    %17 = vector.load %arg9[%c0_8, %c0_9, %c0_10] : memref<2x144x256xbf16, #tpu.memory_space<vmem>>, vector<1x16x256xbf16>
    %18 = vector.shape_cast %17 : vector<1x16x256xbf16> to vector<16x256xbf16>
    %19 = vector.shape_cast %4 : vector<16x256xbf16> to vector<1x16x256xbf16>
    tpu.vector_store %arg9[%c0_8, %c0_9, %c0_10], %19 {strides = array<i32>} : memref<2x144x256xbf16, #tpu.memory_space<vmem>>, vector<1x16x256xbf16>,
    %c0_11 = arith.constant 0 : index
    %c16 = arith.constant 16 : index
    %c0_12 = arith.constant 0 : index
    %20 = vector.load %arg9[%c0_11, %c16, %c0_12] : memref<2x144x256xbf16, #tpu.memory_space<vmem>>, vector<1x112x256xbf16>
    %21 = vector.shape_cast %20 : vector<1x112x256xbf16> to vector<112x256xbf16>
    %22 = vector.shape_cast %16 : vector<112x256xbf16> to vector<1x112x256xbf16>
    tpu.vector_store %arg9[%c0_11, %c16, %c0_12], %22 {strides = array<i32>} : memref<2x144x256xbf16, #tpu.memory_space<vmem>>, vector<1x112x256xbf16>,
    %c0_13 = arith.constant 0 : index
    %c128 = arith.constant 128 : index
    %c0_14 = arith.constant 0 : index
    %23 = vector.load %arg9[%c0_13, %c128, %c0_14] : memref<2x144x256xbf16, #tpu.memory_space<vmem>>, vector<1x16x256xbf16>
    %24 = vector.shape_cast %23 : vector<1x16x256xbf16> to vector<16x256xbf16>
    %25 = vector.shape_cast %4 : vector<16x256xbf16> to vector<1x16x256xbf16>
    tpu.vector_store %arg9[%c0_13, %c128, %c0_14], %25 {strides = array<i32>} : memref<2x144x256xbf16, #tpu.memory_space<vmem>>, vector<1x16x256xbf16>,
    %26 = vector.extract_strided_slice %3 {offsets = [0, 1024], sizes = [112, 512], strides = [1, 1]} : vector<112x2048xf32> to vector<112x512xf32>
    %27 = vector.extract_strided_slice %3 {offsets = [0, 1536], sizes = [112, 512], strides = [1, 1]} : vector<112x2048xf32> to vector<112x512xf32>
    %28 = arith.maximumf %26, %27 : vector<112x512xf32>
    %29 = vector.extract_strided_slice %28 {offsets = [0, 0], sizes = [112, 256], strides = [1, 1]} : vector<112x512xf32> to vector<112x256xf32>
    %30 = vector.extract_strided_slice %28 {offsets = [0, 256], sizes = [112, 256], strides = [1, 1]} : vector<112x512xf32> to vector<112x256xf32>
    %31 = arith.maximumf %29, %30 : vector<112x256xf32>
    %c0_15 = arith.constant 0 : index
    %c0_16 = arith.constant 0 : index
    %32 = vector.load %arg5[%c0_15, %c0_16] : memref<1x256xf32, #tpu.memory_space<vmem>>, vector<1x256xf32>
    %33 = vector.broadcast %32 : vector<1x256xf32> to vector<112x256xf32>
    %34 = arith.addf %31, %33 : vector<112x256xf32>
    %cst_17 = arith.constant 0.000000e+00 : f32
    %35 = vector.broadcast %cst_17 : f32 to vector<112x256xf32>
    %36 = arith.maximumf %34, %35 : vector<112x256xf32>
    %37 = arith.truncf %36 : vector<112x256xf32> to vector<112x256xbf16>
    %c1 = arith.constant 1 : index
    %c0_18 = arith.constant 0 : index
    %c0_19 = arith.constant 0 : index
    %38 = vector.load %arg9[%c1, %c0_18, %c0_19] : memref<2x144x256xbf16, #tpu.memory_space<vmem>>, vector<1x16x256xbf16>
    %39 = vector.shape_cast %38 : vector<1x16x256xbf16> to vector<16x256xbf16>
    %40 = vector.shape_cast %4 : vector<16x256xbf16> to vector<1x16x256xbf16>
    tpu.vector_store %arg9[%c1, %c0_18, %c0_19], %40 {strides = array<i32>} : memref<2x144x256xbf16, #tpu.memory_space<vmem>>, vector<1x16x256xbf16>,
    %c1_20 = arith.constant 1 : index
    %c16_21 = arith.constant 16 : index
    %c0_22 = arith.constant 0 : index
    %41 = vector.load %arg9[%c1_20, %c16_21, %c0_22] : memref<2x144x256xbf16, #tpu.memory_space<vmem>>, vector<1x112x256xbf16>
    %42 = vector.shape_cast %41 : vector<1x112x256xbf16> to vector<112x256xbf16>
    %43 = vector.shape_cast %37 : vector<112x256xbf16> to vector<1x112x256xbf16>
    tpu.vector_store %arg9[%c1_20, %c16_21, %c0_22], %43 {strides = array<i32>} : memref<2x144x256xbf16, #tpu.memory_space<vmem>>, vector<1x112x256xbf16>,
    %c1_23 = arith.constant 1 : index
    %c128_24 = arith.constant 128 : index
    %c0_25 = arith.constant 0 : index
    %44 = vector.load %arg9[%c1_23, %c128_24, %c0_25] : memref<2x144x256xbf16, #tpu.memory_space<vmem>>, vector<1x16x256xbf16>
    %45 = vector.shape_cast %44 : vector<1x16x256xbf16> to vector<16x256xbf16>
    %46 = vector.shape_cast %4 : vector<16x256xbf16> to vector<1x16x256xbf16>
    tpu.vector_store %arg9[%c1_23, %c128_24, %c0_25], %46 {strides = array<i32>} : memref<2x144x256xbf16, #tpu.memory_space<vmem>>, vector<1x16x256xbf16>,
    %c0_26 = arith.constant 0 : index
    %c0_27 = arith.constant 0 : index
    %c0_28 = arith.constant 0 : index
    %47 = vector.load %arg9[%c0_26, %c0_27, %c0_28] : memref<2x144x256xbf16, #tpu.memory_space<vmem>>, vector<1x112x256xbf16>
    %48 = vector.shape_cast %47 : vector<1x112x256xbf16> to vector<112x256xbf16>
    %c0_29 = arith.constant 0 : index
    %c0_30 = arith.constant 0 : index
    %c0_31 = arith.constant 0 : index
    %49 = vector.load %arg3[%c0_29, %c0_30, %c0_31] : memref<5x256x512xbf16, #tpu.memory_space<vmem>>, vector<1x256x512xbf16>
    %50 = vector.shape_cast %49 : vector<1x256x512xbf16> to vector<256x512xbf16>
    %cst_32 = arith.constant dense<0.000000e+00> : vector<112x512xf32>
    %51 = tpu.matmul %48, %50, %cst_32 {dimension_numbers = #tpu.dot_dimension_numbers<[1], [0], [0], [1], [0, 0, 1, 1], [], []>} : vector<112x256xbf16>, vector<256x512xbf16>, vector<112x512xf32> -> vector<112x512xf32>
    %c1_33 = arith.constant 1 : index
    %c0_34 = arith.constant 0 : index
    %c0_35 = arith.constant 0 : index
    %52 = vector.load %arg9[%c1_33, %c0_34, %c0_35] : memref<2x144x256xbf16, #tpu.memory_space<vmem>>, vector<1x112x256xbf16>
    %53 = vector.shape_cast %52 : vector<1x112x256xbf16> to vector<112x256xbf16>
    %c1_36 = arith.constant 1 : index
    %c0_37 = arith.constant 0 : index
    %c0_38 = arith.constant 0 : index
    %54 = vector.load %arg3[%c1_36, %c0_37, %c0_38] : memref<5x256x512xbf16, #tpu.memory_space<vmem>>, vector<1x256x512xbf16>
    %55 = vector.shape_cast %54 : vector<1x256x512xbf16> to vector<256x512xbf16>
    %cst_39 = arith.constant dense<0.000000e+00> : vector<112x512xf32>
    %56 = tpu.matmul %53, %55, %cst_39 {dimension_numbers = #tpu.dot_dimension_numbers<[1], [0], [0], [1], [0, 0, 1, 1], [], []>} : vector<112x256xbf16>, vector<256x512xbf16>, vector<112x512xf32> -> vector<112x512xf32>
    %57 = arith.addf %51, %56 : vector<112x512xf32>
    %c0_40 = arith.constant 0 : index
    %c16_41 = arith.constant 16 : index
    %c0_42 = arith.constant 0 : index
    %58 = vector.load %arg9[%c0_40, %c16_41, %c0_42] : memref<2x144x256xbf16, #tpu.memory_space<vmem>>, vector<1x112x256xbf16>
    %59 = vector.shape_cast %58 : vector<1x112x256xbf16> to vector<112x256xbf16>
    %c2 = arith.constant 2 : index
    %c0_43 = arith.constant 0 : index
    %c0_44 = arith.constant 0 : index
    %60 = vector.load %arg3[%c2, %c0_43, %c0_44] : memref<5x256x512xbf16, #tpu.memory_space<vmem>>, vector<1x256x512xbf16>
    %61 = vector.shape_cast %60 : vector<1x256x512xbf16> to vector<256x512xbf16>
    %cst_45 = arith.constant dense<0.000000e+00> : vector<112x512xf32>
    %62 = tpu.matmul %59, %61, %cst_45 {dimension_numbers = #tpu.dot_dimension_numbers<[1], [0], [0], [1], [0, 0, 1, 1], [], []>} : vector<112x256xbf16>, vector<256x512xbf16>, vector<112x512xf32> -> vector<112x512xf32>
    %63 = arith.addf %57, %62 : vector<112x512xf32>
    %c1_46 = arith.constant 1 : index
    %c16_47 = arith.constant 16 : index
    %c0_48 = arith.constant 0 : index
    %64 = vector.load %arg9[%c1_46, %c16_47, %c0_48] : memref<2x144x256xbf16, #tpu.memory_space<vmem>>, vector<1x112x256xbf16>
    %65 = vector.shape_cast %64 : vector<1x112x256xbf16> to vector<112x256xbf16>
    %c3 = arith.constant 3 : index
    %c0_49 = arith.constant 0 : index
    %c0_50 = arith.constant 0 : index
    %66 = vector.load %arg3[%c3, %c0_49, %c0_50] : memref<5x256x512xbf16, #tpu.memory_space<vmem>>, vector<1x256x512xbf16>
    %67 = vector.shape_cast %66 : vector<1x256x512xbf16> to vector<256x512xbf16>
    %cst_51 = arith.constant dense<0.000000e+00> : vector<112x512xf32>
    %68 = tpu.matmul %65, %67, %cst_51 {dimension_numbers = #tpu.dot_dimension_numbers<[1], [0], [0], [1], [0, 0, 1, 1], [], []>} : vector<112x256xbf16>, vector<256x512xbf16>, vector<112x512xf32> -> vector<112x512xf32>
    %69 = arith.addf %63, %68 : vector<112x512xf32>
    %c0_52 = arith.constant 0 : index
    %c32 = arith.constant 32 : index
    %c0_53 = arith.constant 0 : index
    %70 = vector.load %arg9[%c0_52, %c32, %c0_53] : memref<2x144x256xbf16, #tpu.memory_space<vmem>>, vector<1x112x256xbf16>
    %71 = vector.shape_cast %70 : vector<1x112x256xbf16> to vector<112x256xbf16>
    %c4 = arith.constant 4 : index
    %c0_54 = arith.constant 0 : index
    %c0_55 = arith.constant 0 : index
    %72 = vector.load %arg3[%c4, %c0_54, %c0_55] : memref<5x256x512xbf16, #tpu.memory_space<vmem>>, vector<1x256x512xbf16>
    %73 = vector.shape_cast %72 : vector<1x256x512xbf16> to vector<256x512xbf16>
    %cst_56 = arith.constant dense<0.000000e+00> : vector<112x512xf32>
    %74 = tpu.matmul %71, %73, %cst_56 {dimension_numbers = #tpu.dot_dimension_numbers<[1], [0], [0], [1], [0, 0, 1, 1], [], []>} : vector<112x256xbf16>, vector<256x512xbf16>, vector<112x512xf32> -> vector<112x512xf32>
    %75 = arith.addf %69, %74 : vector<112x512xf32>
    %c1_57 = arith.constant 1 : index
    %c0_58 = arith.constant 0 : index
    %c0_59 = arith.constant 0 : index
    %76 = vector.load %arg9[%c1_57, %c0_58, %c0_59] : memref<2x144x256xbf16, #tpu.memory_space<vmem>>, vector<1x112x256xbf16>
    %77 = vector.shape_cast %76 : vector<1x112x256xbf16> to vector<112x256xbf16>
    %c0_60 = arith.constant 0 : index
    %c0_61 = arith.constant 0 : index
    %c0_62 = arith.constant 0 : index
    %78 = vector.load %arg3[%c0_60, %c0_61, %c0_62] : memref<5x256x512xbf16, #tpu.memory_space<vmem>>, vector<1x256x512xbf16>
    %79 = vector.shape_cast %78 : vector<1x256x512xbf16> to vector<256x512xbf16>
    %cst_63 = arith.constant dense<0.000000e+00> : vector<112x512xf32>
    %80 = tpu.matmul %77, %79, %cst_63 {dimension_numbers = #tpu.dot_dimension_numbers<[1], [0], [0], [1], [0, 0, 1, 1], [], []>} : vector<112x256xbf16>, vector<256x512xbf16>, vector<112x512xf32> -> vector<112x512xf32>
    %c0_64 = arith.constant 0 : index
    %c16_65 = arith.constant 16 : index
    %c0_66 = arith.constant 0 : index
    %81 = vector.load %arg9[%c0_64, %c16_65, %c0_66] : memref<2x144x256xbf16, #tpu.memory_space<vmem>>, vector<1x112x256xbf16>
    %82 = vector.shape_cast %81 : vector<1x112x256xbf16> to vector<112x256xbf16>
    %c1_67 = arith.constant 1 : index
    %c0_68 = arith.constant 0 : index
    %c0_69 = arith.constant 0 : index
    %83 = vector.load %arg3[%c1_67, %c0_68, %c0_69] : memref<5x256x512xbf16, #tpu.memory_space<vmem>>, vector<1x256x512xbf16>
    %84 = vector.shape_cast %83 : vector<1x256x512xbf16> to vector<256x512xbf16>
    %cst_70 = arith.constant dense<0.000000e+00> : vector<112x512xf32>
    %85 = tpu.matmul %82, %84, %cst_70 {dimension_numbers = #tpu.dot_dimension_numbers<[1], [0], [0], [1], [0, 0, 1, 1], [], []>} : vector<112x256xbf16>, vector<256x512xbf16>, vector<112x512xf32> -> vector<112x512xf32>
    %86 = arith.addf %80, %85 : vector<112x512xf32>
    %c1_71 = arith.constant 1 : index
    %c16_72 = arith.constant 16 : index
    %c0_73 = arith.constant 0 : index
    %87 = vector.load %arg9[%c1_71, %c16_72, %c0_73] : memref<2x144x256xbf16, #tpu.memory_space<vmem>>, vector<1x112x256xbf16>
    %88 = vector.shape_cast %87 : vector<1x112x256xbf16> to vector<112x256xbf16>
    %c2_74 = arith.constant 2 : index
    %c0_75 = arith.constant 0 : index
    %c0_76 = arith.constant 0 : index
    %89 = vector.load %arg3[%c2_74, %c0_75, %c0_76] : memref<5x256x512xbf16, #tpu.memory_space<vmem>>, vector<1x256x512xbf16>
    %90 = vector.shape_cast %89 : vector<1x256x512xbf16> to vector<256x512xbf16>
    %cst_77 = arith.constant dense<0.000000e+00> : vector<112x512xf32>
    %91 = tpu.matmul %88, %90, %cst_77 {dimension_numbers = #tpu.dot_dimension_numbers<[1], [0], [0], [1], [0, 0, 1, 1], [], []>} : vector<112x256xbf16>, vector<256x512xbf16>, vector<112x512xf32> -> vector<112x512xf32>
    %92 = arith.addf %86, %91 : vector<112x512xf32>
    %c0_78 = arith.constant 0 : index
    %c32_79 = arith.constant 32 : index
    %c0_80 = arith.constant 0 : index
    %93 = vector.load %arg9[%c0_78, %c32_79, %c0_80] : memref<2x144x256xbf16, #tpu.memory_space<vmem>>, vector<1x112x256xbf16>
    %94 = vector.shape_cast %93 : vector<1x112x256xbf16> to vector<112x256xbf16>
    %c3_81 = arith.constant 3 : index
    %c0_82 = arith.constant 0 : index
    %c0_83 = arith.constant 0 : index
    %95 = vector.load %arg3[%c3_81, %c0_82, %c0_83] : memref<5x256x512xbf16, #tpu.memory_space<vmem>>, vector<1x256x512xbf16>
    %96 = vector.shape_cast %95 : vector<1x256x512xbf16> to vector<256x512xbf16>
    %cst_84 = arith.constant dense<0.000000e+00> : vector<112x512xf32>
    %97 = tpu.matmul %94, %96, %cst_84 {dimension_numbers = #tpu.dot_dimension_numbers<[1], [0], [0], [1], [0, 0, 1, 1], [], []>} : vector<112x256xbf16>, vector<256x512xbf16>, vector<112x512xf32> -> vector<112x512xf32>
    %98 = arith.addf %92, %97 : vector<112x512xf32>
    %c1_85 = arith.constant 1 : index
    %c32_86 = arith.constant 32 : index
    %c0_87 = arith.constant 0 : index
    %99 = vector.load %arg9[%c1_85, %c32_86, %c0_87] : memref<2x144x256xbf16, #tpu.memory_space<vmem>>, vector<1x112x256xbf16>
    %100 = vector.shape_cast %99 : vector<1x112x256xbf16> to vector<112x256xbf16>
    %c4_88 = arith.constant 4 : index
    %c0_89 = arith.constant 0 : index
    %c0_90 = arith.constant 0 : index
    %101 = vector.load %arg3[%c4_88, %c0_89, %c0_90] : memref<5x256x512xbf16, #tpu.memory_space<vmem>>, vector<1x256x512xbf16>
    %102 = vector.shape_cast %101 : vector<1x256x512xbf16> to vector<256x512xbf16>
    %cst_91 = arith.constant dense<0.000000e+00> : vector<112x512xf32>
    %103 = tpu.matmul %100, %102, %cst_91 {dimension_numbers = #tpu.dot_dimension_numbers<[1], [0], [0], [1], [0, 0, 1, 1], [], []>} : vector<112x256xbf16>, vector<256x512xbf16>, vector<112x512xf32> -> vector<112x512xf32>
    %104 = arith.addf %98, %103 : vector<112x512xf32>
    %105 = arith.maximumf %75, %104 : vector<112x512xf32>
    %106 = vector.extract_strided_slice %105 {offsets = [0, 0], sizes = [112, 256], strides = [1, 1]} : vector<112x512xf32> to vector<112x256xf32>
    %107 = vector.extract_strided_slice %105 {offsets = [0, 256], sizes = [112, 256], strides = [1, 1]} : vector<112x512xf32> to vector<112x256xf32>
    %108 = arith.maximumf %106, %107 : vector<112x256xf32>
    %c0_92 = arith.constant 0 : index
    %c0_93 = arith.constant 0 : index
    %109 = vector.load %arg6[%c0_92, %c0_93] : memref<1x256xf32, #tpu.memory_space<vmem>>, vector<1x256xf32>
    %110 = vector.broadcast %109 : vector<1x256xf32> to vector<112x256xf32>
    %111 = arith.addf %108, %110 : vector<112x256xf32>
    %cst_94 = arith.constant 0.000000e+00 : f32
    %112 = vector.broadcast %cst_94 : f32 to vector<112x256xf32>
    %113 = arith.maximumf %111, %112 : vector<112x256xf32>
    %114 = arith.truncf %113 : vector<112x256xf32> to vector<112x256xbf16>
    %115 = vector.extract_strided_slice %114 {offsets = [0, 0], sizes = [16, 256], strides = [1, 1]} : vector<112x256xbf16> to vector<16x256xbf16>
    %c0_95 = arith.constant 0 : index
    %c0_96 = arith.constant 0 : index
    %116 = vector.load %arg10[%c0_95, %c0_96] : memref<16x1792xbf16, #tpu.memory_space<vmem>>, vector<16x256xbf16>
    tpu.vector_store %arg10[%c0_95, %c0_96], %115 {strides = array<i32>} : memref<16x1792xbf16, #tpu.memory_space<vmem>>, vector<16x256xbf16>,
    %117 = vector.extract_strided_slice %114 {offsets = [16, 0], sizes = [16, 256], strides = [1, 1]} : vector<112x256xbf16> to vector<16x256xbf16>
    %c0_97 = arith.constant 0 : index
    %c256 = arith.constant 256 : index
    %118 = vector.load %arg10[%c0_97, %c256] : memref<16x1792xbf16, #tpu.memory_space<vmem>>, vector<16x256xbf16>
    tpu.vector_store %arg10[%c0_97, %c256], %117 {strides = array<i32>} : memref<16x1792xbf16, #tpu.memory_space<vmem>>, vector<16x256xbf16>,
    %119 = vector.extract_strided_slice %114 {offsets = [32, 0], sizes = [16, 256], strides = [1, 1]} : vector<112x256xbf16> to vector<16x256xbf16>
    %c0_98 = arith.constant 0 : index
    %c512 = arith.constant 512 : index
    %120 = vector.load %arg10[%c0_98, %c512] : memref<16x1792xbf16, #tpu.memory_space<vmem>>, vector<16x256xbf16>
    tpu.vector_store %arg10[%c0_98, %c512], %119 {strides = array<i32>} : memref<16x1792xbf16, #tpu.memory_space<vmem>>, vector<16x256xbf16>,
    %121 = vector.extract_strided_slice %114 {offsets = [48, 0], sizes = [16, 256], strides = [1, 1]} : vector<112x256xbf16> to vector<16x256xbf16>
    %c0_99 = arith.constant 0 : index
    %c768 = arith.constant 768 : index
    %122 = vector.load %arg10[%c0_99, %c768] : memref<16x1792xbf16, #tpu.memory_space<vmem>>, vector<16x256xbf16>
    tpu.vector_store %arg10[%c0_99, %c768], %121 {strides = array<i32>} : memref<16x1792xbf16, #tpu.memory_space<vmem>>, vector<16x256xbf16>,
    %123 = vector.extract_strided_slice %114 {offsets = [64, 0], sizes = [16, 256], strides = [1, 1]} : vector<112x256xbf16> to vector<16x256xbf16>
    %c0_100 = arith.constant 0 : index
    %c1024 = arith.constant 1024 : index
    %124 = vector.load %arg10[%c0_100, %c1024] : memref<16x1792xbf16, #tpu.memory_space<vmem>>, vector<16x256xbf16>
    tpu.vector_store %arg10[%c0_100, %c1024], %123 {strides = array<i32>} : memref<16x1792xbf16, #tpu.memory_space<vmem>>, vector<16x256xbf16>,
    %125 = vector.extract_strided_slice %114 {offsets = [80, 0], sizes = [16, 256], strides = [1, 1]} : vector<112x256xbf16> to vector<16x256xbf16>
    %c0_101 = arith.constant 0 : index
    %c1280 = arith.constant 1280 : index
    %126 = vector.load %arg10[%c0_101, %c1280] : memref<16x1792xbf16, #tpu.memory_space<vmem>>, vector<16x256xbf16>
    tpu.vector_store %arg10[%c0_101, %c1280], %125 {strides = array<i32>} : memref<16x1792xbf16, #tpu.memory_space<vmem>>, vector<16x256xbf16>,
    %127 = vector.extract_strided_slice %114 {offsets = [96, 0], sizes = [16, 256], strides = [1, 1]} : vector<112x256xbf16> to vector<16x256xbf16>
    %c0_102 = arith.constant 0 : index
    %c1536 = arith.constant 1536 : index
    %128 = vector.load %arg10[%c0_102, %c1536] : memref<16x1792xbf16, #tpu.memory_space<vmem>>, vector<16x256xbf16>
    tpu.vector_store %arg10[%c0_102, %c1536], %127 {strides = array<i32>} : memref<16x1792xbf16, #tpu.memory_space<vmem>>, vector<16x256xbf16>,
    %c0_103 = arith.constant 0 : index
    %c0_104 = arith.constant 0 : index
    %129 = vector.load %arg10[%c0_103, %c0_104] : memref<16x1792xbf16, #tpu.memory_space<vmem>>, vector<16x1792xbf16>
    %c0_105 = arith.constant 0 : index
    %c0_106 = arith.constant 0 : index
    %130 = vector.load %arg4[%c0_105, %c0_106] : memref<1792x128xbf16, #tpu.memory_space<vmem>>, vector<1792x128xbf16>
    %cst_107 = arith.constant dense<0.000000e+00> : vector<16x128xf32>
    %131 = tpu.matmul %129, %130, %cst_107 {dimension_numbers = #tpu.dot_dimension_numbers<[1], [0], [0], [1], [0, 0, 1, 1], [], []>} : vector<16x1792xbf16>, vector<1792x128xbf16>, vector<16x128xf32> -> vector<16x128xf32>
    %c0_108 = arith.constant 0 : index
    %c0_109 = arith.constant 0 : index
    %132 = vector.load %arg7[%c0_108, %c0_109] : memref<1x128xf32, #tpu.memory_space<vmem>>, vector<1x128xf32>
    %133 = vector.broadcast %132 : vector<1x128xf32> to vector<16x128xf32>
    %134 = arith.addf %131, %133 : vector<16x128xf32>
    %c0_110 = arith.constant 0 : index
    %c0_111 = arith.constant 0 : index
    %135 = vector.load %arg8[%c0_110, %c0_111] : memref<16x128xf32, #tpu.memory_space<vmem>>, vector<16x128xf32>
    tpu.vector_store %arg8[%c0_110, %c0_111], %134 {strides = array<i32>} : memref<16x128xf32, #tpu.memory_space<vmem>>, vector<16x128xf32>,
    return
  }
  func.func @transform_0(%arg0: i32) -> (i32, i32, i32) {
    %c0_i32 = arith.constant 0 : i32
    %c0_i32_0 = arith.constant 0 : i32
    %c0_i32_1 = arith.constant 0 : i32
    return %arg0, %c0_i32, %c0_i32_0 : i32, i32, i32
  }
  func.func @transform_1(%arg0: i32) -> (i32, i32) {
    %c0_i32 = arith.constant 0 : i32
    %c0_i32_0 = arith.constant 0 : i32
    %c0_i32_1 = arith.constant 0 : i32
    return %c0_i32, %c0_i32_0 : i32, i32
  }
  func.func @transform_2(%arg0: i32) -> (i32, i32, i32) {
    %c0_i32 = arith.constant 0 : i32
    %c0_i32_0 = arith.constant 0 : i32
    %c0_i32_1 = arith.constant 0 : i32
    %c0_i32_2 = arith.constant 0 : i32
    return %c0_i32, %c0_i32_0, %c0_i32_1 : i32, i32, i32
  }
  func.func @transform_3(%arg0: i32) -> (i32, i32) {
    %c0_i32 = arith.constant 0 : i32
    %c0_i32_0 = arith.constant 0 : i32
    %c0_i32_1 = arith.constant 0 : i32
    return %c0_i32, %c0_i32_0 : i32, i32
  }
  func.func @transform_4(%arg0: i32) -> (i32, i32) {
    %c0_i32 = arith.constant 0 : i32
    %c0_i32_0 = arith.constant 0 : i32
    %c0_i32_1 = arith.constant 0 : i32
    return %c0_i32, %c0_i32_0 : i32, i32
  }
  func.func @transform_5(%arg0: i32) -> (i32, i32) {
    %c0_i32 = arith.constant 0 : i32
    %c0_i32_0 = arith.constant 0 : i32
    %c0_i32_1 = arith.constant 0 : i32
    return %c0_i32, %c0_i32_0 : i32, i32
  }
  func.func @transform_6(%arg0: i32) -> (i32, i32) {
    %c0_i32 = arith.constant 0 : i32
    %c0_i32_0 = arith.constant 0 : i32
    %c0_i32_1 = arith.constant 0 : i32
    return %c0_i32, %c0_i32_0 : i32, i32
  }
  func.func @transform_7(%arg0: i32) -> (i32, i32) {
    %c0_i32 = arith.constant 0 : i32
    %c0_i32_0 = arith.constant 0 : i32
    return %arg0, %c0_i32 : i32, i32
  }
}

</mosaic_0001>

<bundles_post_ra>
// kernel: net_forward.1
= control target key start
LH: loop header
LB: loop body
LE: loop exit
PB: predicated region body
PF: predicated region fallthrough
CT: control target
= control target key end

     0   :  { %12 = vsyncpa [#allocation5], 0  ;;  %s14447_s0 = inlined_call_operand.vmem [shape: bf16[1,112,256], index: 0, kind: input, shape index: {}]   ;;  %s14448_s1 = inlined_call_operand.hbm [shape: bf16[256,2048], index: 1, kind: input, shape index: {}]   ;;  %s14449_s2 = inlined_call_operand.vmem [shape: bf16[5,256,512], index: 2, kind: input, shape index: {}]   ;;  %s14450_s3 = inlined_call_operand.hbm [shape: bf16[1792,128], index: 3, kind: input, shape index: {}]   ;;  %s14451_s4 = inlined_call_operand.vmem [shape: f32[1,256], index: 4, kind: input, shape index: {}]   ;;  %s14452_s5 = inlined_call_operand.vmem [shape: f32[1,256], index: 5, kind: input, shape index: {}]   ;;  %s14453_s6 = inlined_call_operand.vmem [shape: f32[1,128], index: 6, kind: input, shape index: {}]   ;;  %s14454_s7 = inlined_call_operand.vmem [shape: f32[16,128], index: 7, kind: output, shape index: {}]  }
   0x1   :  { %13 = vsyncpa [#allocation7], 0  ;;  %s11226_s24 = smov [#allocation4]   ;;  %s11178_s28 = scalar_lea.hbm %s14448_s1, 32768 }
   0x2   :  { %s21_s25 = sshll.u32 %s11226_s24, 4  ;;  %p11179_p0 = scmp.ne.s32.totalorder %s14448_s1, %s11178_s28  ;;  %s22_s25 = int_to_ptr.vmem [resolvable:$true] %s21_s25 }
   0x3   :  { %p11182_p1 = scmp.lt.u32.totalorder %s11178_s28, %s14448_s1 }
   0x5   :  { %p11184_p2 = pnand %p11182_p1, %p11179_p0 }
   0x7   :  { %11187 = shalt.err (!%p11184_p2)
}
   0x8   :  { %s11188_s10 = scalar_lea.vmem %s22_s25, 32768  ;;  %p11193_p4 = scmp.lt.s32.totalorder %s22_s25, %s22_s25 }
   0x9   :  { %p11189_p3 = scmp.ne.s32.totalorder %s22_s25, %s11188_s10  ;;  %p11194_p5 = scmp.lt.s32.totalorder %s11188_s10, %s11188_s10 }
   0xb   :  { %p11195_p6 = por %p11194_p5, %p11193_p4 }
   0xd   :  { %p11196_p7 = pnand %p11195_p6, %p11189_p3 }
   0xf   :  { %11199 = shalt.err (!%p11196_p7)
}
  0x10   :  { %s11227_s11 = smov 1024   ;;  %s11228_s12 = smov 64  }
  0x11   :  { %27 = dma.hbm_to_vmem [thread:$0]  %s14448_s1, 32768, %s22_s25, [#allocation5], %s11227_s11, %s11227_s11, %s11228_s12  }
  0x12   :  { %s11229_s15 = smov [#allocation6]   ;;  %s11200_s19 = scalar_lea.hbm %s14450_s3, 14336 }
  0x13   :  { %s35_s16 = sshll.u32 %s11229_s15, 4  ;;  %p11201_p8 = scmp.ne.s32.totalorder %s14450_s3, %s11200_s19  ;;  %s36_s16 = int_to_ptr.vmem [resolvable:$true] %s35_s16 }
  0x14   :  { %p11204_p9 = scmp.lt.u32.totalorder %s11200_s19, %s14450_s3 }
  0x16   :  { %p11206_p10 = pnand %p11204_p9, %p11201_p8 }
  0x18   :  { %11209 = shalt.err (!%p11206_p10)
}
  0x19   :  { %s11210_s24 = scalar_lea.vmem %s36_s16, 14336  ;;  %p11215_p12 = scmp.lt.s32.totalorder %s36_s16, %s36_s16 }
  0x1a   :  { %p11211_p11 = scmp.ne.s32.totalorder %s36_s16, %s11210_s24  ;;  %p11216_p13 = scmp.lt.s32.totalorder %s11210_s24, %s11210_s24 }
  0x1c   :  { %p11217_p0 = por %p11216_p13, %p11215_p12 }
  0x1e   :  { %p11218_p1 = pnand %p11217_p0, %p11211_p11 }
  0x20   :  { %11221 = shalt.err (!%p11218_p1)
}
  0x21   :  { %s11230_s1 = smov 4  }
  0x22   :  { %41 = dma.hbm_to_vmem [thread:$0]  %s14450_s3, 14336, %s36_s16, [#allocation7], %s11228_s12, %s11228_s12, %s11230_s1  }
  0x23   :  { %11222 = dma.done.wait [#allocation5], 32768  }
  0x24   :  { %11223 = vsyncadd [#allocation5], 4294934528 }
  0x25   :  { %11224 = dma.done.wait [#allocation7], 14336  }
  0x26   :  { %11225 = vsyncadd [#allocation7], 4294952960  ;;  %v69_v0 = vld [vmem:[#allocation4] sm:$0xff]  ;;  %v70_v2 = vld [vmem:[#allocation4 + $0x8] sm:$0xff] }
  0x27   :  { %v77_v1 = vld [vmem:[#allocation4 + $0x40] sm:$0xff]  ;;  %v78_v4 = vld [vmem:[#allocation4 + $0x48] sm:$0xff] }
  0x28   :  { %v8679_v3 = vcombine.high %v69_v0, %v77_v1  ;;  %v8678_v5 = vcombine.low %v69_v0, %v77_v1  ;;  %v85_v6 = vld [vmem:[#allocation4 + $0x80] sm:$0xff]  ;;  %v8681_v8 = vcombine.high %v70_v2, %v78_v4  ;;  %v8680_v9 = vcombine.low %v70_v2, %v78_v4  ;;  %v86_v11 = vld [vmem:[#allocation4 + $0x88] sm:$0xff] }
  0x29   :  { %v93_v7 = vld [vmem:[#allocation4 + $0xc0] sm:$0xff]  ;;  %v94_v12 = vld [vmem:[#allocation4 + $0xc8] sm:$0xff] }
  0x2a   :  { %v8695_v10 = vcombine.high %v85_v6, %v93_v7  ;;  %v101_v13 = vld [vmem:[#allocation4 + $0x100] sm:$0xff]  ;;  %1675 = vmatprep.subr.bf16.mxu0 %v8679_v3  ;;  %v8697_v14 = vcombine.high %v86_v11, %v94_v12  ;;  %v102_v16 = vld [vmem:[#allocation4 + $0x108] sm:$0xff]  ;;  %1778 = vmatprep.subr.bf16.mxu1 %v8681_v8  ;;  %v8694_v18 = vcombine.low %v85_v6, %v93_v7 }
  0x2b   :  { %v109_v15 = vld [vmem:[#allocation4 + $0x140] sm:$0xff]  ;;  %v110_v17 = vld [vmem:[#allocation4 + $0x148] sm:$0xff]  ;;  %1676 = vmatpush1.bf16.msra.mxu0 %v8678_v5  ;;  %1779 = vmatpush1.bf16.msra.mxu1 %v8680_v9  ;;  %v8696_v19 = vcombine.low %v86_v11, %v94_v12 }
  0x2c   :  { %1677 = vmatprep.subr.bf16.mxu0 %v8695_v10  ;;  %v8711_v20 = vcombine.high %v101_v13, %v109_v15  ;;  %1780 = vmatprep.subr.bf16.mxu1 %v8697_v14  ;;  %v8713_v21 = vcombine.high %v102_v16, %v110_v17  ;;  %v117_v22 = vld [vmem:[#allocation4 + $0x180] sm:$0xff]  ;;  %v118_v24 = vld [vmem:[#allocation4 + $0x188] sm:$0xff]  ;;  %v8710_v26 = vcombine.low %v101_v13, %v109_v15 }
  0x2d   :  { %v125_v23 = vld [vmem:[#allocation4 + $0x1c0] sm:$0xff]  ;;  %v126_v25 = vld [vmem:[#allocation4 + $0x1c8] sm:$0xff]  ;;  %v8712_v27 = vcombine.low %v102_v16, %v110_v17 }
  0x2e   :  { %v8727_v28 = vcombine.high %v117_v22, %v125_v23  ;;  %v8729_v29 = vcombine.high %v118_v24, %v126_v25  ;;  %v133_v30 = vld [vmem:[#allocation4 + $0x200] sm:$0xff]  ;;  %v134_v32 = vld [vmem:[#allocation4 + $0x208] sm:$0xff]  ;;  %v8726_v34 = vcombine.low %v117_v22, %v125_v23  ;;  %v8728_v35 = vcombine.low %v118_v24, %v126_v25 }
  0x2f   :  { %1678 = vmatpush1.bf16.msra.mxu0 %v8694_v18  ;;  %1781 = vmatpush1.bf16.msra.mxu1 %v8696_v19  ;;  %v141_v31 = vld [vmem:[#allocation4 + $0x240] sm:$0xff]  ;;  %v142_v33 = vld [vmem:[#allocation4 + $0x248] sm:$0xff] }
  0x30   :  { %1679 = vmatprep.subr.bf16.mxu0 %v8711_v20  ;;  %1782 = vmatprep.subr.bf16.mxu1 %v8713_v21  ;;  %v8743_v36 = vcombine.high %v133_v30, %v141_v31  ;;  %v8745_v37 = vcombine.high %v134_v32, %v142_v33  ;;  %v149_v38 = vld [vmem:[#allocation4 + $0x280] sm:$0xff]  ;;  %v150_v40 = vld [vmem:[#allocation4 + $0x288] sm:$0xff]  ;;  %v8742_v42 = vcombine.low %v133_v30, %v141_v31 }
  0x31   :  { %v157_v39 = vld [vmem:[#allocation4 + $0x2c0] sm:$0xff]  ;;  %v158_v41 = vld [vmem:[#allocation4 + $0x2c8] sm:$0xff]  ;;  %v8744_v43 = vcombine.low %v134_v32, %v142_v33 }
  0x32   :  { %v8759_v44 = vcombine.high %v149_v38, %v157_v39  ;;  %v8761_v45 = vcombine.high %v150_v40, %v158_v41  ;;  %v165_v46 = vld [vmem:[#allocation4 + $0x300] sm:$0xff]  ;;  %v166_v48 = vld [vmem:[#allocation4 + $0x308] sm:$0xff]  ;;  %v8758_v50 = vcombine.low %v149_v38, %v157_v39  ;;  %v8760_v51 = vcombine.low %v150_v40, %v158_v41 }
  0x33   :  { %1680 = vmatpush1.bf16.msra.mxu0 %v8710_v26  ;;  %1783 = vmatpush1.bf16.msra.mxu1 %v8712_v27  ;;  %v173_v47 = vld [vmem:[#allocation4 + $0x340] sm:$0xff]  ;;  %v174_v49 = vld [vmem:[#allocation4 + $0x348] sm:$0xff] }
  0x34   :  { %1681 = vmatprep.subr.bf16.mxu0 %v8727_v28  ;;  %1784 = vmatprep.subr.bf16.mxu1 %v8729_v29  ;;  %v8775_v52 = vcombine.high %v165_v46, %v173_v47  ;;  %v8777_v53 = vcombine.high %v166_v48, %v174_v49  ;;  %v181_v54 = vld [vmem:[#allocation4 + $0x380] sm:$0xff]  ;;  %v182_v57 = vld [vmem:[#allocation4 + $0x388] sm:$0xff]  ;;  %v8774_v59 = vcombine.low %v165_v46, %v173_v47 }
  0x35   :  { %v189_v55 = vld [vmem:[#allocation4 + $0x3c0] sm:$0xff]  ;;  %v190_v58 = vld [vmem:[#allocation4 + $0x3c8] sm:$0xff]  ;;  %v8776_v60 = vcombine.low %v166_v48, %v174_v49 }
  0x36   :  { %v11299_v56 = vld [vmem:[%s14447_s0 + $0x4] ss:$8 sps:$4 sm:$0xff]   ;;  %v8791_v61 = vcombine.high %v181_v54, %v189_v55  ;;  %v8793_v62 = vcombine.high %v182_v57, %v190_v58  ;;  %v8790_v3 = vcombine.low %v181_v54, %v189_v55  ;;  %v8792_v4 = vcombine.low %v182_v57, %v190_v58 }
  0x37   :  { %1682 = vmatpush1.bf16.msra.mxu0 %v8726_v34  ;;  %1785 = vmatpush1.bf16.msra.mxu1 %v8728_v35  ;;  %v197_v63 = vld [vmem:[#allocation4 + $0x400] sm:$0xff]  ;;  %v198_v1 = vld [vmem:[#allocation4 + $0x408] sm:$0xff] }
  0x38   :  { %1683 = vmatprep.subr.bf16.mxu0 %v8743_v36  ;;  %1786 = vmatprep.subr.bf16.mxu1 %v8745_v37  ;;  %v205_v0 = vld [vmem:[#allocation4 + $0x440] sm:$0xff]  ;;  %v206_v2 = vld [vmem:[#allocation4 + $0x448] sm:$0xff] }
  0x39   :  { %1707 = vmatprep.mubr.bf16.mxu0 %v11299_v56  ;;  %1810 = vmatprep.mubr.bf16.mxu1 %v11299_v56  ;;  %v8807_v5 = vcombine.high %v197_v63, %v205_v0  ;;  %v8809_v6 = vcombine.high %v198_v1, %v206_v2  ;;  %v213_v7 = vld [vmem:[#allocation4 + $0x480] sm:$0xff]  ;;  %v214_v9 = vld [vmem:[#allocation4 + $0x488] sm:$0xff]  ;;  %v8806_v11 = vcombine.low %v197_v63, %v205_v0  ;;  %v71_v0 = vld [vmem:[#allocation4 + $0x10] sm:$0xff] }
  0x3a   :  { %v221_v8 = vld [vmem:[#allocation4 + $0x4c0] sm:$0xff]  ;;  %v222_v10 = vld [vmem:[#allocation4 + $0x4c8] sm:$0xff]  ;;  %v8808_v12 = vcombine.low %v198_v1, %v206_v2  ;;  %v79_v1 = vld [vmem:[#allocation4 + $0x50] sm:$0xff] }
  0x3b   :  { %1684 = vmatpush1.bf16.msra.mxu0 %v8742_v42  ;;  %1787 = vmatpush1.bf16.msra.mxu1 %v8744_v43  ;;  %v8823_v13 = vcombine.high %v213_v7, %v221_v8  ;;  %v8825_v14 = vcombine.high %v214_v9, %v222_v10  ;;  %v229_v15 = vld [vmem:[#allocation4 + $0x500] sm:$0xff]  ;;  %v230_v17 = vld [vmem:[#allocation4 + $0x508] sm:$0xff]  ;;  %v8822_v19 = vcombine.low %v213_v7, %v221_v8  ;;  %v72_v2 = vld [vmem:[#allocation4 + $0x18] sm:$0xff] }
  0x3c   :  { %1685 = vmatprep.subr.bf16.mxu0 %v8759_v44  ;;  %1788 = vmatprep.subr.bf16.mxu1 %v8761_v45  ;;  %v237_v16 = vld [vmem:[#allocation4 + $0x540] sm:$0xff]  ;;  %v238_v18 = vld [vmem:[#allocation4 + $0x548] sm:$0xff]  ;;  %v8824_v20 = vcombine.low %v214_v9, %v222_v10  ;;  %v87_v8 = vld [vmem:[#allocation4 + $0x90] sm:$0xff] }
  0x3d   :  { %v8839_v21 = vcombine.high %v229_v15, %v237_v16  ;;  %v8841_v22 = vcombine.high %v230_v17, %v238_v18  ;;  %v245_v23 = vld [vmem:[#allocation4 + $0x580] sm:$0xff]  ;;  %v246_v25 = vld [vmem:[#allocation4 + $0x588] sm:$0xff]  ;;  %v8838_v27 = vcombine.low %v229_v15, %v237_v16  ;;  %v8840_v28 = vcombine.low %v230_v17, %v238_v18  ;;  %v95_v9 = vld [vmem:[#allocation4 + $0xd0] sm:$0xff] }
  0x3e   :  { %v253_v24 = vld [vmem:[#allocation4 + $0x5c0] sm:$0xff]  ;;  %v254_v26 = vld [vmem:[#allocation4 + $0x5c8] sm:$0xff]  ;;  %v8699_v15 = vcombine.high %v87_v8, %v95_v9  ;;  %v103_v17 = vld [vmem:[#allocation4 + $0x110] sm:$0xff] }
  0x3f   :  { %1686 = vmatpush1.bf16.msra.mxu0 %v8758_v50  ;;  %1789 = vmatpush1.bf16.msra.mxu1 %v8760_v51  ;;  %v8855_v29 = vcombine.high %v245_v23, %v253_v24  ;;  %v8857_v30 = vcombine.high %v246_v25, %v254_v26  ;;  %v261_v31 = vld [vmem:[#allocation4 + $0x600] sm:$0xff]  ;;  %v262_v33 = vld [vmem:[#allocation4 + $0x608] sm:$0xff]  ;;  %v8854_v35 = vcombine.low %v245_v23, %v253_v24  ;;  %v111_v18 = vld [vmem:[#allocation4 + $0x150] sm:$0xff] }
  0x40   :  { %1687 = vmatprep.subr.bf16.mxu0 %v8775_v52  ;;  %1790 = vmatprep.subr.bf16.mxu1 %v8777_v53  ;;  %v269_v32 = vld [vmem:[#allocation4 + $0x640] sm:$0xff]  ;;  %v270_v34 = vld [vmem:[#allocation4 + $0x648] sm:$0xff]  ;;  %v8856_v36 = vcombine.low %v246_v25, %v254_v26  ;;  %v8715_v24 = vcombine.high %v103_v17, %v111_v18  ;;  %v119_v26 = vld [vmem:[#allocation4 + $0x190] sm:$0xff] }
  0x41   :  { %v8871_v37 = vcombine.high %v261_v31, %v269_v32  ;;  %v8873_v38 = vcombine.high %v262_v33, %v270_v34  ;;  %v277_v39 = vld [vmem:[#allocation4 + $0x680] sm:$0xff]  ;;  %v278_v41 = vld [vmem:[#allocation4 + $0x688] sm:$0xff]  ;;  %v8870_v43 = vcombine.low %v261_v31, %v269_v32  ;;  %v8872_v44 = vcombine.low %v262_v33, %v270_v34 }
  0x42   :  { %v285_v40 = vld [vmem:[#allocation4 + $0x6c0] sm:$0xff]  ;;  %v286_v42 = vld [vmem:[#allocation4 + $0x6c8] sm:$0xff]  ;;  %v8714_v31 = vcombine.low %v103_v17, %v111_v18  ;;  %v223_v18 = vld [vmem:[#allocation4 + $0x4d0] sm:$0xff] }
  0x43   :  { %1688 = vmatpush1.bf16.msra.mxu0 %v8774_v59  ;;  %1791 = vmatpush1.bf16.msra.mxu1 %v8776_v60  ;;  %v8887_v45 = vcombine.high %v277_v39, %v285_v40  ;;  %v8889_v46 = vcombine.high %v278_v41, %v286_v42  ;;  %v293_v47 = vld [vmem:[#allocation4 + $0x700] sm:$0xff]  ;;  %v294_v49 = vld [vmem:[#allocation4 + $0x708] sm:$0xff]  ;;  %v8886_v51 = vcombine.low %v277_v39, %v285_v40  ;;  %v144_v39 = vld [vmem:[#allocation4 + $0x258] sm:$0xff] }
  0x44   :  { %1689 = vmatprep.subr.bf16.mxu0 %v8791_v61  ;;  %1792 = vmatprep.subr.bf16.mxu1 %v8793_v62  ;;  %v301_v48 = vld [vmem:[#allocation4 + $0x740] sm:$0xff]  ;;  %v302_v50 = vld [vmem:[#allocation4 + $0x748] sm:$0xff]  ;;  %v8888_v52 = vcombine.low %v278_v41, %v286_v42 }
  0x45   :  { %v8903_v53 = vcombine.high %v293_v47, %v301_v48  ;;  %v8905_v54 = vcombine.high %v294_v49, %v302_v50  ;;  %v309_v55 = vld [vmem:[#allocation4 + $0x780] sm:$0xff]  ;;  %v310_v58 = vld [vmem:[#allocation4 + $0x788] sm:$0xff]  ;;  %v8902_v60 = vcombine.low %v293_v47, %v301_v48  ;;  %v8904_v61 = vcombine.low %v294_v49, %v302_v50  ;;  %v160_v47 = vld [vmem:[#allocation4 + $0x2d8] sm:$0xff] }
  0x46   :  { %v317_v57 = vld [vmem:[#allocation4 + $0x7c0] sm:$0xff]  ;;  %v318_v59 = vld [vmem:[#allocation4 + $0x7c8] sm:$0xff]  ;;  %v167_v50 = vld [vmem:[#allocation4 + $0x310] sm:$0xff] }
  0x47   :  { %1690 = vmatpush1.bf16.msra.mxu0 %v8790_v3  ;;  %1793 = vmatpush1.bf16.msra.mxu1 %v8792_v4  ;;  %v8919_v62 = vcombine.high %v309_v55, %v317_v57  ;;  %v8921_v63 = vcombine.high %v310_v58, %v318_v59  ;;  %v80_v3 = vld [vmem:[#allocation4 + $0x58] sm:$0xff]  ;;  %v8918_v4 = vcombine.low %v309_v55, %v317_v57  ;;  %v11306_v10 = vld [vmem:[%s14447_s0] ss:$8 sps:$4 sm:$0xff]  }
  0x48   :  { %1691 = vmatprep.subr.bf16.mxu0 %v8807_v5  ;;  %1794 = vmatprep.subr.bf16.mxu1 %v8809_v6  ;;  %v8920_v5 = vcombine.low %v310_v58, %v318_v59  ;;  %v8683_v6 = vcombine.high %v71_v0, %v79_v1  ;;  %v8685_v7 = vcombine.high %v72_v2, %v80_v3  ;;  %v11333_v48 = vld [vmem:[%s14447_s0 + $0x20] ss:$8 sps:$4 sm:$0xff]   ;;  %v176_v55 = vld [vmem:[#allocation4 + $0x358] sm:$0xff] }
  0x49   :  { %v11339_v58 = vld [vmem:[%s14447_s0 + $0x34] ss:$8 sps:$4 sm:$0xff]  }
  0x4b   :  { %1692 = vmatpush1.bf16.msra.mxu0 %v8806_v11  ;;  %1795 = vmatpush1.bf16.msra.mxu1 %v8808_v12  ;;  %v88_v11 = vld [vmem:[#allocation4 + $0x98] sm:$0xff] }
  0x4c   :  { %1693 = vmatprep.subr.bf16.mxu0 %v8823_v13  ;;  %1796 = vmatprep.subr.bf16.mxu1 %v8825_v14  ;;  %v96_v12 = vld [vmem:[#allocation4 + $0xd8] sm:$0xff]  ;;  %v8682_v13 = vcombine.low %v71_v0, %v79_v1  ;;  %v8684_v14 = vcombine.low %v72_v2, %v80_v3 }
  0x4d   :  { %v8701_v16 = vcombine.high %v88_v11, %v96_v12  ;;  %v8700_v23 = vcombine.low %v88_v11, %v96_v12  ;;  %v184_v0 = vld [vmem:[#allocation4 + $0x398] sm:$0xff] }
  0x4e   :  { %v192_v1 = vld [vmem:[#allocation4 + $0x3d8] sm:$0xff] }
  0x4f   :  { %1694 = vmatpush1.bf16.msra.mxu0 %v8822_v19  ;;  %1797 = vmatpush1.bf16.msra.mxu1 %v8824_v20  ;;  %v11311_v19 = vld [vmem:[%s14447_s0 + $0x14] ss:$8 sps:$4 sm:$0xff]   ;;  %v11347_v3 = vld [vmem:[%s14447_s0 + $0x30] ss:$8 sps:$4 sm:$0xff]   ;;  %v8797_v12 = vcombine.high %v184_v0, %v192_v1 }
  0x50   :  { %1695 = vmatprep.subr.bf16.mxu0 %v8839_v21  ;;  %1798 = vmatprep.subr.bf16.mxu1 %v8841_v22  ;;  %v104_v20 = vld [vmem:[#allocation4 + $0x118] sm:$0xff]  ;;  %v8698_v22 = vcombine.low %v87_v8, %v95_v9  ;;  %v207_v8 = vld [vmem:[#allocation4 + $0x450] sm:$0xff] }
  0x51   :  { %v112_v21 = vld [vmem:[#allocation4 + $0x158] sm:$0xff] }
  0x52   :  { %v8717_v25 = vcombine.high %v104_v20, %v112_v21  ;;  %v8716_v32 = vcombine.low %v104_v20, %v112_v21  ;;  %v200_v9 = vld [vmem:[#allocation4 + $0x418] sm:$0xff] }
  0x53   :  { %1696 = vmatpush1.bf16.msra.mxu0 %v8838_v27  ;;  %1799 = vmatpush1.bf16.msra.mxu1 %v8840_v28  ;;  %v127_v27 = vld [vmem:[#allocation4 + $0x1d0] sm:$0xff]  ;;  %v120_v28 = vld [vmem:[#allocation4 + $0x198] sm:$0xff] }
  0x54   :  { %1697 = vmatprep.subr.bf16.mxu0 %v8855_v29  ;;  %1800 = vmatprep.subr.bf16.mxu1 %v8857_v30  ;;  %v128_v29 = vld [vmem:[#allocation4 + $0x1d8] sm:$0xff]  ;;  %v8731_v33 = vcombine.high %v119_v26, %v127_v27  ;;  %v8730_v40 = vcombine.low %v119_v26, %v127_v27 }
  0x55   :  { %v11320_v30 = vld [vmem:[%s14447_s0 + $0x10] ss:$8 sps:$4 sm:$0xff]   ;;  %v8733_v34 = vcombine.high %v120_v28, %v128_v29  ;;  %v8732_v41 = vcombine.low %v120_v28, %v128_v29 }
  0x56   :  { %v208_v11 = vld [vmem:[#allocation4 + $0x458] sm:$0xff]  ;;  %v239_v28 = vld [vmem:[#allocation4 + $0x550] sm:$0xff] }
  0x57   :  { %1698 = vmatpush1.bf16.msra.mxu0 %v8854_v35  ;;  %1801 = vmatpush1.bf16.msra.mxu1 %v8856_v36  ;;  %v135_v35 = vld [vmem:[#allocation4 + $0x210] sm:$0xff]  ;;  %v216_v20 = vld [vmem:[#allocation4 + $0x498] sm:$0xff]  ;;  %v8812_v26 = vcombine.low %v200_v9, %v208_v11 }
  0x58   :  { %1699 = vmatprep.subr.bf16.mxu0 %v8871_v37  ;;  %1802 = vmatprep.subr.bf16.mxu1 %v8873_v38  ;;  %v143_v36 = vld [vmem:[#allocation4 + $0x250] sm:$0xff]  ;;  %v11325_v37 = vld [vmem:[%s14447_s0 + $0x24] ss:$8 sps:$4 sm:$0xff]   ;;  %v136_v38 = vld [vmem:[#allocation4 + $0x218] sm:$0xff] }
  0x59   :  { %v8747_v42 = vcombine.high %v135_v35, %v143_v36  ;;  %v8746_v49 = vcombine.low %v135_v35, %v143_v36  ;;  %v224_v21 = vld [vmem:[#allocation4 + $0x4d8] sm:$0xff]  ;;  %v247_v35 = vld [vmem:[#allocation4 + $0x590] sm:$0xff] }
  0x5a   :  { %v232_v29 = vld [vmem:[#allocation4 + $0x518] sm:$0xff]  ;;  %v8828_v36 = vcombine.low %v216_v20, %v224_v21 }
  0x5b   :  { %1700 = vmatpush1.bf16.msra.mxu0 %v8870_v43  ;;  %1803 = vmatpush1.bf16.msra.mxu1 %v8872_v44  ;;  %v151_v43 = vld [vmem:[#allocation4 + $0x290] sm:$0xff] }
  0x5c   :  { %1701 = vmatprep.subr.bf16.mxu0 %v8887_v45  ;;  %1804 = vmatprep.subr.bf16.mxu1 %v8889_v46  ;;  %v159_v44 = vld [vmem:[#allocation4 + $0x2d0] sm:$0xff]  ;;  %v152_v45 = vld [vmem:[#allocation4 + $0x298] sm:$0xff]  ;;  %v8749_v46 = vcombine.high %v136_v38, %v144_v39 }
  0x5d   :  { %v8765_v57 = vcombine.high %v152_v45, %v160_v47  ;;  %v8762_v59 = vcombine.low %v151_v43, %v159_v44 }
  0x5f   :  { %1702 = vmatpush1.bf16.msra.mxu0 %v8886_v51  ;;  %1805 = vmatpush1.bf16.msra.mxu1 %v8888_v52  ;;  %v8748_v51 = vcombine.low %v136_v38, %v144_v39  ;;  %v8763_v52 = vcombine.high %v151_v43, %v159_v44  ;;  %v255_v39 = vld [vmem:[#allocation4 + $0x5d0] sm:$0xff] }
  0x60   :  { %1703 = vmatprep.subr.bf16.mxu0 %v8903_v53  ;;  %1806 = vmatprep.subr.bf16.mxu1 %v8905_v54  ;;  %v175_v53 = vld [vmem:[#allocation4 + $0x350] sm:$0xff]  ;;  %v168_v54 = vld [vmem:[#allocation4 + $0x318] sm:$0xff] }
  0x61   :  { %v8781_v2 = vcombine.high %v168_v54, %v176_v55  ;;  %v11375_v43 = vld [vmem:[%s14447_s0 + $0x50] ss:$8 sps:$4 sm:$0xff]  }
  0x63   :  { %1704 = vmatpush1.bf16.msra.mxu0 %v8902_v60  ;;  %1807 = vmatpush1.bf16.msra.mxu1 %v8904_v61  ;;  %v183_v60 = vld [vmem:[#allocation4 + $0x390] sm:$0xff]  ;;  %v8764_v61 = vcombine.low %v152_v45, %v160_v47  ;;  %v8859_v47 = vcombine.high %v247_v35, %v255_v39 }
  0x64   :  { %1705 = vmatprep.subr.bf16.mxu0 %v8919_v62  ;;  %1808 = vmatprep.subr.bf16.mxu1 %v8921_v63  ;;  %v8779_v62 = vcombine.high %v167_v50, %v175_v53  ;;  %v191_v63 = vld [vmem:[#allocation4 + $0x3d0] sm:$0xff] }
  0x65   :  { %v263_v45 = vld [vmem:[#allocation4 + $0x610] sm:$0xff] }
  0x67   :  { %1706 = vmatpush1.bf16.msra.mxu0 %v8918_v4  ;;  %1809 = vmatpush1.bf16.msra.mxu1 %v8920_v5  ;;  %v8778_v4 = vcombine.low %v167_v50, %v175_v53  ;;  %v199_v5 = vld [vmem:[#allocation4 + $0x410] sm:$0xff]  ;;  %v264_v50 = vld [vmem:[#allocation4 + $0x618] sm:$0xff]  ;;  %v11381_v53 = vld [vmem:[%s14447_s0 + $0x64] ss:$8 sps:$4 sm:$0xff]  }
  0x68   :  { %1881 = vmatprep.subr.bf16.mxu0 %v8683_v6  ;;  %1984 = vmatprep.subr.bf16.mxu1 %v8685_v7  ;;  %v8780_v6 = vcombine.low %v168_v54, %v176_v55  ;;  %v8795_v7 = vcombine.high %v183_v60, %v191_v63  ;;  %v8811_v17 = vcombine.high %v199_v5, %v207_v8  ;;  %v279_v55 = vld [vmem:[#allocation4 + $0x690] sm:$0xff] }
  0x69   :  { %v8858_v54 = vcombine.low %v247_v35, %v255_v39  ;;  %v89_v35 = vld [vmem:[#allocation4 + $0xa0] sm:$0xff]  ;;  %v98_v39 = vld [vmem:[#allocation4 + $0xe8] sm:$0xff] }
  0x6a   :  { %1708 = vmatmul.mubr.bf16.vlgmr.msra.gmra.mrb[0].mxu0 %v11306_v10  ;;  %1811 = vmatmul.mubr.bf16.vlgmr.msra.gmra.mrb[0].mxu1 %v11306_v10 }
  0x6b   :  { %1882 = vmatpush1.bf16.msra.mxu0 %v8682_v13  ;;  %1985 = vmatpush1.bf16.msra.mxu1 %v8684_v14  ;;  %v11353_v13 = vld [vmem:[%s14447_s0 + $0x44] ss:$8 sps:$4 sm:$0xff]   ;;  %v8794_v14 = vcombine.low %v183_v60, %v191_v63  ;;  %v287_v60 = vld [vmem:[#allocation4 + $0x6d0] sm:$0xff] }
  0x6c   :  { %1883 = vmatprep.subr.bf16.mxu0 %v8699_v15  ;;  %1986 = vmatprep.subr.bf16.mxu1 %v8701_v16  ;;  %v215_v15 = vld [vmem:[#allocation4 + $0x490] sm:$0xff]  ;;  %v8796_v16 = vcombine.low %v184_v0, %v192_v1  ;;  %v11389_v0 = vld [vmem:[%s14447_s0 + $0x60] ss:$8 sps:$4 sm:$0xff]  }
  0x6d   :  { %1717 = vmatprep.mubr.bf16.mxu0 %v11311_v19  ;;  %1820 = vmatprep.mubr.bf16.mxu1 %v11311_v19  ;;  %v8827_v27 = vcombine.high %v215_v15, %v223_v18 }
  0x6f   :  { %1884 = vmatpush1.bf16.msra.mxu0 %v8698_v22  ;;  %1987 = vmatpush1.bf16.msra.mxu1 %v8700_v23  ;;  %v8813_v22 = vcombine.high %v200_v9, %v208_v11  ;;  %v11361_v23 = vld [vmem:[%s14447_s0 + $0x40] ss:$8 sps:$4 sm:$0xff]   ;;  %v304_v9 = vld [vmem:[#allocation4 + $0x758] sm:$0xff]  ;;  %v8890_v11 = vcombine.low %v279_v55, %v287_v60 }
  0x70   :  { %1885 = vmatprep.subr.bf16.mxu0 %v8715_v24  ;;  %1988 = vmatprep.subr.bf16.mxu1 %v8717_v25  ;;  %v8810_v24 = vcombine.low %v199_v5, %v207_v8  ;;  %v231_v25 = vld [vmem:[#allocation4 + $0x510] sm:$0xff] }
  0x71   :  { %v8843_v38 = vcombine.high %v231_v25, %v239_v28  ;;  %v8842_v44 = vcombine.low %v231_v25, %v239_v28  ;;  %v295_v5 = vld [vmem:[#allocation4 + $0x710] sm:$0xff]  ;;  %v73_v25 = vld [vmem:[#allocation4 + $0x20] sm:$0xff] }
  0x72   :  { %1718 = vmatmul.mubr.bf16.gmra.mrb[4].mxu0 %v11320_v30  ;;  %1821 = vmatmul.mubr.bf16.gmra.mrb[4].mxu1 %v11320_v30 }
  0x73   :  { %1886 = vmatpush1.bf16.msra.mxu0 %v8714_v31  ;;  %1989 = vmatpush1.bf16.msra.mxu1 %v8716_v32  ;;  %v240_v31 = vld [vmem:[#allocation4 + $0x558] sm:$0xff]  ;;  %v8829_v32 = vcombine.high %v216_v20, %v224_v21 }
  0x74   :  { %1887 = vmatprep.subr.bf16.mxu0 %v8731_v33  ;;  %1990 = vmatprep.subr.bf16.mxu1 %v8733_v34  ;;  %v11367_v33 = vld [vmem:[%s14447_s0 + $0x54] ss:$8 sps:$4 sm:$0xff]   ;;  %v8826_v34 = vcombine.low %v215_v15, %v223_v18 }
  0x75   :  { %1727 = vmatprep.mubr.bf16.mxu0 %v11325_v37  ;;  %1830 = vmatprep.mubr.bf16.mxu1 %v11325_v37  ;;  %v311_v15 = vld [vmem:[#allocation4 + $0x790] sm:$0xff]  ;;  %v320_v20 = vld [vmem:[#allocation4 + $0x7d8] sm:$0xff] }
  0x77   :  { %1888 = vmatpush1.bf16.msra.mxu0 %v8730_v40  ;;  %1991 = vmatpush1.bf16.msra.mxu1 %v8732_v41  ;;  %v248_v40 = vld [vmem:[#allocation4 + $0x598] sm:$0xff] }
  0x78   :  { %1889 = vmatprep.subr.bf16.mxu0 %v8747_v42  ;;  %1992 = vmatprep.subr.bf16.mxu1 %v8749_v46  ;;  %v256_v41 = vld [vmem:[#allocation4 + $0x5d8] sm:$0xff]  ;;  %v8845_v42 = vcombine.high %v232_v29, %v240_v31  ;;  %v8844_v46 = vcombine.low %v232_v29, %v240_v31  ;;  %v82_v29 = vld [vmem:[#allocation4 + $0x68] sm:$0xff] }
  0x7a   :  { %1728 = vmatmul.mubr.bf16.gmra.mrb[8].mxu0 %v11333_v48  ;;  %1831 = vmatmul.mubr.bf16.gmra.mrb[8].mxu1 %v11333_v48 }
  0x7b   :  { %1890 = vmatpush1.bf16.msra.mxu0 %v8746_v49  ;;  %1993 = vmatpush1.bf16.msra.mxu1 %v8748_v51  ;;  %v271_v49 = vld [vmem:[#allocation4 + $0x650] sm:$0xff]  ;;  %v272_v51 = vld [vmem:[#allocation4 + $0x658] sm:$0xff] }
  0x7c   :  { %1891 = vmatprep.subr.bf16.mxu0 %v8763_v52  ;;  %1994 = vmatprep.subr.bf16.mxu1 %v8765_v57  ;;  %v8861_v52 = vcombine.high %v248_v40, %v256_v41  ;;  %v8860_v57 = vcombine.low %v248_v40, %v256_v41  ;;  %v8877_v63 = vcombine.high %v264_v50, %v272_v51  ;;  %v105_v41 = vld [vmem:[#allocation4 + $0x120] sm:$0xff] }
  0x7d   :  { %1737 = vmatprep.mubr.bf16.mxu0 %v11339_v58  ;;  %1840 = vmatprep.mubr.bf16.mxu1 %v11339_v58  ;;  %v8874_v1 = vcombine.low %v263_v45, %v271_v49 }
  0x7f   :  { %1892 = vmatpush1.bf16.msra.mxu0 %v8762_v59  ;;  %1995 = vmatpush1.bf16.msra.mxu1 %v8764_v61  ;;  %v8875_v59 = vcombine.high %v263_v45, %v271_v49  ;;  %v280_v61 = vld [vmem:[#allocation4 + $0x698] sm:$0xff] }
  0x80   :  { %1893 = vmatprep.subr.bf16.mxu0 %v8779_v62  ;;  %1996 = vmatprep.subr.bf16.mxu1 %v8781_v2  ;;  %v288_v62 = vld [vmem:[#allocation4 + $0x6d8] sm:$0xff]  ;;  %v8876_v2 = vcombine.low %v264_v50, %v272_v51  ;;  %v121_v51 = vld [vmem:[#allocation4 + $0x1a0] sm:$0xff] }
  0x81   :  { %v8893_v8 = vcombine.high %v280_v61, %v288_v62 }
  0x82   :  { %1738 = vmatmul.mubr.bf16.gmra.mrb[12].mxu0 %v11347_v3  ;;  %1841 = vmatmul.mubr.bf16.gmra.mrb[12].mxu1 %v11347_v3 }
  0x83   :  { %1894 = vmatpush1.bf16.msra.mxu0 %v8778_v4  ;;  %1997 = vmatpush1.bf16.msra.mxu1 %v8780_v6  ;;  %v8891_v4 = vcombine.high %v279_v55, %v287_v60  ;;  %v303_v6 = vld [vmem:[#allocation4 + $0x750] sm:$0xff] }
  0x84   :  { %1895 = vmatprep.subr.bf16.mxu0 %v8795_v7  ;;  %1998 = vmatprep.subr.bf16.mxu1 %v8797_v12  ;;  %v296_v7 = vld [vmem:[#allocation4 + $0x718] sm:$0xff]  ;;  %v8892_v12 = vcombine.low %v280_v61, %v288_v62  ;;  %v8906_v21 = vcombine.low %v295_v5, %v303_v6  ;;  %v137_v62 = vld [vmem:[#allocation4 + $0x220] sm:$0xff] }
  0x85   :  { %1747 = vmatprep.mubr.bf16.mxu0 %v11353_v13  ;;  %1850 = vmatprep.mubr.bf16.mxu1 %v11353_v13  ;;  %v8909_v18 = vcombine.high %v296_v7, %v304_v9 }
  0x87   :  { %1896 = vmatpush1.bf16.msra.mxu0 %v8794_v14  ;;  %1999 = vmatpush1.bf16.msra.mxu1 %v8796_v16  ;;  %v8907_v14 = vcombine.high %v295_v5, %v303_v6  ;;  %v319_v16 = vld [vmem:[#allocation4 + $0x7d0] sm:$0xff] }
  0x88   :  { %1897 = vmatprep.subr.bf16.mxu0 %v8811_v17  ;;  %2000 = vmatprep.subr.bf16.mxu1 %v8813_v22  ;;  %v312_v17 = vld [vmem:[#allocation4 + $0x798] sm:$0xff]  ;;  %v8908_v22 = vcombine.low %v296_v7, %v304_v9  ;;  %v8922_v31 = vcombine.low %v311_v15, %v319_v16  ;;  %v153_v7 = vld [vmem:[#allocation4 + $0x2a0] sm:$0xff] }
  0x89   :  { %v8925_v28 = vcombine.high %v312_v17, %v320_v20 }
  0x8a   :  { %1748 = vmatmul.mubr.bf16.gmra.mrb[16].mxu0 %v11361_v23  ;;  %1851 = vmatmul.mubr.bf16.gmra.mrb[16].mxu1 %v11361_v23 }
  0x8b   :  { %1898 = vmatpush1.bf16.msra.mxu0 %v8810_v24  ;;  %2001 = vmatpush1.bf16.msra.mxu1 %v8812_v26  ;;  %v8923_v24 = vcombine.high %v311_v15, %v319_v16  ;;  %v81_v26 = vld [vmem:[#allocation4 + $0x60] sm:$0xff] }
  0x8c   :  { %1899 = vmatprep.subr.bf16.mxu0 %v8827_v27  ;;  %2002 = vmatprep.subr.bf16.mxu1 %v8829_v32  ;;  %v74_v27 = vld [vmem:[#allocation4 + $0x28] sm:$0xff]  ;;  %v8924_v32 = vcombine.low %v312_v17, %v320_v20  ;;  %v8686_v40 = vcombine.low %v73_v25, %v81_v26  ;;  %v169_v16 = vld [vmem:[#allocation4 + $0x320] sm:$0xff] }
  0x8d   :  { %1757 = vmatprep.mubr.bf16.mxu0 %v11367_v33  ;;  %1860 = vmatprep.mubr.bf16.mxu1 %v11367_v33  ;;  %v170_v20 = vld [vmem:[#allocation4 + $0x328] sm:$0xff] }
  0x8f   :  { %1900 = vmatpush1.bf16.msra.mxu0 %v8826_v34  ;;  %2003 = vmatpush1.bf16.msra.mxu1 %v8828_v36  ;;  %v8687_v34 = vcombine.high %v73_v25, %v81_v26  ;;  %v90_v36 = vld [vmem:[#allocation4 + $0xa8] sm:$0xff]  ;;  %v185_v25 = vld [vmem:[#allocation4 + $0x3a0] sm:$0xff] }
  0x90   :  { %1901 = vmatprep.subr.bf16.mxu0 %v8843_v38  ;;  %2004 = vmatprep.subr.bf16.mxu1 %v8845_v42  ;;  %v8689_v38 = vcombine.high %v74_v27, %v82_v29  ;;  %v113_v42 = vld [vmem:[#allocation4 + $0x160] sm:$0xff]  ;;  %v8705_v49 = vcombine.high %v90_v36, %v98_v39 }
  0x91   :  { %v8719_v55 = vcombine.high %v105_v41, %v113_v42  ;;  %v8718_v61 = vcombine.low %v105_v41, %v113_v42  ;;  %v217_v41 = vld [vmem:[#allocation4 + $0x4a0] sm:$0xff] }
  0x92   :  { %1758 = vmatmul.mubr.bf16.gmra.mrb[20].mxu0 %v11375_v43  ;;  %1861 = vmatmul.mubr.bf16.gmra.mrb[20].mxu1 %v11375_v43 }
  0x93   :  { %1902 = vmatpush1.bf16.msra.mxu0 %v8842_v44  ;;  %2005 = vmatpush1.bf16.msra.mxu1 %v8844_v46  ;;  %v8688_v44 = vcombine.low %v74_v27, %v82_v29  ;;  %v106_v46 = vld [vmem:[#allocation4 + $0x128] sm:$0xff] }
  0x94   :  { %1903 = vmatprep.subr.bf16.mxu0 %v8859_v47  ;;  %2006 = vmatprep.subr.bf16.mxu1 %v8861_v52  ;;  %v114_v47 = vld [vmem:[#allocation4 + $0x168] sm:$0xff]  ;;  %v129_v52 = vld [vmem:[#allocation4 + $0x1e0] sm:$0xff] }
  0x95   :  { %1767 = vmatprep.mubr.bf16.mxu0 %v11381_v53  ;;  %1870 = vmatprep.mubr.bf16.mxu1 %v11381_v53  ;;  %v8721_v60 = vcombine.high %v106_v46, %v114_v47  ;;  %v8734_v6 = vcombine.low %v121_v51, %v129_v52  ;;  %v194_v29 = vld [vmem:[#allocation4 + $0x3e8] sm:$0xff] }
  0x97   :  { %1904 = vmatpush1.bf16.msra.mxu0 %v8858_v54  ;;  %2007 = vmatpush1.bf16.msra.mxu1 %v8860_v57  ;;  %v8704_v54 = vcombine.low %v90_v36, %v98_v39  ;;  %v122_v57 = vld [vmem:[#allocation4 + $0x1a8] sm:$0xff] }
  0x98   :  { %1905 = vmatprep.subr.bf16.mxu0 %v8875_v59  ;;  %2008 = vmatprep.subr.bf16.mxu1 %v8877_v63  ;;  %v130_v59 = vld [vmem:[#allocation4 + $0x1e8] sm:$0xff]  ;;  %v8720_v63 = vcombine.low %v106_v46, %v114_v47 }
  0x99   :  { %v8737_v5 = vcombine.high %v122_v57, %v130_v59  ;;  %v202_v36 = vld [vmem:[#allocation4 + $0x428] sm:$0xff] }
  0x9a   :  { %1768 = vmatmul.mubr.bf16.gmra.mrb[24].mxu0 %v11389_v0  ;;  %1871 = vmatmul.mubr.bf16.gmra.mrb[24].mxu1 %v11389_v0  ;;  %v226_v46 = vld [vmem:[#allocation4 + $0x4e8] sm:$0xff] }
  0x9b   :  { %1906 = vmatpush1.bf16.msra.mxu0 %v8874_v1  ;;  %2009 = vmatpush1.bf16.msra.mxu1 %v8876_v2  ;;  %v8735_v1 = vcombine.high %v121_v51, %v129_v52  ;;  %v138_v2 = vld [vmem:[#allocation4 + $0x228] sm:$0xff] }
  0x9c   :  { %1907 = vmatprep.subr.bf16.mxu0 %v8891_v4  ;;  %2010 = vmatprep.subr.bf16.mxu1 %v8893_v8  ;;  %v146_v4 = vld [vmem:[#allocation4 + $0x268] sm:$0xff]  ;;  %v8736_v8 = vcombine.low %v122_v57, %v130_v59 }
  0x9d   :  { %1913 = vmatprep.mubr.bf16.mxu0 %v11299_v56  ;;  %2016 = vmatprep.mubr.bf16.mxu1 %v11299_v56  ;;  %v97_v56 = vld [vmem:[#allocation4 + $0xe0] sm:$0xff]  ;;  %v8752_v17 = vcombine.low %v138_v2, %v146_v4 }
  0x9e   :  { %v8703_v45 = vcombine.high %v89_v35, %v97_v56  ;;  %v8702_v50 = vcombine.low %v89_v35, %v97_v56 }
  0x9f   :  { %1908 = vmatpush1.bf16.msra.mxu0 %v8890_v11  ;;  %2011 = vmatpush1.bf16.msra.mxu1 %v8892_v12  ;;  %v154_v11 = vld [vmem:[#allocation4 + $0x2a8] sm:$0xff] }
  0xa0   :  { %1909 = vmatprep.subr.bf16.mxu0 %v8907_v14  ;;  %2012 = vmatprep.subr.bf16.mxu1 %v8909_v18  ;;  %v162_v12 = vld [vmem:[#allocation4 + $0x2e8] sm:$0xff]  ;;  %v8753_v14 = vcombine.high %v138_v2, %v146_v4  ;;  %v265_v4 = vld [vmem:[#allocation4 + $0x620] sm:$0xff] }
  0xa1   :  { %v8768_v26 = vcombine.low %v154_v11, %v162_v12 }
  0xa3   :  { %1910 = vmatpush1.bf16.msra.mxu0 %v8906_v21  ;;  %2013 = vmatpush1.bf16.msra.mxu1 %v8908_v22  ;;  %v178_v21 = vld [vmem:[#allocation4 + $0x368] sm:$0xff]  ;;  %v8769_v22 = vcombine.high %v154_v11, %v162_v12  ;;  %v281_v11 = vld [vmem:[#allocation4 + $0x6a0] sm:$0xff] }
  0xa4   :  { %1911 = vmatprep.subr.bf16.mxu0 %v8923_v24  ;;  %2014 = vmatprep.subr.bf16.mxu1 %v8925_v28  ;;  %v186_v28 = vld [vmem:[#allocation4 + $0x3a8] sm:$0xff]  ;;  %v8784_v35 = vcombine.low %v170_v20, %v178_v21 }
  0xa5   :  { %v8801_v39 = vcombine.high %v186_v28, %v194_v29  ;;  %v8800_v42 = vcombine.low %v186_v28, %v194_v29  ;;  %v314_v29 = vld [vmem:[#allocation4 + $0x7a8] sm:$0xff] }
  0xa7   :  { %1912 = vmatpush1.bf16.msra.mxu0 %v8922_v31  ;;  %2015 = vmatpush1.bf16.msra.mxu1 %v8924_v32  ;;  %v8785_v31 = vcombine.high %v170_v20, %v178_v21 }
  0xa8   :  { %2087 = vmatprep.subr.bf16.mxu0 %v8687_v34  ;;  %2190 = vmatprep.subr.bf16.mxu1 %v8689_v38  ;;  %v201_v34 = vld [vmem:[#allocation4 + $0x420] sm:$0xff]  ;;  %v210_v38 = vld [vmem:[#allocation4 + $0x468] sm:$0xff] }
  0xa9   :  { %v8817_v47 = vcombine.high %v202_v36, %v210_v38  ;;  %v8816_v51 = vcombine.low %v202_v36, %v210_v38  ;;  %v76_v38 = vld [vmem:[#allocation4 + $0x38] sm:$0xff] }
  0xaa   :  { %1914 = vmatmul.mubr.bf16.vlgmr.msra.gmra.mrb[28].mxu0 %v11306_v10  ;;  %2017 = vmatmul.mubr.bf16.vlgmr.msra.gmra.mrb[28].mxu1 %v11306_v10  ;;  %v145_v10 = vld [vmem:[#allocation4 + $0x260] sm:$0xff] }
  0xab   :  { %2088 = vmatpush1.bf16.msra.mxu0 %v8686_v40  ;;  %2191 = vmatpush1.bf16.msra.mxu1 %v8688_v44  ;;  %v8751_v9 = vcombine.high %v137_v62, %v145_v10  ;;  %v8750_v15 = vcombine.low %v137_v62, %v145_v10  ;;  %v250_v10 = vld [vmem:[#allocation4 + $0x5a8] sm:$0xff] }
  0xac   :  { %2089 = vmatprep.subr.bf16.mxu0 %v8703_v45  ;;  %2192 = vmatprep.subr.bf16.mxu1 %v8705_v49  ;;  %v218_v45 = vld [vmem:[#allocation4 + $0x4a8] sm:$0xff] }
  0xad   :  { %1923 = vmatprep.mubr.bf16.mxu0 %v11311_v19  ;;  %2026 = vmatprep.mubr.bf16.mxu1 %v11311_v19  ;;  %v161_v19 = vld [vmem:[#allocation4 + $0x2e0] sm:$0xff]  ;;  %v8833_v57 = vcombine.high %v218_v45, %v226_v46 }
  0xae   :  { %v8767_v18 = vcombine.high %v153_v7, %v161_v19  ;;  %v8766_v24 = vcombine.low %v153_v7, %v161_v19  ;;  %v266_v7 = vld [vmem:[#allocation4 + $0x628] sm:$0xff] }
  0xaf   :  { %2090 = vmatpush1.bf16.msra.mxu0 %v8702_v50  ;;  %2193 = vmatpush1.bf16.msra.mxu1 %v8704_v54  ;;  %v233_v50 = vld [vmem:[#allocation4 + $0x520] sm:$0xff]  ;;  %v234_v54 = vld [vmem:[#allocation4 + $0x528] sm:$0xff] }
  0xb0   :  { %2091 = vmatprep.subr.bf16.mxu0 %v8719_v55  ;;  %2194 = vmatprep.subr.bf16.mxu1 %v8721_v60  ;;  %v242_v55 = vld [vmem:[#allocation4 + $0x568] sm:$0xff]  ;;  %v249_v60 = vld [vmem:[#allocation4 + $0x5a0] sm:$0xff] }
  0xb1   :  { %v274_v19 = vld [vmem:[#allocation4 + $0x668] sm:$0xff] }
  0xb2   :  { %1924 = vmatmul.mubr.bf16.gmra.mrb[32].mxu0 %v11320_v30  ;;  %2027 = vmatmul.mubr.bf16.gmra.mrb[32].mxu1 %v11320_v30  ;;  %v177_v30 = vld [vmem:[#allocation4 + $0x360] sm:$0xff]  ;;  %v8880_v20 = vcombine.low %v266_v7, %v274_v19 }
  0xb3   :  { %2092 = vmatpush1.bf16.msra.mxu0 %v8718_v61  ;;  %2195 = vmatpush1.bf16.msra.mxu1 %v8720_v63  ;;  %v8783_v27 = vcombine.high %v169_v16, %v177_v30  ;;  %v8782_v32 = vcombine.low %v169_v16, %v177_v30  ;;  %v8832_v61 = vcombine.low %v218_v45, %v226_v46  ;;  %v258_v63 = vld [vmem:[#allocation4 + $0x5e8] sm:$0xff]  ;;  %v92_v46 = vld [vmem:[#allocation4 + $0xb8] sm:$0xff] }
  0xb4   :  { %2093 = vmatprep.subr.bf16.mxu0 %v8735_v1  ;;  %2196 = vmatprep.subr.bf16.mxu1 %v8737_v5  ;;  %v8849_v1 = vcombine.high %v234_v54, %v242_v55  ;;  %v8848_v5 = vcombine.low %v234_v54, %v242_v55  ;;  %v8864_v12 = vcombine.low %v250_v10, %v258_v63  ;;  %v290_v16 = vld [vmem:[#allocation4 + $0x6e8] sm:$0xff]  ;;  %v108_v55 = vld [vmem:[#allocation4 + $0x138] sm:$0xff] }
  0xb5   :  { %1933 = vmatprep.mubr.bf16.mxu0 %v11325_v37  ;;  %2036 = vmatprep.mubr.bf16.mxu1 %v11325_v37  ;;  %v193_v37 = vld [vmem:[#allocation4 + $0x3e0] sm:$0xff]  ;;  %v8881_v30 = vcombine.high %v266_v7, %v274_v19  ;;  %v147_v7 = vld [vmem:[#allocation4 + $0x270] sm:$0xff] }
  0xb6   :  { %v8799_v56 = vcombine.high %v185_v25, %v193_v37  ;;  %v8798_v40 = vcombine.low %v185_v25, %v193_v37 }
  0xb7   :  { %2094 = vmatpush1.bf16.msra.mxu0 %v8734_v6  ;;  %2197 = vmatpush1.bf16.msra.mxu1 %v8736_v8  ;;  %v8865_v8 = vcombine.high %v250_v10, %v258_v63 }
  0xb8   :  { %2095 = vmatprep.subr.bf16.mxu0 %v8751_v9  ;;  %2198 = vmatprep.subr.bf16.mxu1 %v8753_v14 }
  0xba   :  { %1934 = vmatmul.mubr.bf16.gmra.mrb[36].mxu0 %v11333_v48  ;;  %2037 = vmatmul.mubr.bf16.gmra.mrb[36].mxu1 %v11333_v48  ;;  %v209_v48 = vld [vmem:[#allocation4 + $0x460] sm:$0xff] }
  0xbb   :  { %2096 = vmatpush1.bf16.msra.mxu0 %v8750_v15  ;;  %2199 = vmatpush1.bf16.msra.mxu1 %v8752_v17  ;;  %v8815_v44 = vcombine.high %v201_v34, %v209_v48  ;;  %v8814_v49 = vcombine.low %v201_v34, %v209_v48  ;;  %v282_v15 = vld [vmem:[#allocation4 + $0x6a8] sm:$0xff]  ;;  %v75_v48 = vld [vmem:[#allocation4 + $0x30] sm:$0xff] }
  0xbc   :  { %2097 = vmatprep.subr.bf16.mxu0 %v8767_v18  ;;  %2200 = vmatprep.subr.bf16.mxu1 %v8769_v22  ;;  %v297_v18 = vld [vmem:[#allocation4 + $0x720] sm:$0xff]  ;;  %v298_v22 = vld [vmem:[#allocation4 + $0x728] sm:$0xff]  ;;  %v8897_v25 = vcombine.high %v282_v15, %v290_v16 }
  0xbd   :  { %1943 = vmatprep.mubr.bf16.mxu0 %v11339_v58  ;;  %2046 = vmatprep.mubr.bf16.mxu1 %v11339_v58  ;;  %v225_v58 = vld [vmem:[#allocation4 + $0x4e0] sm:$0xff] }
  0xbe   :  { %v8831_v52 = vcombine.high %v217_v41, %v225_v58  ;;  %v8830_v59 = vcombine.low %v217_v41, %v225_v58  ;;  %v11425_v34 = vld [vmem:[%s14447_s0 + $0x4] ss:$8 sps:$4 sm:$0xff]   ;;  %v91_v58 = vld [vmem:[#allocation4 + $0xb0] sm:$0xff] }
  0xbf   :  { %2098 = vmatpush1.bf16.msra.mxu0 %v8766_v24  ;;  %2201 = vmatpush1.bf16.msra.mxu1 %v8768_v26  ;;  %v306_v24 = vld [vmem:[#allocation4 + $0x768] sm:$0xff]  ;;  %v313_v26 = vld [vmem:[#allocation4 + $0x7a0] sm:$0xff] }
  0xc0   :  { %2099 = vmatprep.subr.bf16.mxu0 %v8783_v27  ;;  %2202 = vmatprep.subr.bf16.mxu1 %v8785_v31  ;;  %v8896_v27 = vcombine.low %v282_v15, %v290_v16  ;;  %v322_v31 = vld [vmem:[#allocation4 + $0x7e8] sm:$0xff]  ;;  %v155_v15 = vld [vmem:[#allocation4 + $0x2b0] sm:$0xff] }
  0xc1   :  { %v163_v16 = vld [vmem:[#allocation4 + $0x2f0] sm:$0xff] }
  0xc2   :  { %1944 = vmatmul.mubr.bf16.gmra.mrb[40].mxu0 %v11347_v3  ;;  %2047 = vmatmul.mubr.bf16.gmra.mrb[40].mxu1 %v11347_v3  ;;  %v241_v3 = vld [vmem:[#allocation4 + $0x560] sm:$0xff] }
  0xc3   :  { %2100 = vmatpush1.bf16.msra.mxu0 %v8782_v32  ;;  %2203 = vmatpush1.bf16.msra.mxu1 %v8784_v35  ;;  %v8847_v62 = vcombine.high %v233_v50, %v241_v3  ;;  %v8846_v2 = vcombine.low %v233_v50, %v241_v3  ;;  %v8913_v32 = vcombine.high %v298_v22, %v306_v24  ;;  %v83_v35 = vld [vmem:[#allocation4 + $0x70] sm:$0xff] }
  0xc4   :  { %2101 = vmatprep.subr.bf16.mxu0 %v8799_v56  ;;  %2204 = vmatprep.subr.bf16.mxu1 %v8801_v39  ;;  %v8912_v56 = vcombine.low %v298_v22, %v306_v24  ;;  %v84_v39 = vld [vmem:[#allocation4 + $0x78] sm:$0xff]  ;;  %v8691_v45 = vcombine.high %v75_v48, %v83_v35  ;;  %v8690_v50 = vcombine.low %v75_v48, %v83_v35  ;;  %v107_v3 = vld [vmem:[#allocation4 + $0x130] sm:$0xff] }
  0xc5   :  { %1953 = vmatprep.mubr.bf16.mxu0 %v11353_v13  ;;  %2056 = vmatprep.mubr.bf16.mxu1 %v11353_v13  ;;  %v257_v13 = vld [vmem:[#allocation4 + $0x5e0] sm:$0xff]  ;;  %v171_v24 = vld [vmem:[#allocation4 + $0x330] sm:$0xff] }
  0xc6   :  { %v8863_v6 = vcombine.high %v249_v60, %v257_v13  ;;  %v8862_v9 = vcombine.low %v249_v60, %v257_v13  ;;  %v11432_v60 = vld [vmem:[%s14447_s0] ss:$8 sps:$4 sm:$0xff]  }
  0xc7   :  { %2102 = vmatpush1.bf16.msra.mxu0 %v8798_v40  ;;  %2205 = vmatpush1.bf16.msra.mxu1 %v8800_v42  ;;  %v8929_v40 = vcombine.high %v314_v29, %v322_v31  ;;  %v99_v42 = vld [vmem:[#allocation4 + $0xf0] sm:$0xff] }
  0xc8   :  { %2103 = vmatprep.subr.bf16.mxu0 %v8815_v44  ;;  %2206 = vmatprep.subr.bf16.mxu1 %v8817_v47  ;;  %v8928_v44 = vcombine.low %v314_v29, %v322_v31  ;;  %v100_v47 = vld [vmem:[#allocation4 + $0xf8] sm:$0xff]  ;;  %v8707_v54 = vcombine.high %v91_v58, %v99_v42  ;;  %v8706_v13 = vcombine.low %v91_v58, %v99_v42  ;;  %v11460_v29 = vld [vmem:[%s14447_s0 + $0x20] ss:$8 sps:$4 sm:$0xff]   ;;  %v211_v58 = vld [vmem:[#allocation4 + $0x470] sm:$0xff] }
  0xc9   :  { %v8708_v10 = vcombine.low %v92_v46, %v100_v47  ;;  %v8770_v31 = vcombine.low %v155_v15, %v163_v16 }
  0xca   :  { %1954 = vmatmul.mubr.bf16.gmra.mrb[44].mxu0 %v11361_v23  ;;  %2057 = vmatmul.mubr.bf16.gmra.mrb[44].mxu1 %v11361_v23  ;;  %v273_v23 = vld [vmem:[#allocation4 + $0x660] sm:$0xff] }
  0xcb   :  { %2104 = vmatpush1.bf16.msra.mxu0 %v8814_v49  ;;  %2207 = vmatpush1.bf16.msra.mxu1 %v8816_v51  ;;  %v8879_v14 = vcombine.high %v265_v4, %v273_v23  ;;  %v8878_v17 = vcombine.low %v265_v4, %v273_v23  ;;  %v8693_v49 = vcombine.high %v76_v38, %v84_v39  ;;  %v115_v51 = vld [vmem:[#allocation4 + $0x170] sm:$0xff] }
  0xcc   :  { %2105 = vmatprep.subr.bf16.mxu0 %v8831_v52  ;;  %2208 = vmatprep.subr.bf16.mxu1 %v8833_v57  ;;  %v8692_v52 = vcombine.low %v76_v38, %v84_v39  ;;  %v116_v57 = vld [vmem:[#allocation4 + $0x178] sm:$0xff]  ;;  %v8723_v63 = vcombine.high %v107_v3, %v115_v51 }
  0xcd   :  { %1963 = vmatprep.mubr.bf16.mxu0 %v11367_v33  ;;  %2066 = vmatprep.mubr.bf16.mxu1 %v11367_v33  ;;  %v289_v33 = vld [vmem:[#allocation4 + $0x6e0] sm:$0xff]  ;;  %v8725_v4 = vcombine.high %v108_v55, %v116_v57  ;;  %v11439_v23 = vld [vmem:[%s14447_s0 + $0x14] ss:$8 sps:$4 sm:$0xff]   ;;  %v8724_v19 = vcombine.low %v108_v55, %v116_v57 }
  0xce   :  { %v8895_v21 = vcombine.high %v281_v11, %v289_v33  ;;  %v8894_v37 = vcombine.low %v281_v11, %v289_v33  ;;  %v148_v11 = vld [vmem:[#allocation4 + $0x278] sm:$0xff] }
  0xcf   :  { %2106 = vmatpush1.bf16.msra.mxu0 %v8830_v59  ;;  %2209 = vmatpush1.bf16.msra.mxu1 %v8832_v61  ;;  %v8709_v59 = vcombine.high %v92_v46, %v100_v47  ;;  %v123_v61 = vld [vmem:[#allocation4 + $0x1b0] sm:$0xff]  ;;  %v196_v39 = vld [vmem:[#allocation4 + $0x3f8] sm:$0xff] }
  0xd0   :  { %2107 = vmatprep.subr.bf16.mxu0 %v8847_v62  ;;  %2210 = vmatprep.subr.bf16.mxu1 %v8849_v1  ;;  %v131_v62 = vld [vmem:[#allocation4 + $0x1f0] sm:$0xff]  ;;  %v124_v1 = vld [vmem:[#allocation4 + $0x1b8] sm:$0xff] }
  0xd1   :  { %v11467_v38 = vld [vmem:[%s14447_s0 + $0x34] ss:$8 sps:$4 sm:$0xff]  }
  0xd2   :  { %1964 = vmatmul.mubr.bf16.gmra.mrb[48].mxu0 %v11375_v43  ;;  %2067 = vmatmul.mubr.bf16.gmra.mrb[48].mxu1 %v11375_v43  ;;  %v305_v43 = vld [vmem:[#allocation4 + $0x760] sm:$0xff]  ;;  %v212_v46 = vld [vmem:[#allocation4 + $0x478] sm:$0xff] }
  0xd3   :  { %2108 = vmatpush1.bf16.msra.mxu0 %v8846_v2  ;;  %2211 = vmatpush1.bf16.msra.mxu1 %v8848_v5  ;;  %v8911_v28 = vcombine.high %v297_v18, %v305_v43  ;;  %v132_v2 = vld [vmem:[#allocation4 + $0x1f8] sm:$0xff]  ;;  %v8722_v5 = vcombine.low %v107_v3, %v115_v51  ;;  %v219_v3 = vld [vmem:[#allocation4 + $0x4b0] sm:$0xff] }
  0xd4   :  { %2109 = vmatprep.subr.bf16.mxu0 %v8863_v6  ;;  %2212 = vmatprep.subr.bf16.mxu1 %v8865_v8  ;;  %v139_v6 = vld [vmem:[#allocation4 + $0x230] sm:$0xff]  ;;  %v8739_v8 = vcombine.high %v123_v61, %v131_v62  ;;  %v8741_v33 = vcombine.high %v124_v1, %v132_v2  ;;  %v220_v55 = vld [vmem:[#allocation4 + $0x4b8] sm:$0xff] }
  0xd5   :  { %1973 = vmatprep.mubr.bf16.mxu0 %v11381_v53  ;;  %2076 = vmatprep.mubr.bf16.mxu1 %v11381_v53  ;;  %v321_v53 = vld [vmem:[#allocation4 + $0x7e0] sm:$0xff]  ;;  %v8754_v22 = vcombine.low %v139_v6, %v147_v7  ;;  %v227_v51 = vld [vmem:[#allocation4 + $0x4f0] sm:$0xff]  ;;  %v228_v57 = vld [vmem:[#allocation4 + $0x4f8] sm:$0xff] }
  0xd6   :  { %v8927_v36 = vcombine.high %v313_v26, %v321_v53  ;;  %v8926_v41 = vcombine.low %v313_v26, %v321_v53  ;;  %v8771_v26 = vcombine.high %v155_v15, %v163_v16  ;;  %v172_v53 = vld [vmem:[#allocation4 + $0x338] sm:$0xff] }
  0xd7   :  { %2110 = vmatpush1.bf16.msra.mxu0 %v8862_v9  ;;  %2213 = vmatpush1.bf16.msra.mxu1 %v8864_v12  ;;  %v140_v9 = vld [vmem:[#allocation4 + $0x238] sm:$0xff] }
  0xd8   :  { %2111 = vmatprep.subr.bf16.mxu0 %v8879_v14  ;;  %2214 = vmatprep.subr.bf16.mxu1 %v8881_v30  ;;  %v11446_v12 = vld [vmem:[%s14447_s0 + $0x10] ss:$8 sps:$4 sm:$0xff]   ;;  %v8738_v14 = vcombine.low %v123_v61, %v131_v62  ;;  %v8740_v30 = vcombine.low %v124_v1, %v132_v2  ;;  %v8835_v1 = vcombine.high %v219_v3, %v227_v51  ;;  %v11495_v16 = vld [vmem:[%s14447_s0 + $0x54] ss:$8 sps:$4 sm:$0xff]  }
  0xd9   :  { %v235_v62 = vld [vmem:[#allocation4 + $0x530] sm:$0xff]  ;;  %v236_v2 = vld [vmem:[#allocation4 + $0x538] sm:$0xff] }
  0xda   :  { %1974 = vmatmul.mubr.bf16.gmra.mrb[52].mxu0 %v11389_v0  ;;  %2077 = vmatmul.mubr.bf16.gmra.mrb[52].mxu1 %v11389_v0  ;;  %v8910_v0 = vcombine.low %v297_v18, %v305_v43  ;;  %v156_v18 = vld [vmem:[#allocation4 + $0x2b8] sm:$0xff] }
  0xdb   :  { %2112 = vmatpush1.bf16.msra.mxu0 %v8878_v17  ;;  %2215 = vmatpush1.bf16.msra.mxu1 %v8880_v20  ;;  %v8755_v17 = vcombine.high %v139_v6, %v147_v7  ;;  %v164_v43 = vld [vmem:[#allocation4 + $0x2f8] sm:$0xff]  ;;  %v8757_v20 = vcombine.high %v140_v9, %v148_v11  ;;  %v11488_v6 = vld [vmem:[%s14447_s0 + $0x40] ss:$8 sps:$4 sm:$0xff]   ;;  %v8834_v7 = vcombine.low %v219_v3, %v227_v51 }
  0xdc   :  { %2113 = vmatprep.subr.bf16.mxu0 %v8895_v21  ;;  %2216 = vmatprep.subr.bf16.mxu1 %v8897_v25  ;;  %v11453_v21 = vld [vmem:[%s14447_s0 + $0x24] ss:$8 sps:$4 sm:$0xff]   ;;  %v179_v25 = vld [vmem:[#allocation4 + $0x370] sm:$0xff]  ;;  %v8772_v48 = vcombine.low %v156_v18, %v164_v43 }
  0xdd   :  { %2119 = vmatprep.mubr.bf16.mxu0 %v11425_v34  ;;  %2222 = vmatprep.mubr.bf16.mxu1 %v11425_v34  ;;  %v8787_v35 = vcombine.high %v171_v24, %v179_v25 }
  0xdf   :  { %2114 = vmatpush1.bf16.msra.mxu0 %v8894_v37  ;;  %2217 = vmatpush1.bf16.msra.mxu1 %v8896_v27  ;;  %v8756_v37 = vcombine.low %v140_v9, %v148_v11  ;;  %v180_v27 = vld [vmem:[#allocation4 + $0x378] sm:$0xff]  ;;  %v8836_v9 = vcombine.low %v220_v55, %v228_v57 }
  0xe0   :  { %2115 = vmatprep.subr.bf16.mxu0 %v8911_v28  ;;  %2218 = vmatprep.subr.bf16.mxu1 %v8913_v32  ;;  %v8773_v28 = vcombine.high %v156_v18, %v164_v43  ;;  %v187_v32 = vld [vmem:[#allocation4 + $0x3b0] sm:$0xff]  ;;  %v8788_v42 = vcombine.low %v172_v53, %v180_v27 }
  0xe1   :  { %v275_v18 = vld [vmem:[#allocation4 + $0x670] sm:$0xff] }
  0xe3   :  { %2116 = vmatpush1.bf16.msra.mxu0 %v8910_v0  ;;  %2219 = vmatpush1.bf16.msra.mxu1 %v8912_v56  ;;  %v195_v0 = vld [vmem:[#allocation4 + $0x3f0] sm:$0xff]  ;;  %v188_v56 = vld [vmem:[#allocation4 + $0x3b8] sm:$0xff] }
  0xe4   :  { %2117 = vmatprep.subr.bf16.mxu0 %v8927_v36  ;;  %2220 = vmatprep.subr.bf16.mxu1 %v8929_v40  ;;  %v8789_v36 = vcombine.high %v172_v53, %v180_v27  ;;  %v8786_v40 = vcombine.low %v171_v24, %v179_v25  ;;  %v8805_v47 = vcombine.high %v188_v56, %v196_v39  ;;  %v276_v24 = vld [vmem:[#allocation4 + $0x678] sm:$0xff]  ;;  %v283_v53 = vld [vmem:[#allocation4 + $0x6b0] sm:$0xff] }
  0xe5   :  { %v291_v27 = vld [vmem:[#allocation4 + $0x6f0] sm:$0xff] }
  0xe7   :  { %2118 = vmatpush1.bf16.msra.mxu0 %v8926_v41  ;;  %2221 = vmatpush1.bf16.msra.mxu1 %v8928_v44  ;;  %v203_v41 = vld [vmem:[#allocation4 + $0x430] sm:$0xff]  ;;  %v8803_v44 = vcombine.high %v187_v32, %v195_v0 }
  0xe8   :  { %2293 = vmatprep.subr.bf16.mxu0 %v8691_v45  ;;  %2396 = vmatprep.subr.bf16.mxu1 %v8693_v49  ;;  %v204_v45 = vld [vmem:[#allocation4 + $0x438] sm:$0xff]  ;;  %v8818_v61 = vcombine.low %v203_v41, %v211_v58 }
  0xe9   :  { %v11474_v49 = vld [vmem:[%s14447_s0 + $0x30] ss:$8 sps:$4 sm:$0xff]  }
  0xea   :  { %2120 = vmatmul.mubr.bf16.vlgmr.msra.gmra.mrb[56].mxu0 %v11432_v60  ;;  %2223 = vmatmul.mubr.bf16.vlgmr.msra.gmra.mrb[56].mxu1 %v11432_v60 }
  0xeb   :  { %2294 = vmatpush1.bf16.msra.mxu0 %v8690_v50  ;;  %2397 = vmatpush1.bf16.msra.mxu1 %v8692_v52  ;;  %v8802_v50 = vcombine.low %v187_v32, %v195_v0  ;;  %v8804_v52 = vcombine.low %v188_v56, %v196_v39  ;;  %v284_v32 = vld [vmem:[#allocation4 + $0x6b8] sm:$0xff]  ;;  %v307_v39 = vld [vmem:[#allocation4 + $0x770] sm:$0xff] }
  0xec   :  { %2295 = vmatprep.subr.bf16.mxu0 %v8707_v54  ;;  %2398 = vmatprep.subr.bf16.mxu1 %v8709_v59  ;;  %v8819_v54 = vcombine.high %v203_v41, %v211_v58  ;;  %v8821_v59 = vcombine.high %v204_v45, %v212_v46  ;;  %v292_v0 = vld [vmem:[#allocation4 + $0x6f8] sm:$0xff]  ;;  %v8899_v41 = vcombine.high %v283_v53, %v291_v27 }
  0xed   :  { %2129 = vmatprep.mubr.bf16.mxu0 %v11439_v23  ;;  %2232 = vmatprep.mubr.bf16.mxu1 %v11439_v23  ;;  %v300_v58 = vld [vmem:[#allocation4 + $0x738] sm:$0xff]  ;;  %v8900_v3 = vcombine.low %v284_v32, %v292_v0 }
  0xef   :  { %2296 = vmatpush1.bf16.msra.mxu0 %v8706_v13  ;;  %2399 = vmatpush1.bf16.msra.mxu1 %v8708_v10  ;;  %v11481_v13 = vld [vmem:[%s14447_s0 + $0x44] ss:$8 sps:$4 sm:$0xff]   ;;  %v243_v10 = vld [vmem:[#allocation4 + $0x570] sm:$0xff] }
  0xf0   :  { %2297 = vmatprep.subr.bf16.mxu0 %v8723_v63  ;;  %2400 = vmatprep.subr.bf16.mxu1 %v8725_v4  ;;  %v8820_v63 = vcombine.low %v204_v45, %v212_v46  ;;  %v244_v4 = vld [vmem:[#allocation4 + $0x578] sm:$0xff]  ;;  %v8851_v11 = vcombine.high %v235_v62, %v243_v10  ;;  %v11516_v45 = vld [vmem:[%s14447_s0 + $0x60] ss:$8 sps:$4 sm:$0xff]   ;;  %v8898_v46 = vcombine.low %v283_v53, %v291_v27  ;;  %v10278_v27 = vld [vmem:[%s14449_s2 + $0x284] ss:$16 sps:$4 sm:$0xff]  }
  0xf1   :  { %v8853_v15 = vcombine.high %v236_v2, %v244_v4  ;;  %v8852_v43 = vcombine.low %v236_v2, %v244_v4  ;;  %v10263_v4 = vld [vmem:[%s14449_s2 + $0x22c] ss:$16 sps:$4 sm:$0xff]  }
  0xf2   :  { %2130 = vmatmul.mubr.bf16.gmra.mrb[60].mxu0 %v11446_v12  ;;  %2233 = vmatmul.mubr.bf16.gmra.mrb[60].mxu1 %v11446_v12 }
  0xf3   :  { %2298 = vmatpush1.bf16.msra.mxu0 %v8722_v5  ;;  %2401 = vmatpush1.bf16.msra.mxu1 %v8724_v19  ;;  %v8837_v5 = vcombine.high %v220_v55, %v228_v57  ;;  %v251_v19 = vld [vmem:[#allocation4 + $0x5b0] sm:$0xff] }
  0xf4   :  { %2299 = vmatprep.subr.bf16.mxu0 %v8739_v8  ;;  %2402 = vmatprep.subr.bf16.mxu1 %v8741_v33  ;;  %v259_v8 = vld [vmem:[#allocation4 + $0x5f0] sm:$0xff]  ;;  %v252_v33 = vld [vmem:[#allocation4 + $0x5b8] sm:$0xff] }
  0xf5   :  { %2139 = vmatprep.mubr.bf16.mxu0 %v11453_v21  ;;  %2242 = vmatprep.mubr.bf16.mxu1 %v11453_v21 }
  0xf7   :  { %2300 = vmatpush1.bf16.msra.mxu0 %v8738_v14  ;;  %2403 = vmatpush1.bf16.msra.mxu1 %v8740_v30  ;;  %v260_v14 = vld [vmem:[#allocation4 + $0x5f8] sm:$0xff]  ;;  %v8850_v30 = vcombine.low %v235_v62, %v243_v10 }
  0xf8   :  { %2301 = vmatprep.subr.bf16.mxu0 %v8755_v17  ;;  %2404 = vmatprep.subr.bf16.mxu1 %v8757_v20  ;;  %v267_v17 = vld [vmem:[#allocation4 + $0x630] sm:$0xff]  ;;  %v8867_v20 = vcombine.high %v251_v19, %v259_v8  ;;  %v8869_v25 = vcombine.high %v252_v33, %v260_v14 }
  0xf9   :  { %v8882_v56 = vcombine.low %v267_v17, %v275_v18 }
  0xfa   :  { %2140 = vmatmul.mubr.bf16.gmra.mrb[64].mxu0 %v11460_v29  ;;  %2243 = vmatmul.mubr.bf16.gmra.mrb[64].mxu1 %v11460_v29 }
  0xfb   :  { %2302 = vmatpush1.bf16.msra.mxu0 %v8754_v22  ;;  %2405 = vmatpush1.bf16.msra.mxu1 %v8756_v37  ;;  %v268_v22 = vld [vmem:[#allocation4 + $0x638] sm:$0xff] }
  0xfc   :  { %2303 = vmatprep.subr.bf16.mxu0 %v8771_v26  ;;  %2406 = vmatprep.subr.bf16.mxu1 %v8773_v28  ;;  %v11502_v37 = vld [vmem:[%s14447_s0 + $0x50] ss:$8 sps:$4 sm:$0xff]   ;;  %v8866_v26 = vcombine.low %v251_v19, %v259_v8  ;;  %v8868_v28 = vcombine.low %v252_v33, %v260_v14  ;;  %v10266_v14 = vld [vmem:[%s14449_s2 + $0x244] ss:$16 sps:$4 sm:$0xff]  }
  0xfd   :  { %2149 = vmatprep.mubr.bf16.mxu0 %v11467_v38  ;;  %2252 = vmatprep.mubr.bf16.mxu1 %v11467_v38  ;;  %v10261_v19 = vld [vmem:[%s14449_s2 + $0x228] ss:$16 sps:$4 sm:$0xff]   ;;  %v10264_v33 = vld [vmem:[%s14449_s2 + $0x240] ss:$16 sps:$4 sm:$0xff]  }
  0xff   :  { %2304 = vmatpush1.bf16.msra.mxu0 %v8770_v31  ;;  %2407 = vmatpush1.bf16.msra.mxu1 %v8772_v48  ;;  %v8883_v31 = vcombine.high %v267_v17, %v275_v18  ;;  %v8885_v48 = vcombine.high %v268_v22, %v276_v24  ;;  %v10272_v17 = vld [vmem:[%s14449_s2 + $0x264] ss:$16 sps:$4 sm:$0xff]   ;;  %v10275_v18 = vld [vmem:[%s14449_s2 + $0x26c] ss:$16 sps:$4 sm:$0xff]  }
 0x100   :  { %2305 = vmatprep.subr.bf16.mxu0 %v8787_v35  ;;  %2408 = vmatprep.subr.bf16.mxu1 %v8789_v36  ;;  %v11509_v35 = vld [vmem:[%s14447_s0 + $0x64] ss:$8 sps:$4 sm:$0xff]   ;;  %v299_v36 = vld [vmem:[#allocation4 + $0x730] sm:$0xff] }
 0x101   :  { %v8915_v51 = vcombine.high %v299_v36, %v307_v39  ;;  %v8914_v57 = vcombine.low %v299_v36, %v307_v39  ;;  %v10282_v39 = vld [vmem:[%s14449_s2 + $0x2a0] ss:$16 sps:$4 sm:$0xff]  }
 0x102   :  { %2150 = vmatmul.mubr.bf16.gmra.mrb[68].mxu0 %v11474_v49  ;;  %2253 = vmatmul.mubr.bf16.gmra.mrb[68].mxu1 %v11474_v49 }
 0x103   :  { %2306 = vmatpush1.bf16.msra.mxu0 %v8786_v40  ;;  %2409 = vmatpush1.bf16.msra.mxu1 %v8788_v42  ;;  %v8884_v40 = vcombine.low %v268_v22, %v276_v24  ;;  %v308_v42 = vld [vmem:[#allocation4 + $0x778] sm:$0xff] }
 0x104   :  { %2307 = vmatprep.subr.bf16.mxu0 %v8803_v44  ;;  %2410 = vmatprep.subr.bf16.mxu1 %v8805_v47  ;;  %v8901_v44 = vcombine.high %v284_v32, %v292_v0  ;;  %v315_v47 = vld [vmem:[#allocation4 + $0x7b0] sm:$0xff]  ;;  %v8917_v55 = vcombine.high %v300_v58, %v308_v42  ;;  %v10273_v24 = vld [vmem:[%s14449_s2 + $0x268] ss:$16 sps:$4 sm:$0xff]   ;;  %v10281_v32 = vld [vmem:[%s14449_s2 + $0x28c] ss:$16 sps:$4 sm:$0xff]  }
 0x105   :  { %2159 = vmatprep.mubr.bf16.mxu0 %v11481_v13  ;;  %2262 = vmatprep.mubr.bf16.mxu1 %v11481_v13  ;;  %v10279_v0 = vld [vmem:[%s14449_s2 + $0x288] ss:$16 sps:$4 sm:$0xff]  }
 0x107   :  { %2308 = vmatpush1.bf16.msra.mxu0 %v8802_v50  ;;  %2411 = vmatpush1.bf16.msra.mxu1 %v8804_v52  ;;  %v323_v50 = vld [vmem:[#allocation4 + $0x7f0] sm:$0xff]  ;;  %v316_v52 = vld [vmem:[#allocation4 + $0x7b8] sm:$0xff] }
 0x108   :  { %2309 = vmatprep.subr.bf16.mxu0 %v8819_v54  ;;  %2412 = vmatprep.subr.bf16.mxu1 %v8821_v59  ;;  %v324_v54 = vld [vmem:[#allocation4 + $0x7f8] sm:$0xff]  ;;  %v8916_v59 = vcombine.low %v300_v58, %v308_v42  ;;  %v8930_v10 = vcombine.low %v315_v47, %v323_v50 }
 0x109   :  { %v8933_v62 = vcombine.high %v316_v52, %v324_v54 }
 0x10a   :  { %2160 = vmatmul.mubr.bf16.gmra.mrb[72].mxu0 %v11488_v6  ;;  %2263 = vmatmul.mubr.bf16.gmra.mrb[72].mxu1 %v11488_v6 }
 0x10b   :  { %2310 = vmatpush1.bf16.msra.mxu0 %v8818_v61  ;;  %2413 = vmatpush1.bf16.msra.mxu1 %v8820_v63  ;;  %v8931_v61 = vcombine.high %v315_v47, %v323_v50  ;;  %v8932_v63 = vcombine.low %v316_v52, %v324_v54  ;;  %v10288_v50 = vld [vmem:[%s14449_s2 + $0x2c0] ss:$16 sps:$4 sm:$0xff]   ;;  %v10296_v52 = vld [vmem:[%s14449_s2 + $0x2e4] ss:$16 sps:$4 sm:$0xff]   ;;  %v10299_v54 = vld [vmem:[%s14449_s2 + $0x2ec] ss:$16 sps:$4 sm:$0xff]  }
 0x10c   :  { %2311 = vmatprep.subr.bf16.mxu0 %v8835_v1  ;;  %2414 = vmatprep.subr.bf16.mxu1 %v8837_v5 }
 0x10d   :  { %2169 = vmatprep.mubr.bf16.mxu0 %v11495_v16  ;;  %2272 = vmatprep.mubr.bf16.mxu1 %v11495_v16 }
 0x10f   :  { %2312 = vmatpush1.bf16.msra.mxu0 %v8834_v7  ;;  %2415 = vmatpush1.bf16.msra.mxu1 %v8836_v9  ;;  %v10258_v7 = vld [vmem:[%s14449_s2 + $0x220] ss:$16 sps:$4 sm:$0xff]  }
 0x110   :  { %2313 = vmatprep.subr.bf16.mxu0 %v8851_v11  ;;  %2416 = vmatprep.subr.bf16.mxu1 %v8853_v15  ;;  %v10267_v15 = vld [vmem:[%s14449_s2 + $0x248] ss:$16 sps:$4 sm:$0xff]  }
 0x112   :  { %2170 = vmatmul.mubr.bf16.gmra.mrb[76].mxu0 %v11502_v37  ;;  %2273 = vmatmul.mubr.bf16.gmra.mrb[76].mxu1 %v11502_v37 }
 0x113   :  { %2314 = vmatpush1.bf16.msra.mxu0 %v8850_v30  ;;  %2417 = vmatpush1.bf16.msra.mxu1 %v8852_v43  ;;  %v10269_v30 = vld [vmem:[%s14449_s2 + $0x24c] ss:$16 sps:$4 sm:$0xff]  }
 0x114   :  { %2315 = vmatprep.subr.bf16.mxu0 %v8867_v20  ;;  %2418 = vmatprep.subr.bf16.mxu1 %v8869_v25 }
 0x115   :  { %2179 = vmatprep.mubr.bf16.mxu0 %v11509_v35  ;;  %2282 = vmatprep.mubr.bf16.mxu1 %v11509_v35 }
 0x117   :  { %2316 = vmatpush1.bf16.msra.mxu0 %v8866_v26  ;;  %2419 = vmatpush1.bf16.msra.mxu1 %v8868_v28 }
 0x118   :  { %2317 = vmatprep.subr.bf16.mxu0 %v8883_v31  ;;  %2420 = vmatprep.subr.bf16.mxu1 %v8885_v48  ;;  %v10276_v31 = vld [vmem:[%s14449_s2 + $0x280] ss:$16 sps:$4 sm:$0xff]   ;;  %v10284_v48 = vld [vmem:[%s14449_s2 + $0x2a4] ss:$16 sps:$4 sm:$0xff]  }
 0x11a   :  { %2180 = vmatmul.mubr.bf16.gmra.mrb[80].mxu0 %v11516_v45  ;;  %2283 = vmatmul.mubr.bf16.gmra.mrb[80].mxu1 %v11516_v45 }
 0x11b   :  { %2318 = vmatpush1.bf16.msra.mxu0 %v8882_v56  ;;  %2421 = vmatpush1.bf16.msra.mxu1 %v8884_v40  ;;  %v10287_v56 = vld [vmem:[%s14449_s2 + $0x2ac] ss:$16 sps:$4 sm:$0xff]  }
 0x11c   :  { %2319 = vmatprep.subr.bf16.mxu0 %v8899_v41  ;;  %2422 = vmatprep.subr.bf16.mxu1 %v8901_v44  ;;  %v10285_v41 = vld [vmem:[%s14449_s2 + $0x2a8] ss:$16 sps:$4 sm:$0xff]  }
 0x11d   :  { %2325 = vmatprep.mubr.bf16.mxu0 %v11425_v34  ;;  %2428 = vmatprep.mubr.bf16.mxu1 %v11425_v34  ;;  %v10252_v34 = vld [vmem:[%s14449_s2 + $0x200] ss:$16 sps:$4 sm:$0xff]  }
 0x11f   :  { %2320 = vmatpush1.bf16.msra.mxu0 %v8898_v46  ;;  %2423 = vmatpush1.bf16.msra.mxu1 %v8900_v3  ;;  %v10290_v46 = vld [vmem:[%s14449_s2 + $0x2c4] ss:$16 sps:$4 sm:$0xff]   ;;  %v10293_v3 = vld [vmem:[%s14449_s2 + $0x2cc] ss:$16 sps:$4 sm:$0xff]  }
 0x120   :  { %2321 = vmatprep.subr.bf16.mxu0 %v8915_v51  ;;  %2424 = vmatprep.subr.bf16.mxu1 %v8917_v55  ;;  %v10291_v51 = vld [vmem:[%s14449_s2 + $0x2c8] ss:$16 sps:$4 sm:$0xff]  }
 0x123   :  { %2322 = vmatpush1.bf16.msra.mxu0 %v8914_v57  ;;  %2425 = vmatpush1.bf16.msra.mxu1 %v8916_v59  ;;  %v10294_v57 = vld [vmem:[%s14449_s2 + $0x2e0] ss:$16 sps:$4 sm:$0xff]  }
 0x124   :  { %2323 = vmatprep.subr.bf16.mxu0 %v8931_v61  ;;  %2426 = vmatprep.subr.bf16.mxu1 %v8933_v62  ;;  %v10297_v61 = vld [vmem:[%s14449_s2 + $0x2e8] ss:$16 sps:$4 sm:$0xff]  }
 0x127   :  { %2324 = vmatpush1.bf16.msra.mxu0 %v8930_v10  ;;  %2427 = vmatpush1.bf16.msra.mxu1 %v8932_v63  ;;  %v10302_v10 = vld [vmem:[%s14449_s2 + $0x304] ss:$16 sps:$4 sm:$0xff]  }
 0x12a   :  { %2326 = vmatmul.mubr.bf16.vlgmr.msra.gmra.mrb[84].mxu0 %v11432_v60  ;;  %2429 = vmatmul.mubr.bf16.vlgmr.msra.gmra.mrb[84].mxu1 %v11432_v60  ;;  %v10254_v60 = vld [vmem:[%s14449_s2 + $0x204] ss:$16 sps:$4 sm:$0xff]  }
 0x12b   :  { %2335 = vmatprep.mubr.bf16.mxu0 %v11439_v23  ;;  %2438 = vmatprep.mubr.bf16.mxu1 %v11439_v23  ;;  %v10255_v23 = vld [vmem:[%s14449_s2 + $0x208] ss:$16 sps:$4 sm:$0xff]  }
 0x12c   :  { %3345 = vmatprep.subr.bf16.mxu0 %v10254_v60  ;;  %v10305_v60 = vld [vmem:[%s14449_s2 + $0x30c] ss:$16 sps:$4 sm:$0xff]  }
 0x12d   :  { %3346 = vmatpush1.bf16.msra.mxu0 %v10252_v34 }
 0x132   :  { %2336 = vmatmul.mubr.bf16.gmra.mrb[88].mxu0 %v11446_v12  ;;  %2439 = vmatmul.mubr.bf16.gmra.mrb[88].mxu1 %v11446_v12  ;;  %v10257_v12 = vld [vmem:[%s14449_s2 + $0x20c] ss:$16 sps:$4 sm:$0xff]  }
 0x133   :  { %2345 = vmatprep.mubr.bf16.mxu0 %v11453_v21  ;;  %2448 = vmatprep.mubr.bf16.mxu1 %v11453_v21 }
 0x134   :  { %3448 = vmatprep.subr.bf16.mxu1 %v10257_v12  ;;  %v10300_v12 = vld [vmem:[%s14449_s2 + $0x300] ss:$16 sps:$4 sm:$0xff]  }
 0x135   :  { %3449 = vmatpush1.bf16.msra.mxu1 %v10255_v23 }
 0x136   :  { %3450 = vmatprep.subr.bf16.mxu1 %v10263_v4  ;;  %v10308_v4 = vld [vmem:[%s14449_s2 + $0x324] ss:$16 sps:$4 sm:$0xff]  }
 0x139   :  { %3451 = vmatpush1.bf16.msra.mxu1 %v10261_v19 }
 0x13a   :  { %2346 = vmatmul.mubr.bf16.gmra.mrb[92].mxu0 %v11460_v29  ;;  %2449 = vmatmul.mubr.bf16.gmra.mrb[92].mxu1 %v11460_v29  ;;  %v10260_v29 = vld [vmem:[%s14449_s2 + $0x224] ss:$16 sps:$4 sm:$0xff]  }
 0x13b   :  { %2355 = vmatprep.mubr.bf16.mxu0 %v11467_v38  ;;  %2458 = vmatprep.mubr.bf16.mxu1 %v11467_v38 }
 0x13c   :  { %3347 = vmatprep.subr.bf16.mxu0 %v10260_v29  ;;  %3452 = vmatprep.subr.bf16.mxu1 %v10269_v30  ;;  %v10303_v29 = vld [vmem:[%s14449_s2 + $0x308] ss:$16 sps:$4 sm:$0xff]  }
 0x13d   :  { %v11546_v21 = vpop.f32.mrb[0].mxu0  ;;  %v11548_v1 = vpop.f32.mrb[0].mxu1  ;;  %3348 = vmatpush1.bf16.msra.mxu0 %v10258_v7  ;;  %3453 = vmatpush1.bf16.msra.mxu1 %v10267_v15  ;;  %v10311_v7 = vld [vmem:[%s14449_s2 + $0x32c] ss:$16 sps:$4 sm:$0xff]  }
 0x13e   :  { %v11550_v2 = vpop.f32.mrb[1].mxu0  ;;  %v11558_v5 = vpop.f32.mrb[1].mxu1  ;;  %3349 = vmatprep.subr.bf16.mxu0 %v10266_v14  ;;  %3454 = vmatprep.subr.bf16.mxu1 %v10275_v18  ;;  %v10314_v18 = vld [vmem:[%s14449_s2 + $0x344] ss:$16 sps:$4 sm:$0xff]  }
 0x13f   :  { %v11560_v38 = vpop.f32.mrb[2].mxu0  ;;  %v11568_v8 = vpop.f32.mrb[2].mxu1 }
 0x140   :  { %v11570_v9 = vpop.f32.mrb[3].mxu0  ;;  %v11572_v11 = vpop.f32.mrb[3].mxu1 }
 0x141   :  { %3350 = vmatpush1.bf16.msra.mxu0 %v10264_v33  ;;  %3455 = vmatpush1.bf16.msra.mxu1 %v10273_v24  ;;  %v10306_v33 = vld [vmem:[%s14449_s2 + $0x320] ss:$16 sps:$4 sm:$0xff]  }
 0x142   :  { %2356 = vmatmul.mubr.bf16.gmra.mrb[96].mxu0 %v11474_v49  ;;  %2459 = vmatmul.mubr.bf16.gmra.mrb[96].mxu1 %v11474_v49  ;;  %v10270_v49 = vld [vmem:[%s14449_s2 + $0x260] ss:$16 sps:$4 sm:$0xff]  }
 0x143   :  { %2365 = vmatprep.mubr.bf16.mxu0 %v11481_v13  ;;  %2468 = vmatprep.mubr.bf16.mxu1 %v11481_v13 }
 0x144   :  { %3351 = vmatprep.subr.bf16.mxu0 %v10272_v17  ;;  %3456 = vmatprep.subr.bf16.mxu1 %v10281_v32  ;;  %v10312_v32 = vld [vmem:[%s14449_s2 + $0x340] ss:$16 sps:$4 sm:$0xff]  }
 0x145   :  { %v11596_v43 = vpop.f32.mrb[4].mxu0  ;;  %v11601_v20 = vpop.f32.mrb[4].mxu1  ;;  %3352 = vmatpush1.bf16.msra.mxu0 %v10270_v49  ;;  %3457 = vmatpush1.bf16.msra.mxu1 %v10279_v0  ;;  %v10315_v0 = vld [vmem:[%s14449_s2 + $0x348] ss:$16 sps:$4 sm:$0xff]  }
 0x146   :  { %v11603_v22 = vpop.f32.mrb[5].mxu0  ;;  %v11608_v13 = vpop.f32.mrb[5].mxu1  ;;  %3353 = vmatprep.subr.bf16.mxu0 %v10278_v27  ;;  %3458 = vmatprep.subr.bf16.mxu1 %v10287_v56  ;;  %v10317_v27 = vld [vmem:[%s14449_s2 + $0x34c] ss:$16 sps:$4 sm:$0xff]  }
 0x147   :  { %v11610_v25 = vpop.f32.mrb[6].mxu0  ;;  %v11612_v26 = vpop.f32.mrb[6].mxu1  ;;  %v10323_v56 = vld [vmem:[%s14449_s2 + $0x36c] ss:$16 sps:$4 sm:$0xff]  }
 0x148   :  { %v11614_v53 = vpop.f32.mrb[7].mxu0  ;;  %v11619_v28 = vpop.f32.mrb[7].mxu1 }
 0x149   :  { %3354 = vmatpush1.bf16.msra.mxu0 %v10276_v31  ;;  %3459 = vmatpush1.bf16.msra.mxu1 %v10285_v41  ;;  %v10318_v41 = vld [vmem:[%s14449_s2 + $0x360] ss:$16 sps:$4 sm:$0xff]  }
 0x14a   :  { %2366 = vmatmul.mubr.bf16.gmra.mrb[100].mxu0 %v11488_v6  ;;  %2469 = vmatmul.mubr.bf16.gmra.mrb[100].mxu1 %v11488_v6 }
 0x14b   :  { %2375 = vmatprep.mubr.bf16.mxu0 %v11495_v16  ;;  %2478 = vmatprep.mubr.bf16.mxu1 %v11495_v16 }
 0x14c   :  { %3355 = vmatprep.subr.bf16.mxu0 %v10284_v48  ;;  %3460 = vmatprep.subr.bf16.mxu1 %v10293_v3  ;;  %v10320_v48 = vld [vmem:[%s14449_s2 + $0x364] ss:$16 sps:$4 sm:$0xff]   ;;  %v10321_v3 = vld [vmem:[%s14449_s2 + $0x368] ss:$16 sps:$4 sm:$0xff]  }
 0x14d   :  { %v11640_v36 = vpop.f32.mrb[8].mxu0  ;;  %v11645_v40 = vpop.f32.mrb[8].mxu1  ;;  %3356 = vmatpush1.bf16.msra.mxu0 %v10282_v39  ;;  %3461 = vmatpush1.bf16.msra.mxu1 %v10291_v51 }
 0x14e   :  { %v11647_v6 = vpop.f32.mrb[9].mxu0  ;;  %v11652_v16 = vpop.f32.mrb[9].mxu1  ;;  %3357 = vmatprep.subr.bf16.mxu0 %v10290_v46  ;;  %3462 = vmatprep.subr.bf16.mxu1 %v10299_v54  ;;  %v10326_v54 = vld [vmem:[%s14449_s2 + $0x384] ss:$16 sps:$4 sm:$0xff]  }
 0x14f   :  { %v11654_v58 = vpop.f32.mrb[10].mxu0  ;;  %v11656_v42 = vpop.f32.mrb[10].mxu1 }
 0x150   :  { %v11658_v44 = vpop.f32.mrb[11].mxu0  ;;  %v11663_v47 = vpop.f32.mrb[11].mxu1 }
 0x151   :  { %3358 = vmatpush1.bf16.msra.mxu0 %v10288_v50  ;;  %3463 = vmatpush1.bf16.msra.mxu1 %v10297_v61 }
 0x152   :  { %2376 = vmatmul.mubr.bf16.gmra.mrb[104].mxu0 %v11502_v37  ;;  %2479 = vmatmul.mubr.bf16.gmra.mrb[104].mxu1 %v11502_v37 }
 0x153   :  { %2385 = vmatprep.mubr.bf16.mxu0 %v11509_v35  ;;  %2488 = vmatprep.mubr.bf16.mxu1 %v11509_v35 }
 0x154   :  { %3359 = vmatprep.subr.bf16.mxu0 %v10296_v52  ;;  %3464 = vmatprep.subr.bf16.mxu1 %v10305_v60 }
 0x155   :  { %v11684_v55 = vpop.f32.mrb[12].mxu0  ;;  %v11689_v59 = vpop.f32.mrb[12].mxu1  ;;  %3360 = vmatpush1.bf16.msra.mxu0 %v10294_v57  ;;  %3465 = vmatpush1.bf16.msra.mxu1 %v10303_v29  ;;  %v10327_v29 = vld [vmem:[%s14449_s2 + $0x388] ss:$16 sps:$4 sm:$0xff]  }
 0x156   :  { %v11691_v37 = vpop.f32.mrb[13].mxu0  ;;  %v11696_v35 = vpop.f32.mrb[13].mxu1  ;;  %3361 = vmatprep.subr.bf16.mxu0 %v10302_v10  ;;  %3466 = vmatprep.subr.bf16.mxu1 %v10311_v7  ;;  %v10329_v10 = vld [vmem:[%s14449_s2 + $0x38c] ss:$16 sps:$4 sm:$0xff]  }
 0x157   :  { %v11698_v62 = vpop.f32.mrb[14].mxu0  ;;  %v11703_v63 = vpop.f32.mrb[14].mxu1  ;;  %v10335_v7 = vld [vmem:[%s14449_s2 + $0x3ac] ss:$16 sps:$4 sm:$0xff]  }
 0x158   :  { %v11705_v34 = vpop.f32.mrb[15].mxu0  ;;  %v11710_v23 = vpop.f32.mrb[15].mxu1 }
 0x159   :  { %3362 = vmatpush1.bf16.msra.mxu0 %v10300_v12  ;;  %v10324_v12 = vld [vmem:[%s14449_s2 + $0x380] ss:$16 sps:$4 sm:$0xff]  }
 0x15a   :  { %2386 = vmatmul.mubr.bf16.gmra.mrb[108].mxu0 %v11516_v45  ;;  %2489 = vmatmul.mubr.bf16.gmra.mrb[108].mxu1 %v11516_v45  ;;  %v10309_v45 = vld [vmem:[%s14449_s2 + $0x328] ss:$16 sps:$4 sm:$0xff]  }
 0x15b   :  { %3363 = vmatprep.subr.bf16.mxu0 %v10308_v4  ;;  %3467 = vmatpush1.bf16.msra.mxu1 %v10309_v45  ;;  %v10332_v4 = vld [vmem:[%s14449_s2 + $0x3a4] ss:$16 sps:$4 sm:$0xff]   ;;  %v10330_v45 = vld [vmem:[%s14449_s2 + $0x3a0] ss:$16 sps:$4 sm:$0xff]  }
 0x15c   :  { %3468 = vmatprep.subr.bf16.mxu1 %v10317_v27 }
 0x15d   :  { %v11726_v19 = vpop.f32.mrb[16].mxu0  ;;  %v11731_v14 = vpop.f32.mrb[16].mxu1  ;;  %3364 = vmatpush1.bf16.msra.mxu0 %v10306_v33 }
 0x15e   :  { %v11733_v15 = vpop.f32.mrb[17].mxu0  ;;  %v11738_v30 = vpop.f32.mrb[17].mxu1  ;;  %3365 = vmatprep.subr.bf16.mxu0 %v10314_v18 }
 0x15f   :  { %v11740_v17 = vpop.f32.mrb[18].mxu0  ;;  %v11745_v49 = vpop.f32.mrb[18].mxu1  ;;  %3469 = vmatpush1.bf16.msra.mxu1 %v10315_v0 }
 0x160   :  { %v11747_v24 = vpop.f32.mrb[19].mxu0  ;;  %v11752_v31 = vpop.f32.mrb[19].mxu1  ;;  %3470 = vmatprep.subr.bf16.mxu1 %v10323_v56  ;;  %v10338_v56 = vld [vmem:[%s14449_s2 + $0x3c4] ss:$16 sps:$4 sm:$0xff]  }
 0x161   :  { %3366 = vmatpush1.bf16.msra.mxu0 %v10312_v32  ;;  %v10333_v32 = vld [vmem:[%s14449_s2 + $0x3a8] ss:$16 sps:$4 sm:$0xff]  }
 0x162   :  { %3367 = vmatprep.subr.bf16.mxu0 %v10320_v48 }
 0x163   :  { %3471 = vmatpush1.bf16.msra.mxu1 %v10321_v3 }
 0x164   :  { %3472 = vmatprep.subr.bf16.mxu1 %v10329_v10 }
 0x165   :  { %v11766_v39 = vpop.f32.mrb[20].mxu0  ;;  %v11771_v46 = vpop.f32.mrb[20].mxu1  ;;  %3368 = vmatpush1.bf16.msra.mxu0 %v10318_v41 }
 0x166   :  { %v11773_v50 = vpop.f32.mrb[21].mxu0  ;;  %v11778_v51 = vpop.f32.mrb[21].mxu1  ;;  %3369 = vmatprep.subr.bf16.mxu0 %v10326_v54  ;;  %v10341_v54 = vld [vmem:[%s14449_s2 + $0x3cc] ss:$16 sps:$4 sm:$0xff]  }
 0x167   :  { %v11780_v52 = vpop.f32.mrb[22].mxu0  ;;  %v11785_v57 = vpop.f32.mrb[22].mxu1  ;;  %3473 = vmatpush1.bf16.msra.mxu1 %v10327_v29  ;;  %v10339_v29 = vld [vmem:[%s14449_s2 + $0x3c8] ss:$16 sps:$4 sm:$0xff]  }
 0x168   :  { %14474 = vst [vmem:[#allocation10_spill] sm:$0xff] %v11780_v52  ;;  %14475 = vst [vmem:[#allocation11_spill] sm:$0xff] %v11785_v57  ;;  %v11787_v61 = vpop.f32.mrb[23].mxu0  ;;  %v11792_v60 = vpop.f32.mrb[23].mxu1  ;;  %3474 = vmatprep.subr.bf16.mxu1 %v10335_v7  ;;  %v2585_v7 = vlaneseq }
 0x169   :  { %14476 = vst [vmem:[#allocation12_spill] sm:$0xff] %v11787_v61  ;;  %14477 = vst [vmem:[#allocation13_spill] sm:$0xff] %v11792_v60  ;;  %3370 = vmatpush1.bf16.msra.mxu0 %v10324_v12  ;;  %v10336_v12 = vld [vmem:[%s14449_s2 + $0x3c0] ss:$16 sps:$4 sm:$0xff]  }
 0x16a   :  { %3371 = vmatprep.subr.bf16.mxu0 %v10332_v4  ;;  %v10344_v4 = vld [vmem:[%s14449_s2 + $0x3e4] ss:$16 sps:$4 sm:$0xff]  }
 0x16b   :  { %3475 = vmatpush1.bf16.msra.mxu1 %v10333_v32  ;;  %v10342_v32 = vld [vmem:[%s14449_s2 + $0x3e0] ss:$16 sps:$4 sm:$0xff]  }
 0x16c   :  { %3476 = vmatprep.subr.bf16.mxu1 %v10341_v54  ;;  %v10350_v54 = vld [vmem:[%s14449_s2 + $0x4] ss:$16 sps:$4 sm:$0xff]  }
 0x16d   :  { %v11806_v33 = vpop.f32.mrb[24].mxu0  ;;  %v11811_v18 = vpop.f32.mrb[24].mxu1  ;;  %3372 = vmatpush1.bf16.msra.mxu0 %v10330_v45  ;;  %v10347_v45 = vld [vmem:[%s14449_s2 + $0x3ec] ss:$16 sps:$4 sm:$0xff]  }
 0x16e   :  { %14478 = vst [vmem:[#allocation14_spill] sm:$0xff] %v11806_v33  ;;  %14479 = vst [vmem:[#allocation15_spill] sm:$0xff] %v11811_v18  ;;  %v11813_v27 = vpop.f32.mrb[25].mxu0  ;;  %v11818_v0 = vpop.f32.mrb[25].mxu1  ;;  %3373 = vmatprep.subr.bf16.mxu0 %v10338_v56  ;;  %v10345_v56 = vld [vmem:[%s14449_s2 + $0x3e8] ss:$16 sps:$4 sm:$0xff]  }
 0x16f   :  { %14480 = vst [vmem:[#allocation16_spill] sm:$0xff] %v11813_v27  ;;  %14481 = vst [vmem:[#allocation17_spill] sm:$0xff] %v11818_v0  ;;  %v11820_v48 = vpop.f32.mrb[26].mxu0  ;;  %v11825_v41 = vpop.f32.mrb[26].mxu1  ;;  %3477 = vmatpush1.bf16.msra.mxu1 %v10339_v29  ;;  %v10348_v29 = vld [vmem:[%s14449_s2] ss:$16 sps:$4 sm:$0xff]  }
 0x170   :  { %14482 = vst [vmem:[#allocation18_spill] sm:$0xff] %v11820_v48  ;;  %14483 = vst [vmem:[#allocation19_spill] sm:$0xff] %v11825_v41  ;;  %v11827_v3 = vpop.f32.mrb[27].mxu0  ;;  %v11832_v10 = vpop.f32.mrb[27].mxu1  ;;  %3478 = vmatprep.subr.bf16.mxu1 %v10347_v45 }
 0x171   :  { %14484 = vst [vmem:[#allocation20_spill] sm:$0xff] %v11827_v3  ;;  %14485 = vst [vmem:[#allocation21_spill] sm:$0xff] %v11832_v10  ;;  %v14455_v10 = vmov 0   ;;  %3374 = vmatpush1.bf16.msra.mxu0 %v10336_v12  ;;  %v2586_v3 = vshrl.u32 %v2585_v7, 7  ;;  %v10353_v12 = vld [vmem:[%s14449_s2 + $0xc] ss:$16 sps:$4 sm:$0xff]  }
 0x172   :  { %3377 = vmatprep.mubr.bf16.mxu0 %v14455_v10  ;;  %3480 = vmatprep.mubr.bf16.mxu1 %v14455_v10  ;;  %v2583_v7 = vld [vmem:[%s14451_s4] sm:$0x3] }
 0x173   :  { %3375 = vmatprep.subr.bf16.mxu0 %v10344_v4  ;;  %3479 = vmatpush1.bf16.msra.mxu1 %v10345_v56  ;;  %v10351_v4 = vld [vmem:[%s14449_s2 + $0x8] ss:$16 sps:$4 sm:$0xff]   ;;  %v11866_v10 = vsub.s32 0, %v2586_v3  ;;  %v11871_v45 = vsub.s32 1, %v2586_v3  ;;  %v10359_v3 = vld [vmem:[%s14449_s2 + $0x2c] ss:$16 sps:$4 sm:$0xff]  }
 0x174   :  { %3974 = vmatprep.subr.bf16.mxu1 %v10353_v12  ;;  %v10356_v12 = vld [vmem:[%s14449_s2 + $0x24] ss:$16 sps:$4 sm:$0xff]  }
 0x175   :  { %3376 = vmatpush1.bf16.msra.mxu0 %v10342_v32  ;;  %14486 = vst [vmem:[#allocation22_spill] sm:$0xff] %v11866_v10  ;;  %v14487_v32 = vmov 0   ;;  %v11884_v27 = vrot.slane %v2583_v7, %v11866_v10  ;;  %v11895_v33 = vrot.slane %v2583_v7, %v11871_v45 }
 0x176   :  { %3871 = vmatprep.subr.bf16.mxu0 %v10350_v54  ;;  %3481 = vmatmul.mubr.bf16.vlgmr.msra.gmra.mrb[112].mxu1 %v14487_v32 }
 0x177   :  { %3975 = vmatpush1.bf16.msra.mxu1 %v10351_v4  ;;  %v10357_v4 = vld [vmem:[%s14449_s2 + $0x28] ss:$16 sps:$4 sm:$0xff]  }
 0x178   :  { %3378 = vmatmul.mubr.bf16.vlgmr.msra.gmra.mrb[112].mxu0 %v14487_v32  ;;  %3976 = vmatprep.subr.bf16.mxu1 %v10359_v3 }
 0x179   :  { %3872 = vmatpush1.bf16.msra.mxu0 %v10348_v29 }
 0x17a   :  { %3873 = vmatprep.subr.bf16.mxu0 %v10356_v12 }
 0x17b   :  { %3977 = vmatpush1.bf16.msra.mxu1 %v10357_v4 }
 0x17d   :  { %v1915_v41 = vpop.f32.mrb[28].mxu0  ;;  %v2018_v54 = vpop.f32.mrb[28].mxu1 }
 0x17e   :  { %v2499_v56 = vmax.f32 %v11546_v21, %v1915_v41  ;;  %v1917_v48 = vpop.f32.mrb[29].mxu0  ;;  %v2501_v0 = vmax.f32 %v11548_v1, %v2018_v54  ;;  %v2020_v32 = vpop.f32.mrb[29].mxu1  ;;  %v10354_v41 = vld [vmem:[%s14449_s2 + $0x20] ss:$16 sps:$4 sm:$0xff]  }
 0x17f   :  { %v2500_v29 = vmax.f32 %v11550_v2, %v1917_v48  ;;  %v1919_v21 = vpop.f32.mrb[30].mxu0  ;;  %v2502_v18 = vmax.f32 %v11558_v5, %v2020_v32  ;;  %v2022_v54 = vpop.f32.mrb[30].mxu1  ;;  %3874 = vmatpush1.bf16.msra.mxu0 %v10354_v41  ;;  %v10362_v5 = vld [vmem:[%s14449_s2 + $0x44] ss:$16 sps:$4 sm:$0xff]  }
 0x180   :  { %v2503_v1 = vmax.f32 %v11560_v38, %v1919_v21  ;;  %v1921_v10 = vpop.f32.mrb[31].mxu0  ;;  %v2555_v2 = vmax.f32 %v2499_v56, %v2501_v0  ;;  %v2505_v48 = vmax.f32 %v11568_v8, %v2022_v54  ;;  %v2024_v61 = vpop.f32.mrb[31].mxu1  ;;  %v10365_v38 = vld [vmem:[%s14449_s2 + $0x4c] ss:$16 sps:$4 sm:$0xff]   ;;  %v10360_v8 = vld [vmem:[%s14449_s2 + $0x40] ss:$16 sps:$4 sm:$0xff]   ;;  %3875 = vmatprep.subr.bf16.mxu0 %v10362_v5 }
 0x181   :  { %v2504_v60 = vmax.f32 %v11570_v9, %v1921_v10  ;;  %v2556_v57 = vmax.f32 %v2500_v29, %v2502_v18  ;;  %v2506_v52 = vmax.f32 %v11572_v11, %v2024_v61  ;;  %v10363_v9 = vld [vmem:[%s14449_s2 + $0x48] ss:$16 sps:$4 sm:$0xff]   ;;  %3978 = vmatprep.subr.bf16.mxu1 %v10365_v38  ;;  %v10368_v29 = vld [vmem:[%s14449_s2 + $0x64] ss:$16 sps:$4 sm:$0xff]  }
 0x182   :  { %v2595_v0 = vadd.f32 %v11884_v27, %v2555_v2  ;;  %v2557_v7 = vmax.f32 %v2503_v1, %v2505_v48  ;;  %3979 = vmatpush1.bf16.msra.mxu1 %v10363_v9  ;;  %v10366_v1 = vld [vmem:[%s14449_s2 + $0x60] ss:$16 sps:$4 sm:$0xff]  }
 0x183   :  { %v2596_v11 = vadd.f32 %v11895_v33, %v2556_v57  ;;  %v2558_v61 = vmax.f32 %v2504_v60, %v2506_v52  ;;  %3876 = vmatpush1.bf16.msra.mxu0 %v10360_v8 }
 0x184   :  { %v2597_v18 = vadd.f32 %v11884_v27, %v2557_v7  ;;  %v2623_v21 = vmax.f32 %v2595_v0, 0.0  ;;  %3877 = vmatprep.subr.bf16.mxu0 %v10368_v29 }
 0x185   :  { %v1925_v10 = vpop.f32.mrb[32].mxu0  ;;  %v2598_v32 = vadd.f32 %v11895_v33, %v2558_v61  ;;  %v2028_v12 = vpop.f32.mrb[32].mxu1 }
 0x186   :  { %v2507_v56 = vmax.f32 %v11596_v43, %v1925_v10  ;;  %v1927_v3 = vpop.f32.mrb[33].mxu0  ;;  %v2625_v57 = vmax.f32 %v2597_v18, 0.0  ;;  %v2509_v52 = vmax.f32 %v11601_v20, %v2028_v12  ;;  %v2030_v41 = vpop.f32.mrb[33].mxu1  ;;  %v2624_v43 = vmax.f32 %v2596_v11, 0.0  ;;  %v10369_v20 = vld [vmem:[%s14449_s2 + $0x68] ss:$16 sps:$4 sm:$0xff]  }
 0x187   :  { %v2508_v60 = vmax.f32 %v11603_v22, %v1927_v3  ;;  %v1929_v4 = vpop.f32.mrb[34].mxu0  ;;  %v2626_v54 = vmax.f32 %v2598_v32, 0.0  ;;  %v2510_v2 = vmax.f32 %v11608_v13, %v2030_v41  ;;  %v2032_v5 = vpop.f32.mrb[34].mxu1  ;;  %v10371_v13 = vld [vmem:[%s14449_s2 + $0x6c] ss:$16 sps:$4 sm:$0xff]   ;;  %3878 = vmatpush1.bf16.msra.mxu0 %v10366_v1 }
 0x188   :  { %v2511_v48 = vmax.f32 %v11610_v25, %v1929_v4  ;;  %v1931_v38 = vpop.f32.mrb[35].mxu0  ;;  %v11931_v22 = vpack.c.bf16 %v2625_v57, %v2623_v21  ;;  %v2559_v0 = vmax.f32 %v2507_v56, %v2509_v52  ;;  %v2513_v7 = vmax.f32 %v11612_v26, %v2032_v5  ;;  %v2034_v9 = vpop.f32.mrb[35].mxu1  ;;  %v10374_v18 = vld [vmem:[%s14449_s2 + $0x84] ss:$16 sps:$4 sm:$0xff]   ;;  %v10377_v26 = vld [vmem:[%s14449_s2 + $0x8c] ss:$16 sps:$4 sm:$0xff]   ;;  %3980 = vmatprep.subr.bf16.mxu1 %v10371_v13 }
 0x189   :  { %v2512_v8 = vmax.f32 %v11614_v53, %v1931_v38  ;;  %v11938_v25 = vpack.c.bf16 %v2626_v54, %v2624_v43  ;;  %v2560_v11 = vmax.f32 %v2508_v60, %v2510_v2  ;;  %v2514_v61 = vmax.f32 %v11619_v28, %v2034_v9  ;;  %v10372_v32 = vld [vmem:[%s14449_s2 + $0x80] ss:$16 sps:$4 sm:$0xff]   ;;  %3981 = vmatpush1.bf16.msra.mxu1 %v10369_v20  ;;  %v10375_v28 = vld [vmem:[%s14449_s2 + $0x88] ss:$16 sps:$4 sm:$0xff]   ;;  %v10380_v41 = vld [vmem:[%s14449_s2 + $0xa4] ss:$16 sps:$4 sm:$0xff]  }
 0x18a   :  { %14488 = vst [vmem:[#allocation23_spill] sm:$0xff] %v11931_v22  ;;  %v2599_v53 = vadd.f32 %v11884_v27, %v2559_v0  ;;  %v2561_v10 = vmax.f32 %v2511_v48, %v2513_v7  ;;  %3879 = vmatprep.subr.bf16.mxu0 %v10374_v18  ;;  %3982 = vmatprep.subr.bf16.mxu1 %v10377_v26  ;;  %v10378_v5 = vld [vmem:[%s14449_s2 + $0xa0] ss:$16 sps:$4 sm:$0xff]  }
 0x18b   :  { %14489 = vst [vmem:[#allocation24_spill] sm:$0xff] %v11938_v25  ;;  %v2600_v56 = vadd.f32 %v11895_v33, %v2560_v11  ;;  %v2562_v12 = vmax.f32 %v2512_v8, %v2514_v61  ;;  %3880 = vmatpush1.bf16.msra.mxu0 %v10372_v32  ;;  %v10384_v32 = vld [vmem:[%s14449_s2 + $0xc0] ss:$16 sps:$4 sm:$0xff]  }
 0x18c   :  { %v2601_v3 = vadd.f32 %v11884_v27, %v2561_v10  ;;  %v2627_v4 = vmax.f32 %v2599_v53, 0.0  ;;  %3881 = vmatprep.subr.bf16.mxu0 %v10380_v41  ;;  %v10386_v53 = vld [vmem:[%s14449_s2 + $0xc4] ss:$16 sps:$4 sm:$0xff]  }
 0x18d   :  { %v1935_v29 = vpop.f32.mrb[36].mxu0  ;;  %v2602_v21 = vadd.f32 %v11895_v33, %v2562_v12  ;;  %v2038_v52 = vpop.f32.mrb[36].mxu1  ;;  %v2628_v38 = vmax.f32 %v2600_v56, 0.0  ;;  %3983 = vmatpush1.bf16.msra.mxu1 %v10375_v28  ;;  %v14524_v25 = vld [vmem:[#allocation22_spill] sm:$0xff] }
 0x18e   :  { %v2515_v57 = vmax.f32 %v11640_v36, %v1935_v29  ;;  %v1937_v60 = vpop.f32.mrb[37].mxu0  ;;  %v2629_v1 = vmax.f32 %v2601_v3, 0.0  ;;  %v2517_v43 = vmax.f32 %v11645_v40, %v2038_v52  ;;  %v2040_v2 = vpop.f32.mrb[37].mxu1  ;;  %v10381_v40 = vld [vmem:[%s14449_s2 + $0xa8] ss:$16 sps:$4 sm:$0xff]  }
 0x18f   :  { %v2516_v54 = vmax.f32 %v11647_v6, %v1937_v60  ;;  %v1939_v48 = vpop.f32.mrb[38].mxu0  ;;  %v2630_v36 = vmax.f32 %v2602_v21, 0.0  ;;  %v2518_v20 = vmax.f32 %v11652_v16, %v2040_v2  ;;  %v2042_v7 = vpop.f32.mrb[38].mxu1  ;;  %v10383_v16 = vld [vmem:[%s14449_s2 + $0xac] ss:$16 sps:$4 sm:$0xff]   ;;  %3882 = vmatpush1.bf16.msra.mxu0 %v10378_v5 }
 0x190   :  { %v2519_v0 = vmax.f32 %v11654_v58, %v1939_v48  ;;  %v1941_v8 = vpop.f32.mrb[39].mxu0  ;;  %v11971_v6 = vpack.c.bf16 %v2629_v1, %v2627_v4  ;;  %v2563_v9 = vmax.f32 %v2515_v57, %v2517_v43  ;;  %v2521_v13 = vmax.f32 %v11656_v42, %v2042_v7  ;;  %v2044_v61 = vpop.f32.mrb[39].mxu1  ;;  %v10389_v42 = vld [vmem:[%s14449_s2 + $0xcc] ss:$16 sps:$4 sm:$0xff]   ;;  %3984 = vmatprep.subr.bf16.mxu1 %v10383_v16  ;;  %v10392_v60 = vld [vmem:[%s14449_s2 + $0xe4] ss:$16 sps:$4 sm:$0xff]  }
 0x191   :  { %v2520_v11 = vmax.f32 %v11658_v44, %v1941_v8  ;;  %v11978_v58 = vpack.c.bf16 %v2630_v36, %v2628_v38  ;;  %v2564_v18 = vmax.f32 %v2516_v54, %v2518_v20  ;;  %v2522_v26 = vmax.f32 %v11663_v47, %v2044_v61  ;;  %3985 = vmatpush1.bf16.msra.mxu1 %v10381_v40  ;;  %v10387_v47 = vld [vmem:[%s14449_s2 + $0xc8] ss:$16 sps:$4 sm:$0xff]   ;;  %v10390_v48 = vld [vmem:[%s14449_s2 + $0xe0] ss:$16 sps:$4 sm:$0xff]   ;;  %v10398_v61 = vld [vmem:[%s14449_s2 + $0x104] ss:$16 sps:$4 sm:$0xff]  }
 0x192   :  { %14490 = vst [vmem:[#allocation25_spill] sm:$0xff] %v11971_v6  ;;  %v2603_v44 = vadd.f32 %v11884_v27, %v2563_v9  ;;  %v2565_v10 = vmax.f32 %v2519_v0, %v2521_v13  ;;  %3883 = vmatprep.subr.bf16.mxu0 %v10386_v53  ;;  %3986 = vmatprep.subr.bf16.mxu1 %v10389_v42 }
 0x193   :  { %14491 = vst [vmem:[#allocation26_spill] sm:$0xff] %v11978_v58  ;;  %v2604_v56 = vadd.f32 %v11895_v33, %v2564_v18  ;;  %v2566_v12 = vmax.f32 %v2520_v11, %v2522_v26  ;;  %3884 = vmatpush1.bf16.msra.mxu0 %v10384_v32  ;;  %v10396_v18 = vld [vmem:[%s14449_s2 + $0x100] ss:$16 sps:$4 sm:$0xff]  }
 0x194   :  { %v2605_v28 = vadd.f32 %v11884_v27, %v2565_v10  ;;  %v2631_v41 = vmax.f32 %v2603_v44, 0.0  ;;  %3885 = vmatprep.subr.bf16.mxu0 %v10392_v60  ;;  %v10402_v60 = vld [vmem:[%s14449_s2 + $0x120] ss:$16 sps:$4 sm:$0xff]  }
 0x195   :  { %v1945_v3 = vpop.f32.mrb[40].mxu0  ;;  %v2606_v29 = vadd.f32 %v11895_v33, %v2566_v12  ;;  %v2048_v57 = vpop.f32.mrb[40].mxu1  ;;  %v2632_v5 = vmax.f32 %v2604_v56, 0.0  ;;  %3987 = vmatpush1.bf16.msra.mxu1 %v10387_v47  ;;  %v10404_v47 = vld [vmem:[%s14449_s2 + $0x124] ss:$16 sps:$4 sm:$0xff]  }
 0x196   :  { %v2523_v21 = vmax.f32 %v11684_v55, %v1945_v3  ;;  %v1947_v52 = vpop.f32.mrb[41].mxu0  ;;  %v2633_v4 = vmax.f32 %v2605_v28, 0.0  ;;  %v2525_v1 = vmax.f32 %v11689_v59, %v2048_v57  ;;  %v2050_v54 = vpop.f32.mrb[41].mxu1  ;;  %v10393_v59 = vld [vmem:[%s14449_s2 + $0xe8] ss:$16 sps:$4 sm:$0xff]  }
 0x197   :  { %v2524_v43 = vmax.f32 %v11691_v37, %v1947_v52  ;;  %v1949_v2 = vpop.f32.mrb[42].mxu0  ;;  %v2634_v55 = vmax.f32 %v2606_v29, 0.0  ;;  %v2526_v38 = vmax.f32 %v11696_v35, %v2050_v54  ;;  %v2052_v20 = vpop.f32.mrb[42].mxu1  ;;  %v10395_v35 = vld [vmem:[%s14449_s2 + $0xec] ss:$16 sps:$4 sm:$0xff]   ;;  %3886 = vmatpush1.bf16.msra.mxu0 %v10390_v48 }
 0x198   :  { %v2527_v36 = vmax.f32 %v11698_v62, %v1949_v2  ;;  %v1951_v0 = vpop.f32.mrb[43].mxu0  ;;  %v12011_v37 = vpack.c.bf16 %v2633_v4, %v2631_v41  ;;  %v2567_v7 = vmax.f32 %v2523_v21, %v2525_v1  ;;  %v2529_v8 = vmax.f32 %v11703_v63, %v2052_v20  ;;  %v2054_v9 = vpop.f32.mrb[43].mxu1  ;;  %v10401_v63 = vld [vmem:[%s14449_s2 + $0x10c] ss:$16 sps:$4 sm:$0xff]   ;;  %3988 = vmatprep.subr.bf16.mxu1 %v10395_v35  ;;  %v10410_v20 = vld [vmem:[%s14449_s2 + $0x144] ss:$16 sps:$4 sm:$0xff]  }
 0x199   :  { %v2528_v40 = vmax.f32 %v11705_v34, %v1951_v0  ;;  %v12018_v62 = vpack.c.bf16 %v2634_v55, %v2632_v5  ;;  %v2568_v13 = vmax.f32 %v2524_v43, %v2526_v38  ;;  %v2530_v11 = vmax.f32 %v11710_v23, %v2054_v9  ;;  %3989 = vmatpush1.bf16.msra.mxu1 %v10393_v59  ;;  %v10399_v23 = vld [vmem:[%s14449_s2 + $0x108] ss:$16 sps:$4 sm:$0xff]   ;;  %v10408_v59 = vld [vmem:[%s14449_s2 + $0x140] ss:$16 sps:$4 sm:$0xff]  }
 0x19a   :  { %14492 = vst [vmem:[#allocation27_spill] sm:$0xff] %v12011_v37  ;;  %v2607_v34 = vadd.f32 %v11884_v27, %v2567_v7  ;;  %v2569_v16 = vmax.f32 %v2527_v36, %v2529_v8  ;;  %3887 = vmatprep.subr.bf16.mxu0 %v10398_v61  ;;  %3990 = vmatprep.subr.bf16.mxu1 %v10401_v63  ;;  %v10416_v63 = vld [vmem:[%s14449_s2 + $0x164] ss:$16 sps:$4 sm:$0xff]  }
 0x19b   :  { %14493 = vst [vmem:[#allocation28_spill] sm:$0xff] %v12018_v62  ;;  %v2608_v26 = vadd.f32 %v11895_v33, %v2568_v13  ;;  %v2570_v53 = vmax.f32 %v2528_v40, %v2530_v11  ;;  %3888 = vmatpush1.bf16.msra.mxu0 %v10396_v18 }
 0x19c   :  { %v2609_v42 = vadd.f32 %v11884_v27, %v2569_v16  ;;  %v2635_v28 = vmax.f32 %v2607_v34, 0.0  ;;  %3889 = vmatprep.subr.bf16.mxu0 %v10404_v47 }
 0x19d   :  { %v1955_v44 = vpop.f32.mrb[44].mxu0  ;;  %v2610_v10 = vadd.f32 %v11895_v33, %v2570_v53  ;;  %v2058_v56 = vpop.f32.mrb[44].mxu1  ;;  %v2636_v41 = vmax.f32 %v2608_v26, 0.0  ;;  %3991 = vmatpush1.bf16.msra.mxu1 %v10399_v23 }
 0x19e   :  { %v2531_v32 = vmax.f32 %v11726_v19, %v1955_v44  ;;  %v1957_v12 = vpop.f32.mrb[45].mxu0  ;;  %v2637_v3 = vmax.f32 %v2609_v42, 0.0  ;;  %v2533_v29 = vmax.f32 %v11731_v14, %v2058_v56  ;;  %v2060_v57 = vpop.f32.mrb[45].mxu1  ;;  %v10405_v14 = vld [vmem:[%s14449_s2 + $0x128] ss:$16 sps:$4 sm:$0xff]  }
 0x19f   :  { %v2532_v21 = vmax.f32 %v11733_v15, %v1957_v12  ;;  %v1959_v52 = vpop.f32.mrb[46].mxu0  ;;  %v2638_v19 = vmax.f32 %v2610_v10, 0.0  ;;  %v2534_v4 = vmax.f32 %v11738_v30, %v2060_v57  ;;  %v2062_v43 = vpop.f32.mrb[46].mxu1  ;;  %v10407_v30 = vld [vmem:[%s14449_s2 + $0x12c] ss:$16 sps:$4 sm:$0xff]   ;;  %3890 = vmatpush1.bf16.msra.mxu0 %v10402_v60 }
 0x1a0   :  { %v2535_v1 = vmax.f32 %v11740_v17, %v1959_v52  ;;  %v1961_v54 = vpop.f32.mrb[47].mxu0  ;;  %v12051_v15 = vpack.c.bf16 %v2637_v3, %v2635_v28  ;;  %v2571_v2 = vmax.f32 %v2531_v32, %v2533_v29  ;;  %v2537_v48 = vmax.f32 %v11745_v49, %v2062_v43  ;;  %v2064_v55 = vpop.f32.mrb[47].mxu1  ;;  %v10413_v49 = vld [vmem:[%s14449_s2 + $0x14c] ss:$16 sps:$4 sm:$0xff]   ;;  %3992 = vmatprep.subr.bf16.mxu1 %v10407_v30  ;;  %v10414_v42 = vld [vmem:[%s14449_s2 + $0x160] ss:$16 sps:$4 sm:$0xff]  }
 0x1a1   :  { %v2536_v5 = vmax.f32 %v11747_v24, %v1961_v54  ;;  %v12058_v17 = vpack.c.bf16 %v2638_v19, %v2636_v41  ;;  %v2572_v38 = vmax.f32 %v2532_v21, %v2534_v4  ;;  %v2538_v36 = vmax.f32 %v11752_v31, %v2064_v55  ;;  %3993 = vmatpush1.bf16.msra.mxu1 %v10405_v14  ;;  %v10411_v31 = vld [vmem:[%s14449_s2 + $0x148] ss:$16 sps:$4 sm:$0xff]   ;;  %v14496_v32 = vld [vmem:[#allocation10_spill] sm:$0xff]  ;;  %v14499_v21 = vld [vmem:[#allocation12_spill] sm:$0xff] }
 0x1a2   :  { %14494 = vst [vmem:[#allocation29_spill] sm:$0xff] %v12051_v15  ;;  %v2611_v24 = vadd.f32 %v11884_v27, %v2571_v2  ;;  %v2573_v0 = vmax.f32 %v2535_v1, %v2537_v48  ;;  %3891 = vmatprep.subr.bf16.mxu0 %v10410_v20  ;;  %3994 = vmatprep.subr.bf16.mxu1 %v10413_v49  ;;  %v14498_v3 = vld [vmem:[#allocation11_spill] sm:$0xff]  ;;  %v14501_v19 = vld [vmem:[#allocation13_spill] sm:$0xff]  ;;  %v10422_v1 = vld [vmem:[%s14449_s2 + $0x184] ss:$16 sps:$4 sm:$0xff]  }
 0x1a3   :  { %14495 = vst [vmem:[#allocation30_spill] sm:$0xff] %v12058_v17  ;;  %v2612_v7 = vadd.f32 %v11895_v33, %v2572_v38  ;;  %v2574_v8 = vmax.f32 %v2536_v5, %v2538_v36  ;;  %3892 = vmatpush1.bf16.msra.mxu0 %v10408_v59  ;;  %v10425_v43 = vld [vmem:[%s14449_s2 + $0x18c] ss:$16 sps:$4 sm:$0xff]   ;;  %v10420_v2 = vld [vmem:[%s14449_s2 + $0x180] ss:$16 sps:$4 sm:$0xff]  }
 0x1a4   :  { %v2613_v40 = vadd.f32 %v11884_v27, %v2573_v0  ;;  %v2639_v34 = vmax.f32 %v2611_v24, 0.0  ;;  %3893 = vmatprep.subr.bf16.mxu0 %v10416_v63  ;;  %v10423_v55 = vld [vmem:[%s14449_s2 + $0x188] ss:$16 sps:$4 sm:$0xff]   ;;  %v14502_v20 = vld [vmem:[#allocation14_spill] sm:$0xff] }
 0x1a5   :  { %v1965_v9 = vpop.f32.mrb[48].mxu0  ;;  %v2614_v35 = vadd.f32 %v11895_v33, %v2574_v8  ;;  %v2068_v11 = vpop.f32.mrb[48].mxu1  ;;  %v2640_v44 = vmax.f32 %v2612_v7, 0.0  ;;  %3995 = vmatpush1.bf16.msra.mxu1 %v10411_v31  ;;  %v10428_v59 = vld [vmem:[%s14449_s2 + $0x1a4] ss:$16 sps:$4 sm:$0xff]   ;;  %v14503_v31 = vld [vmem:[#allocation15_spill] sm:$0xff] }
 0x1a6   :  { %v2539_v13 = vmax.f32 %v11766_v39, %v1965_v9  ;;  %v1967_v61 = vpop.f32.mrb[49].mxu0  ;;  %v2641_v16 = vmax.f32 %v2613_v40, 0.0  ;;  %v2541_v18 = vmax.f32 %v11771_v46, %v2068_v11  ;;  %v2070_v53 = vpop.f32.mrb[49].mxu1  ;;  %v10417_v46 = vld [vmem:[%s14449_s2 + $0x168] ss:$16 sps:$4 sm:$0xff]   ;;  %v14504_v9 = vld [vmem:[#allocation16_spill] sm:$0xff] }
 0x1a7   :  { %v2540_v26 = vmax.f32 %v11773_v50, %v1967_v61  ;;  %v1969_v23 = vpop.f32.mrb[50].mxu0  ;;  %v2642_v39 = vmax.f32 %v2614_v35, 0.0  ;;  %v2542_v10 = vmax.f32 %v11778_v51, %v2070_v53  ;;  %v2072_v12 = vpop.f32.mrb[50].mxu1  ;;  %v10419_v51 = vld [vmem:[%s14449_s2 + $0x16c] ss:$16 sps:$4 sm:$0xff]   ;;  %3894 = vmatpush1.bf16.msra.mxu0 %v10414_v42 }
 0x1a8   :  { %v2543_v56 = vmax.f32 %v14496_v32, %v1969_v23  ;;  %v1971_v47 = vpop.f32.mrb[51].mxu0  ;;  %v12091_v50 = vpack.c.bf16 %v2641_v16, %v2639_v34  ;;  %v2575_v28 = vmax.f32 %v2539_v13, %v2541_v18  ;;  %v2545_v29 = vmax.f32 %v14498_v3, %v2072_v12  ;;  %v2074_v52 = vpop.f32.mrb[51].mxu1  ;;  %3996 = vmatprep.subr.bf16.mxu1 %v10419_v51  ;;  %v10426_v61 = vld [vmem:[%s14449_s2 + $0x1a0] ss:$16 sps:$4 sm:$0xff]   ;;  %v14505_v16 = vld [vmem:[#allocation17_spill] sm:$0xff]  ;;  %v14508_v32 = vld [vmem:[#allocation19_spill] sm:$0xff] }
 0x1a9   :  { %v2544_v57 = vmax.f32 %v14499_v21, %v1971_v47  ;;  %v12098_v60 = vpack.c.bf16 %v2642_v39, %v2640_v44  ;;  %v2576_v41 = vmax.f32 %v2540_v26, %v2542_v10  ;;  %v2546_v4 = vmax.f32 %v14501_v19, %v2074_v52  ;;  %3997 = vmatpush1.bf16.msra.mxu1 %v10417_v46  ;;  %v14506_v26 = vld [vmem:[#allocation18_spill] sm:$0xff]  ;;  %v10429_v44 = vld [vmem:[%s14449_s2 + $0x1a8] ss:$16 sps:$4 sm:$0xff]   ;;  %v14509_v12 = vld [vmem:[#allocation20_spill] sm:$0xff] }
 0x1aa   :  { %14497 = vst [vmem:[#allocation10_spill] sm:$0xff] %v12091_v50  ;;  %v2615_v54 = vadd.f32 %v11884_v27, %v2575_v28  ;;  %v2577_v14 = vmax.f32 %v2543_v56, %v2545_v29  ;;  %3895 = vmatprep.subr.bf16.mxu0 %v10422_v1  ;;  %3998 = vmatprep.subr.bf16.mxu1 %v10425_v43  ;;  %v10431_v28 = vld [vmem:[%s14449_s2 + $0x1ac] ss:$16 sps:$4 sm:$0xff]   ;;  %v10434_v52 = vld [vmem:[%s14449_s2 + $0x1c4] ss:$16 sps:$4 sm:$0xff]  }
 0x1ab   :  { %14500 = vst [vmem:[#allocation11_spill] sm:$0xff] %v12098_v60  ;;  %v2616_v48 = vadd.f32 %v11895_v33, %v2576_v41  ;;  %v2578_v5 = vmax.f32 %v2544_v57, %v2546_v4  ;;  %3896 = vmatpush1.bf16.msra.mxu0 %v10420_v2  ;;  %v14511_v21 = vld [vmem:[#allocation21_spill] sm:$0xff]  ;;  %v10432_v4 = vld [vmem:[%s14449_s2 + $0x1c0] ss:$16 sps:$4 sm:$0xff]  }
 0x1ac   :  { %v2617_v30 = vadd.f32 %v11884_v27, %v2577_v14  ;;  %v2643_v7 = vmax.f32 %v2615_v54, 0.0  ;;  %3897 = vmatprep.subr.bf16.mxu0 %v10428_v59  ;;  %v10437_v51 = vld [vmem:[%s14449_s2 + $0x1cc] ss:$16 sps:$4 sm:$0xff]   ;;  %v10435_v54 = vld [vmem:[%s14449_s2 + $0x1c8] ss:$16 sps:$4 sm:$0xff]  }
 0x1ad   :  { %v1975_v38 = vpop.f32.mrb[52].mxu0  ;;  %v2618_v36 = vadd.f32 %v11895_v33, %v2578_v5  ;;  %v2078_v24 = vpop.f32.mrb[52].mxu1  ;;  %v2644_v63 = vmax.f32 %v2616_v48, 0.0  ;;  %3999 = vmatpush1.bf16.msra.mxu1 %v10423_v55  ;;  %v10440_v48 = vld [vmem:[%s14449_s2 + $0x1e4] ss:$16 sps:$4 sm:$0xff]  }
 0x1ae   :  { %v2547_v49 = vmax.f32 %v14502_v20, %v1975_v38  ;;  %v1977_v0 = vpop.f32.mrb[53].mxu0  ;;  %v2645_v8 = vmax.f32 %v2617_v30, 0.0  ;;  %v2549_v40 = vmax.f32 %v14503_v31, %v2078_v24  ;;  %v2080_v13 = vpop.f32.mrb[53].mxu1  ;;  %4000 = vmatprep.subr.bf16.mxu1 %v10431_v28  ;;  %v10443_v5 = vld [vmem:[%s14449_s2 + $0x1ec] ss:$16 sps:$4 sm:$0xff]  }
 0x1af   :  { %v2548_v35 = vmax.f32 %v14504_v9, %v1977_v0  ;;  %v1979_v11 = vpop.f32.mrb[54].mxu0  ;;  %v2646_v34 = vmax.f32 %v2618_v36, 0.0  ;;  %v2550_v18 = vmax.f32 %v14505_v16, %v2080_v13  ;;  %v2082_v23 = vpop.f32.mrb[54].mxu1  ;;  %3898 = vmatpush1.bf16.msra.mxu0 %v10426_v61  ;;  %v10438_v38 = vld [vmem:[%s14449_s2 + $0x1e0] ss:$16 sps:$4 sm:$0xff]  }
 0x1b0   :  { %v2551_v53 = vmax.f32 %v14506_v26, %v1979_v11  ;;  %v1981_v42 = vpop.f32.mrb[55].mxu0  ;;  %v12131_v39 = vpack.c.bf16 %v2645_v8, %v2643_v7  ;;  %v2579_v10 = vmax.f32 %v2547_v49, %v2549_v40  ;;  %v2553_v56 = vmax.f32 %v14508_v32, %v2082_v23  ;;  %v2084_v46 = vpop.f32.mrb[55].mxu1  ;;  %3899 = vmatprep.subr.bf16.mxu0 %v10434_v52  ;;  %v10446_v24 = vld [vmem:[%s14449_s2 + $0x404] ss:$16 sps:$4 sm:$0xff]   ;;  %v10449_v0 = vld [vmem:[%s14449_s2 + $0x40c] ss:$16 sps:$4 sm:$0xff]  }
 0x1b1   :  { %v2552_v47 = vmax.f32 %v14509_v12, %v1981_v42  ;;  %v12138_v3 = vpack.c.bf16 %v2646_v34, %v2644_v63  ;;  %v2580_v29 = vmax.f32 %v2548_v35, %v2550_v18  ;;  %v2554_v57 = vmax.f32 %v14511_v21, %v2084_v46  ;;  %4001 = vmatpush1.bf16.msra.mxu1 %v10429_v44  ;;  %v2767_v17 = vld [vmem:[%s14451_s4] sm:$0x3] }
 0x1b2   :  { %14507 = vst [vmem:[#allocation12_spill] sm:$0xff] %v12131_v39  ;;  %v2619_v41 = vadd.f32 %v11884_v27, %v2579_v10  ;;  %v2581_v19 = vmax.f32 %v2551_v53, %v2553_v56  ;;  %4002 = vmatprep.subr.bf16.mxu1 %v10437_v51 }
 0x1b3   :  { %14510 = vst [vmem:[#allocation13_spill] sm:$0xff] %v12138_v3  ;;  %v2620_v1 = vadd.f32 %v11895_v33, %v2580_v29  ;;  %v2582_v43 = vmax.f32 %v2552_v47, %v2554_v57  ;;  %3900 = vmatpush1.bf16.msra.mxu0 %v10432_v4 }
 0x1b4   :  { %v2621_v14 = vadd.f32 %v11884_v27, %v2581_v19  ;;  %v2647_v55 = vmax.f32 %v2619_v41, 0.0  ;;  %3901 = vmatprep.subr.bf16.mxu0 %v10440_v48 }
 0x1b5   :  { %v2622_v2 = vadd.f32 %v11895_v33, %v2582_v43  ;;  %v2648_v36 = vmax.f32 %v2620_v1, 0.0  ;;  %4003 = vmatpush1.bf16.msra.mxu1 %v10435_v54  ;;  %v10441_v33 = vld [vmem:[%s14449_s2 + $0x1e8] ss:$16 sps:$4 sm:$0xff]  }
 0x1b6   :  { %v2649_v30 = vmax.f32 %v2621_v14, 0.0  ;;  %4004 = vmatprep.subr.bf16.mxu1 %v10443_v5 }
 0x1b7   :  { %v2650_v27 = vmax.f32 %v2622_v2, 0.0  ;;  %3902 = vmatpush1.bf16.msra.mxu0 %v10438_v38 }
 0x1b8   :  { %v12169_v20 = vpack.c.bf16 %v2649_v30, %v2647_v55  ;;  %4476 = vmatprep.subr.bf16.mxu0 %v10446_v24 }
 0x1b9   :  { %v12171_v49 = vpack.c.bf16 %v2650_v27, %v2648_v36  ;;  %4005 = vmatpush1.bf16.msra.mxu1 %v10441_v33 }
 0x1ba   :  { %14512 = vst [vmem:[#allocation14_spill] sm:$0xff] %v12169_v20  ;;  %4579 = vmatprep.subr.bf16.mxu1 %v10449_v0 }
 0x1bb   :  { %14513 = vst [vmem:[#allocation15_spill] sm:$0xff] %v12171_v49 }
 0x1bd   :  { %v12179_v59 = vpop.f32.mrb[56].mxu0  ;;  %v12181_v7 = vpop.f32.mrb[56].mxu1 }
 0x1be   :  { %v12183_v8 = vpop.f32.mrb[57].mxu0  ;;  %v12185_v31 = vpop.f32.mrb[57].mxu1 }
 0x1bf   :  { %v12187_v40 = vpop.f32.mrb[58].mxu0  ;;  %v12189_v9 = vpop.f32.mrb[58].mxu1 }
 0x1c0   :  { %v12191_v35 = vpop.f32.mrb[59].mxu0  ;;  %v12193_v13 = vpop.f32.mrb[59].mxu1 }
 0x1c5   :  { %v12195_v11 = vpop.f32.mrb[60].mxu0  ;;  %v12197_v61 = vpop.f32.mrb[60].mxu1 }
 0x1c6   :  { %v12199_v63 = vpop.f32.mrb[61].mxu0  ;;  %v12201_v34 = vpop.f32.mrb[61].mxu1 }
 0x1c7   :  { %v12203_v16 = vpop.f32.mrb[62].mxu0  ;;  %v12205_v18 = vpop.f32.mrb[62].mxu1 }
 0x1c8   :  { %v12207_v26 = vpop.f32.mrb[63].mxu0  ;;  %v12209_v53 = vpop.f32.mrb[63].mxu1 }
 0x1cd   :  { %v12211_v23 = vpop.f32.mrb[64].mxu0  ;;  %v12213_v42 = vpop.f32.mrb[64].mxu1 }
 0x1ce   :  { %v12215_v44 = vpop.f32.mrb[65].mxu0  ;;  %v12217_v10 = vpop.f32.mrb[65].mxu1 }
 0x1cf   :  { %v12219_v32 = vpop.f32.mrb[66].mxu0  ;;  %v12221_v56 = vpop.f32.mrb[66].mxu1 }
 0x1d0   :  { %v12223_v12 = vpop.f32.mrb[67].mxu0  ;;  %v12225_v47 = vpop.f32.mrb[67].mxu1 }
 0x1d5   :  { %v12227_v46 = vpop.f32.mrb[68].mxu0  ;;  %v12229_v28 = vpop.f32.mrb[68].mxu1 }
 0x1d6   :  { %v12231_v29 = vpop.f32.mrb[69].mxu0  ;;  %v12233_v21 = vpop.f32.mrb[69].mxu1 }
 0x1d7   :  { %v12235_v57 = vpop.f32.mrb[70].mxu0  ;;  %v12237_v52 = vpop.f32.mrb[70].mxu1 }
 0x1d8   :  { %v12239_v51 = vpop.f32.mrb[71].mxu0  ;;  %v12241_v41 = vpop.f32.mrb[71].mxu1 }
 0x1dd   :  { %v12243_v19 = vpop.f32.mrb[72].mxu0  ;;  %v12245_v4 = vpop.f32.mrb[72].mxu1 }
 0x1de   :  { %v12247_v1 = vpop.f32.mrb[73].mxu0  ;;  %v12249_v43 = vpop.f32.mrb[73].mxu1 }
 0x1df   :  { %v12251_v54 = vpop.f32.mrb[74].mxu0  ;;  %v12253_v14 = vpop.f32.mrb[74].mxu1 }
 0x1e0   :  { %v12255_v2 = vpop.f32.mrb[75].mxu0  ;;  %v12257_v48 = vpop.f32.mrb[75].mxu1 }
 0x1e5   :  { %v12259_v5 = vpop.f32.mrb[76].mxu0  ;;  %v12261_v55 = vpop.f32.mrb[76].mxu1 }
 0x1e6   :  { %v12263_v30 = vpop.f32.mrb[77].mxu0  ;;  %v12265_v38 = vpop.f32.mrb[77].mxu1 }
 0x1e7   :  { %v12267_v36 = vpop.f32.mrb[78].mxu0  ;;  %v12269_v27 = vpop.f32.mrb[78].mxu1 }
 0x1e8   :  { %v12271_v33 = vpop.f32.mrb[79].mxu0  ;;  %v12273_v24 = vpop.f32.mrb[79].mxu1 }
 0x1e9   :  { %14514 = vst [vmem:[#allocation16_spill] sm:$0xff] %v12271_v33  ;;  %14515 = vst [vmem:[#allocation17_spill] sm:$0xff] %v12273_v24 }
 0x1ed   :  { %v12275_v0 = vpop.f32.mrb[80].mxu0  ;;  %v12277_v20 = vpop.f32.mrb[80].mxu1 }
 0x1ee   :  { %14516 = vst [vmem:[#allocation18_spill] sm:$0xff] %v12275_v0  ;;  %14517 = vst [vmem:[#allocation19_spill] sm:$0xff] %v12277_v20  ;;  %v12279_v49 = vpop.f32.mrb[81].mxu0  ;;  %v12281_v39 = vpop.f32.mrb[81].mxu1 }
 0x1ef   :  { %14518 = vst [vmem:[#allocation20_spill] sm:$0xff] %v12279_v49  ;;  %14519 = vst [vmem:[#allocation21_spill] sm:$0xff] %v12281_v39  ;;  %v12283_v3 = vpop.f32.mrb[82].mxu0  ;;  %v12285_v50 = vpop.f32.mrb[82].mxu1  ;;  %v12297_v39 = vrot.slane %v2767_v17, %v14524_v25  ;;  %v12302_v49 = vrot.slane %v2767_v17, %v11871_v45 }
 0x1f0   :  { %14520 = vst [vmem:[#allocation31_spill] sm:$0xff] %v12283_v3  ;;  %14521 = vst [vmem:[#allocation32_spill] sm:$0xff] %v12285_v50  ;;  %v12287_v60 = vpop.f32.mrb[83].mxu0  ;;  %v12289_v15 = vpop.f32.mrb[83].mxu1 }
 0x1f1   :  { %14522 = vst [vmem:[#allocation33_spill] sm:$0xff] %v12287_v60  ;;  %14523 = vst [vmem:[#allocation34_spill] sm:$0xff] %v12289_v15 }
 0x1fd   :  { %v2327_v37 = vpop.f32.mrb[84].mxu0  ;;  %v2430_v6 = vpop.f32.mrb[84].mxu1 }
 0x1fe   :  { %v2683_v62 = vmax.f32 %v12179_v59, %v2327_v37  ;;  %v2329_v58 = vpop.f32.mrb[85].mxu0  ;;  %v2685_v22 = vmax.f32 %v12181_v7, %v2430_v6  ;;  %v2432_v3 = vpop.f32.mrb[85].mxu1 }
 0x1ff   :  { %v2684_v50 = vmax.f32 %v12183_v8, %v2329_v58  ;;  %v2331_v60 = vpop.f32.mrb[86].mxu0  ;;  %v2686_v15 = vmax.f32 %v12185_v31, %v2432_v3  ;;  %v2434_v0 = vpop.f32.mrb[86].mxu1 }
 0x200   :  { %v2687_v20 = vmax.f32 %v12187_v40, %v2331_v60  ;;  %v2333_v37 = vpop.f32.mrb[87].mxu0  ;;  %v2739_v59 = vmax.f32 %v2683_v62, %v2685_v22  ;;  %v2689_v24 = vmax.f32 %v12189_v9, %v2434_v0  ;;  %v2436_v7 = vpop.f32.mrb[87].mxu1 }
 0x201   :  { %v2688_v6 = vmax.f32 %v12191_v35, %v2333_v37  ;;  %v2740_v25 = vmax.f32 %v2684_v50, %v2686_v15  ;;  %v2690_v58 = vmax.f32 %v12193_v13, %v2436_v7 }
 0x202   :  { %v2779_v8 = vadd.f32 %v12297_v39, %v2739_v59  ;;  %v2741_v33 = vmax.f32 %v2687_v20, %v2689_v24 }
 0x203   :  { %v2780_v3 = vadd.f32 %v12302_v49, %v2740_v25  ;;  %v2742_v17 = vmax.f32 %v2688_v6, %v2690_v58 }
 0x204   :  { %v2781_v31 = vadd.f32 %v12297_v39, %v2741_v33  ;;  %v2807_v35 = vmax.f32 %v2779_v8, 0.0 }
 0x205   :  { %v2337_v60 = vpop.f32.mrb[88].mxu0  ;;  %v2782_v40 = vadd.f32 %v12302_v49, %v2742_v17  ;;  %v2440_v62 = vpop.f32.mrb[88].mxu1  ;;  %v2808_v24 = vmax.f32 %v2780_v3, 0.0 }
 0x206   :  { %v2691_v22 = vmax.f32 %v12195_v11, %v2337_v60  ;;  %v2339_v9 = vpop.f32.mrb[89].mxu0  ;;  %v2809_v0 = vmax.f32 %v2781_v31, 0.0  ;;  %v2693_v15 = vmax.f32 %v12197_v61, %v2440_v62  ;;  %v2442_v13 = vpop.f32.mrb[89].mxu1 }
 0x207   :  { %v2692_v50 = vmax.f32 %v12199_v63, %v2339_v9  ;;  %v2341_v20 = vpop.f32.mrb[90].mxu0  ;;  %v2810_v25 = vmax.f32 %v2782_v40, 0.0  ;;  %v2694_v37 = vmax.f32 %v12201_v34, %v2442_v13  ;;  %v2444_v59 = vpop.f32.mrb[90].mxu1 }
 0x208   :  { %v2695_v33 = vmax.f32 %v12203_v16, %v2341_v20  ;;  %v2343_v6 = vpop.f32.mrb[91].mxu0  ;;  %v12317_v7 = vpack.c.bf16 %v2809_v0, %v2807_v35  ;;  %v2743_v11 = vmax.f32 %v2691_v22, %v2693_v15  ;;  %v2697_v58 = vmax.f32 %v12205_v18, %v2444_v59  ;;  %v2446_v61 = vpop.f32.mrb[91].mxu1 }
 0x209   :  { %v2696_v8 = vmax.f32 %v12207_v26, %v2343_v6  ;;  %v12321_v17 = vpack.c.bf16 %v2810_v25, %v2808_v24  ;;  %v2744_v63 = vmax.f32 %v2692_v50, %v2694_v37  ;;  %v2698_v3 = vmax.f32 %v12209_v53, %v2446_v61 }
 0x20a   :  { %v2783_v31 = vadd.f32 %v12297_v39, %v2743_v11  ;;  %v2745_v34 = vmax.f32 %v2695_v33, %v2697_v58 }
 0x20b   :  { %v2784_v16 = vadd.f32 %v12302_v49, %v2744_v63  ;;  %v2746_v60 = vmax.f32 %v2696_v8, %v2698_v3  ;;  %3387 = vmatprep.mubr.bf16.mxu0 %v12321_v17  ;;  %3490 = vmatprep.mubr.bf16.mxu1 %v12321_v17 }
 0x20c   :  { %v2785_v18 = vadd.f32 %v12297_v39, %v2745_v34  ;;  %3388 = vmatmul.mubr.bf16.gmra.mrb[116].mxu0 %v12317_v7  ;;  %3491 = vmatmul.mubr.bf16.gmra.mrb[116].mxu1 %v12317_v7  ;;  %v2811_v9 = vmax.f32 %v2783_v31, 0.0 }
 0x20d   :  { %v2347_v26 = vpop.f32.mrb[92].mxu0  ;;  %v2786_v40 = vadd.f32 %v12302_v49, %v2746_v60  ;;  %v2450_v22 = vpop.f32.mrb[92].mxu1  ;;  %v2812_v20 = vmax.f32 %v2784_v16, 0.0 }
 0x20e   :  { %v2699_v53 = vmax.f32 %v12211_v23, %v2347_v26  ;;  %v2349_v62 = vpop.f32.mrb[93].mxu0  ;;  %v2813_v35 = vmax.f32 %v2785_v18, 0.0  ;;  %v2701_v0 = vmax.f32 %v12213_v42, %v2450_v22  ;;  %v2452_v50 = vpop.f32.mrb[93].mxu1 }
 0x20f   :  { %v2700_v15 = vmax.f32 %v12215_v44, %v2349_v62  ;;  %v2351_v13 = vpop.f32.mrb[94].mxu0  ;;  %v2814_v24 = vmax.f32 %v2786_v40, 0.0  ;;  %v2702_v25 = vmax.f32 %v12217_v10, %v2452_v50  ;;  %v2454_v33 = vpop.f32.mrb[94].mxu1 }
 0x210   :  { %v2703_v37 = vmax.f32 %v12219_v32, %v2351_v13  ;;  %v2353_v59 = vpop.f32.mrb[95].mxu0  ;;  %v12337_v6 = vpack.c.bf16 %v2813_v35, %v2811_v9  ;;  %v2747_v23 = vmax.f32 %v2699_v53, %v2701_v0  ;;  %v2705_v11 = vmax.f32 %v12221_v56, %v2454_v33  ;;  %v2456_v42 = vpop.f32.mrb[95].mxu1 }
 0x211   :  { %v2704_v58 = vmax.f32 %v12223_v12, %v2353_v59  ;;  %v12341_v8 = vpack.c.bf16 %v2814_v24, %v2812_v20  ;;  %v2748_v44 = vmax.f32 %v2700_v15, %v2702_v25  ;;  %v2706_v61 = vmax.f32 %v12225_v47, %v2456_v42 }
 0x212   :  { %v2787_v63 = vadd.f32 %v12297_v39, %v2747_v23  ;;  %v2749_v10 = vmax.f32 %v2703_v37, %v2705_v11 }
 0x213   :  { %v2788_v32 = vadd.f32 %v12302_v49, %v2748_v44  ;;  %v2750_v3 = vmax.f32 %v2704_v58, %v2706_v61  ;;  %3397 = vmatprep.mubr.bf16.mxu0 %v12341_v8  ;;  %3500 = vmatprep.mubr.bf16.mxu1 %v12341_v8 }
 0x214   :  { %v2789_v56 = vadd.f32 %v12297_v39, %v2749_v10  ;;  %3398 = vmatmul.mubr.bf16.gmra.mrb[120].mxu0 %v12337_v6  ;;  %3501 = vmatmul.mubr.bf16.gmra.mrb[120].mxu1 %v12337_v6  ;;  %v2815_v60 = vmax.f32 %v2787_v63, 0.0 }
 0x215   :  { %v2357_v12 = vpop.f32.mrb[96].mxu0  ;;  %v2790_v31 = vadd.f32 %v12302_v49, %v2750_v3  ;;  %v2460_v34 = vpop.f32.mrb[96].mxu1  ;;  %v2816_v62 = vmax.f32 %v2788_v32, 0.0 }
 0x216   :  { %v2707_v47 = vmax.f32 %v12227_v46, %v2357_v12  ;;  %v2359_v16 = vpop.f32.mrb[97].mxu0  ;;  %v2817_v18 = vmax.f32 %v2789_v56, 0.0  ;;  %v2709_v26 = vmax.f32 %v12229_v28, %v2460_v34  ;;  %v2462_v53 = vpop.f32.mrb[97].mxu1 }
 0x217   :  { %v2708_v40 = vmax.f32 %v12231_v29, %v2359_v16  ;;  %v2361_v22 = vpop.f32.mrb[98].mxu0  ;;  %v2818_v9 = vmax.f32 %v2790_v31, 0.0  ;;  %v2710_v35 = vmax.f32 %v12233_v21, %v2462_v53  ;;  %v2464_v15 = vpop.f32.mrb[98].mxu1 }
 0x218   :  { %v2711_v0 = vmax.f32 %v12235_v57, %v2361_v22  ;;  %v2363_v50 = vpop.f32.mrb[99].mxu0  ;;  %v12357_v13 = vpack.c.bf16 %v2817_v18, %v2815_v60  ;;  %v2751_v46 = vmax.f32 %v2707_v47, %v2709_v26  ;;  %v2713_v20 = vmax.f32 %v12237_v52, %v2464_v15  ;;  %v2466_v28 = vpop.f32.mrb[99].mxu1 }
 0x219   :  { %v2712_v24 = vmax.f32 %v12239_v51, %v2363_v50  ;;  %v12361_v25 = vpack.c.bf16 %v2818_v9, %v2816_v62  ;;  %v2752_v29 = vmax.f32 %v2708_v40, %v2710_v35  ;;  %v2714_v37 = vmax.f32 %v12241_v41, %v2466_v28 }
 0x21a   :  { %v2791_v33 = vadd.f32 %v12297_v39, %v2751_v46  ;;  %v2753_v21 = vmax.f32 %v2711_v0, %v2713_v20 }
 0x21b   :  { %v2792_v57 = vadd.f32 %v12302_v49, %v2752_v29  ;;  %v2754_v59 = vmax.f32 %v2712_v24, %v2714_v37  ;;  %3407 = vmatprep.mubr.bf16.mxu0 %v12361_v25  ;;  %3510 = vmatprep.mubr.bf16.mxu1 %v12361_v25 }
 0x21c   :  { %v2793_v52 = vadd.f32 %v12297_v39, %v2753_v21  ;;  %3408 = vmatmul.mubr.bf16.gmra.mrb[124].mxu0 %v12357_v13  ;;  %3511 = vmatmul.mubr.bf16.gmra.mrb[124].mxu1 %v12357_v13  ;;  %v2819_v42 = vmax.f32 %v2791_v33, 0.0 }
 0x21d   :  { %v2367_v51 = vpop.f32.mrb[100].mxu0  ;;  %v2794_v23 = vadd.f32 %v12302_v49, %v2754_v59  ;;  %v2470_v11 = vpop.f32.mrb[100].mxu1  ;;  %v2820_v3 = vmax.f32 %v2792_v57, 0.0 }
 0x21e   :  { %v2715_v41 = vmax.f32 %v12243_v19, %v2367_v51  ;;  %v2369_v58 = vpop.f32.mrb[101].mxu0  ;;  %v2821_v44 = vmax.f32 %v2793_v52, 0.0  ;;  %v2717_v61 = vmax.f32 %v12245_v4, %v2470_v11  ;;  %v2472_v10 = vpop.f32.mrb[101].mxu1  ;;  %v14525_v51 = vld [vmem:[#allocation16_spill] sm:$0xff]  ;;  %v14526_v11 = vld [vmem:[#allocation17_spill] sm:$0xff] }
 0x21f   :  { %v2716_v63 = vmax.f32 %v12247_v1, %v2369_v58  ;;  %v2371_v32 = vpop.f32.mrb[102].mxu0  ;;  %v2822_v56 = vmax.f32 %v2794_v23, 0.0  ;;  %v2718_v12 = vmax.f32 %v12249_v43, %v2472_v10  ;;  %v2474_v47 = vpop.f32.mrb[102].mxu1  ;;  %v14527_v10 = vld [vmem:[#allocation18_spill] sm:$0xff] }
 0x220   :  { %v2719_v31 = vmax.f32 %v12251_v54, %v2371_v32  ;;  %v2373_v34 = vpop.f32.mrb[103].mxu0  ;;  %v12377_v16 = vpack.c.bf16 %v2821_v44, %v2819_v42  ;;  %v2755_v19 = vmax.f32 %v2715_v41, %v2717_v61  ;;  %v2721_v60 = vmax.f32 %v12253_v14, %v2474_v47  ;;  %v2476_v4 = vpop.f32.mrb[103].mxu1  ;;  %v14528_v47 = vld [vmem:[#allocation19_spill] sm:$0xff] }
 0x221   :  { %v2720_v18 = vmax.f32 %v12255_v2, %v2373_v34  ;;  %v12381_v26 = vpack.c.bf16 %v2822_v56, %v2820_v3  ;;  %v2756_v1 = vmax.f32 %v2716_v63, %v2718_v12  ;;  %v2722_v40 = vmax.f32 %v12257_v48, %v2476_v4 }
 0x222   :  { %v2795_v53 = vadd.f32 %v12297_v39, %v2755_v19  ;;  %v2757_v43 = vmax.f32 %v2719_v31, %v2721_v60  ;;  %v14529_v19 = vld [vmem:[#allocation20_spill] sm:$0xff] }
 0x223   :  { %v2796_v54 = vadd.f32 %v12302_v49, %v2756_v1  ;;  %v2758_v22 = vmax.f32 %v2720_v18, %v2722_v40  ;;  %3417 = vmatprep.mubr.bf16.mxu0 %v12381_v26  ;;  %3520 = vmatprep.mubr.bf16.mxu1 %v12381_v26 }
 0x224   :  { %v2797_v14 = vadd.f32 %v12297_v39, %v2757_v43  ;;  %3418 = vmatmul.mubr.bf16.gmra.mrb[128].mxu0 %v12377_v16  ;;  %3521 = vmatmul.mubr.bf16.gmra.mrb[128].mxu1 %v12377_v16  ;;  %v2823_v0 = vmax.f32 %v2795_v53, 0.0  ;;  %v14530_v53 = vld [vmem:[#allocation21_spill] sm:$0xff] }
 0x225   :  { %v2377_v2 = vpop.f32.mrb[104].mxu0  ;;  %v2798_v62 = vadd.f32 %v12302_v49, %v2758_v22  ;;  %v2480_v9 = vpop.f32.mrb[104].mxu1  ;;  %v2824_v28 = vmax.f32 %v2796_v54, 0.0  ;;  %v14531_v54 = vld [vmem:[#allocation31_spill] sm:$0xff] }
 0x226   :  { %v2723_v48 = vmax.f32 %v12259_v5, %v2377_v2  ;;  %v2379_v35 = vpop.f32.mrb[105].mxu0  ;;  %v2825_v15 = vmax.f32 %v2797_v14, 0.0  ;;  %v2725_v50 = vmax.f32 %v12261_v55, %v2480_v9  ;;  %v2482_v20 = vpop.f32.mrb[105].mxu1  ;;  %v14532_v9 = vld [vmem:[#allocation32_spill] sm:$0xff] }
 0x227   :  { %v2724_v46 = vmax.f32 %v12263_v30, %v2379_v35  ;;  %v2381_v24 = vpop.f32.mrb[106].mxu0  ;;  %v2826_v29 = vmax.f32 %v2798_v62, 0.0  ;;  %v2726_v37 = vmax.f32 %v12265_v38, %v2482_v20  ;;  %v2484_v21 = vpop.f32.mrb[106].mxu1 }
 0x228   :  { %v2727_v33 = vmax.f32 %v12267_v36, %v2381_v24  ;;  %v2383_v57 = vpop.f32.mrb[107].mxu0  ;;  %v12397_v59 = vpack.c.bf16 %v2825_v15, %v2823_v0  ;;  %v2759_v5 = vmax.f32 %v2723_v48, %v2725_v50  ;;  %v2729_v52 = vmax.f32 %v12269_v27, %v2484_v21  ;;  %v2486_v55 = vpop.f32.mrb[107].mxu1  ;;  %v14533_v0 = vld [vmem:[#allocation33_spill] sm:$0xff]  ;;  %v14534_v24 = vld [vmem:[#allocation34_spill] sm:$0xff] }
 0x229   :  { %v2728_v23 = vmax.f32 %v14525_v51, %v2383_v57  ;;  %v12401_v41 = vpack.c.bf16 %v2826_v29, %v2824_v28  ;;  %v2760_v30 = vmax.f32 %v2724_v46, %v2726_v37  ;;  %v2730_v58 = vmax.f32 %v14526_v11, %v2486_v55 }
 0x22a   :  { %v2799_v42 = vadd.f32 %v12297_v39, %v2759_v5  ;;  %v2761_v38 = vmax.f32 %v2727_v33, %v2729_v52  ;;  %v14535_v52 = vmov 0  }
 0x22b   :  { %v2800_v36 = vadd.f32 %v12302_v49, %v2760_v30  ;;  %v2762_v44 = vmax.f32 %v2728_v23, %v2730_v58  ;;  %3427 = vmatprep.mubr.bf16.mxu0 %v12401_v41  ;;  %3530 = vmatprep.mubr.bf16.mxu1 %v12401_v41 }
 0x22c   :  { %v2801_v27 = vadd.f32 %v12297_v39, %v2761_v38  ;;  %3428 = vmatmul.mubr.bf16.gmra.mrb[132].mxu0 %v12397_v59  ;;  %3531 = vmatmul.mubr.bf16.gmra.mrb[132].mxu1 %v12397_v59  ;;  %v2827_v12 = vmax.f32 %v2799_v42, 0.0  ;;  %v10452_v42 = vld [vmem:[%s14449_s2 + $0x424] ss:$16 sps:$4 sm:$0xff]   ;;  %v10455_v38 = vld [vmem:[%s14449_s2 + $0x42c] ss:$16 sps:$4 sm:$0xff]  }
 0x22d   :  { %v2387_v61 = vpop.f32.mrb[108].mxu0  ;;  %v2802_v63 = vadd.f32 %v12302_v49, %v2762_v44  ;;  %v2490_v3 = vpop.f32.mrb[108].mxu1  ;;  %v2828_v1 = vmax.f32 %v2800_v36, 0.0  ;;  %v10450_v36 = vld [vmem:[%s14449_s2 + $0x420] ss:$16 sps:$4 sm:$0xff]  }
 0x22e   :  { %v2731_v32 = vmax.f32 %v14527_v10, %v2387_v61  ;;  %v2389_v56 = vpop.f32.mrb[109].mxu0  ;;  %v2829_v31 = vmax.f32 %v2801_v27, 0.0  ;;  %v2733_v34 = vmax.f32 %v14528_v47, %v2490_v3  ;;  %v2492_v18 = vpop.f32.mrb[109].mxu1  ;;  %v10453_v44 = vld [vmem:[%s14449_s2 + $0x428] ss:$16 sps:$4 sm:$0xff]   ;;  %v14536_v27 = vld [vmem:[#allocation24_spill] sm:$0xff] }
 0x22f   :  { %v2732_v60 = vmax.f32 %v14529_v19, %v2389_v56  ;;  %v2391_v4 = vpop.f32.mrb[110].mxu0  ;;  %v2830_v40 = vmax.f32 %v2802_v63, 0.0  ;;  %v2734_v43 = vmax.f32 %v14530_v53, %v2492_v18  ;;  %v2494_v14 = vpop.f32.mrb[110].mxu1  ;;  %v10458_v61 = vld [vmem:[%s14449_s2 + $0x444] ss:$16 sps:$4 sm:$0xff]   ;;  %v14539_v53 = vld [vmem:[#allocation25_spill] sm:$0xff] }
 0x230   :  { %v2735_v22 = vmax.f32 %v14531_v54, %v2391_v4  ;;  %v2393_v2 = vpop.f32.mrb[111].mxu0  ;;  %v12417_v62 = vpack.c.bf16 %v2829_v31, %v2827_v12  ;;  %v2763_v48 = vmax.f32 %v2731_v32, %v2733_v34  ;;  %v2737_v35 = vmax.f32 %v14532_v9, %v2494_v14  ;;  %v2496_v50 = vpop.f32.mrb[111].mxu1  ;;  %v10461_v63 = vld [vmem:[%s14449_s2 + $0x44c] ss:$16 sps:$4 sm:$0xff]   ;;  %v10456_v10 = vld [vmem:[%s14449_s2 + $0x440] ss:$16 sps:$4 sm:$0xff]  }
 0x231   :  { %v2736_v15 = vmax.f32 %v14533_v0, %v2393_v2  ;;  %v12421_v46 = vpack.c.bf16 %v2830_v40, %v2828_v1  ;;  %v2764_v20 = vmax.f32 %v2732_v60, %v2734_v43  ;;  %v2738_v28 = vmax.f32 %v14534_v24, %v2496_v50  ;;  %v10459_v32 = vld [vmem:[%s14449_s2 + $0x448] ss:$16 sps:$4 sm:$0xff]   ;;  %v10464_v3 = vld [vmem:[%s14449_s2 + $0x464] ss:$16 sps:$4 sm:$0xff]   ;;  %v10467_v56 = vld [vmem:[%s14449_s2 + $0x46c] ss:$16 sps:$4 sm:$0xff]  }
 0x232   :  { %v2803_v29 = vadd.f32 %v12297_v39, %v2763_v48  ;;  %v2765_v37 = vmax.f32 %v2735_v22, %v2737_v35  ;;  %v14537_v12 = vld [vmem:[#allocation23_spill] sm:$0xff]  ;;  %v10462_v31 = vld [vmem:[%s14449_s2 + $0x460] ss:$16 sps:$4 sm:$0xff]   ;;  %v10470_v19 = vld [vmem:[%s14449_s2 + $0x484] ss:$16 sps:$4 sm:$0xff]  }
 0x233   :  { %v2804_v33 = vadd.f32 %v12302_v49, %v2764_v20  ;;  %v2766_v21 = vmax.f32 %v2736_v15, %v2738_v28  ;;  %3437 = vmatprep.mubr.bf16.mxu0 %v12421_v46  ;;  %3540 = vmatprep.mubr.bf16.mxu1 %v12421_v46  ;;  %v10465_v47 = vld [vmem:[%s14449_s2 + $0x468] ss:$16 sps:$4 sm:$0xff]   ;;  %v14538_v34 = vld [vmem:[#allocation26_spill] sm:$0xff]  ;;  %v10473_v60 = vld [vmem:[%s14449_s2 + $0x48c] ss:$16 sps:$4 sm:$0xff]  }
 0x234   :  { %v2805_v57 = vadd.f32 %v12297_v39, %v2765_v37  ;;  %3438 = vmatmul.mubr.bf16.gmra.mrb[136].mxu0 %v12417_v62  ;;  %3541 = vmatmul.mubr.bf16.gmra.mrb[136].mxu1 %v12417_v62  ;;  %v2831_v51 = vmax.f32 %v2803_v29, 0.0  ;;  %v10444_v39 = vld [vmem:[%s14449_s2 + $0x400] ss:$16 sps:$4 sm:$0xff]   ;;  %v10471_v4 = vld [vmem:[%s14449_s2 + $0x488] ss:$16 sps:$4 sm:$0xff]  }
 0x235   :  { %v2806_v5 = vadd.f32 %v12302_v49, %v2766_v21  ;;  %3903 = vmatprep.mubr.bf16.mxu0 %v14535_v52  ;;  %4006 = vmatprep.mubr.bf16.mxu1 %v14535_v52  ;;  %v2832_v55 = vmax.f32 %v2804_v33, 0.0  ;;  %v10447_v49 = vld [vmem:[%s14449_s2 + $0x408] ss:$16 sps:$4 sm:$0xff]   ;;  %v10468_v18 = vld [vmem:[%s14449_s2 + $0x480] ss:$16 sps:$4 sm:$0xff]  }
 0x236   :  { %v2833_v23 = vmax.f32 %v2805_v57, 0.0  ;;  %v10476_v1 = vld [vmem:[%s14449_s2 + $0x4a4] ss:$16 sps:$4 sm:$0xff]   ;;  %v10479_v40 = vld [vmem:[%s14449_s2 + $0x4ac] ss:$16 sps:$4 sm:$0xff]  }
 0x237   :  { %v2834_v30 = vmax.f32 %v2806_v5, 0.0  ;;  %v10474_v43 = vld [vmem:[%s14449_s2 + $0x4a0] ss:$16 sps:$4 sm:$0xff]   ;;  %v10477_v54 = vld [vmem:[%s14449_s2 + $0x4a8] ss:$16 sps:$4 sm:$0xff]  }
 0x238   :  { %v12434_v11 = vpack.c.bf16 %v2833_v23, %v2831_v51  ;;  %v14540_v22 = vld [vmem:[#allocation28_spill] sm:$0xff]  ;;  %v10485_v2 = vld [vmem:[%s14449_s2 + $0x4cc] ss:$16 sps:$4 sm:$0xff]   ;;  %v10483_v9 = vld [vmem:[%s14449_s2 + $0x4c8] ss:$16 sps:$4 sm:$0xff]  }
 0x239   :  { %v12436_v58 = vpack.c.bf16 %v2834_v30, %v2832_v55  ;;  %v10482_v14 = vld [vmem:[%s14449_s2 + $0x4c4] ss:$16 sps:$4 sm:$0xff]   ;;  %v10480_v48 = vld [vmem:[%s14449_s2 + $0x4c0] ss:$16 sps:$4 sm:$0xff]   ;;  %v10491_v0 = vld [vmem:[%s14449_s2 + $0x4ec] ss:$16 sps:$4 sm:$0xff]  }
 0x23a   :  { %v10488_v35 = vld [vmem:[%s14449_s2 + $0x4e4] ss:$16 sps:$4 sm:$0xff]   ;;  %v14541_v15 = vld [vmem:[#allocation27_spill] sm:$0xff]  ;;  %v10486_v50 = vld [vmem:[%s14449_s2 + $0x4e0] ss:$16 sps:$4 sm:$0xff]  }
 0x23b   :  { %v10489_v20 = vld [vmem:[%s14449_s2 + $0x4e8] ss:$16 sps:$4 sm:$0xff]   ;;  %v14542_v24 = vld [vmem:[#allocation30_spill] sm:$0xff]  ;;  %v10497_v29 = vld [vmem:[%s14449_s2 + $0x50c] ss:$16 sps:$4 sm:$0xff]  }
 0x23c   :  { %3904 = vmatmul.mubr.bf16.vlgmr.msra.gmra.mrb[112].mxu0 %v14535_v52  ;;  %4007 = vmatmul.mubr.bf16.vlgmr.msra.gmra.mrb[112].mxu1 %v14535_v52  ;;  %v10494_v28 = vld [vmem:[%s14449_s2 + $0x504] ss:$16 sps:$4 sm:$0xff]   ;;  %v10492_v37 = vld [vmem:[%s14449_s2 + $0x500] ss:$16 sps:$4 sm:$0xff]   ;;  %v10495_v33 = vld [vmem:[%s14449_s2 + $0x508] ss:$16 sps:$4 sm:$0xff]  }
 0x23d   :  { %4477 = vmatpush1.bf16.msra.mxu0 %v10444_v39  ;;  %4580 = vmatpush1.bf16.msra.mxu1 %v10447_v49  ;;  %v10500_v21 = vld [vmem:[%s14449_s2 + $0x524] ss:$16 sps:$4 sm:$0xff]   ;;  %v10503_v57 = vld [vmem:[%s14449_s2 + $0x52c] ss:$16 sps:$4 sm:$0xff]   ;;  %v10498_v51 = vld [vmem:[%s14449_s2 + $0x520] ss:$16 sps:$4 sm:$0xff]  }
 0x23e   :  { %3913 = vmatprep.mubr.bf16.mxu0 %v14536_v27  ;;  %4016 = vmatprep.mubr.bf16.mxu1 %v14536_v27  ;;  %v14543_v5 = vld [vmem:[#allocation29_spill] sm:$0xff]  ;;  %v14544_v55 = vld [vmem:[#allocation11_spill] sm:$0xff]  ;;  %v10506_v30 = vld [vmem:[%s14449_s2 + $0x544] ss:$16 sps:$4 sm:$0xff]  }
 0x23f   :  { %4478 = vmatprep.subr.bf16.mxu0 %v10452_v42  ;;  %4581 = vmatprep.subr.bf16.mxu1 %v10455_v38  ;;  %v10501_v23 = vld [vmem:[%s14449_s2 + $0x528] ss:$16 sps:$4 sm:$0xff]   ;;  %v10509_v39 = vld [vmem:[%s14449_s2 + $0x54c] ss:$16 sps:$4 sm:$0xff]   ;;  %v10504_v49 = vld [vmem:[%s14449_s2 + $0x540] ss:$16 sps:$4 sm:$0xff]  }
 0x240   :  { %v10507_v42 = vld [vmem:[%s14449_s2 + $0x548] ss:$16 sps:$4 sm:$0xff]   ;;  %v10512_v38 = vld [vmem:[%s14449_s2 + $0x564] ss:$16 sps:$4 sm:$0xff]  }
 0x241   :  { %4479 = vmatpush1.bf16.msra.mxu0 %v10450_v36  ;;  %4582 = vmatpush1.bf16.msra.mxu1 %v10453_v44  ;;  %v10515_v36 = vld [vmem:[%s14449_s2 + $0x56c] ss:$16 sps:$4 sm:$0xff]   ;;  %v14545_v44 = vld [vmem:[#allocation10_spill] sm:$0xff] }
 0x242   :  { %4480 = vmatprep.subr.bf16.mxu0 %v10458_v61  ;;  %4583 = vmatprep.subr.bf16.mxu1 %v10461_v63  ;;  %v10510_v61 = vld [vmem:[%s14449_s2 + $0x560] ss:$16 sps:$4 sm:$0xff]   ;;  %v10513_v63 = vld [vmem:[%s14449_s2 + $0x568] ss:$16 sps:$4 sm:$0xff]  }
 0x244   :  { %3914 = vmatmul.mubr.bf16.gmra.mrb[116].mxu0 %v14537_v12  ;;  %4017 = vmatmul.mubr.bf16.gmra.mrb[116].mxu1 %v14537_v12 }
 0x245   :  { %4481 = vmatpush1.bf16.msra.mxu0 %v10456_v10  ;;  %4584 = vmatpush1.bf16.msra.mxu1 %v10459_v32  ;;  %v14546_v10 = vld [vmem:[#allocation13_spill] sm:$0xff]  ;;  %v10518_v32 = vld [vmem:[%s14449_s2 + $0x584] ss:$16 sps:$4 sm:$0xff]  }
 0x246   :  { %3923 = vmatprep.mubr.bf16.mxu0 %v14538_v34  ;;  %4026 = vmatprep.mubr.bf16.mxu1 %v14538_v34 }
 0x247   :  { %4482 = vmatprep.subr.bf16.mxu0 %v10464_v3  ;;  %4585 = vmatprep.subr.bf16.mxu1 %v10467_v56  ;;  %v10521_v3 = vld [vmem:[%s14449_s2 + $0x58c] ss:$16 sps:$4 sm:$0xff]   ;;  %v10516_v56 = vld [vmem:[%s14449_s2 + $0x580] ss:$16 sps:$4 sm:$0xff]  }
 0x249   :  { %4483 = vmatpush1.bf16.msra.mxu0 %v10462_v31  ;;  %4586 = vmatpush1.bf16.msra.mxu1 %v10465_v47  ;;  %v10519_v31 = vld [vmem:[%s14449_s2 + $0x588] ss:$16 sps:$4 sm:$0xff]   ;;  %v10524_v47 = vld [vmem:[%s14449_s2 + $0x5a4] ss:$16 sps:$4 sm:$0xff]  }
 0x24a   :  { %4484 = vmatprep.subr.bf16.mxu0 %v10470_v19  ;;  %4587 = vmatprep.subr.bf16.mxu1 %v10473_v60  ;;  %v10527_v19 = vld [vmem:[%s14449_s2 + $0x5ac] ss:$16 sps:$4 sm:$0xff]   ;;  %v14547_v60 = vld [vmem:[#allocation12_spill] sm:$0xff] }
 0x24c   :  { %3924 = vmatmul.mubr.bf16.gmra.mrb[120].mxu0 %v14539_v53  ;;  %4027 = vmatmul.mubr.bf16.gmra.mrb[120].mxu1 %v14539_v53 }
 0x24d   :  { %4485 = vmatpush1.bf16.msra.mxu0 %v10468_v18  ;;  %4588 = vmatpush1.bf16.msra.mxu1 %v10471_v4  ;;  %v10522_v18 = vld [vmem:[%s14449_s2 + $0x5a0] ss:$16 sps:$4 sm:$0xff]   ;;  %v10525_v4 = vld [vmem:[%s14449_s2 + $0x5a8] ss:$16 sps:$4 sm:$0xff]  }
 0x24e   :  { %3933 = vmatprep.mubr.bf16.mxu0 %v14540_v22  ;;  %4036 = vmatprep.mubr.bf16.mxu1 %v14540_v22 }
 0x24f   :  { %4486 = vmatprep.subr.bf16.mxu0 %v10476_v1  ;;  %4589 = vmatprep.subr.bf16.mxu1 %v10479_v40  ;;  %v10530_v1 = vld [vmem:[%s14449_s2 + $0x5c4] ss:$16 sps:$4 sm:$0xff]   ;;  %v10533_v40 = vld [vmem:[%s14449_s2 + $0x5cc] ss:$16 sps:$4 sm:$0xff]  }
 0x251   :  { %4487 = vmatpush1.bf16.msra.mxu0 %v10474_v43  ;;  %4590 = vmatpush1.bf16.msra.mxu1 %v10477_v54  ;;  %v10528_v43 = vld [vmem:[%s14449_s2 + $0x5c0] ss:$16 sps:$4 sm:$0xff]   ;;  %v10531_v54 = vld [vmem:[%s14449_s2 + $0x5c8] ss:$16 sps:$4 sm:$0xff]  }
 0x252   :  { %4488 = vmatprep.subr.bf16.mxu0 %v10482_v14  ;;  %4591 = vmatprep.subr.bf16.mxu1 %v10485_v2  ;;  %v10536_v14 = vld [vmem:[%s14449_s2 + $0x5e4] ss:$16 sps:$4 sm:$0xff]   ;;  %v10539_v2 = vld [vmem:[%s14449_s2 + $0x5ec] ss:$16 sps:$4 sm:$0xff]  }
 0x254   :  { %3934 = vmatmul.mubr.bf16.gmra.mrb[124].mxu0 %v14541_v15  ;;  %4037 = vmatmul.mubr.bf16.gmra.mrb[124].mxu1 %v14541_v15 }
 0x255   :  { %4489 = vmatpush1.bf16.msra.mxu0 %v10480_v48  ;;  %4592 = vmatpush1.bf16.msra.mxu1 %v10483_v9  ;;  %v10534_v48 = vld [vmem:[%s14449_s2 + $0x5e0] ss:$16 sps:$4 sm:$0xff]   ;;  %v10537_v9 = vld [vmem:[%s14449_s2 + $0x5e8] ss:$16 sps:$4 sm:$0xff]  }
 0x256   :  { %3943 = vmatprep.mubr.bf16.mxu0 %v14542_v24  ;;  %4046 = vmatprep.mubr.bf16.mxu1 %v14542_v24 }
 0x257   :  { %4490 = vmatprep.subr.bf16.mxu0 %v10488_v35  ;;  %4593 = vmatprep.subr.bf16.mxu1 %v10491_v0  ;;  %v10542_v35 = vld [vmem:[%s14449_s2 + $0x604] ss:$16 sps:$4 sm:$0xff]   ;;  %v10545_v0 = vld [vmem:[%s14449_s2 + $0x60c] ss:$16 sps:$4 sm:$0xff]  }
 0x259   :  { %4491 = vmatpush1.bf16.msra.mxu0 %v10486_v50  ;;  %4594 = vmatpush1.bf16.msra.mxu1 %v10489_v20  ;;  %v10540_v50 = vld [vmem:[%s14449_s2 + $0x600] ss:$16 sps:$4 sm:$0xff]   ;;  %v10543_v20 = vld [vmem:[%s14449_s2 + $0x608] ss:$16 sps:$4 sm:$0xff]  }
 0x25a   :  { %4492 = vmatprep.subr.bf16.mxu0 %v10494_v28  ;;  %4595 = vmatprep.subr.bf16.mxu1 %v10497_v29  ;;  %v10548_v28 = vld [vmem:[%s14449_s2 + $0x624] ss:$16 sps:$4 sm:$0xff]   ;;  %v10551_v29 = vld [vmem:[%s14449_s2 + $0x62c] ss:$16 sps:$4 sm:$0xff]  }
 0x25c   :  { %3944 = vmatmul.mubr.bf16.gmra.mrb[128].mxu0 %v14543_v5  ;;  %4047 = vmatmul.mubr.bf16.gmra.mrb[128].mxu1 %v14543_v5 }
 0x25d   :  { %4493 = vmatpush1.bf16.msra.mxu0 %v10492_v37  ;;  %4596 = vmatpush1.bf16.msra.mxu1 %v10495_v33  ;;  %v10546_v37 = vld [vmem:[%s14449_s2 + $0x620] ss:$16 sps:$4 sm:$0xff]   ;;  %v10549_v33 = vld [vmem:[%s14449_s2 + $0x628] ss:$16 sps:$4 sm:$0xff]  }
 0x25e   :  { %3953 = vmatprep.mubr.bf16.mxu0 %v14544_v55  ;;  %4056 = vmatprep.mubr.bf16.mxu1 %v14544_v55 }
 0x25f   :  { %4494 = vmatprep.subr.bf16.mxu0 %v10500_v21  ;;  %4597 = vmatprep.subr.bf16.mxu1 %v10503_v57  ;;  %v10554_v21 = vld [vmem:[%s14449_s2 + $0x644] ss:$16 sps:$4 sm:$0xff]   ;;  %v10557_v57 = vld [vmem:[%s14449_s2 + $0x64c] ss:$16 sps:$4 sm:$0xff]  }
 0x261   :  { %4495 = vmatpush1.bf16.msra.mxu0 %v10498_v51  ;;  %4598 = vmatpush1.bf16.msra.mxu1 %v10501_v23  ;;  %v10552_v51 = vld [vmem:[%s14449_s2 + $0x640] ss:$16 sps:$4 sm:$0xff]   ;;  %v10555_v23 = vld [vmem:[%s14449_s2 + $0x648] ss:$16 sps:$4 sm:$0xff]  }
 0x262   :  { %4496 = vmatprep.subr.bf16.mxu0 %v10506_v30  ;;  %4599 = vmatprep.subr.bf16.mxu1 %v10509_v39  ;;  %v10560_v30 = vld [vmem:[%s14449_s2 + $0x664] ss:$16 sps:$4 sm:$0xff]   ;;  %v10563_v39 = vld [vmem:[%s14449_s2 + $0x66c] ss:$16 sps:$4 sm:$0xff]  }
 0x264   :  { %3954 = vmatmul.mubr.bf16.gmra.mrb[132].mxu0 %v14545_v44  ;;  %4057 = vmatmul.mubr.bf16.gmra.mrb[132].mxu1 %v14545_v44 }
 0x265   :  { %4497 = vmatpush1.bf16.msra.mxu0 %v10504_v49  ;;  %4600 = vmatpush1.bf16.msra.mxu1 %v10507_v42  ;;  %v10558_v49 = vld [vmem:[%s14449_s2 + $0x660] ss:$16 sps:$4 sm:$0xff]   ;;  %v10561_v42 = vld [vmem:[%s14449_s2 + $0x668] ss:$16 sps:$4 sm:$0xff]  }
 0x266   :  { %3963 = vmatprep.mubr.bf16.mxu0 %v14546_v10  ;;  %4066 = vmatprep.mubr.bf16.mxu1 %v14546_v10 }
 0x267   :  { %4498 = vmatprep.subr.bf16.mxu0 %v10512_v38  ;;  %4601 = vmatprep.subr.bf16.mxu1 %v10515_v36  ;;  %v10566_v38 = vld [vmem:[%s14449_s2 + $0x684] ss:$16 sps:$4 sm:$0xff]   ;;  %v10569_v36 = vld [vmem:[%s14449_s2 + $0x68c] ss:$16 sps:$4 sm:$0xff]  }
 0x269   :  { %4499 = vmatpush1.bf16.msra.mxu0 %v10510_v61  ;;  %4602 = vmatpush1.bf16.msra.mxu1 %v10513_v63  ;;  %v10564_v61 = vld [vmem:[%s14449_s2 + $0x680] ss:$16 sps:$4 sm:$0xff]   ;;  %v10567_v63 = vld [vmem:[%s14449_s2 + $0x688] ss:$16 sps:$4 sm:$0xff]  }
 0x26a   :  { %4500 = vmatprep.subr.bf16.mxu0 %v10518_v32  ;;  %4603 = vmatprep.subr.bf16.mxu1 %v10521_v3  ;;  %v10572_v32 = vld [vmem:[%s14449_s2 + $0x6a4] ss:$16 sps:$4 sm:$0xff]   ;;  %v10575_v3 = vld [vmem:[%s14449_s2 + $0x6ac] ss:$16 sps:$4 sm:$0xff]  }
 0x26c   :  { %3964 = vmatmul.mubr.bf16.gmra.mrb[136].mxu0 %v14547_v60  ;;  %4067 = vmatmul.mubr.bf16.gmra.mrb[136].mxu1 %v14547_v60 }
 0x26d   :  { %4501 = vmatpush1.bf16.msra.mxu0 %v10516_v56  ;;  %4604 = vmatpush1.bf16.msra.mxu1 %v10519_v31  ;;  %v10570_v56 = vld [vmem:[%s14449_s2 + $0x6a0] ss:$16 sps:$4 sm:$0xff]   ;;  %v10573_v31 = vld [vmem:[%s14449_s2 + $0x6a8] ss:$16 sps:$4 sm:$0xff]  }
 0x26e   :  { %4508 = vmatprep.mubr.bf16.mxu0 %v14536_v27  ;;  %4611 = vmatprep.mubr.bf16.mxu1 %v14536_v27 }
 0x26f   :  { %4502 = vmatprep.subr.bf16.mxu0 %v10524_v47  ;;  %4605 = vmatprep.subr.bf16.mxu1 %v10527_v19  ;;  %v10578_v47 = vld [vmem:[%s14449_s2 + $0x6c4] ss:$16 sps:$4 sm:$0xff]   ;;  %v10581_v19 = vld [vmem:[%s14449_s2 + $0x6cc] ss:$16 sps:$4 sm:$0xff]  }
 0x271   :  { %4503 = vmatpush1.bf16.msra.mxu0 %v10522_v18  ;;  %4606 = vmatpush1.bf16.msra.mxu1 %v10525_v4  ;;  %v10576_v18 = vld [vmem:[%s14449_s2 + $0x6c0] ss:$16 sps:$4 sm:$0xff]   ;;  %v10579_v4 = vld [vmem:[%s14449_s2 + $0x6c8] ss:$16 sps:$4 sm:$0xff]  }
 0x272   :  { %4504 = vmatprep.subr.bf16.mxu0 %v10530_v1  ;;  %4607 = vmatprep.subr.bf16.mxu1 %v10533_v40  ;;  %v10584_v1 = vld [vmem:[%s14449_s2 + $0x6e4] ss:$16 sps:$4 sm:$0xff]   ;;  %v10587_v40 = vld [vmem:[%s14449_s2 + $0x6ec] ss:$16 sps:$4 sm:$0xff]  }
 0x275   :  { %4505 = vmatpush1.bf16.msra.mxu0 %v10528_v43  ;;  %4608 = vmatpush1.bf16.msra.mxu1 %v10531_v54  ;;  %v10582_v43 = vld [vmem:[%s14449_s2 + $0x6e0] ss:$16 sps:$4 sm:$0xff]   ;;  %v10585_v54 = vld [vmem:[%s14449_s2 + $0x6e8] ss:$16 sps:$4 sm:$0xff]  }
 0x276   :  { %4506 = vmatprep.subr.bf16.mxu0 %v10536_v14  ;;  %4609 = vmatprep.subr.bf16.mxu1 %v10539_v2  ;;  %v10590_v14 = vld [vmem:[%s14449_s2 + $0x704] ss:$16 sps:$4 sm:$0xff]   ;;  %v10593_v2 = vld [vmem:[%s14449_s2 + $0x70c] ss:$16 sps:$4 sm:$0xff]  }
 0x279   :  { %4507 = vmatpush1.bf16.msra.mxu0 %v10534_v48  ;;  %4610 = vmatpush1.bf16.msra.mxu1 %v10537_v9  ;;  %v10588_v48 = vld [vmem:[%s14449_s2 + $0x700] ss:$16 sps:$4 sm:$0xff]   ;;  %v10591_v9 = vld [vmem:[%s14449_s2 + $0x708] ss:$16 sps:$4 sm:$0xff]  }
 0x27a   :  { %5137 = vmatprep.subr.bf16.mxu0 %v10542_v35  ;;  %5240 = vmatprep.subr.bf16.mxu1 %v10545_v0  ;;  %v10596_v35 = vld [vmem:[%s14449_s2 + $0x724] ss:$16 sps:$4 sm:$0xff]   ;;  %v10599_v0 = vld [vmem:[%s14449_s2 + $0x72c] ss:$16 sps:$4 sm:$0xff]  }
 0x27c   :  { %4509 = vmatmul.mubr.bf16.vlgmr.msra.gmra.mrb[112].mxu0 %v14537_v12  ;;  %4612 = vmatmul.mubr.bf16.vlgmr.msra.gmra.mrb[112].mxu1 %v14537_v12 }
 0x27d   :  { %4518 = vmatprep.mubr.bf16.mxu0 %v14538_v34  ;;  %4621 = vmatprep.mubr.bf16.mxu1 %v14538_v34 }
 0x27e   :  { %5138 = vmatpush1.bf16.msra.mxu0 %v10540_v50  ;;  %5241 = vmatpush1.bf16.msra.mxu1 %v10543_v20  ;;  %v10594_v50 = vld [vmem:[%s14449_s2 + $0x720] ss:$16 sps:$4 sm:$0xff]   ;;  %v10597_v20 = vld [vmem:[%s14449_s2 + $0x728] ss:$16 sps:$4 sm:$0xff]  }
 0x27f   :  { %5139 = vmatprep.subr.bf16.mxu0 %v10548_v28  ;;  %5242 = vmatprep.subr.bf16.mxu1 %v10551_v29  ;;  %v10602_v28 = vld [vmem:[%s14449_s2 + $0x744] ss:$16 sps:$4 sm:$0xff]   ;;  %v10605_v29 = vld [vmem:[%s14449_s2 + $0x74c] ss:$16 sps:$4 sm:$0xff]  }
 0x282   :  { %5140 = vmatpush1.bf16.msra.mxu0 %v10546_v37  ;;  %5243 = vmatpush1.bf16.msra.mxu1 %v10549_v33  ;;  %v10600_v37 = vld [vmem:[%s14449_s2 + $0x740] ss:$16 sps:$4 sm:$0xff]   ;;  %v10603_v33 = vld [vmem:[%s14449_s2 + $0x748] ss:$16 sps:$4 sm:$0xff]  }
 0x283   :  { %5141 = vmatprep.subr.bf16.mxu0 %v10554_v21  ;;  %5244 = vmatprep.subr.bf16.mxu1 %v10557_v57  ;;  %v10608_v21 = vld [vmem:[%s14449_s2 + $0x764] ss:$16 sps:$4 sm:$0xff]   ;;  %v10611_v57 = vld [vmem:[%s14449_s2 + $0x76c] ss:$16 sps:$4 sm:$0xff]  }
 0x284   :  { %4519 = vmatmul.mubr.bf16.gmra.mrb[116].mxu0 %v14539_v53  ;;  %4622 = vmatmul.mubr.bf16.gmra.mrb[116].mxu1 %v14539_v53 }
 0x285   :  { %4528 = vmatprep.mubr.bf16.mxu0 %v14540_v22  ;;  %4631 = vmatprep.mubr.bf16.mxu1 %v14540_v22 }
 0x286   :  { %5142 = vmatpush1.bf16.msra.mxu0 %v10552_v51  ;;  %5245 = vmatpush1.bf16.msra.mxu1 %v10555_v23  ;;  %v14548_v51 = vld [vmem:[#allocation15_spill] sm:$0xff]  ;;  %v10606_v23 = vld [vmem:[%s14449_s2 + $0x760] ss:$16 sps:$4 sm:$0xff]  }
 0x287   :  { %5143 = vmatprep.subr.bf16.mxu0 %v10560_v30  ;;  %5246 = vmatprep.subr.bf16.mxu1 %v10563_v39  ;;  %v10609_v30 = vld [vmem:[%s14449_s2 + $0x768] ss:$16 sps:$4 sm:$0xff]   ;;  %v10614_v39 = vld [vmem:[%s14449_s2 + $0x784] ss:$16 sps:$4 sm:$0xff]  }
 0x28a   :  { %5144 = vmatpush1.bf16.msra.mxu0 %v10558_v49  ;;  %5247 = vmatpush1.bf16.msra.mxu1 %v10561_v42  ;;  %v10617_v49 = vld [vmem:[%s14449_s2 + $0x78c] ss:$16 sps:$4 sm:$0xff]   ;;  %v10612_v42 = vld [vmem:[%s14449_s2 + $0x780] ss:$16 sps:$4 sm:$0xff]  }
 0x28b   :  { %5145 = vmatprep.subr.bf16.mxu0 %v10566_v38  ;;  %5248 = vmatprep.subr.bf16.mxu1 %v10569_v36  ;;  %v10615_v38 = vld [vmem:[%s14449_s2 + $0x788] ss:$16 sps:$4 sm:$0xff]   ;;  %v10620_v36 = vld [vmem:[%s14449_s2 + $0x7a4] ss:$16 sps:$4 sm:$0xff]  }
 0x28c   :  { %4529 = vmatmul.mubr.bf16.gmra.mrb[120].mxu0 %v14541_v15  ;;  %4632 = vmatmul.mubr.bf16.gmra.mrb[120].mxu1 %v14541_v15 }
 0x28d   :  { %4538 = vmatprep.mubr.bf16.mxu0 %v14542_v24  ;;  %4641 = vmatprep.mubr.bf16.mxu1 %v14542_v24 }
 0x28e   :  { %5146 = vmatpush1.bf16.msra.mxu0 %v10564_v61  ;;  %5249 = vmatpush1.bf16.msra.mxu1 %v10567_v63  ;;  %v10623_v61 = vld [vmem:[%s14449_s2 + $0x7ac] ss:$16 sps:$4 sm:$0xff]   ;;  %v14549_v63 = vld [vmem:[#allocation14_spill] sm:$0xff] }
 0x28f   :  { %5147 = vmatprep.subr.bf16.mxu0 %v10572_v32  ;;  %5250 = vmatprep.subr.bf16.mxu1 %v10575_v3  ;;  %v10618_v32 = vld [vmem:[%s14449_s2 + $0x7a0] ss:$16 sps:$4 sm:$0xff]   ;;  %v10621_v3 = vld [vmem:[%s14449_s2 + $0x7a8] ss:$16 sps:$4 sm:$0xff]  }
 0x292   :  { %5148 = vmatpush1.bf16.msra.mxu0 %v10570_v56  ;;  %5251 = vmatpush1.bf16.msra.mxu1 %v10573_v31  ;;  %v10626_v56 = vld [vmem:[%s14449_s2 + $0x7c4] ss:$16 sps:$4 sm:$0xff]   ;;  %v10629_v31 = vld [vmem:[%s14449_s2 + $0x7cc] ss:$16 sps:$4 sm:$0xff]  }
 0x293   :  { %5149 = vmatprep.subr.bf16.mxu0 %v10578_v47  ;;  %5252 = vmatprep.subr.bf16.mxu1 %v10581_v19  ;;  %v10624_v47 = vld [vmem:[%s14449_s2 + $0x7c0] ss:$16 sps:$4 sm:$0xff]   ;;  %v10627_v19 = vld [vmem:[%s14449_s2 + $0x7c8] ss:$16 sps:$4 sm:$0xff]  }
 0x294   :  { %4539 = vmatmul.mubr.bf16.gmra.mrb[124].mxu0 %v14543_v5  ;;  %4642 = vmatmul.mubr.bf16.gmra.mrb[124].mxu1 %v14543_v5 }
 0x295   :  { %4548 = vmatprep.mubr.bf16.mxu0 %v14544_v55  ;;  %4651 = vmatprep.mubr.bf16.mxu1 %v14544_v55 }
 0x296   :  { %5150 = vmatpush1.bf16.msra.mxu0 %v10576_v18  ;;  %5253 = vmatpush1.bf16.msra.mxu1 %v10579_v4  ;;  %v10632_v18 = vld [vmem:[%s14449_s2 + $0x7e4] ss:$16 sps:$4 sm:$0xff]   ;;  %v10635_v4 = vld [vmem:[%s14449_s2 + $0x7ec] ss:$16 sps:$4 sm:$0xff]  }
 0x297   :  { %5151 = vmatprep.subr.bf16.mxu0 %v10584_v1  ;;  %5254 = vmatprep.subr.bf16.mxu1 %v10587_v40  ;;  %v10630_v1 = vld [vmem:[%s14449_s2 + $0x7e0] ss:$16 sps:$4 sm:$0xff]   ;;  %v10633_v40 = vld [vmem:[%s14449_s2 + $0x7e8] ss:$16 sps:$4 sm:$0xff]  }
 0x29a   :  { %5152 = vmatpush1.bf16.msra.mxu0 %v10582_v43  ;;  %5255 = vmatpush1.bf16.msra.mxu1 %v10585_v54  ;;  %v10638_v43 = vld [vmem:[%s14449_s2 + $0x804] ss:$16 sps:$4 sm:$0xff]   ;;  %v10641_v54 = vld [vmem:[%s14449_s2 + $0x80c] ss:$16 sps:$4 sm:$0xff]  }
 0x29b   :  { %5153 = vmatprep.subr.bf16.mxu0 %v10590_v14  ;;  %5256 = vmatprep.subr.bf16.mxu1 %v10593_v2  ;;  %v10636_v14 = vld [vmem:[%s14449_s2 + $0x800] ss:$16 sps:$4 sm:$0xff]   ;;  %v10639_v2 = vld [vmem:[%s14449_s2 + $0x808] ss:$16 sps:$4 sm:$0xff]  }
 0x29c   :  { %4549 = vmatmul.mubr.bf16.gmra.mrb[128].mxu0 %v14545_v44  ;;  %4652 = vmatmul.mubr.bf16.gmra.mrb[128].mxu1 %v14545_v44 }
 0x29d   :  { %4558 = vmatprep.mubr.bf16.mxu0 %v14546_v10  ;;  %4661 = vmatprep.mubr.bf16.mxu1 %v14546_v10 }
 0x29e   :  { %5154 = vmatpush1.bf16.msra.mxu0 %v10588_v48  ;;  %5257 = vmatpush1.bf16.msra.mxu1 %v10591_v9  ;;  %v10644_v48 = vld [vmem:[%s14449_s2 + $0x824] ss:$16 sps:$4 sm:$0xff]   ;;  %v10647_v9 = vld [vmem:[%s14449_s2 + $0x82c] ss:$16 sps:$4 sm:$0xff]  }
 0x29f   :  { %5155 = vmatprep.subr.bf16.mxu0 %v10596_v35  ;;  %5258 = vmatprep.subr.bf16.mxu1 %v10599_v0  ;;  %v10642_v35 = vld [vmem:[%s14449_s2 + $0x820] ss:$16 sps:$4 sm:$0xff]   ;;  %v10645_v0 = vld [vmem:[%s14449_s2 + $0x828] ss:$16 sps:$4 sm:$0xff]  }
 0x2a2   :  { %5156 = vmatpush1.bf16.msra.mxu0 %v10594_v50  ;;  %5259 = vmatpush1.bf16.msra.mxu1 %v10597_v20  ;;  %v10650_v50 = vld [vmem:[%s14449_s2 + $0x844] ss:$16 sps:$4 sm:$0xff]   ;;  %v10653_v20 = vld [vmem:[%s14449_s2 + $0x84c] ss:$16 sps:$4 sm:$0xff]  }
 0x2a3   :  { %5157 = vmatprep.subr.bf16.mxu0 %v10602_v28  ;;  %5260 = vmatprep.subr.bf16.mxu1 %v10605_v29  ;;  %v10648_v28 = vld [vmem:[%s14449_s2 + $0x840] ss:$16 sps:$4 sm:$0xff]   ;;  %v10651_v29 = vld [vmem:[%s14449_s2 + $0x848] ss:$16 sps:$4 sm:$0xff]  }
 0x2a4   :  { %4559 = vmatmul.mubr.bf16.gmra.mrb[132].mxu0 %v14547_v60  ;;  %4662 = vmatmul.mubr.bf16.gmra.mrb[132].mxu1 %v14547_v60 }
 0x2a5   :  { %4568 = vmatprep.mubr.bf16.mxu0 %v14548_v51  ;;  %4671 = vmatprep.mubr.bf16.mxu1 %v14548_v51 }
 0x2a6   :  { %5158 = vmatpush1.bf16.msra.mxu0 %v10600_v37  ;;  %5261 = vmatpush1.bf16.msra.mxu1 %v10603_v33  ;;  %v10656_v37 = vld [vmem:[%s14449_s2 + $0x864] ss:$16 sps:$4 sm:$0xff]   ;;  %v10659_v33 = vld [vmem:[%s14449_s2 + $0x86c] ss:$16 sps:$4 sm:$0xff]  }
 0x2a7   :  { %5159 = vmatprep.subr.bf16.mxu0 %v10608_v21  ;;  %5262 = vmatprep.subr.bf16.mxu1 %v10611_v57  ;;  %v10654_v21 = vld [vmem:[%s14449_s2 + $0x860] ss:$16 sps:$4 sm:$0xff]   ;;  %v10657_v57 = vld [vmem:[%s14449_s2 + $0x868] ss:$16 sps:$4 sm:$0xff]  }
 0x2aa   :  { %5160 = vmatpush1.bf16.msra.mxu0 %v10606_v23  ;;  %5263 = vmatpush1.bf16.msra.mxu1 %v10609_v30  ;;  %v10662_v23 = vld [vmem:[%s14449_s2 + $0x884] ss:$16 sps:$4 sm:$0xff]   ;;  %v10665_v30 = vld [vmem:[%s14449_s2 + $0x88c] ss:$16 sps:$4 sm:$0xff]  }
 0x2ab   :  { %5161 = vmatprep.subr.bf16.mxu0 %v10614_v39  ;;  %5264 = vmatprep.subr.bf16.mxu1 %v10617_v49  ;;  %v10660_v39 = vld [vmem:[%s14449_s2 + $0x880] ss:$16 sps:$4 sm:$0xff]   ;;  %v10663_v49 = vld [vmem:[%s14449_s2 + $0x888] ss:$16 sps:$4 sm:$0xff]  }
 0x2ac   :  { %4569 = vmatmul.mubr.bf16.gmra.mrb[136].mxu0 %v14549_v63  ;;  %4672 = vmatmul.mubr.bf16.gmra.mrb[136].mxu1 %v14549_v63 }
 0x2ad   :  { %5169 = vmatprep.mubr.bf16.mxu0 %v12321_v17  ;;  %5272 = vmatprep.mubr.bf16.mxu1 %v12321_v17 }
 0x2ae   :  { %5162 = vmatpush1.bf16.msra.mxu0 %v10612_v42  ;;  %5265 = vmatpush1.bf16.msra.mxu1 %v10615_v38  ;;  %v10668_v42 = vld [vmem:[%s14449_s2 + $0x8a4] ss:$16 sps:$4 sm:$0xff]   ;;  %v10671_v38 = vld [vmem:[%s14449_s2 + $0x8ac] ss:$16 sps:$4 sm:$0xff]  }
 0x2af   :  { %5163 = vmatprep.subr.bf16.mxu0 %v10620_v36  ;;  %5266 = vmatprep.subr.bf16.mxu1 %v10623_v61  ;;  %v10666_v36 = vld [vmem:[%s14449_s2 + $0x8a0] ss:$16 sps:$4 sm:$0xff]   ;;  %v10669_v61 = vld [vmem:[%s14449_s2 + $0x8a8] ss:$16 sps:$4 sm:$0xff]  }
 0x2b2   :  { %5164 = vmatpush1.bf16.msra.mxu0 %v10618_v32  ;;  %5267 = vmatpush1.bf16.msra.mxu1 %v10621_v3  ;;  %v10674_v32 = vld [vmem:[%s14449_s2 + $0x8c4] ss:$16 sps:$4 sm:$0xff]   ;;  %v10677_v3 = vld [vmem:[%s14449_s2 + $0x8cc] ss:$16 sps:$4 sm:$0xff]  }
 0x2b3   :  { %5165 = vmatprep.subr.bf16.mxu0 %v10626_v56  ;;  %5268 = vmatprep.subr.bf16.mxu1 %v10629_v31  ;;  %v10672_v56 = vld [vmem:[%s14449_s2 + $0x8c0] ss:$16 sps:$4 sm:$0xff]   ;;  %v10675_v31 = vld [vmem:[%s14449_s2 + $0x8c8] ss:$16 sps:$4 sm:$0xff]  }
 0x2b6   :  { %5166 = vmatpush1.bf16.msra.mxu0 %v10624_v47  ;;  %5269 = vmatpush1.bf16.msra.mxu1 %v10627_v19  ;;  %v10680_v47 = vld [vmem:[%s14449_s2 + $0x8e4] ss:$16 sps:$4 sm:$0xff]   ;;  %v10683_v19 = vld [vmem:[%s14449_s2 + $0x8ec] ss:$16 sps:$4 sm:$0xff]  }
 0x2b7   :  { %5167 = vmatprep.subr.bf16.mxu0 %v10632_v18  ;;  %5270 = vmatprep.subr.bf16.mxu1 %v10635_v4  ;;  %v10678_v18 = vld [vmem:[%s14449_s2 + $0x8e0] ss:$16 sps:$4 sm:$0xff]   ;;  %v10681_v4 = vld [vmem:[%s14449_s2 + $0x8e8] ss:$16 sps:$4 sm:$0xff]  }
 0x2ba   :  { %5168 = vmatpush1.bf16.msra.mxu0 %v10630_v1  ;;  %5271 = vmatpush1.bf16.msra.mxu1 %v10633_v40  ;;  %v10686_v1 = vld [vmem:[%s14449_s2 + $0x904] ss:$16 sps:$4 sm:$0xff]   ;;  %v10689_v40 = vld [vmem:[%s14449_s2 + $0x90c] ss:$16 sps:$4 sm:$0xff]  }
 0x2bb   :  { %5798 = vmatprep.subr.bf16.mxu0 %v10638_v43  ;;  %5901 = vmatprep.subr.bf16.mxu1 %v10641_v54  ;;  %v10684_v43 = vld [vmem:[%s14449_s2 + $0x900] ss:$16 sps:$4 sm:$0xff]   ;;  %v10687_v54 = vld [vmem:[%s14449_s2 + $0x908] ss:$16 sps:$4 sm:$0xff]  }
 0x2bd   :  { %5170 = vmatmul.mubr.bf16.vlgmr.msra.gmra.mrb[112].mxu0 %v12317_v7  ;;  %5273 = vmatmul.mubr.bf16.vlgmr.msra.gmra.mrb[112].mxu1 %v12317_v7 }
 0x2be   :  { %5179 = vmatprep.mubr.bf16.mxu0 %v12341_v8  ;;  %5282 = vmatprep.mubr.bf16.mxu1 %v12341_v8 }
 0x2bf   :  { %5799 = vmatpush1.bf16.msra.mxu0 %v10636_v14  ;;  %5902 = vmatpush1.bf16.msra.mxu1 %v10639_v2  ;;  %v10692_v14 = vld [vmem:[%s14449_s2 + $0x924] ss:$16 sps:$4 sm:$0xff]   ;;  %v10695_v2 = vld [vmem:[%s14449_s2 + $0x92c] ss:$16 sps:$4 sm:$0xff]  }
 0x2c0   :  { %5800 = vmatprep.subr.bf16.mxu0 %v10644_v48  ;;  %5903 = vmatprep.subr.bf16.mxu1 %v10647_v9  ;;  %v10690_v48 = vld [vmem:[%s14449_s2 + $0x920] ss:$16 sps:$4 sm:$0xff]   ;;  %v10693_v9 = vld [vmem:[%s14449_s2 + $0x928] ss:$16 sps:$4 sm:$0xff]  }
 0x2c3   :  { %5801 = vmatpush1.bf16.msra.mxu0 %v10642_v35  ;;  %5904 = vmatpush1.bf16.msra.mxu1 %v10645_v0  ;;  %v10698_v35 = vld [vmem:[%s14449_s2 + $0x944] ss:$16 sps:$4 sm:$0xff]   ;;  %v10701_v0 = vld [vmem:[%s14449_s2 + $0x94c] ss:$16 sps:$4 sm:$0xff]  }
 0x2c4   :  { %5802 = vmatprep.subr.bf16.mxu0 %v10650_v50  ;;  %5905 = vmatprep.subr.bf16.mxu1 %v10653_v20  ;;  %v10696_v50 = vld [vmem:[%s14449_s2 + $0x940] ss:$16 sps:$4 sm:$0xff]   ;;  %v10699_v20 = vld [vmem:[%s14449_s2 + $0x948] ss:$16 sps:$4 sm:$0xff]  }
 0x2c5   :  { %5180 = vmatmul.mubr.bf16.gmra.mrb[116].mxu0 %v12337_v6  ;;  %5283 = vmatmul.mubr.bf16.gmra.mrb[116].mxu1 %v12337_v6 }
 0x2c6   :  { %5189 = vmatprep.mubr.bf16.mxu0 %v12361_v25  ;;  %5292 = vmatprep.mubr.bf16.mxu1 %v12361_v25 }
 0x2c7   :  { %5803 = vmatpush1.bf16.msra.mxu0 %v10648_v28  ;;  %5906 = vmatpush1.bf16.msra.mxu1 %v10651_v29  ;;  %v10704_v28 = vld [vmem:[%s14449_s2 + $0x964] ss:$16 sps:$4 sm:$0xff]   ;;  %v10707_v29 = vld [vmem:[%s14449_s2 + $0x96c] ss:$16 sps:$4 sm:$0xff]  }
 0x2c8   :  { %5804 = vmatprep.subr.bf16.mxu0 %v10656_v37  ;;  %5907 = vmatprep.subr.bf16.mxu1 %v10659_v33  ;;  %v10702_v37 = vld [vmem:[%s14449_s2 + $0x960] ss:$16 sps:$4 sm:$0xff]   ;;  %v10705_v33 = vld [vmem:[%s14449_s2 + $0x968] ss:$16 sps:$4 sm:$0xff]  }
 0x2cb   :  { %5805 = vmatpush1.bf16.msra.mxu0 %v10654_v21  ;;  %5908 = vmatpush1.bf16.msra.mxu1 %v10657_v57  ;;  %v10710_v21 = vld [vmem:[%s14449_s2 + $0x984] ss:$16 sps:$4 sm:$0xff]   ;;  %v10713_v57 = vld [vmem:[%s14449_s2 + $0x98c] ss:$16 sps:$4 sm:$0xff]  }
 0x2cc   :  { %5806 = vmatprep.subr.bf16.mxu0 %v10662_v23  ;;  %5909 = vmatprep.subr.bf16.mxu1 %v10665_v30  ;;  %v10708_v23 = vld [vmem:[%s14449_s2 + $0x980] ss:$16 sps:$4 sm:$0xff]   ;;  %v10711_v30 = vld [vmem:[%s14449_s2 + $0x988] ss:$16 sps:$4 sm:$0xff]  }
 0x2cd   :  { %5190 = vmatmul.mubr.bf16.gmra.mrb[120].mxu0 %v12357_v13  ;;  %5293 = vmatmul.mubr.bf16.gmra.mrb[120].mxu1 %v12357_v13 }
 0x2ce   :  { %5199 = vmatprep.mubr.bf16.mxu0 %v12381_v26  ;;  %5302 = vmatprep.mubr.bf16.mxu1 %v12381_v26 }
 0x2cf   :  { %5807 = vmatpush1.bf16.msra.mxu0 %v10660_v39  ;;  %5910 = vmatpush1.bf16.msra.mxu1 %v10663_v49  ;;  %v10716_v39 = vld [vmem:[%s14449_s2 + $0x9a4] ss:$16 sps:$4 sm:$0xff]   ;;  %v10719_v49 = vld [vmem:[%s14449_s2 + $0x9ac] ss:$16 sps:$4 sm:$0xff]  }
 0x2d0   :  { %5808 = vmatprep.subr.bf16.mxu0 %v10668_v42  ;;  %5911 = vmatprep.subr.bf16.mxu1 %v10671_v38  ;;  %v10714_v42 = vld [vmem:[%s14449_s2 + $0x9a0] ss:$16 sps:$4 sm:$0xff]   ;;  %v10717_v38 = vld [vmem:[%s14449_s2 + $0x9a8] ss:$16 sps:$4 sm:$0xff]  }
 0x2d3   :  { %5809 = vmatpush1.bf16.msra.mxu0 %v10666_v36  ;;  %5912 = vmatpush1.bf16.msra.mxu1 %v10669_v61  ;;  %v10722_v36 = vld [vmem:[%s14449_s2 + $0x9c4] ss:$16 sps:$4 sm:$0xff]   ;;  %v10725_v61 = vld [vmem:[%s14449_s2 + $0x9cc] ss:$16 sps:$4 sm:$0xff]  }
 0x2d4   :  { %5810 = vmatprep.subr.bf16.mxu0 %v10674_v32  ;;  %5913 = vmatprep.subr.bf16.mxu1 %v10677_v3  ;;  %v10720_v32 = vld [vmem:[%s14449_s2 + $0x9c0] ss:$16 sps:$4 sm:$0xff]   ;;  %v10723_v3 = vld [vmem:[%s14449_s2 + $0x9c8] ss:$16 sps:$4 sm:$0xff]  }
 0x2d5   :  { %5200 = vmatmul.mubr.bf16.gmra.mrb[124].mxu0 %v12377_v16  ;;  %5303 = vmatmul.mubr.bf16.gmra.mrb[124].mxu1 %v12377_v16 }
 0x2d6   :  { %5209 = vmatprep.mubr.bf16.mxu0 %v12401_v41  ;;  %5312 = vmatprep.mubr.bf16.mxu1 %v12401_v41 }
 0x2d7   :  { %5811 = vmatpush1.bf16.msra.mxu0 %v10672_v56  ;;  %5914 = vmatpush1.bf16.msra.mxu1 %v10675_v31  ;;  %v10728_v56 = vld [vmem:[%s14449_s2 + $0x9e4] ss:$16 sps:$4 sm:$0xff]   ;;  %v10731_v31 = vld [vmem:[%s14449_s2 + $0x9ec] ss:$16 sps:$4 sm:$0xff]  }
 0x2d8   :  { %5812 = vmatprep.subr.bf16.mxu0 %v10680_v47  ;;  %5915 = vmatprep.subr.bf16.mxu1 %v10683_v19  ;;  %v10726_v47 = vld [vmem:[%s14449_s2 + $0x9e0] ss:$16 sps:$4 sm:$0xff]   ;;  %v10729_v19 = vld [vmem:[%s14449_s2 + $0x9e8] ss:$16 sps:$4 sm:$0xff]  }
 0x2db   :  { %5813 = vmatpush1.bf16.msra.mxu0 %v10678_v18  ;;  %5916 = vmatpush1.bf16.msra.mxu1 %v10681_v4  ;;  %v10858_v18 = vld [vmem:[%s14449_s2 + $0x204] ss:$16 sps:$4 sm:$0xff]   ;;  %v10859_v4 = vld [vmem:[%s14449_s2 + $0x20c] ss:$16 sps:$4 sm:$0xff]  }
 0x2dc   :  { %5814 = vmatprep.subr.bf16.mxu0 %v10686_v1  ;;  %5917 = vmatprep.subr.bf16.mxu1 %v10689_v40  ;;  %v10860_v1 = vld [vmem:[%s14449_s2 + $0x200] ss:$16 sps:$4 sm:$0xff]   ;;  %v10861_v40 = vld [vmem:[%s14449_s2 + $0x208] ss:$16 sps:$4 sm:$0xff]  }
 0x2dd   :  { %5210 = vmatmul.mubr.bf16.gmra.mrb[128].mxu0 %v12397_v59  ;;  %5313 = vmatmul.mubr.bf16.gmra.mrb[128].mxu1 %v12397_v59 }
 0x2de   :  { %5219 = vmatprep.mubr.bf16.mxu0 %v12421_v46  ;;  %5322 = vmatprep.mubr.bf16.mxu1 %v12421_v46 }
 0x2df   :  { %5815 = vmatpush1.bf16.msra.mxu0 %v10684_v43  ;;  %5918 = vmatpush1.bf16.msra.mxu1 %v10687_v54  ;;  %v10862_v43 = vld [vmem:[%s14449_s2 + $0x224] ss:$16 sps:$4 sm:$0xff]   ;;  %v10863_v54 = vld [vmem:[%s14449_s2 + $0x22c] ss:$16 sps:$4 sm:$0xff]  }
 0x2e0   :  { %5816 = vmatprep.subr.bf16.mxu0 %v10692_v14  ;;  %5919 = vmatprep.subr.bf16.mxu1 %v10695_v2  ;;  %v10864_v14 = vld [vmem:[%s14449_s2 + $0x220] ss:$16 sps:$4 sm:$0xff]   ;;  %v10865_v2 = vld [vmem:[%s14449_s2 + $0x228] ss:$16 sps:$4 sm:$0xff]  }
 0x2e3   :  { %5817 = vmatpush1.bf16.msra.mxu0 %v10690_v48  ;;  %5920 = vmatpush1.bf16.msra.mxu1 %v10693_v9  ;;  %v10866_v48 = vld [vmem:[%s14449_s2 + $0x244] ss:$16 sps:$4 sm:$0xff]   ;;  %v10867_v9 = vld [vmem:[%s14449_s2 + $0x24c] ss:$16 sps:$4 sm:$0xff]  }
 0x2e4   :  { %5818 = vmatprep.subr.bf16.mxu0 %v10698_v35  ;;  %5921 = vmatprep.subr.bf16.mxu1 %v10701_v0  ;;  %v10868_v35 = vld [vmem:[%s14449_s2 + $0x240] ss:$16 sps:$4 sm:$0xff]   ;;  %v10869_v0 = vld [vmem:[%s14449_s2 + $0x248] ss:$16 sps:$4 sm:$0xff]  }
 0x2e5   :  { %5220 = vmatmul.mubr.bf16.gmra.mrb[132].mxu0 %v12417_v62  ;;  %5323 = vmatmul.mubr.bf16.gmra.mrb[132].mxu1 %v12417_v62 }
 0x2e6   :  { %5229 = vmatprep.mubr.bf16.mxu0 %v12436_v58  ;;  %5332 = vmatprep.mubr.bf16.mxu1 %v12436_v58 }
 0x2e7   :  { %5819 = vmatpush1.bf16.msra.mxu0 %v10696_v50  ;;  %5922 = vmatpush1.bf16.msra.mxu1 %v10699_v20  ;;  %v10870_v50 = vld [vmem:[%s14449_s2 + $0x264] ss:$16 sps:$4 sm:$0xff]   ;;  %v10871_v20 = vld [vmem:[%s14449_s2 + $0x26c] ss:$16 sps:$4 sm:$0xff]  }
 0x2e8   :  { %5820 = vmatprep.subr.bf16.mxu0 %v10704_v28  ;;  %5923 = vmatprep.subr.bf16.mxu1 %v10707_v29  ;;  %v10872_v28 = vld [vmem:[%s14449_s2 + $0x260] ss:$16 sps:$4 sm:$0xff]   ;;  %v10873_v29 = vld [vmem:[%s14449_s2 + $0x268] ss:$16 sps:$4 sm:$0xff]  }
 0x2eb   :  { %5821 = vmatpush1.bf16.msra.mxu0 %v10702_v37  ;;  %5924 = vmatpush1.bf16.msra.mxu1 %v10705_v33  ;;  %v10874_v37 = vld [vmem:[%s14449_s2 + $0x284] ss:$16 sps:$4 sm:$0xff]   ;;  %v10875_v33 = vld [vmem:[%s14449_s2 + $0x28c] ss:$16 sps:$4 sm:$0xff]  }
 0x2ec   :  { %5822 = vmatprep.subr.bf16.mxu0 %v10710_v21  ;;  %5925 = vmatprep.subr.bf16.mxu1 %v10713_v57  ;;  %v10876_v21 = vld [vmem:[%s14449_s2 + $0x280] ss:$16 sps:$4 sm:$0xff]   ;;  %v10877_v57 = vld [vmem:[%s14449_s2 + $0x288] ss:$16 sps:$4 sm:$0xff]  }
 0x2ed   :  { %5230 = vmatmul.mubr.bf16.gmra.mrb[136].mxu0 %v12434_v11  ;;  %5333 = vmatmul.mubr.bf16.gmra.mrb[136].mxu1 %v12434_v11 }
 0x2ee   :  { %5830 = vmatprep.mubr.bf16.mxu0 %v14538_v34  ;;  %5933 = vmatprep.mubr.bf16.mxu1 %v14538_v34 }
 0x2ef   :  { %5823 = vmatpush1.bf16.msra.mxu0 %v10708_v23  ;;  %5926 = vmatpush1.bf16.msra.mxu1 %v10711_v30  ;;  %v10878_v23 = vld [vmem:[%s14449_s2 + $0x2a4] ss:$16 sps:$4 sm:$0xff]   ;;  %v10879_v30 = vld [vmem:[%s14449_s2 + $0x2ac] ss:$16 sps:$4 sm:$0xff]  }
 0x2f0   :  { %5824 = vmatprep.subr.bf16.mxu0 %v10716_v39  ;;  %5927 = vmatprep.subr.bf16.mxu1 %v10719_v49  ;;  %v10880_v39 = vld [vmem:[%s14449_s2 + $0x2a0] ss:$16 sps:$4 sm:$0xff]   ;;  %v10881_v49 = vld [vmem:[%s14449_s2 + $0x2a8] ss:$16 sps:$4 sm:$0xff]  }
 0x2f3   :  { %5825 = vmatpush1.bf16.msra.mxu0 %v10714_v42  ;;  %5928 = vmatpush1.bf16.msra.mxu1 %v10717_v38  ;;  %v10882_v42 = vld [vmem:[%s14449_s2 + $0x2c4] ss:$16 sps:$4 sm:$0xff]   ;;  %v10883_v38 = vld [vmem:[%s14449_s2 + $0x2cc] ss:$16 sps:$4 sm:$0xff]  }
 0x2f4   :  { %5826 = vmatprep.subr.bf16.mxu0 %v10722_v36  ;;  %5929 = vmatprep.subr.bf16.mxu1 %v10725_v61  ;;  %v10884_v36 = vld [vmem:[%s14449_s2 + $0x2c0] ss:$16 sps:$4 sm:$0xff]   ;;  %v10885_v61 = vld [vmem:[%s14449_s2 + $0x2c8] ss:$16 sps:$4 sm:$0xff]  }
 0x2f7   :  { %5827 = vmatpush1.bf16.msra.mxu0 %v10720_v32  ;;  %5930 = vmatpush1.bf16.msra.mxu1 %v10723_v3  ;;  %v10886_v32 = vld [vmem:[%s14449_s2 + $0x2e4] ss:$16 sps:$4 sm:$0xff]   ;;  %v10887_v3 = vld [vmem:[%s14449_s2 + $0x2ec] ss:$16 sps:$4 sm:$0xff]  }
 0x2f8   :  { %5828 = vmatprep.subr.bf16.mxu0 %v10728_v56  ;;  %5931 = vmatprep.subr.bf16.mxu1 %v10731_v31  ;;  %v10888_v56 = vld [vmem:[%s14449_s2 + $0x2e0] ss:$16 sps:$4 sm:$0xff]   ;;  %v10889_v31 = vld [vmem:[%s14449_s2 + $0x2e8] ss:$16 sps:$4 sm:$0xff]  }
 0x2fb   :  { %5829 = vmatpush1.bf16.msra.mxu0 %v10726_v47  ;;  %5932 = vmatpush1.bf16.msra.mxu1 %v10729_v19  ;;  %v10890_v47 = vld [vmem:[%s14449_s2 + $0x304] ss:$16 sps:$4 sm:$0xff]   ;;  %v10891_v19 = vld [vmem:[%s14449_s2 + $0x30c] ss:$16 sps:$4 sm:$0xff]  }
 0x2fc   :  { %6060 = vmatprep.subr.bf16.mxu0 %v10858_v18  ;;  %6163 = vmatprep.subr.bf16.mxu1 %v10859_v4  ;;  %v10892_v18 = vld [vmem:[%s14449_s2 + $0x300] ss:$16 sps:$4 sm:$0xff]   ;;  %v10893_v4 = vld [vmem:[%s14449_s2 + $0x308] ss:$16 sps:$4 sm:$0xff]  }
 0x2fe   :  { %5831 = vmatmul.mubr.bf16.vlgmr.msra.gmra.mrb[112].mxu0 %v14539_v53  ;;  %5934 = vmatmul.mubr.bf16.vlgmr.msra.gmra.mrb[112].mxu1 %v14539_v53 }
 0x2ff   :  { %5840 = vmatprep.mubr.bf16.mxu0 %v14540_v22  ;;  %5943 = vmatprep.mubr.bf16.mxu1 %v14540_v22 }
 0x300   :  { %6061 = vmatpush1.bf16.msra.mxu0 %v10860_v1  ;;  %6164 = vmatpush1.bf16.msra.mxu1 %v10861_v40  ;;  %v10894_v1 = vld [vmem:[%s14449_s2 + $0x324] ss:$16 sps:$4 sm:$0xff]   ;;  %v10895_v40 = vld [vmem:[%s14449_s2 + $0x32c] ss:$16 sps:$4 sm:$0xff]  }
 0x301   :  { %6062 = vmatprep.subr.bf16.mxu0 %v10862_v43  ;;  %6165 = vmatprep.subr.bf16.mxu1 %v10863_v54  ;;  %v10896_v43 = vld [vmem:[%s14449_s2 + $0x320] ss:$16 sps:$4 sm:$0xff]   ;;  %v10897_v54 = vld [vmem:[%s14449_s2 + $0x328] ss:$16 sps:$4 sm:$0xff]  }
 0x304   :  { %6063 = vmatpush1.bf16.msra.mxu0 %v10864_v14  ;;  %6166 = vmatpush1.bf16.msra.mxu1 %v10865_v2  ;;  %v10898_v14 = vld [vmem:[%s14449_s2 + $0x344] ss:$16 sps:$4 sm:$0xff]   ;;  %v10899_v2 = vld [vmem:[%s14449_s2 + $0x34c] ss:$16 sps:$4 sm:$0xff]  }
 0x305   :  { %6064 = vmatprep.subr.bf16.mxu0 %v10866_v48  ;;  %6167 = vmatprep.subr.bf16.mxu1 %v10867_v9  ;;  %v10900_v48 = vld [vmem:[%s14449_s2 + $0x340] ss:$16 sps:$4 sm:$0xff]   ;;  %v10901_v9 = vld [vmem:[%s14449_s2 + $0x348] ss:$16 sps:$4 sm:$0xff]  }
 0x306   :  { %5841 = vmatmul.mubr.bf16.gmra.mrb[116].mxu0 %v14541_v15  ;;  %5944 = vmatmul.mubr.bf16.gmra.mrb[116].mxu1 %v14541_v15 }
 0x307   :  { %5850 = vmatprep.mubr.bf16.mxu0 %v14542_v24  ;;  %5953 = vmatprep.mubr.bf16.mxu1 %v14542_v24 }
 0x308   :  { %6065 = vmatpush1.bf16.msra.mxu0 %v10868_v35  ;;  %6168 = vmatpush1.bf16.msra.mxu1 %v10869_v0  ;;  %v10902_v35 = vld [vmem:[%s14449_s2 + $0x364] ss:$16 sps:$4 sm:$0xff]   ;;  %v10903_v0 = vld [vmem:[%s14449_s2 + $0x36c] ss:$16 sps:$4 sm:$0xff]  }
 0x309   :  { %6066 = vmatprep.subr.bf16.mxu0 %v10870_v50  ;;  %6169 = vmatprep.subr.bf16.mxu1 %v10871_v20  ;;  %v10904_v50 = vld [vmem:[%s14449_s2 + $0x360] ss:$16 sps:$4 sm:$0xff]   ;;  %v10905_v20 = vld [vmem:[%s14449_s2 + $0x368] ss:$16 sps:$4 sm:$0xff]  }
 0x30c   :  { %6067 = vmatpush1.bf16.msra.mxu0 %v10872_v28  ;;  %6170 = vmatpush1.bf16.msra.mxu1 %v10873_v29  ;;  %v10906_v28 = vld [vmem:[%s14449_s2 + $0x384] ss:$16 sps:$4 sm:$0xff]   ;;  %v10907_v29 = vld [vmem:[%s14449_s2 + $0x38c] ss:$16 sps:$4 sm:$0xff]  }
 0x30d   :  { %6068 = vmatprep.subr.bf16.mxu0 %v10874_v37  ;;  %6171 = vmatprep.subr.bf16.mxu1 %v10875_v33  ;;  %v10908_v37 = vld [vmem:[%s14449_s2 + $0x380] ss:$16 sps:$4 sm:$0xff]   ;;  %v10909_v33 = vld [vmem:[%s14449_s2 + $0x388] ss:$16 sps:$4 sm:$0xff]  }
 0x30e   :  { %5851 = vmatmul.mubr.bf16.gmra.mrb[120].mxu0 %v14543_v5  ;;  %5954 = vmatmul.mubr.bf16.gmra.mrb[120].mxu1 %v14543_v5 }
 0x30f   :  { %5860 = vmatprep.mubr.bf16.mxu0 %v14544_v55  ;;  %5963 = vmatprep.mubr.bf16.mxu1 %v14544_v55 }
 0x310   :  { %6069 = vmatpush1.bf16.msra.mxu0 %v10876_v21  ;;  %6172 = vmatpush1.bf16.msra.mxu1 %v10877_v57  ;;  %v10910_v21 = vld [vmem:[%s14449_s2 + $0x3a4] ss:$16 sps:$4 sm:$0xff]   ;;  %v10911_v57 = vld [vmem:[%s14449_s2 + $0x3ac] ss:$16 sps:$4 sm:$0xff]  }
 0x311   :  { %6070 = vmatprep.subr.bf16.mxu0 %v10878_v23  ;;  %6173 = vmatprep.subr.bf16.mxu1 %v10879_v30  ;;  %v10913_v23 = vld [vmem:[%s14449_s2 + $0x3a8] ss:$16 sps:$4 sm:$0xff]   ;;  %v10914_v30 = vld [vmem:[%s14449_s2 + $0x3c4] ss:$16 sps:$4 sm:$0xff]  }
 0x314   :  { %6071 = vmatpush1.bf16.msra.mxu0 %v10880_v39  ;;  %6174 = vmatpush1.bf16.msra.mxu1 %v10881_v49  ;;  %v10915_v39 = vld [vmem:[%s14449_s2 + $0x3cc] ss:$16 sps:$4 sm:$0xff]   ;;  %v10916_v49 = vld [vmem:[%s14449_s2 + $0x3c0] ss:$16 sps:$4 sm:$0xff]  }
 0x315   :  { %6072 = vmatprep.subr.bf16.mxu0 %v10882_v42  ;;  %6175 = vmatprep.subr.bf16.mxu1 %v10883_v38  ;;  %v10917_v42 = vld [vmem:[%s14449_s2 + $0x3c8] ss:$16 sps:$4 sm:$0xff]   ;;  %v10918_v38 = vld [vmem:[%s14449_s2 + $0x3e4] ss:$16 sps:$4 sm:$0xff]  }
 0x316   :  { %5861 = vmatmul.mubr.bf16.gmra.mrb[124].mxu0 %v14545_v44  ;;  %5964 = vmatmul.mubr.bf16.gmra.mrb[124].mxu1 %v14545_v44 }
 0x317   :  { %5870 = vmatprep.mubr.bf16.mxu0 %v14546_v10  ;;  %5973 = vmatprep.mubr.bf16.mxu1 %v14546_v10 }
 0x318   :  { %6073 = vmatpush1.bf16.msra.mxu0 %v10884_v36  ;;  %6176 = vmatpush1.bf16.msra.mxu1 %v10885_v61  ;;  %v10919_v36 = vld [vmem:[%s14449_s2 + $0x3ec] ss:$16 sps:$4 sm:$0xff]   ;;  %v10920_v61 = vld [vmem:[%s14449_s2 + $0x3e0] ss:$16 sps:$4 sm:$0xff]  }
 0x319   :  { %6074 = vmatprep.subr.bf16.mxu0 %v10886_v32  ;;  %6177 = vmatprep.subr.bf16.mxu1 %v10887_v3  ;;  %v10921_v32 = vld [vmem:[%s14449_s2 + $0x3e8] ss:$16 sps:$4 sm:$0xff]   ;;  %v10922_v3 = vld [vmem:[%s14449_s2 + $0x4] ss:$16 sps:$4 sm:$0xff]  }
 0x31c   :  { %6075 = vmatpush1.bf16.msra.mxu0 %v10888_v56  ;;  %6178 = vmatpush1.bf16.msra.mxu1 %v10889_v31  ;;  %v10923_v56 = vld [vmem:[%s14449_s2 + $0xc] ss:$16 sps:$4 sm:$0xff]   ;;  %v10924_v31 = vld [vmem:[%s14449_s2] ss:$16 sps:$4 sm:$0xff]  }
 0x31d   :  { %6076 = vmatprep.subr.bf16.mxu0 %v10890_v47  ;;  %6179 = vmatprep.subr.bf16.mxu1 %v10891_v19  ;;  %v10925_v47 = vld [vmem:[%s14449_s2 + $0x8] ss:$16 sps:$4 sm:$0xff]   ;;  %v10926_v19 = vld [vmem:[%s14449_s2 + $0x24] ss:$16 sps:$4 sm:$0xff]  }
 0x31e   :  { %5871 = vmatmul.mubr.bf16.gmra.mrb[128].mxu0 %v14547_v60  ;;  %5974 = vmatmul.mubr.bf16.gmra.mrb[128].mxu1 %v14547_v60 }
 0x31f   :  { %5880 = vmatprep.mubr.bf16.mxu0 %v14548_v51  ;;  %5983 = vmatprep.mubr.bf16.mxu1 %v14548_v51 }
 0x320   :  { %6077 = vmatpush1.bf16.msra.mxu0 %v10892_v18  ;;  %6180 = vmatpush1.bf16.msra.mxu1 %v10893_v4  ;;  %v10928_v18 = vld [vmem:[%s14449_s2 + $0x20] ss:$16 sps:$4 sm:$0xff]   ;;  %v10929_v4 = vld [vmem:[%s14449_s2 + $0x28] ss:$16 sps:$4 sm:$0xff]  }
 0x321   :  { %6078 = vmatprep.subr.bf16.mxu0 %v10894_v1  ;;  %6181 = vmatprep.subr.bf16.mxu1 %v10895_v40  ;;  %v10930_v1 = vld [vmem:[%s14449_s2 + $0x44] ss:$16 sps:$4 sm:$0xff]   ;;  %v10931_v40 = vld [vmem:[%s14449_s2 + $0x4c] ss:$16 sps:$4 sm:$0xff]  }
 0x324   :  { %6079 = vmatpush1.bf16.msra.mxu0 %v10896_v43  ;;  %6182 = vmatpush1.bf16.msra.mxu1 %v10897_v54  ;;  %v10932_v43 = vld [vmem:[%s14449_s2 + $0x40] ss:$16 sps:$4 sm:$0xff]   ;;  %v10933_v54 = vld [vmem:[%s14449_s2 + $0x48] ss:$16 sps:$4 sm:$0xff]  }
 0x325   :  { %6080 = vmatprep.subr.bf16.mxu0 %v10898_v14  ;;  %6183 = vmatprep.subr.bf16.mxu1 %v10899_v2  ;;  %v10934_v14 = vld [vmem:[%s14449_s2 + $0x64] ss:$16 sps:$4 sm:$0xff]   ;;  %v10935_v2 = vld [vmem:[%s14449_s2 + $0x6c] ss:$16 sps:$4 sm:$0xff]  }
 0x326   :  { %5881 = vmatmul.mubr.bf16.gmra.mrb[132].mxu0 %v14549_v63  ;;  %5984 = vmatmul.mubr.bf16.gmra.mrb[132].mxu1 %v14549_v63 }
 0x327   :  { %5890 = vmatprep.mubr.bf16.mxu0 %v14535_v52  ;;  %5993 = vmatprep.mubr.bf16.mxu1 %v14535_v52 }
 0x328   :  { %6081 = vmatpush1.bf16.msra.mxu0 %v10900_v48  ;;  %6184 = vmatpush1.bf16.msra.mxu1 %v10901_v9  ;;  %v10936_v48 = vld [vmem:[%s14449_s2 + $0x60] ss:$16 sps:$4 sm:$0xff]   ;;  %v10937_v9 = vld [vmem:[%s14449_s2 + $0x68] ss:$16 sps:$4 sm:$0xff]  }
 0x329   :  { %6082 = vmatprep.subr.bf16.mxu0 %v10902_v35  ;;  %6185 = vmatprep.subr.bf16.mxu1 %v10903_v0  ;;  %v10938_v35 = vld [vmem:[%s14449_s2 + $0x84] ss:$16 sps:$4 sm:$0xff]   ;;  %v10939_v0 = vld [vmem:[%s14449_s2 + $0x8c] ss:$16 sps:$4 sm:$0xff]  }
 0x32c   :  { %6083 = vmatpush1.bf16.msra.mxu0 %v10904_v50  ;;  %6186 = vmatpush1.bf16.msra.mxu1 %v10905_v20  ;;  %v10940_v50 = vld [vmem:[%s14449_s2 + $0x80] ss:$16 sps:$4 sm:$0xff]   ;;  %v10941_v20 = vld [vmem:[%s14449_s2 + $0x88] ss:$16 sps:$4 sm:$0xff]  }
 0x32d   :  { %6084 = vmatprep.subr.bf16.mxu0 %v10906_v28  ;;  %6187 = vmatprep.subr.bf16.mxu1 %v10907_v29  ;;  %v10942_v28 = vld [vmem:[%s14449_s2 + $0xa4] ss:$16 sps:$4 sm:$0xff]   ;;  %v10943_v29 = vld [vmem:[%s14449_s2 + $0xac] ss:$16 sps:$4 sm:$0xff]  }
 0x32e   :  { %5891 = vmatmul.mubr.bf16.gmra.mrb[136].mxu0 %v14535_v52  ;;  %5994 = vmatmul.mubr.bf16.gmra.mrb[136].mxu1 %v14535_v52 }
 0x32f   :  { %6092 = vmatprep.mubr.bf16.mxu0 %v14536_v27  ;;  %6195 = vmatprep.mubr.bf16.mxu1 %v14536_v27  ;;  %v10912_v27 = vld [vmem:[%s14449_s2 + $0x3a0] ss:$16 sps:$4 sm:$0xff]  }
 0x330   :  { %6085 = vmatpush1.bf16.msra.mxu0 %v10908_v37  ;;  %6188 = vmatpush1.bf16.msra.mxu1 %v10909_v33  ;;  %v10944_v37 = vld [vmem:[%s14449_s2 + $0xa0] ss:$16 sps:$4 sm:$0xff]   ;;  %v10945_v33 = vld [vmem:[%s14449_s2 + $0xa8] ss:$16 sps:$4 sm:$0xff]  }
 0x331   :  { %6086 = vmatprep.subr.bf16.mxu0 %v10910_v21  ;;  %6189 = vmatprep.subr.bf16.mxu1 %v10911_v57  ;;  %v10946_v21 = vld [vmem:[%s14449_s2 + $0xc4] ss:$16 sps:$4 sm:$0xff]   ;;  %v10947_v57 = vld [vmem:[%s14449_s2 + $0xcc] ss:$16 sps:$4 sm:$0xff]  }
 0x334   :  { %6087 = vmatpush1.bf16.msra.mxu0 %v10912_v27  ;;  %6190 = vmatpush1.bf16.msra.mxu1 %v10913_v23  ;;  %v10948_v27 = vld [vmem:[%s14449_s2 + $0xc0] ss:$16 sps:$4 sm:$0xff]   ;;  %v10949_v23 = vld [vmem:[%s14449_s2 + $0xc8] ss:$16 sps:$4 sm:$0xff]  }
 0x335   :  { %6088 = vmatprep.subr.bf16.mxu0 %v10914_v30  ;;  %6191 = vmatprep.subr.bf16.mxu1 %v10915_v39  ;;  %v10950_v30 = vld [vmem:[%s14449_s2 + $0xe4] ss:$16 sps:$4 sm:$0xff]   ;;  %v10951_v39 = vld [vmem:[%s14449_s2 + $0xec] ss:$16 sps:$4 sm:$0xff]  }
 0x338   :  { %6089 = vmatpush1.bf16.msra.mxu0 %v10916_v49  ;;  %6192 = vmatpush1.bf16.msra.mxu1 %v10917_v42  ;;  %v10952_v49 = vld [vmem:[%s14449_s2 + $0xe0] ss:$16 sps:$4 sm:$0xff]   ;;  %v10953_v42 = vld [vmem:[%s14449_s2 + $0xe8] ss:$16 sps:$4 sm:$0xff]  }
 0x339   :  { %6090 = vmatprep.subr.bf16.mxu0 %v10918_v38  ;;  %6193 = vmatprep.subr.bf16.mxu1 %v10919_v36  ;;  %v10954_v38 = vld [vmem:[%s14449_s2 + $0x104] ss:$16 sps:$4 sm:$0xff]   ;;  %v10955_v36 = vld [vmem:[%s14449_s2 + $0x10c] ss:$16 sps:$4 sm:$0xff]  }
 0x33c   :  { %6091 = vmatpush1.bf16.msra.mxu0 %v10920_v61  ;;  %6194 = vmatpush1.bf16.msra.mxu1 %v10921_v32  ;;  %v10956_v61 = vld [vmem:[%s14449_s2 + $0x100] ss:$16 sps:$4 sm:$0xff]   ;;  %v10957_v32 = vld [vmem:[%s14449_s2 + $0x108] ss:$16 sps:$4 sm:$0xff]  }
 0x33d   :  { %6266 = vmatprep.subr.bf16.mxu0 %v10922_v3  ;;  %6369 = vmatprep.subr.bf16.mxu1 %v10923_v56  ;;  %v10958_v3 = vld [vmem:[%s14449_s2 + $0x124] ss:$16 sps:$4 sm:$0xff]   ;;  %v10959_v56 = vld [vmem:[%s14449_s2 + $0x12c] ss:$16 sps:$4 sm:$0xff]  }
 0x33f   :  { %6093 = vmatmul.mubr.bf16.vlgmr.msra.gmra.mrb[140].mxu0 %v14537_v12  ;;  %6196 = vmatmul.mubr.bf16.vlgmr.msra.gmra.mrb[140].mxu1 %v14537_v12  ;;  %v10927_v12 = vld [vmem:[%s14449_s2 + $0x2c] ss:$16 sps:$4 sm:$0xff]  }
 0x340   :  { %6102 = vmatprep.mubr.bf16.mxu0 %v14538_v34  ;;  %6205 = vmatprep.mubr.bf16.mxu1 %v14538_v34 }
 0x341   :  { %6267 = vmatpush1.bf16.msra.mxu0 %v10924_v31  ;;  %6370 = vmatpush1.bf16.msra.mxu1 %v10925_v47  ;;  %v10960_v31 = vld [vmem:[%s14449_s2 + $0x120] ss:$16 sps:$4 sm:$0xff]   ;;  %v10961_v47 = vld [vmem:[%s14449_s2 + $0x128] ss:$16 sps:$4 sm:$0xff]  }
 0x342   :  { %6268 = vmatprep.subr.bf16.mxu0 %v10926_v19  ;;  %6371 = vmatprep.subr.bf16.mxu1 %v10927_v12  ;;  %v10962_v19 = vld [vmem:[%s14449_s2 + $0x144] ss:$16 sps:$4 sm:$0xff]   ;;  %v10963_v12 = vld [vmem:[%s14449_s2 + $0x14c] ss:$16 sps:$4 sm:$0xff]  }
 0x345   :  { %6269 = vmatpush1.bf16.msra.mxu0 %v10928_v18  ;;  %6372 = vmatpush1.bf16.msra.mxu1 %v10929_v4  ;;  %v10964_v18 = vld [vmem:[%s14449_s2 + $0x140] ss:$16 sps:$4 sm:$0xff]   ;;  %v10965_v4 = vld [vmem:[%s14449_s2 + $0x148] ss:$16 sps:$4 sm:$0xff]  }
 0x346   :  { %6270 = vmatprep.subr.bf16.mxu0 %v10930_v1  ;;  %6373 = vmatprep.subr.bf16.mxu1 %v10931_v40  ;;  %v10966_v1 = vld [vmem:[%s14449_s2 + $0x164] ss:$16 sps:$4 sm:$0xff]   ;;  %v10967_v40 = vld [vmem:[%s14449_s2 + $0x16c] ss:$16 sps:$4 sm:$0xff]  }
 0x347   :  { %6103 = vmatmul.mubr.bf16.gmra.mrb[144].mxu0 %v14539_v53  ;;  %6206 = vmatmul.mubr.bf16.gmra.mrb[144].mxu1 %v14539_v53 }
 0x348   :  { %6112 = vmatprep.mubr.bf16.mxu0 %v14540_v22  ;;  %6215 = vmatprep.mubr.bf16.mxu1 %v14540_v22 }
 0x349   :  { %6271 = vmatpush1.bf16.msra.mxu0 %v10932_v43  ;;  %6374 = vmatpush1.bf16.msra.mxu1 %v10933_v54  ;;  %v10968_v43 = vld [vmem:[%s14449_s2 + $0x160] ss:$16 sps:$4 sm:$0xff]   ;;  %v10969_v54 = vld [vmem:[%s14449_s2 + $0x168] ss:$16 sps:$4 sm:$0xff]  }
 0x34a   :  { %6272 = vmatprep.subr.bf16.mxu0 %v10934_v14  ;;  %6375 = vmatprep.subr.bf16.mxu1 %v10935_v2  ;;  %v10970_v14 = vld [vmem:[%s14449_s2 + $0x184] ss:$16 sps:$4 sm:$0xff]   ;;  %v10971_v2 = vld [vmem:[%s14449_s2 + $0x18c] ss:$16 sps:$4 sm:$0xff]  }
 0x34d   :  { %6273 = vmatpush1.bf16.msra.mxu0 %v10936_v48  ;;  %6376 = vmatpush1.bf16.msra.mxu1 %v10937_v9  ;;  %v10972_v48 = vld [vmem:[%s14449_s2 + $0x180] ss:$16 sps:$4 sm:$0xff]   ;;  %v10973_v9 = vld [vmem:[%s14449_s2 + $0x188] ss:$16 sps:$4 sm:$0xff]  }
 0x34e   :  { %6274 = vmatprep.subr.bf16.mxu0 %v10938_v35  ;;  %6377 = vmatprep.subr.bf16.mxu1 %v10939_v0  ;;  %v10974_v35 = vld [vmem:[%s14449_s2 + $0x1a4] ss:$16 sps:$4 sm:$0xff]   ;;  %v10975_v0 = vld [vmem:[%s14449_s2 + $0x1ac] ss:$16 sps:$4 sm:$0xff]  }
 0x34f   :  { %6113 = vmatmul.mubr.bf16.gmra.mrb[148].mxu0 %v14541_v15  ;;  %6216 = vmatmul.mubr.bf16.gmra.mrb[148].mxu1 %v14541_v15 }
 0x350   :  { %6122 = vmatprep.mubr.bf16.mxu0 %v14542_v24  ;;  %6225 = vmatprep.mubr.bf16.mxu1 %v14542_v24 }
 0x351   :  { %6275 = vmatpush1.bf16.msra.mxu0 %v10940_v50  ;;  %6378 = vmatpush1.bf16.msra.mxu1 %v10941_v20  ;;  %v10976_v50 = vld [vmem:[%s14449_s2 + $0x1a0] ss:$16 sps:$4 sm:$0xff]   ;;  %v10977_v20 = vld [vmem:[%s14449_s2 + $0x1a8] ss:$16 sps:$4 sm:$0xff]  }
 0x352   :  { %6276 = vmatprep.subr.bf16.mxu0 %v10942_v28  ;;  %6379 = vmatprep.subr.bf16.mxu1 %v10943_v29  ;;  %v10978_v28 = vld [vmem:[%s14449_s2 + $0x1c4] ss:$16 sps:$4 sm:$0xff]   ;;  %v10979_v29 = vld [vmem:[%s14449_s2 + $0x1cc] ss:$16 sps:$4 sm:$0xff]  }
 0x355   :  { %6277 = vmatpush1.bf16.msra.mxu0 %v10944_v37  ;;  %6380 = vmatpush1.bf16.msra.mxu1 %v10945_v33  ;;  %v10980_v37 = vld [vmem:[%s14449_s2 + $0x1c0] ss:$16 sps:$4 sm:$0xff]   ;;  %v10981_v33 = vld [vmem:[%s14449_s2 + $0x1c8] ss:$16 sps:$4 sm:$0xff]  }
 0x356   :  { %6278 = vmatprep.subr.bf16.mxu0 %v10946_v21  ;;  %6381 = vmatprep.subr.bf16.mxu1 %v10947_v57  ;;  %v10982_v21 = vld [vmem:[%s14449_s2 + $0x1e4] ss:$16 sps:$4 sm:$0xff]   ;;  %v10983_v57 = vld [vmem:[%s14449_s2 + $0x1ec] ss:$16 sps:$4 sm:$0xff]  }
 0x357   :  { %6123 = vmatmul.mubr.bf16.gmra.mrb[152].mxu0 %v14543_v5  ;;  %6226 = vmatmul.mubr.bf16.gmra.mrb[152].mxu1 %v14543_v5 }
 0x358   :  { %6132 = vmatprep.mubr.bf16.mxu0 %v14544_v55  ;;  %6235 = vmatprep.mubr.bf16.mxu1 %v14544_v55 }
 0x359   :  { %6279 = vmatpush1.bf16.msra.mxu0 %v10948_v27  ;;  %6382 = vmatpush1.bf16.msra.mxu1 %v10949_v23  ;;  %v10984_v27 = vld [vmem:[%s14449_s2 + $0x1e0] ss:$16 sps:$4 sm:$0xff]   ;;  %v10985_v23 = vld [vmem:[%s14449_s2 + $0x1e8] ss:$16 sps:$4 sm:$0xff]  }
 0x35a   :  { %6280 = vmatprep.subr.bf16.mxu0 %v10950_v30  ;;  %6383 = vmatprep.subr.bf16.mxu1 %v10951_v39  ;;  %v10986_v30 = vld [vmem:[%s14449_s2 + $0x404] ss:$16 sps:$4 sm:$0xff]   ;;  %v10987_v39 = vld [vmem:[%s14449_s2 + $0x40c] ss:$16 sps:$4 sm:$0xff]  }
 0x35d   :  { %6281 = vmatpush1.bf16.msra.mxu0 %v10952_v49  ;;  %6384 = vmatpush1.bf16.msra.mxu1 %v10953_v42  ;;  %v10988_v49 = vld [vmem:[%s14449_s2 + $0x400] ss:$16 sps:$4 sm:$0xff]   ;;  %v10989_v42 = vld [vmem:[%s14449_s2 + $0x408] ss:$16 sps:$4 sm:$0xff]  }
 0x35e   :  { %6282 = vmatprep.subr.bf16.mxu0 %v10954_v38  ;;  %6385 = vmatprep.subr.bf16.mxu1 %v10955_v36  ;;  %v10990_v38 = vld [vmem:[%s14449_s2 + $0x424] ss:$16 sps:$4 sm:$0xff]   ;;  %v10991_v36 = vld [vmem:[%s14449_s2 + $0x42c] ss:$16 sps:$4 sm:$0xff]  }
 0x35f   :  { %6133 = vmatmul.mubr.bf16.gmra.mrb[156].mxu0 %v14545_v44  ;;  %6236 = vmatmul.mubr.bf16.gmra.mrb[156].mxu1 %v14545_v44 }
 0x360   :  { %6142 = vmatprep.mubr.bf16.mxu0 %v14546_v10  ;;  %6245 = vmatprep.mubr.bf16.mxu1 %v14546_v10 }
 0x361   :  { %6283 = vmatpush1.bf16.msra.mxu0 %v10956_v61  ;;  %6386 = vmatpush1.bf16.msra.mxu1 %v10957_v32  ;;  %v10992_v61 = vld [vmem:[%s14449_s2 + $0x420] ss:$16 sps:$4 sm:$0xff]   ;;  %v10993_v32 = vld [vmem:[%s14449_s2 + $0x428] ss:$16 sps:$4 sm:$0xff]  }
 0x362   :  { %6284 = vmatprep.subr.bf16.mxu0 %v10958_v3  ;;  %6387 = vmatprep.subr.bf16.mxu1 %v10959_v56  ;;  %v10994_v3 = vld [vmem:[%s14449_s2 + $0x444] ss:$16 sps:$4 sm:$0xff]   ;;  %v10995_v56 = vld [vmem:[%s14449_s2 + $0x44c] ss:$16 sps:$4 sm:$0xff]  }
 0x365   :  { %6285 = vmatpush1.bf16.msra.mxu0 %v10960_v31  ;;  %6388 = vmatpush1.bf16.msra.mxu1 %v10961_v47  ;;  %v10996_v31 = vld [vmem:[%s14449_s2 + $0x440] ss:$16 sps:$4 sm:$0xff]   ;;  %v10997_v47 = vld [vmem:[%s14449_s2 + $0x448] ss:$16 sps:$4 sm:$0xff]  }
 0x366   :  { %6286 = vmatprep.subr.bf16.mxu0 %v10962_v19  ;;  %6389 = vmatprep.subr.bf16.mxu1 %v10963_v12  ;;  %v10998_v19 = vld [vmem:[%s14449_s2 + $0x464] ss:$16 sps:$4 sm:$0xff]   ;;  %v10999_v12 = vld [vmem:[%s14449_s2 + $0x46c] ss:$16 sps:$4 sm:$0xff]  }
 0x367   :  { %6143 = vmatmul.mubr.bf16.gmra.mrb[160].mxu0 %v14547_v60  ;;  %6246 = vmatmul.mubr.bf16.gmra.mrb[160].mxu1 %v14547_v60 }
 0x368   :  { %6152 = vmatprep.mubr.bf16.mxu0 %v14548_v51  ;;  %6255 = vmatprep.mubr.bf16.mxu1 %v14548_v51 }
 0x369   :  { %6287 = vmatpush1.bf16.msra.mxu0 %v10964_v18  ;;  %6390 = vmatpush1.bf16.msra.mxu1 %v10965_v4  ;;  %v11000_v18 = vld [vmem:[%s14449_s2 + $0x460] ss:$16 sps:$4 sm:$0xff]   ;;  %v11001_v4 = vld [vmem:[%s14449_s2 + $0x468] ss:$16 sps:$4 sm:$0xff]  }
 0x36a   :  { %6288 = vmatprep.subr.bf16.mxu0 %v10966_v1  ;;  %6391 = vmatprep.subr.bf16.mxu1 %v10967_v40  ;;  %v11002_v1 = vld [vmem:[%s14449_s2 + $0x484] ss:$16 sps:$4 sm:$0xff]   ;;  %v11003_v40 = vld [vmem:[%s14449_s2 + $0x48c] ss:$16 sps:$4 sm:$0xff]  }
 0x36d   :  { %6289 = vmatpush1.bf16.msra.mxu0 %v10968_v43  ;;  %6392 = vmatpush1.bf16.msra.mxu1 %v10969_v54  ;;  %v11004_v43 = vld [vmem:[%s14449_s2 + $0x480] ss:$16 sps:$4 sm:$0xff]   ;;  %v11005_v54 = vld [vmem:[%s14449_s2 + $0x488] ss:$16 sps:$4 sm:$0xff]  }
 0x36e   :  { %6290 = vmatprep.subr.bf16.mxu0 %v10970_v14  ;;  %6393 = vmatprep.subr.bf16.mxu1 %v10971_v2  ;;  %v11006_v14 = vld [vmem:[%s14449_s2 + $0x4a4] ss:$16 sps:$4 sm:$0xff]   ;;  %v11007_v2 = vld [vmem:[%s14449_s2 + $0x4ac] ss:$16 sps:$4 sm:$0xff]  }
 0x36f   :  { %6153 = vmatmul.mubr.bf16.gmra.mrb[164].mxu0 %v14549_v63  ;;  %6256 = vmatmul.mubr.bf16.gmra.mrb[164].mxu1 %v14549_v63 }
 0x370   :  { %6298 = vmatprep.mubr.bf16.mxu0 %v14535_v52  ;;  %6401 = vmatprep.mubr.bf16.mxu1 %v14535_v52 }
 0x371   :  { %6291 = vmatpush1.bf16.msra.mxu0 %v10972_v48  ;;  %6394 = vmatpush1.bf16.msra.mxu1 %v10973_v9  ;;  %v11008_v48 = vld [vmem:[%s14449_s2 + $0x4a0] ss:$16 sps:$4 sm:$0xff]   ;;  %v11009_v9 = vld [vmem:[%s14449_s2 + $0x4a8] ss:$16 sps:$4 sm:$0xff]  }
 0x372   :  { %6292 = vmatprep.subr.bf16.mxu0 %v10974_v35  ;;  %6395 = vmatprep.subr.bf16.mxu1 %v10975_v0  ;;  %v11010_v35 = vld [vmem:[%s14449_s2 + $0x4c4] ss:$16 sps:$4 sm:$0xff]   ;;  %v11011_v0 = vld [vmem:[%s14449_s2 + $0x4cc] ss:$16 sps:$4 sm:$0xff]  }
 0x375   :  { %6293 = vmatpush1.bf16.msra.mxu0 %v10976_v50  ;;  %6396 = vmatpush1.bf16.msra.mxu1 %v10977_v20  ;;  %v11012_v50 = vld [vmem:[%s14449_s2 + $0x4c0] ss:$16 sps:$4 sm:$0xff]   ;;  %v11013_v20 = vld [vmem:[%s14449_s2 + $0x4c8] ss:$16 sps:$4 sm:$0xff]  }
 0x376   :  { %6294 = vmatprep.subr.bf16.mxu0 %v10978_v28  ;;  %6397 = vmatprep.subr.bf16.mxu1 %v10979_v29  ;;  %v11014_v28 = vld [vmem:[%s14449_s2 + $0x4e4] ss:$16 sps:$4 sm:$0xff]   ;;  %v11015_v29 = vld [vmem:[%s14449_s2 + $0x4ec] ss:$16 sps:$4 sm:$0xff]  }
 0x379   :  { %6295 = vmatpush1.bf16.msra.mxu0 %v10980_v37  ;;  %6398 = vmatpush1.bf16.msra.mxu1 %v10981_v33  ;;  %v11016_v37 = vld [vmem:[%s14449_s2 + $0x4e0] ss:$16 sps:$4 sm:$0xff]   ;;  %v11017_v33 = vld [vmem:[%s14449_s2 + $0x4e8] ss:$16 sps:$4 sm:$0xff]  }
 0x37a   :  { %6296 = vmatprep.subr.bf16.mxu0 %v10982_v21  ;;  %6399 = vmatprep.subr.bf16.mxu1 %v10983_v57  ;;  %v11018_v21 = vld [vmem:[%s14449_s2 + $0x504] ss:$16 sps:$4 sm:$0xff]   ;;  %v11019_v57 = vld [vmem:[%s14449_s2 + $0x50c] ss:$16 sps:$4 sm:$0xff]  }
 0x37d   :  { %6297 = vmatpush1.bf16.msra.mxu0 %v10984_v27  ;;  %6400 = vmatpush1.bf16.msra.mxu1 %v10985_v23  ;;  %v11020_v27 = vld [vmem:[%s14449_s2 + $0x500] ss:$16 sps:$4 sm:$0xff]   ;;  %v11021_v23 = vld [vmem:[%s14449_s2 + $0x508] ss:$16 sps:$4 sm:$0xff]  }
 0x37e   :  { %6472 = vmatprep.subr.bf16.mxu0 %v10986_v30  ;;  %6575 = vmatprep.subr.bf16.mxu1 %v10987_v39  ;;  %v11022_v30 = vld [vmem:[%s14449_s2 + $0x524] ss:$16 sps:$4 sm:$0xff]   ;;  %v11023_v39 = vld [vmem:[%s14449_s2 + $0x52c] ss:$16 sps:$4 sm:$0xff]  }
 0x380   :  { %6299 = vmatmul.mubr.bf16.vlgmr.msra.gmra.mrb[140].mxu0 %v14535_v52  ;;  %6402 = vmatmul.mubr.bf16.vlgmr.msra.gmra.mrb[140].mxu1 %v14535_v52 }
 0x381   :  { %6308 = vmatprep.mubr.bf16.mxu0 %v12321_v17  ;;  %6411 = vmatprep.mubr.bf16.mxu1 %v12321_v17 }
 0x382   :  { %6473 = vmatpush1.bf16.msra.mxu0 %v10988_v49  ;;  %6576 = vmatpush1.bf16.msra.mxu1 %v10989_v42  ;;  %v11024_v49 = vld [vmem:[%s14449_s2 + $0x520] ss:$16 sps:$4 sm:$0xff]   ;;  %v11025_v42 = vld [vmem:[%s14449_s2 + $0x528] ss:$16 sps:$4 sm:$0xff]  }
 0x383   :  { %6474 = vmatprep.subr.bf16.mxu0 %v10990_v38  ;;  %6577 = vmatprep.subr.bf16.mxu1 %v10991_v36  ;;  %v11026_v38 = vld [vmem:[%s14449_s2 + $0x544] ss:$16 sps:$4 sm:$0xff]   ;;  %v11027_v36 = vld [vmem:[%s14449_s2 + $0x54c] ss:$16 sps:$4 sm:$0xff]  }
 0x386   :  { %6475 = vmatpush1.bf16.msra.mxu0 %v10992_v61  ;;  %6578 = vmatpush1.bf16.msra.mxu1 %v10993_v32  ;;  %v11028_v61 = vld [vmem:[%s14449_s2 + $0x540] ss:$16 sps:$4 sm:$0xff]   ;;  %v11029_v32 = vld [vmem:[%s14449_s2 + $0x548] ss:$16 sps:$4 sm:$0xff]  }
 0x387   :  { %6476 = vmatprep.subr.bf16.mxu0 %v10994_v3  ;;  %6579 = vmatprep.subr.bf16.mxu1 %v10995_v56  ;;  %v11030_v3 = vld [vmem:[%s14449_s2 + $0x564] ss:$16 sps:$4 sm:$0xff]   ;;  %v11031_v56 = vld [vmem:[%s14449_s2 + $0x56c] ss:$16 sps:$4 sm:$0xff]  }
 0x388   :  { %6309 = vmatmul.mubr.bf16.gmra.mrb[144].mxu0 %v12317_v7  ;;  %6412 = vmatmul.mubr.bf16.gmra.mrb[144].mxu1 %v12317_v7 }
 0x389   :  { %6318 = vmatprep.mubr.bf16.mxu0 %v12341_v8  ;;  %6421 = vmatprep.mubr.bf16.mxu1 %v12341_v8 }
 0x38a   :  { %6477 = vmatpush1.bf16.msra.mxu0 %v10996_v31  ;;  %6580 = vmatpush1.bf16.msra.mxu1 %v10997_v47  ;;  %v11032_v31 = vld [vmem:[%s14449_s2 + $0x560] ss:$16 sps:$4 sm:$0xff]   ;;  %v11033_v47 = vld [vmem:[%s14449_s2 + $0x568] ss:$16 sps:$4 sm:$0xff]  }
 0x38b   :  { %6478 = vmatprep.subr.bf16.mxu0 %v10998_v19  ;;  %6581 = vmatprep.subr.bf16.mxu1 %v10999_v12  ;;  %v11034_v19 = vld [vmem:[%s14449_s2 + $0x584] ss:$16 sps:$4 sm:$0xff]   ;;  %v11035_v12 = vld [vmem:[%s14449_s2 + $0x58c] ss:$16 sps:$4 sm:$0xff]  }
 0x38e   :  { %6479 = vmatpush1.bf16.msra.mxu0 %v11000_v18  ;;  %6582 = vmatpush1.bf16.msra.mxu1 %v11001_v4  ;;  %v11036_v18 = vld [vmem:[%s14449_s2 + $0x580] ss:$16 sps:$4 sm:$0xff]   ;;  %v11037_v4 = vld [vmem:[%s14449_s2 + $0x588] ss:$16 sps:$4 sm:$0xff]  }
 0x38f   :  { %6480 = vmatprep.subr.bf16.mxu0 %v11002_v1  ;;  %6583 = vmatprep.subr.bf16.mxu1 %v11003_v40  ;;  %v11038_v1 = vld [vmem:[%s14449_s2 + $0x5a4] ss:$16 sps:$4 sm:$0xff]   ;;  %v11039_v40 = vld [vmem:[%s14449_s2 + $0x5ac] ss:$16 sps:$4 sm:$0xff]  }
 0x390   :  { %6319 = vmatmul.mubr.bf16.gmra.mrb[148].mxu0 %v12337_v6  ;;  %6422 = vmatmul.mubr.bf16.gmra.mrb[148].mxu1 %v12337_v6 }
 0x391   :  { %6328 = vmatprep.mubr.bf16.mxu0 %v12361_v25  ;;  %6431 = vmatprep.mubr.bf16.mxu1 %v12361_v25 }
 0x392   :  { %6481 = vmatpush1.bf16.msra.mxu0 %v11004_v43  ;;  %6584 = vmatpush1.bf16.msra.mxu1 %v11005_v54  ;;  %v11041_v43 = vld [vmem:[%s14449_s2 + $0x5a8] ss:$16 sps:$4 sm:$0xff]   ;;  %v11042_v54 = vld [vmem:[%s14449_s2 + $0x5c4] ss:$16 sps:$4 sm:$0xff]  }
 0x393   :  { %6482 = vmatprep.subr.bf16.mxu0 %v11006_v14  ;;  %6585 = vmatprep.subr.bf16.mxu1 %v11007_v2  ;;  %v11043_v14 = vld [vmem:[%s14449_s2 + $0x5cc] ss:$16 sps:$4 sm:$0xff]   ;;  %v11044_v2 = vld [vmem:[%s14449_s2 + $0x5c0] ss:$16 sps:$4 sm:$0xff]  }
 0x396   :  { %6483 = vmatpush1.bf16.msra.mxu0 %v11008_v48  ;;  %6586 = vmatpush1.bf16.msra.mxu1 %v11009_v9  ;;  %v11045_v48 = vld [vmem:[%s14449_s2 + $0x5c8] ss:$16 sps:$4 sm:$0xff]   ;;  %v11046_v9 = vld [vmem:[%s14449_s2 + $0x5e4] ss:$16 sps:$4 sm:$0xff]  }
 0x397   :  { %6484 = vmatprep.subr.bf16.mxu0 %v11010_v35  ;;  %6587 = vmatprep.subr.bf16.mxu1 %v11011_v0  ;;  %v11047_v35 = vld [vmem:[%s14449_s2 + $0x5ec] ss:$16 sps:$4 sm:$0xff]   ;;  %v11048_v0 = vld [vmem:[%s14449_s2 + $0x5e0] ss:$16 sps:$4 sm:$0xff]  }
 0x398   :  { %6329 = vmatmul.mubr.bf16.gmra.mrb[152].mxu0 %v12357_v13  ;;  %6432 = vmatmul.mubr.bf16.gmra.mrb[152].mxu1 %v12357_v13 }
 0x399   :  { %6338 = vmatprep.mubr.bf16.mxu0 %v12381_v26  ;;  %6441 = vmatprep.mubr.bf16.mxu1 %v12381_v26 }
 0x39a   :  { %6485 = vmatpush1.bf16.msra.mxu0 %v11012_v50  ;;  %6588 = vmatpush1.bf16.msra.mxu1 %v11013_v20  ;;  %v11049_v50 = vld [vmem:[%s14449_s2 + $0x5e8] ss:$16 sps:$4 sm:$0xff]   ;;  %v11050_v20 = vld [vmem:[%s14449_s2 + $0x604] ss:$16 sps:$4 sm:$0xff]  }
 0x39b   :  { %6486 = vmatprep.subr.bf16.mxu0 %v11014_v28  ;;  %6589 = vmatprep.subr.bf16.mxu1 %v11015_v29  ;;  %v11051_v28 = vld [vmem:[%s14449_s2 + $0x60c] ss:$16 sps:$4 sm:$0xff]   ;;  %v11052_v29 = vld [vmem:[%s14449_s2 + $0x600] ss:$16 sps:$4 sm:$0xff]  }
 0x39e   :  { %6487 = vmatpush1.bf16.msra.mxu0 %v11016_v37  ;;  %6590 = vmatpush1.bf16.msra.mxu1 %v11017_v33  ;;  %v11053_v37 = vld [vmem:[%s14449_s2 + $0x608] ss:$16 sps:$4 sm:$0xff]   ;;  %v11054_v33 = vld [vmem:[%s14449_s2 + $0x624] ss:$16 sps:$4 sm:$0xff]  }
 0x39f   :  { %6488 = vmatprep.subr.bf16.mxu0 %v11018_v21  ;;  %6591 = vmatprep.subr.bf16.mxu1 %v11019_v57  ;;  %v11056_v21 = vld [vmem:[%s14449_s2 + $0x620] ss:$16 sps:$4 sm:$0xff]   ;;  %v11057_v57 = vld [vmem:[%s14449_s2 + $0x628] ss:$16 sps:$4 sm:$0xff]  }
 0x3a0   :  { %6339 = vmatmul.mubr.bf16.gmra.mrb[156].mxu0 %v12377_v16  ;;  %6442 = vmatmul.mubr.bf16.gmra.mrb[156].mxu1 %v12377_v16 }
 0x3a1   :  { %6348 = vmatprep.mubr.bf16.mxu0 %v12401_v41  ;;  %6451 = vmatprep.mubr.bf16.mxu1 %v12401_v41 }
 0x3a2   :  { %6489 = vmatpush1.bf16.msra.mxu0 %v11020_v27  ;;  %6592 = vmatpush1.bf16.msra.mxu1 %v11021_v23  ;;  %v11058_v27 = vld [vmem:[%s14449_s2 + $0x644] ss:$16 sps:$4 sm:$0xff]   ;;  %v11059_v23 = vld [vmem:[%s14449_s2 + $0x64c] ss:$16 sps:$4 sm:$0xff]  }
 0x3a3   :  { %6490 = vmatprep.subr.bf16.mxu0 %v11022_v30  ;;  %6593 = vmatprep.subr.bf16.mxu1 %v11023_v39  ;;  %v11060_v30 = vld [vmem:[%s14449_s2 + $0x640] ss:$16 sps:$4 sm:$0xff]   ;;  %v11061_v39 = vld [vmem:[%s14449_s2 + $0x648] ss:$16 sps:$4 sm:$0xff]  }
 0x3a6   :  { %6491 = vmatpush1.bf16.msra.mxu0 %v11024_v49  ;;  %6594 = vmatpush1.bf16.msra.mxu1 %v11025_v42  ;;  %v11062_v49 = vld [vmem:[%s14449_s2 + $0x664] ss:$16 sps:$4 sm:$0xff]   ;;  %v11063_v42 = vld [vmem:[%s14449_s2 + $0x66c] ss:$16 sps:$4 sm:$0xff]  }
 0x3a7   :  { %6492 = vmatprep.subr.bf16.mxu0 %v11026_v38  ;;  %6595 = vmatprep.subr.bf16.mxu1 %v11027_v36  ;;  %v11064_v38 = vld [vmem:[%s14449_s2 + $0x660] ss:$16 sps:$4 sm:$0xff]   ;;  %v11065_v36 = vld [vmem:[%s14449_s2 + $0x668] ss:$16 sps:$4 sm:$0xff]  }
 0x3a8   :  { %6349 = vmatmul.mubr.bf16.gmra.mrb[160].mxu0 %v12397_v59  ;;  %6452 = vmatmul.mubr.bf16.gmra.mrb[160].mxu1 %v12397_v59 }
 0x3a9   :  { %6358 = vmatprep.mubr.bf16.mxu0 %v12421_v46  ;;  %6461 = vmatprep.mubr.bf16.mxu1 %v12421_v46 }
 0x3aa   :  { %6493 = vmatpush1.bf16.msra.mxu0 %v11028_v61  ;;  %6596 = vmatpush1.bf16.msra.mxu1 %v11029_v32  ;;  %v11066_v61 = vld [vmem:[%s14449_s2 + $0x684] ss:$16 sps:$4 sm:$0xff]   ;;  %v11067_v32 = vld [vmem:[%s14449_s2 + $0x68c] ss:$16 sps:$4 sm:$0xff]  }
 0x3ab   :  { %6494 = vmatprep.subr.bf16.mxu0 %v11030_v3  ;;  %6597 = vmatprep.subr.bf16.mxu1 %v11031_v56 }
 0x3ae   :  { %6495 = vmatpush1.bf16.msra.mxu0 %v11032_v31  ;;  %6598 = vmatpush1.bf16.msra.mxu1 %v11033_v47 }
 0x3af   :  { %6496 = vmatprep.subr.bf16.mxu0 %v11034_v19  ;;  %6599 = vmatprep.subr.bf16.mxu1 %v11035_v12  ;;  %v11068_v19 = vld [vmem:[%s14449_s2 + $0x680] ss:$16 sps:$4 sm:$0xff]   ;;  %v11069_v12 = vld [vmem:[%s14449_s2 + $0x688] ss:$16 sps:$4 sm:$0xff]  }
 0x3b0   :  { %6359 = vmatmul.mubr.bf16.gmra.mrb[164].mxu0 %v12417_v62  ;;  %6462 = vmatmul.mubr.bf16.gmra.mrb[164].mxu1 %v12417_v62 }
 0x3b1   :  { %6504 = vmatprep.mubr.bf16.mxu0 %v12321_v17  ;;  %6607 = vmatprep.mubr.bf16.mxu1 %v12321_v17  ;;  %v11040_v17 = vld [vmem:[%s14449_s2 + $0x5a0] ss:$16 sps:$4 sm:$0xff]  }
 0x3b2   :  { %6497 = vmatpush1.bf16.msra.mxu0 %v11036_v18  ;;  %6600 = vmatpush1.bf16.msra.mxu1 %v11037_v4 }
 0x3b3   :  { %6498 = vmatprep.subr.bf16.mxu0 %v11038_v1  ;;  %6601 = vmatprep.subr.bf16.mxu1 %v11039_v40  ;;  %v11070_v1 = vld [vmem:[%s14449_s2 + $0x6a4] ss:$16 sps:$4 sm:$0xff]   ;;  %v11071_v40 = vld [vmem:[%s14449_s2 + $0x6ac] ss:$16 sps:$4 sm:$0xff]  }
 0x3b6   :  { %6499 = vmatpush1.bf16.msra.mxu0 %v11040_v17  ;;  %6602 = vmatpush1.bf16.msra.mxu1 %v11041_v43 }
 0x3b7   :  { %6500 = vmatprep.subr.bf16.mxu0 %v11042_v54  ;;  %6603 = vmatprep.subr.bf16.mxu1 %v11043_v14  ;;  %v11072_v54 = vld [vmem:[%s14449_s2 + $0x6a0] ss:$16 sps:$4 sm:$0xff]   ;;  %v11073_v14 = vld [vmem:[%s14449_s2 + $0x6a8] ss:$16 sps:$4 sm:$0xff]  }
 0x3ba   :  { %6501 = vmatpush1.bf16.msra.mxu0 %v11044_v2  ;;  %6604 = vmatpush1.bf16.msra.mxu1 %v11045_v48  ;;  %v11074_v2 = vld [vmem:[%s14449_s2 + $0x6c4] ss:$16 sps:$4 sm:$0xff]   ;;  %v11075_v48 = vld [vmem:[%s14449_s2 + $0x6cc] ss:$16 sps:$4 sm:$0xff]  }
 0x3bb   :  { %6502 = vmatprep.subr.bf16.mxu0 %v11046_v9  ;;  %6605 = vmatprep.subr.bf16.mxu1 %v11047_v35 }
 0x3be   :  { %6503 = vmatpush1.bf16.msra.mxu0 %v11048_v0  ;;  %6606 = vmatpush1.bf16.msra.mxu1 %v11049_v50 }
 0x3bf   :  { %6734 = vmatprep.subr.bf16.mxu0 %v11050_v20  ;;  %6837 = vmatprep.subr.bf16.mxu1 %v11051_v28  ;;  %v11076_v20 = vld [vmem:[%s14449_s2 + $0x6c0] ss:$16 sps:$4 sm:$0xff]   ;;  %v11077_v28 = vld [vmem:[%s14449_s2 + $0x6c8] ss:$16 sps:$4 sm:$0xff]  }
 0x3c1   :  { %6505 = vmatmul.mubr.bf16.vlgmr.msra.gmra.mrb[140].mxu0 %v12317_v7  ;;  %6608 = vmatmul.mubr.bf16.vlgmr.msra.gmra.mrb[140].mxu1 %v12317_v7  ;;  %v11055_v7 = vld [vmem:[%s14449_s2 + $0x62c] ss:$16 sps:$4 sm:$0xff]  }
 0x3c2   :  { %6514 = vmatprep.mubr.bf16.mxu0 %v12341_v8  ;;  %6617 = vmatprep.mubr.bf16.mxu1 %v12341_v8 }
 0x3c3   :  { %6735 = vmatpush1.bf16.msra.mxu0 %v11052_v29  ;;  %6838 = vmatpush1.bf16.msra.mxu1 %v11053_v37 }
 0x3c4   :  { %6736 = vmatprep.subr.bf16.mxu0 %v11054_v33  ;;  %6839 = vmatprep.subr.bf16.mxu1 %v11055_v7  ;;  %v11078_v33 = vld [vmem:[%s14449_s2 + $0x6e4] ss:$16 sps:$4 sm:$0xff]   ;;  %v11079_v7 = vld [vmem:[%s14449_s2 + $0x6ec] ss:$16 sps:$4 sm:$0xff]  }
 0x3c7   :  { %6737 = vmatpush1.bf16.msra.mxu0 %v11056_v21  ;;  %6840 = vmatpush1.bf16.msra.mxu1 %v11057_v57 }
 0x3c8   :  { %6738 = vmatprep.subr.bf16.mxu0 %v11058_v27  ;;  %6841 = vmatprep.subr.bf16.mxu1 %v11059_v23  ;;  %v11080_v27 = vld [vmem:[%s14449_s2 + $0x6e0] ss:$16 sps:$4 sm:$0xff]   ;;  %v11081_v23 = vld [vmem:[%s14449_s2 + $0x6e8] ss:$16 sps:$4 sm:$0xff]  }
 0x3c9   :  { %6515 = vmatmul.mubr.bf16.gmra.mrb[144].mxu0 %v12337_v6  ;;  %6618 = vmatmul.mubr.bf16.gmra.mrb[144].mxu1 %v12337_v6 }
 0x3ca   :  { %6524 = vmatprep.mubr.bf16.mxu0 %v12361_v25  ;;  %6627 = vmatprep.mubr.bf16.mxu1 %v12361_v25 }
 0x3cb   :  { %6739 = vmatpush1.bf16.msra.mxu0 %v11060_v30  ;;  %6842 = vmatpush1.bf16.msra.mxu1 %v11061_v39  ;;  %v11082_v30 = vld [vmem:[%s14449_s2 + $0x704] ss:$16 sps:$4 sm:$0xff]   ;;  %v11083_v39 = vld [vmem:[%s14449_s2 + $0x70c] ss:$16 sps:$4 sm:$0xff]  }
 0x3cc   :  { %6740 = vmatprep.subr.bf16.mxu0 %v11062_v49  ;;  %6843 = vmatprep.subr.bf16.mxu1 %v11063_v42 }
 0x3cf   :  { %6741 = vmatpush1.bf16.msra.mxu0 %v11064_v38  ;;  %6844 = vmatpush1.bf16.msra.mxu1 %v11065_v36 }
 0x3d0   :  { %6742 = vmatprep.subr.bf16.mxu0 %v11066_v61  ;;  %6845 = vmatprep.subr.bf16.mxu1 %v11067_v32  ;;  %v11084_v61 = vld [vmem:[%s14449_s2 + $0x700] ss:$16 sps:$4 sm:$0xff]   ;;  %v11085_v32 = vld [vmem:[%s14449_s2 + $0x708] ss:$16 sps:$4 sm:$0xff]  }
 0x3d1   :  { %6525 = vmatmul.mubr.bf16.gmra.mrb[148].mxu0 %v12357_v13  ;;  %6628 = vmatmul.mubr.bf16.gmra.mrb[148].mxu1 %v12357_v13  ;;  %v13816_v3 = vpop.f32.mrb[112].mxu0  ;;  %v13818_v56 = vpop.f32.mrb[112].mxu1 }
 0x3d2   :  { %6534 = vmatprep.mubr.bf16.mxu0 %v12381_v26  ;;  %6637 = vmatprep.mubr.bf16.mxu1 %v12381_v26  ;;  %v13822_v31 = vpop.f32.mrb[113].mxu0  ;;  %v13824_v47 = vpop.f32.mrb[113].mxu1 }
 0x3d3   :  { %6743 = vmatpush1.bf16.msra.mxu0 %v11068_v19  ;;  %6846 = vmatpush1.bf16.msra.mxu1 %v11069_v12  ;;  %v13832_v18 = vpop.f32.mrb[114].mxu0  ;;  %v13834_v4 = vpop.f32.mrb[114].mxu1 }
 0x3d4   :  { %6744 = vmatprep.subr.bf16.mxu0 %v11070_v1  ;;  %6847 = vmatprep.subr.bf16.mxu1 %v11071_v40  ;;  %v13842_v17 = vpop.f32.mrb[115].mxu0  ;;  %v13844_v43 = vpop.f32.mrb[115].mxu1  ;;  %v11086_v1 = vld [vmem:[%s14449_s2 + $0x724] ss:$16 sps:$4 sm:$0xff]   ;;  %v11087_v40 = vld [vmem:[%s14449_s2 + $0x72c] ss:$16 sps:$4 sm:$0xff]  }
 0x3d7   :  { %6745 = vmatpush1.bf16.msra.mxu0 %v11072_v54  ;;  %6848 = vmatpush1.bf16.msra.mxu1 %v11073_v14 }
 0x3d8   :  { %6746 = vmatprep.subr.bf16.mxu0 %v11074_v2  ;;  %6849 = vmatprep.subr.bf16.mxu1 %v11075_v48  ;;  %v11088_v2 = vld [vmem:[%s14449_s2 + $0x720] ss:$16 sps:$4 sm:$0xff]   ;;  %v11089_v48 = vld [vmem:[%s14449_s2 + $0x728] ss:$16 sps:$4 sm:$0xff]  }
 0x3d9   :  { %6535 = vmatmul.mubr.bf16.gmra.mrb[152].mxu0 %v12377_v16  ;;  %6638 = vmatmul.mubr.bf16.gmra.mrb[152].mxu1 %v12377_v16  ;;  %v13860_v9 = vpop.f32.mrb[116].mxu0  ;;  %v13862_v35 = vpop.f32.mrb[116].mxu1 }
 0x3da   :  { %6544 = vmatprep.mubr.bf16.mxu0 %v12401_v41  ;;  %6647 = vmatprep.mubr.bf16.mxu1 %v12401_v41  ;;  %v13866_v0 = vpop.f32.mrb[117].mxu0  ;;  %v13868_v50 = vpop.f32.mrb[117].mxu1 }
 0x3db   :  { %6747 = vmatpush1.bf16.msra.mxu0 %v11076_v20  ;;  %6850 = vmatpush1.bf16.msra.mxu1 %v11077_v28  ;;  %v13876_v29 = vpop.f32.mrb[118].mxu0  ;;  %v13878_v37 = vpop.f32.mrb[118].mxu1  ;;  %v11090_v20 = vld [vmem:[%s14449_s2 + $0x744] ss:$16 sps:$4 sm:$0xff]   ;;  %v11091_v28 = vld [vmem:[%s14449_s2 + $0x74c] ss:$16 sps:$4 sm:$0xff]  }
 0x3dc   :  { %6748 = vmatprep.subr.bf16.mxu0 %v11078_v33  ;;  %6851 = vmatprep.subr.bf16.mxu1 %v11079_v7  ;;  %v13886_v21 = vpop.f32.mrb[119].mxu0  ;;  %v13888_v57 = vpop.f32.mrb[119].mxu1 }
 0x3df   :  { %6749 = vmatpush1.bf16.msra.mxu0 %v11080_v27  ;;  %6852 = vmatpush1.bf16.msra.mxu1 %v11081_v23 }
 0x3e0   :  { %6750 = vmatprep.subr.bf16.mxu0 %v11082_v30  ;;  %6853 = vmatprep.subr.bf16.mxu1 %v11083_v39  ;;  %v11092_v30 = vld [vmem:[%s14449_s2 + $0x740] ss:$16 sps:$4 sm:$0xff]   ;;  %v11093_v39 = vld [vmem:[%s14449_s2 + $0x748] ss:$16 sps:$4 sm:$0xff]  }
 0x3e1   :  { %6545 = vmatmul.mubr.bf16.gmra.mrb[156].mxu0 %v12397_v59  ;;  %6648 = vmatmul.mubr.bf16.gmra.mrb[156].mxu1 %v12397_v59  ;;  %v13904_v49 = vpop.f32.mrb[120].mxu0  ;;  %v13906_v42 = vpop.f32.mrb[120].mxu1 }
 0x3e2   :  { %6554 = vmatprep.mubr.bf16.mxu0 %v12421_v46  ;;  %6657 = vmatprep.mubr.bf16.mxu1 %v12421_v46  ;;  %v13910_v38 = vpop.f32.mrb[121].mxu0  ;;  %v13912_v36 = vpop.f32.mrb[121].mxu1 }
 0x3e3   :  { %6751 = vmatpush1.bf16.msra.mxu0 %v11084_v61  ;;  %6854 = vmatpush1.bf16.msra.mxu1 %v11085_v32  ;;  %v13920_v19 = vpop.f32.mrb[122].mxu0  ;;  %v13922_v12 = vpop.f32.mrb[122].mxu1 }
 0x3e4   :  { %6752 = vmatprep.subr.bf16.mxu0 %v11086_v1  ;;  %6855 = vmatprep.subr.bf16.mxu1 %v11087_v40  ;;  %v13930_v54 = vpop.f32.mrb[123].mxu0  ;;  %v13932_v14 = vpop.f32.mrb[123].mxu1  ;;  %v11094_v1 = vld [vmem:[%s14449_s2 + $0x764] ss:$16 sps:$4 sm:$0xff]   ;;  %v11095_v40 = vld [vmem:[%s14449_s2 + $0x76c] ss:$16 sps:$4 sm:$0xff]  }
 0x3e7   :  { %6753 = vmatpush1.bf16.msra.mxu0 %v11088_v2  ;;  %6856 = vmatpush1.bf16.msra.mxu1 %v11089_v48 }
 0x3e8   :  { %6754 = vmatprep.subr.bf16.mxu0 %v11090_v20  ;;  %6857 = vmatprep.subr.bf16.mxu1 %v11091_v28  ;;  %v11096_v20 = vld [vmem:[%s14449_s2 + $0x760] ss:$16 sps:$4 sm:$0xff]   ;;  %v11097_v28 = vld [vmem:[%s14449_s2 + $0x768] ss:$16 sps:$4 sm:$0xff]  }
 0x3e9   :  { %6555 = vmatmul.mubr.bf16.gmra.mrb[160].mxu0 %v12417_v62  ;;  %6658 = vmatmul.mubr.bf16.gmra.mrb[160].mxu1 %v12417_v62  ;;  %v13948_v33 = vpop.f32.mrb[124].mxu0  ;;  %v13950_v7 = vpop.f32.mrb[124].mxu1 }
 0x3ea   :  { %6564 = vmatprep.mubr.bf16.mxu0 %v12436_v58  ;;  %6667 = vmatprep.mubr.bf16.mxu1 %v12436_v58  ;;  %v13954_v27 = vpop.f32.mrb[125].mxu0  ;;  %v13956_v23 = vpop.f32.mrb[125].mxu1 }
 0x3eb   :  { %6755 = vmatpush1.bf16.msra.mxu0 %v11092_v30  ;;  %6858 = vmatpush1.bf16.msra.mxu1 %v11093_v39  ;;  %v13964_v61 = vpop.f32.mrb[126].mxu0  ;;  %v13966_v32 = vpop.f32.mrb[126].mxu1  ;;  %v11098_v30 = vld [vmem:[%s14449_s2 + $0x784] ss:$16 sps:$4 sm:$0xff]   ;;  %v11099_v39 = vld [vmem:[%s14449_s2 + $0x78c] ss:$16 sps:$4 sm:$0xff]  }
 0x3ec   :  { %6756 = vmatprep.subr.bf16.mxu0 %v11094_v1  ;;  %6859 = vmatprep.subr.bf16.mxu1 %v11095_v40  ;;  %v13974_v2 = vpop.f32.mrb[127].mxu0  ;;  %v13976_v48 = vpop.f32.mrb[127].mxu1 }
 0x3ed   :  { %14550 = vst [vmem:[#allocation16_spill] sm:$0xff] %v13976_v48 }
 0x3ef   :  { %6757 = vmatpush1.bf16.msra.mxu0 %v11096_v20  ;;  %6860 = vmatpush1.bf16.msra.mxu1 %v11097_v28 }
 0x3f0   :  { %6758 = vmatprep.subr.bf16.mxu0 %v11098_v30  ;;  %6861 = vmatprep.subr.bf16.mxu1 %v11099_v39  ;;  %v11100_v30 = vld [vmem:[%s14449_s2 + $0x780] ss:$16 sps:$4 sm:$0xff]   ;;  %v11101_v39 = vld [vmem:[%s14449_s2 + $0x788] ss:$16 sps:$4 sm:$0xff]  }
 0x3f1   :  { %6565 = vmatmul.mubr.bf16.gmra.mrb[164].mxu0 %v12434_v11  ;;  %6668 = vmatmul.mubr.bf16.gmra.mrb[164].mxu1 %v12434_v11  ;;  %v13992_v1 = vpop.f32.mrb[128].mxu0  ;;  %v13994_v40 = vpop.f32.mrb[128].mxu1 }
 0x3f2   :  { %14551 = vst [vmem:[#allocation17_spill] sm:$0xff] %v13992_v1  ;;  %14552 = vst [vmem:[#allocation18_spill] sm:$0xff] %v13994_v40  ;;  %6766 = vmatprep.mubr.bf16.mxu0 %v14538_v34  ;;  %6869 = vmatprep.mubr.bf16.mxu1 %v14538_v34  ;;  %v13998_v20 = vpop.f32.mrb[129].mxu0  ;;  %v14000_v28 = vpop.f32.mrb[129].mxu1  ;;  %v11102_v34 = vld [vmem:[%s14449_s2 + $0x7a4] ss:$16 sps:$4 sm:$0xff]  }
 0x3f3   :  { %14553 = vst [vmem:[#allocation19_spill] sm:$0xff] %v13998_v20  ;;  %14554 = vst [vmem:[#allocation20_spill] sm:$0xff] %v14000_v28  ;;  %6759 = vmatpush1.bf16.msra.mxu0 %v11100_v30  ;;  %6862 = vmatpush1.bf16.msra.mxu1 %v11101_v39  ;;  %v14008_v1 = vpop.f32.mrb[130].mxu0  ;;  %v14010_v40 = vpop.f32.mrb[130].mxu1  ;;  %v11103_v28 = vld [vmem:[%s14449_s2 + $0x7ac] ss:$16 sps:$4 sm:$0xff]  }
 0x3f4   :  { %14555 = vst [vmem:[#allocation21_spill] sm:$0xff] %v14008_v1  ;;  %14556 = vst [vmem:[#allocation31_spill] sm:$0xff] %v14010_v40  ;;  %6760 = vmatprep.subr.bf16.mxu0 %v11102_v34  ;;  %6863 = vmatprep.subr.bf16.mxu1 %v11103_v28  ;;  %v14018_v30 = vpop.f32.mrb[131].mxu0  ;;  %v14020_v20 = vpop.f32.mrb[131].mxu1  ;;  %v11104_v39 = vld [vmem:[%s14449_s2 + $0x7a0] ss:$16 sps:$4 sm:$0xff]  }
 0x3f5   :  { %14557 = vst [vmem:[#allocation32_spill] sm:$0xff] %v14018_v30  ;;  %14558 = vst [vmem:[#allocation33_spill] sm:$0xff] %v14020_v20  ;;  %v11105_v40 = vld [vmem:[%s14449_s2 + $0x7a8] ss:$16 sps:$4 sm:$0xff]   ;;  %v11106_v34 = vld [vmem:[%s14449_s2 + $0x7c4] ss:$16 sps:$4 sm:$0xff]  }
 0x3f6   :  { %v11107_v28 = vld [vmem:[%s14449_s2 + $0x7cc] ss:$16 sps:$4 sm:$0xff]  }
 0x3f7   :  { %6761 = vmatpush1.bf16.msra.mxu0 %v11104_v39  ;;  %6864 = vmatpush1.bf16.msra.mxu1 %v11105_v40  ;;  %v11108_v40 = vld [vmem:[%s14449_s2 + $0x7c0] ss:$16 sps:$4 sm:$0xff]  }
 0x3f8   :  { %6762 = vmatprep.subr.bf16.mxu0 %v11106_v34  ;;  %6865 = vmatprep.subr.bf16.mxu1 %v11107_v28  ;;  %v11109_v34 = vld [vmem:[%s14449_s2 + $0x7c8] ss:$16 sps:$4 sm:$0xff]  }
 0x3f9   :  { %v14034_v20 = vpop.f32.mrb[132].mxu0  ;;  %v14036_v30 = vpop.f32.mrb[132].mxu1 }
 0x3fa   :  { %14559 = vst [vmem:[#allocation34_spill] sm:$0xff] %v14036_v30  ;;  %v14038_v39 = vpop.f32.mrb[133].mxu0  ;;  %v14040_v1 = vpop.f32.mrb[133].mxu1 }
 0x3fb   :  { %14560 = vst [vmem:[#allocation24_spill] sm:$0xff] %v14038_v39  ;;  %14561 = vst [vmem:[#allocation23_spill] sm:$0xff] %v14040_v1  ;;  %6763 = vmatpush1.bf16.msra.mxu0 %v11108_v40  ;;  %6866 = vmatpush1.bf16.msra.mxu1 %v11109_v34  ;;  %v14048_v48 = vpop.f32.mrb[134].mxu0  ;;  %v14050_v28 = vpop.f32.mrb[134].mxu1  ;;  %v11110_v39 = vld [vmem:[%s14449_s2 + $0x7e4] ss:$16 sps:$4 sm:$0xff]  }
 0x3fc   :  { %14562 = vst [vmem:[#allocation26_spill] sm:$0xff] %v14048_v48  ;;  %14563 = vst [vmem:[#allocation25_spill] sm:$0xff] %v14050_v28  ;;  %6764 = vmatprep.subr.bf16.mxu0 %v11110_v39  ;;  %v11111_v1 = vld [vmem:[%s14449_s2 + $0x7ec] ss:$16 sps:$4 sm:$0xff]   ;;  %v14058_v40 = vpop.f32.mrb[135].mxu0  ;;  %v14060_v30 = vpop.f32.mrb[135].mxu1 }
 0x3fd   :  { %6867 = vmatprep.subr.bf16.mxu1 %v11111_v1  ;;  %14564 = vst [vmem:[#allocation28_spill] sm:$0xff] %v14058_v40  ;;  %14565 = vst [vmem:[#allocation27_spill] sm:$0xff] %v14060_v30  ;;  %v11112_v34 = vld [vmem:[%s14449_s2 + $0x7e0] ss:$16 sps:$4 sm:$0xff]   ;;  %v11113_v28 = vld [vmem:[%s14449_s2 + $0x7e8] ss:$16 sps:$4 sm:$0xff]  }
 0x3fe   :  { %v11114_v39 = vld [vmem:[%s14449_s2 + $0x804] ss:$16 sps:$4 sm:$0xff]   ;;  %v11115_v1 = vld [vmem:[%s14449_s2 + $0x80c] ss:$16 sps:$4 sm:$0xff]  }
 0x3ff   :  { %6765 = vmatpush1.bf16.msra.mxu0 %v11112_v34  ;;  %6868 = vmatpush1.bf16.msra.mxu1 %v11113_v28 }
 0x400   :  { %7010 = vmatprep.subr.bf16.mxu0 %v11114_v39  ;;  %7113 = vmatprep.subr.bf16.mxu1 %v11115_v1  ;;  %v11116_v1 = vld [vmem:[%s14449_s2 + $0x800] ss:$16 sps:$4 sm:$0xff]  }
 0x401   :  { %v14074_v30 = vpop.f32.mrb[136].mxu0  ;;  %v14076_v40 = vpop.f32.mrb[136].mxu1 }
 0x402   :  { %6767 = vmatmul.mubr.bf16.vlgmr.msra.gmra.mrb[140].mxu0 %v14539_v53  ;;  %6870 = vmatmul.mubr.bf16.vlgmr.msra.gmra.mrb[140].mxu1 %v14539_v53  ;;  %v14080_v34 = vpop.f32.mrb[137].mxu0  ;;  %v14082_v28 = vpop.f32.mrb[137].mxu1  ;;  %v11117_v53 = vld [vmem:[%s14449_s2 + $0x808] ss:$16 sps:$4 sm:$0xff]  }
 0x403   :  { %14566 = vst [vmem:[#allocation30_spill] sm:$0xff] %v14080_v34  ;;  %14567 = vst [vmem:[#allocation29_spill] sm:$0xff] %v14082_v28  ;;  %6776 = vmatprep.mubr.bf16.mxu0 %v14540_v22  ;;  %6879 = vmatprep.mubr.bf16.mxu1 %v14540_v22  ;;  %v14086_v39 = vpop.f32.mrb[138].mxu0  ;;  %v14088_v48 = vpop.f32.mrb[138].mxu1  ;;  %v11118_v22 = vld [vmem:[%s14449_s2 + $0x824] ss:$16 sps:$4 sm:$0xff]  }
 0x404   :  { %14568 = vst [vmem:[#allocation11_spill] sm:$0xff] %v14088_v48  ;;  %7011 = vmatpush1.bf16.msra.mxu0 %v11116_v1  ;;  %7114 = vmatpush1.bf16.msra.mxu1 %v11117_v53  ;;  %v14096_v34 = vpop.f32.mrb[139].mxu0  ;;  %v14098_v28 = vpop.f32.mrb[139].mxu1  ;;  %v11119_v48 = vld [vmem:[%s14449_s2 + $0x82c] ss:$16 sps:$4 sm:$0xff]  }
 0x405   :  { %14569 = vst [vmem:[#allocation10_spill] sm:$0xff] %v14098_v28  ;;  %7012 = vmatprep.subr.bf16.mxu0 %v11118_v22  ;;  %7115 = vmatprep.subr.bf16.mxu1 %v11119_v48  ;;  %v11120_v1 = vld [vmem:[%s14449_s2 + $0x820] ss:$16 sps:$4 sm:$0xff]   ;;  %v11121_v53 = vld [vmem:[%s14449_s2 + $0x828] ss:$16 sps:$4 sm:$0xff]  }
 0x406   :  { %v11122_v28 = vld [vmem:[%s14449_s2 + $0x844] ss:$16 sps:$4 sm:$0xff]   ;;  %v11123_v22 = vld [vmem:[%s14449_s2 + $0x84c] ss:$16 sps:$4 sm:$0xff]   ;;  %v11124_v48 = vld [vmem:[%s14449_s2 + $0x840] ss:$16 sps:$4 sm:$0xff]  }
 0x408   :  { %7013 = vmatpush1.bf16.msra.mxu0 %v11120_v1  ;;  %7116 = vmatpush1.bf16.msra.mxu1 %v11121_v53  ;;  %v11126_v1 = vld [vmem:[%s14449_s2 + $0x864] ss:$16 sps:$4 sm:$0xff]   ;;  %v11129_v53 = vld [vmem:[%s14449_s2 + $0x868] ss:$16 sps:$4 sm:$0xff]  }
 0x409   :  { %7014 = vmatprep.subr.bf16.mxu0 %v11122_v28  ;;  %7117 = vmatprep.subr.bf16.mxu1 %v11123_v22  ;;  %v11125_v28 = vld [vmem:[%s14449_s2 + $0x848] ss:$16 sps:$4 sm:$0xff]   ;;  %v11130_v22 = vld [vmem:[%s14449_s2 + $0x884] ss:$16 sps:$4 sm:$0xff]  }
 0x40a   :  { %6777 = vmatmul.mubr.bf16.gmra.mrb[144].mxu0 %v14541_v15  ;;  %6880 = vmatmul.mubr.bf16.gmra.mrb[144].mxu1 %v14541_v15  ;;  %v11127_v15 = vld [vmem:[%s14449_s2 + $0x86c] ss:$16 sps:$4 sm:$0xff]  }
 0x40b   :  { %6786 = vmatprep.mubr.bf16.mxu0 %v14542_v24  ;;  %6889 = vmatprep.mubr.bf16.mxu1 %v14542_v24  ;;  %v11128_v24 = vld [vmem:[%s14449_s2 + $0x860] ss:$16 sps:$4 sm:$0xff]  }
 0x40c   :  { %7015 = vmatpush1.bf16.msra.mxu0 %v11124_v48  ;;  %7118 = vmatpush1.bf16.msra.mxu1 %v11125_v28  ;;  %v11131_v48 = vld [vmem:[%s14449_s2 + $0x88c] ss:$16 sps:$4 sm:$0xff]   ;;  %v11132_v28 = vld [vmem:[%s14449_s2 + $0x880] ss:$16 sps:$4 sm:$0xff]  }
 0x40d   :  { %7016 = vmatprep.subr.bf16.mxu0 %v11126_v1  ;;  %7119 = vmatprep.subr.bf16.mxu1 %v11127_v15  ;;  %v11133_v1 = vld [vmem:[%s14449_s2 + $0x888] ss:$16 sps:$4 sm:$0xff]   ;;  %v11134_v15 = vld [vmem:[%s14449_s2 + $0x8a4] ss:$16 sps:$4 sm:$0xff]  }
 0x410   :  { %7017 = vmatpush1.bf16.msra.mxu0 %v11128_v24  ;;  %7120 = vmatpush1.bf16.msra.mxu1 %v11129_v53  ;;  %v11137_v24 = vld [vmem:[%s14449_s2 + $0x8a8] ss:$16 sps:$4 sm:$0xff]   ;;  %v11138_v53 = vld [vmem:[%s14449_s2 + $0x8c4] ss:$16 sps:$4 sm:$0xff]  }
 0x411   :  { %7018 = vmatprep.subr.bf16.mxu0 %v11130_v22  ;;  %7121 = vmatprep.subr.bf16.mxu1 %v11131_v48  ;;  %v11139_v22 = vld [vmem:[%s14449_s2 + $0x8cc] ss:$16 sps:$4 sm:$0xff]   ;;  %v11140_v48 = vld [vmem:[%s14449_s2 + $0x8c0] ss:$16 sps:$4 sm:$0xff]  }
 0x412   :  { %6787 = vmatmul.mubr.bf16.gmra.mrb[148].mxu0 %v14543_v5  ;;  %6890 = vmatmul.mubr.bf16.gmra.mrb[148].mxu1 %v14543_v5  ;;  %v11135_v5 = vld [vmem:[%s14449_s2 + $0x8ac] ss:$16 sps:$4 sm:$0xff]  }
 0x413   :  { %6796 = vmatprep.mubr.bf16.mxu0 %v14544_v55  ;;  %6899 = vmatprep.mubr.bf16.mxu1 %v14544_v55  ;;  %v11136_v55 = vld [vmem:[%s14449_s2 + $0x8a0] ss:$16 sps:$4 sm:$0xff]  }
 0x414   :  { %7019 = vmatpush1.bf16.msra.mxu0 %v11132_v28  ;;  %7122 = vmatpush1.bf16.msra.mxu1 %v11133_v1  ;;  %v11141_v28 = vld [vmem:[%s14449_s2 + $0x8c8] ss:$16 sps:$4 sm:$0xff]   ;;  %v11142_v1 = vld [vmem:[%s14449_s2 + $0x8e4] ss:$16 sps:$4 sm:$0xff]  }
 0x415   :  { %7020 = vmatprep.subr.bf16.mxu0 %v11134_v15  ;;  %7123 = vmatprep.subr.bf16.mxu1 %v11135_v5  ;;  %v11145_v15 = vld [vmem:[%s14449_s2 + $0x8e8] ss:$16 sps:$4 sm:$0xff]   ;;  %v11146_v5 = vld [vmem:[%s14449_s2 + $0x904] ss:$16 sps:$4 sm:$0xff]  }
 0x418   :  { %7021 = vmatpush1.bf16.msra.mxu0 %v11136_v55  ;;  %7124 = vmatpush1.bf16.msra.mxu1 %v11137_v24  ;;  %v11147_v55 = vld [vmem:[%s14449_s2 + $0x90c] ss:$16 sps:$4 sm:$0xff]   ;;  %v11148_v24 = vld [vmem:[%s14449_s2 + $0x900] ss:$16 sps:$4 sm:$0xff]  }
 0x419   :  { %7022 = vmatprep.subr.bf16.mxu0 %v11138_v53  ;;  %7125 = vmatprep.subr.bf16.mxu1 %v11139_v22  ;;  %v11149_v53 = vld [vmem:[%s14449_s2 + $0x908] ss:$16 sps:$4 sm:$0xff]   ;;  %v11150_v22 = vld [vmem:[%s14449_s2 + $0x924] ss:$16 sps:$4 sm:$0xff]  }
 0x41a   :  { %6797 = vmatmul.mubr.bf16.gmra.mrb[152].mxu0 %v14545_v44  ;;  %6900 = vmatmul.mubr.bf16.gmra.mrb[152].mxu1 %v14545_v44  ;;  %v11143_v44 = vld [vmem:[%s14449_s2 + $0x8ec] ss:$16 sps:$4 sm:$0xff]  }
 0x41b   :  { %6806 = vmatprep.mubr.bf16.mxu0 %v14546_v10  ;;  %6909 = vmatprep.mubr.bf16.mxu1 %v14546_v10  ;;  %v11144_v10 = vld [vmem:[%s14449_s2 + $0x8e0] ss:$16 sps:$4 sm:$0xff]  }
 0x41c   :  { %7023 = vmatpush1.bf16.msra.mxu0 %v11140_v48  ;;  %7126 = vmatpush1.bf16.msra.mxu1 %v11141_v28  ;;  %v11153_v48 = vld [vmem:[%s14449_s2 + $0x928] ss:$16 sps:$4 sm:$0xff]   ;;  %v11154_v28 = vld [vmem:[%s14449_s2 + $0x944] ss:$16 sps:$4 sm:$0xff]  }
 0x41d   :  { %7024 = vmatprep.subr.bf16.mxu0 %v11142_v1  ;;  %7127 = vmatprep.subr.bf16.mxu1 %v11143_v44  ;;  %v11155_v1 = vld [vmem:[%s14449_s2 + $0x94c] ss:$16 sps:$4 sm:$0xff]   ;;  %v11156_v44 = vld [vmem:[%s14449_s2 + $0x940] ss:$16 sps:$4 sm:$0xff]  }
 0x420   :  { %7025 = vmatpush1.bf16.msra.mxu0 %v11144_v10  ;;  %7128 = vmatpush1.bf16.msra.mxu1 %v11145_v15  ;;  %v11157_v10 = vld [vmem:[%s14449_s2 + $0x948] ss:$16 sps:$4 sm:$0xff]   ;;  %v11158_v15 = vld [vmem:[%s14449_s2 + $0x964] ss:$16 sps:$4 sm:$0xff]  }
 0x421   :  { %7026 = vmatprep.subr.bf16.mxu0 %v11146_v5  ;;  %7129 = vmatprep.subr.bf16.mxu1 %v11147_v55  ;;  %v11160_v5 = vld [vmem:[%s14449_s2 + $0x960] ss:$16 sps:$4 sm:$0xff]   ;;  %v11161_v55 = vld [vmem:[%s14449_s2 + $0x968] ss:$16 sps:$4 sm:$0xff]  }
 0x422   :  { %6807 = vmatmul.mubr.bf16.gmra.mrb[156].mxu0 %v14547_v60  ;;  %6910 = vmatmul.mubr.bf16.gmra.mrb[156].mxu1 %v14547_v60  ;;  %v11151_v60 = vld [vmem:[%s14449_s2 + $0x92c] ss:$16 sps:$4 sm:$0xff]  }
 0x423   :  { %6816 = vmatprep.mubr.bf16.mxu0 %v14548_v51  ;;  %6919 = vmatprep.mubr.bf16.mxu1 %v14548_v51  ;;  %v11152_v51 = vld [vmem:[%s14449_s2 + $0x920] ss:$16 sps:$4 sm:$0xff]  }
 0x424   :  { %7027 = vmatpush1.bf16.msra.mxu0 %v11148_v24  ;;  %7130 = vmatpush1.bf16.msra.mxu1 %v11149_v53  ;;  %v11162_v24 = vld [vmem:[%s14449_s2 + $0x984] ss:$16 sps:$4 sm:$0xff]   ;;  %v11163_v53 = vld [vmem:[%s14449_s2 + $0x98c] ss:$16 sps:$4 sm:$0xff]  }
 0x425   :  { %7028 = vmatprep.subr.bf16.mxu0 %v11150_v22  ;;  %7131 = vmatprep.subr.bf16.mxu1 %v11151_v60  ;;  %v11164_v22 = vld [vmem:[%s14449_s2 + $0x980] ss:$16 sps:$4 sm:$0xff]   ;;  %v11165_v60 = vld [vmem:[%s14449_s2 + $0x988] ss:$16 sps:$4 sm:$0xff]  }
 0x428   :  { %7029 = vmatpush1.bf16.msra.mxu0 %v11152_v51  ;;  %7132 = vmatpush1.bf16.msra.mxu1 %v11153_v48  ;;  %v11166_v51 = vld [vmem:[%s14449_s2 + $0x9a4] ss:$16 sps:$4 sm:$0xff]   ;;  %v11167_v48 = vld [vmem:[%s14449_s2 + $0x9ac] ss:$16 sps:$4 sm:$0xff]  }
 0x429   :  { %7030 = vmatprep.subr.bf16.mxu0 %v11154_v28  ;;  %7133 = vmatprep.subr.bf16.mxu1 %v11155_v1  ;;  %v11169_v28 = vld [vmem:[%s14449_s2 + $0x9a8] ss:$16 sps:$4 sm:$0xff]   ;;  %v11170_v1 = vld [vmem:[%s14449_s2 + $0x9c4] ss:$16 sps:$4 sm:$0xff]  }
 0x42a   :  { %6817 = vmatmul.mubr.bf16.gmra.mrb[160].mxu0 %v14549_v63  ;;  %6920 = vmatmul.mubr.bf16.gmra.mrb[160].mxu1 %v14549_v63  ;;  %v11159_v63 = vld [vmem:[%s14449_s2 + $0x96c] ss:$16 sps:$4 sm:$0xff]  }
 0x42b   :  { %6826 = vmatprep.mubr.bf16.mxu0 %v14535_v52  ;;  %6929 = vmatprep.mubr.bf16.mxu1 %v14535_v52 }
 0x42c   :  { %7031 = vmatpush1.bf16.msra.mxu0 %v11156_v44  ;;  %7134 = vmatpush1.bf16.msra.mxu1 %v11157_v10  ;;  %v11171_v44 = vld [vmem:[%s14449_s2 + $0x9cc] ss:$16 sps:$4 sm:$0xff]   ;;  %v11172_v10 = vld [vmem:[%s14449_s2 + $0x9c0] ss:$16 sps:$4 sm:$0xff]  }
 0x42d   :  { %7032 = vmatprep.subr.bf16.mxu0 %v11158_v15  ;;  %7135 = vmatprep.subr.bf16.mxu1 %v11159_v63  ;;  %v11173_v15 = vld [vmem:[%s14449_s2 + $0x9c8] ss:$16 sps:$4 sm:$0xff]   ;;  %v11174_v63 = vld [vmem:[%s14449_s2 + $0x9e4] ss:$16 sps:$4 sm:$0xff]  }
 0x430   :  { %7033 = vmatpush1.bf16.msra.mxu0 %v11160_v5  ;;  %7136 = vmatpush1.bf16.msra.mxu1 %v11161_v55  ;;  %v11175_v5 = vld [vmem:[%s14449_s2 + $0x9ec] ss:$16 sps:$4 sm:$0xff]   ;;  %v10732_v55 = vld [vmem:[#allocation6 + $0x40] sm:$0xff]  }
 0x431   :  { %7034 = vmatprep.subr.bf16.mxu0 %v11162_v24  ;;  %7137 = vmatprep.subr.bf16.mxu1 %v11163_v53  ;;  %v10742_v24 = vld [vmem:[#allocation6 + $0xc0] sm:$0xff]  }
 0x432   :  { %6827 = vmatmul.mubr.bf16.gmra.mrb[164].mxu0 %v14535_v52  ;;  %6930 = vmatmul.mubr.bf16.gmra.mrb[164].mxu1 %v14535_v52  ;;  %v11176_v53 = vld [vmem:[%s14449_s2 + $0x9e0] ss:$16 sps:$4 sm:$0xff]  }
 0x433   :  { %7042 = vmatprep.mubr.bf16.mxu0 %v12341_v8  ;;  %7145 = vmatprep.mubr.bf16.mxu1 %v12341_v8  ;;  %v11168_v8 = vld [vmem:[%s14449_s2 + $0x9a0] ss:$16 sps:$4 sm:$0xff]  }
 0x434   :  { %7035 = vmatpush1.bf16.msra.mxu0 %v11164_v22  ;;  %7138 = vmatpush1.bf16.msra.mxu1 %v11165_v60  ;;  %v11177_v22 = vld [vmem:[%s14449_s2 + $0x9e8] ss:$16 sps:$4 sm:$0xff]   ;;  %v10733_v60 = vld [vmem:[#allocation6] sm:$0xff]  }
 0x435   :  { %7036 = vmatprep.subr.bf16.mxu0 %v11166_v51  ;;  %7139 = vmatprep.subr.bf16.mxu1 %v11167_v48  ;;  %v10743_v51 = vld [vmem:[#allocation6 + $0x80] sm:$0xff]   ;;  %v10734_v48 = vld [vmem:[#allocation6 + $0x48] sm:$0xff]  }
 0x438   :  { %7037 = vmatpush1.bf16.msra.mxu0 %v11168_v8  ;;  %7140 = vmatpush1.bf16.msra.mxu1 %v11169_v28  ;;  %v10746_v8 = vld [vmem:[#allocation6 + $0xc8] sm:$0xff]  }
 0x439   :  { %7038 = vmatprep.subr.bf16.mxu0 %v11170_v1  ;;  %7141 = vmatprep.subr.bf16.mxu1 %v11171_v44  ;;  %v10735_v28 = vld [vmem:[#allocation6 + $0x8] sm:$0xff]   ;;  %v10736_v44 = vld [vmem:[#allocation6 + $0x50] sm:$0xff]  }
 0x43a   :  { %v10747_v1 = vld [vmem:[#allocation6 + $0x88] sm:$0xff]  }
 0x43c   :  { %7039 = vmatpush1.bf16.msra.mxu0 %v11172_v10  ;;  %7142 = vmatpush1.bf16.msra.mxu1 %v11173_v15  ;;  %v10748_v10 = vld [vmem:[#allocation6 + $0xd0] sm:$0xff]  }
 0x43d   :  { %7040 = vmatprep.subr.bf16.mxu0 %v11174_v63  ;;  %7143 = vmatprep.subr.bf16.mxu1 %v11175_v5  ;;  %v10737_v15 = vld [vmem:[#allocation6 + $0x10] sm:$0xff]   ;;  %v10738_v5 = vld [vmem:[#allocation6 + $0x58] sm:$0xff]  }
 0x43e   :  { %v10749_v63 = vld [vmem:[#allocation6 + $0x90] sm:$0xff]  }
 0x440   :  { %7041 = vmatpush1.bf16.msra.mxu0 %v11176_v53  ;;  %7144 = vmatpush1.bf16.msra.mxu1 %v11177_v22  ;;  %v10757_v53 = vld [vmem:[#allocation6 + $0x38] sm:$0xff]   ;;  %v10759_v22 = vld [vmem:[#allocation6 + $0xa8] sm:$0xff]  }
 0x441   :  { %9623 = vmatprep.subr.bf16.mxu0 %v10732_v55  ;;  %9645 = vmatprep.subr.bf16.mxu1 %v10742_v24  ;;  %v10741_v55 = vld [vmem:[#allocation6 + $0x20] sm:$0xff]   ;;  %v10744_v24 = vld [vmem:[#allocation6 + $0x68] sm:$0xff]  }
 0x443   :  { %7043 = vmatmul.mubr.bf16.vlgmr.msra.gmra.mrb[140].mxu0 %v12337_v6  ;;  %7146 = vmatmul.mubr.bf16.vlgmr.msra.gmra.mrb[140].mxu1 %v12337_v6  ;;  %v10739_v6 = vld [vmem:[#allocation6 + $0x18] sm:$0xff]  }
 0x444   :  { %7052 = vmatprep.mubr.bf16.mxu0 %v12361_v25  ;;  %7155 = vmatprep.mubr.bf16.mxu1 %v12361_v25  ;;  %v10740_v25 = vld [vmem:[#allocation6 + $0x60] sm:$0xff]  }
 0x445   :  { %9624 = vmatpush3.bf16.msra.mxu0 %v10733_v60  ;;  %9646 = vmatpush3.bf16.msra.mxu1 %v10743_v51  ;;  %v10761_v60 = vld [vmem:[#allocation6 + $0x140] sm:$0xff]   ;;  %v10762_v51 = vld [vmem:[#allocation6 + $0xb0] sm:$0xff]  }
 0x446   :  { %9625 = vmatprep.subr.bf16.mxu0 %v10734_v48  ;;  %9647 = vmatprep.subr.bf16.mxu1 %v10746_v8  ;;  %v10764_v48 = vld [vmem:[#allocation6 + $0xf8] sm:$0xff]  }
 0x447   :  { %v10766_v8 = vld [vmem:[#allocation6 + $0xb8] sm:$0xff]  }
 0x449   :  { %9626 = vmatpush3.bf16.msra.mxu0 %v10735_v28  ;;  %9648 = vmatpush3.bf16.msra.mxu1 %v10747_v1  ;;  %v10769_v28 = vld [vmem:[#allocation6 + $0x1c0] sm:$0xff]  }
 0x44a   :  { %9627 = vmatprep.subr.bf16.mxu0 %v10736_v44  ;;  %9649 = vmatprep.subr.bf16.mxu1 %v10748_v10  ;;  %v7356_v1 = vld [vmem:[%s14452_s5] sm:$0x3] }
 0x44b   :  { %7053 = vmatmul.mubr.bf16.gmra.mrb[144].mxu0 %v12357_v13  ;;  %7156 = vmatmul.mubr.bf16.gmra.mrb[144].mxu1 %v12357_v13  ;;  %v10745_v13 = vld [vmem:[#allocation6 + $0x28] sm:$0xff]  }
 0x44c   :  { %7062 = vmatprep.mubr.bf16.mxu0 %v12381_v26  ;;  %7165 = vmatprep.mubr.bf16.mxu1 %v12381_v26  ;;  %v10753_v26 = vld [vmem:[#allocation6 + $0x98] sm:$0xff]  }
 0x44d   :  { %9628 = vmatpush3.bf16.msra.mxu0 %v10737_v15  ;;  %9650 = vmatpush3.bf16.msra.mxu1 %v10749_v63 }
 0x44e   :  { %9629 = vmatprep.subr.bf16.mxu0 %v10738_v5  ;;  %v14570_v5 = vld [vmem:[#allocation22_spill] sm:$0xff] }
 0x451   :  { %9630 = vmatpush3.bf16.msra.mxu0 %v10739_v6  ;;  %v14336_v6 = vrot.slane %v7356_v1, %v14570_v5 }
 0x452   :  { %9631 = vmatprep.subr.bf16.mxu0 %v10740_v25 }
 0x453   :  { %7063 = vmatmul.mubr.bf16.gmra.mrb[148].mxu0 %v12377_v16  ;;  %7166 = vmatmul.mubr.bf16.gmra.mrb[148].mxu1 %v12377_v16  ;;  %v10752_v16 = vld [vmem:[#allocation6 + $0xd8] sm:$0xff]  }
 0x454   :  { %7072 = vmatprep.mubr.bf16.mxu0 %v12401_v41  ;;  %7175 = vmatprep.mubr.bf16.mxu1 %v12401_v41  ;;  %v10754_v41 = vld [vmem:[#allocation6 + $0xe0] sm:$0xff]  }
 0x455   :  { %9632 = vmatpush3.bf16.msra.mxu0 %v10741_v55  ;;  %9651 = vmatprep.subr.bf16.mxu1 %v10752_v16  ;;  %v14341_v16 = vrot.slane %v7356_v1, %v11871_v45 }
 0x456   :  { %9633 = vmatprep.subr.bf16.mxu0 %v10744_v24  ;;  %9652 = vmatpush3.bf16.msra.mxu1 %v10753_v26 }
 0x457   :  { %9653 = vmatprep.subr.bf16.mxu1 %v10754_v41 }
 0x459   :  { %9634 = vmatpush3.bf16.msra.mxu0 %v10745_v13 }
 0x45b   :  { %7073 = vmatmul.mubr.bf16.gmra.mrb[152].mxu0 %v12397_v59  ;;  %7176 = vmatmul.mubr.bf16.gmra.mrb[152].mxu1 %v12397_v59  ;;  %v10750_v59 = vld [vmem:[#allocation6 + $0x70] sm:$0xff]  }
 0x45c   :  { %7082 = vmatprep.mubr.bf16.mxu0 %v12421_v46  ;;  %7185 = vmatprep.mubr.bf16.mxu1 %v12421_v46  ;;  %v10756_v46 = vld [vmem:[#allocation6 + $0xa0] sm:$0xff]  }
 0x45d   :  { %9635 = vmatprep.subr.bf16.mxu0 %v10750_v59  ;;  %9654 = vmatpush3.bf16.msra.mxu1 %v10756_v46 }
 0x463   :  { %7083 = vmatmul.mubr.bf16.gmra.mrb[156].mxu0 %v12417_v62  ;;  %7186 = vmatmul.mubr.bf16.gmra.mrb[156].mxu1 %v12417_v62  ;;  %v10751_v62 = vld [vmem:[#allocation6 + $0x30] sm:$0xff]  }
 0x464   :  { %7092 = vmatprep.mubr.bf16.mxu0 %v12436_v58  ;;  %7195 = vmatprep.mubr.bf16.mxu1 %v12436_v58  ;;  %v10758_v58 = vld [vmem:[#allocation6 + $0xe8] sm:$0xff]  }
 0x465   :  { %9636 = vmatpush3.bf16.msra.mxu0 %v10751_v62  ;;  %9655 = vmatprep.subr.bf16.mxu1 %v10758_v58 }
 0x466   :  { %9656 = vmatpush3.bf16.msra.mxu1 %v10759_v22 }
 0x46b   :  { %7093 = vmatmul.mubr.bf16.gmra.mrb[160].mxu0 %v12434_v11  ;;  %7196 = vmatmul.mubr.bf16.gmra.mrb[160].mxu1 %v12434_v11  ;;  %v10755_v11 = vld [vmem:[#allocation6 + $0x78] sm:$0xff]  }
 0x46c   :  { %7102 = vmatprep.mubr.bf16.mxu0 %v14535_v52  ;;  %7205 = vmatprep.mubr.bf16.mxu1 %v14535_v52 }
 0x46d   :  { %9637 = vmatprep.subr.bf16.mxu0 %v10755_v11 }
 0x46e   :  { %9638 = vmatpush3.bf16.msra.mxu0 %v10757_v53 }
 0x46f   :  { %9667 = vmatprep.subr.bf16.mxu0 %v10761_v60 }
 0x473   :  { %7103 = vmatmul.mubr.bf16.gmra.mrb[164].mxu0 %v14535_v52  ;;  %7206 = vmatmul.mubr.bf16.gmra.mrb[164].mxu1 %v14535_v52  ;;  %v10760_v52 = vld [vmem:[#allocation6 + $0xf0] sm:$0xff]  }
 0x474   :  { %9657 = vmatprep.subr.bf16.mxu1 %v10760_v52 }
 0x475   :  { %9658 = vmatpush3.bf16.msra.mxu1 %v10762_v51 }
 0x476   :  { %9659 = vmatprep.subr.bf16.mxu1 %v10764_v48 }
 0x479   :  { %9660 = vmatpush3.bf16.msra.mxu1 %v10766_v8 }
 0x47a   :  { %9689 = vmatprep.subr.bf16.mxu1 %v10769_v28 }
 0x516   :  { %v7044_v44 = vpop.f32.mrb[140].mxu0  ;;  %v7147_v10 = vpop.f32.mrb[140].mxu1 }
 0x517   :  { %v7272_v15 = vmax.f32 %v13816_v3, %v7044_v44  ;;  %v7274_v63 = vmax.f32 %v13818_v56, %v7147_v10  ;;  %v7046_v25 = vpop.f32.mrb[141].mxu0  ;;  %v7149_v55 = vpop.f32.mrb[141].mxu1 }
 0x518   :  { %v7273_v24 = vmax.f32 %v13822_v31, %v7046_v25  ;;  %v7275_v13 = vmax.f32 %v13824_v47, %v7149_v55  ;;  %v7048_v26 = vpop.f32.mrb[142].mxu0  ;;  %v7151_v59 = vpop.f32.mrb[142].mxu1 }
 0x519   :  { %v7328_v41 = vmax.f32 %v7272_v15, %v7274_v63  ;;  %v7276_v62 = vmax.f32 %v13832_v18, %v7048_v26  ;;  %v7278_v3 = vmax.f32 %v13834_v4, %v7151_v59  ;;  %v7050_v56 = vpop.f32.mrb[143].mxu0  ;;  %v7153_v46 = vpop.f32.mrb[143].mxu1 }
 0x51a   :  { %v7329_v11 = vmax.f32 %v7273_v24, %v7275_v13  ;;  %v7277_v58 = vmax.f32 %v13842_v17, %v7050_v56  ;;  %v7279_v53 = vmax.f32 %v13844_v43, %v7153_v46  ;;  %v10765_v56 = vld [vmem:[#allocation6 + $0x148] sm:$0xff]  }
 0x51b   :  { %v7368_v31 = vadd.f32 %v14336_v6, %v7328_v41  ;;  %v7330_v47 = vmax.f32 %v7276_v62, %v7278_v3  ;;  %v10763_v3 = vld [vmem:[#allocation6 + $0x100] sm:$0xff]  }
 0x51c   :  { %v7369_v45 = vadd.f32 %v14341_v16, %v7329_v11  ;;  %v7331_v22 = vmax.f32 %v7277_v58, %v7279_v53  ;;  %v10767_v53 = vld [vmem:[#allocation6 + $0x108] sm:$0xff]  }
 0x51d   :  { %v7370_v52 = vadd.f32 %v14336_v6, %v7330_v47  ;;  %v7396_v4 = vmax.f32 %v7368_v31, 0.0 }
 0x51e   :  { %v7371_v60 = vadd.f32 %v14341_v16, %v7331_v22  ;;  %v7054_v18 = vpop.f32.mrb[144].mxu0  ;;  %v7157_v51 = vpop.f32.mrb[144].mxu1  ;;  %v7397_v1 = vmax.f32 %v7369_v45, 0.0 }
 0x51f   :  { %v7398_v48 = vmax.f32 %v7370_v52, 0.0  ;;  %v7280_v8 = vmax.f32 %v13860_v9, %v7054_v18  ;;  %v7282_v17 = vmax.f32 %v13862_v35, %v7157_v51  ;;  %v7056_v28 = vpop.f32.mrb[145].mxu0  ;;  %v7159_v43 = vpop.f32.mrb[145].mxu1 }
 0x520   :  { %v7399_v44 = vmax.f32 %v7371_v60, 0.0  ;;  %v7281_v10 = vmax.f32 %v13866_v0, %v7056_v28  ;;  %v7283_v15 = vmax.f32 %v13868_v50, %v7159_v43  ;;  %v7058_v63 = vpop.f32.mrb[146].mxu0  ;;  %v7161_v5 = vpop.f32.mrb[146].mxu1  ;;  %v10768_v60 = vld [vmem:[#allocation6 + $0x150] sm:$0xff]  }
 0x521   :  { %v7424_v25 = vpack.c.bf16 %v7398_v48, %v7396_v4  ;;  %v7332_v55 = vmax.f32 %v7280_v8, %v7282_v17  ;;  %v7284_v24 = vmax.f32 %v13876_v29, %v7058_v63  ;;  %v7286_v13 = vmax.f32 %v13878_v37, %v7161_v5  ;;  %v7060_v26 = vpop.f32.mrb[147].mxu0  ;;  %v7163_v9 = vpop.f32.mrb[147].mxu1 }
 0x522   :  { %v7333_v59 = vmax.f32 %v7281_v10, %v7283_v15  ;;  %v7285_v35 = vmax.f32 %v13886_v21, %v7060_v26  ;;  %v7287_v41 = vmax.f32 %v13888_v57, %v7163_v9  ;;  %v7425_v62 = vpack.c.bf16 %v7399_v44, %v7397_v1 }
 0x523   :  { %v7372_v0 = vadd.f32 %v14336_v6, %v7332_v55  ;;  %v7334_v50 = vmax.f32 %v7284_v24, %v7286_v13  ;;  %v10772_v24 = vld [vmem:[#allocation6 + $0x158] sm:$0xff]   ;;  %v10773_v13 = vld [vmem:[#allocation6 + $0x1c8] sm:$0xff]  }
 0x524   :  { %v7373_v46 = vadd.f32 %v14341_v16, %v7333_v59  ;;  %v7335_v11 = vmax.f32 %v7285_v35, %v7287_v41  ;;  %8401 = vmatprep.mubr.bf16.mxu0 %v7425_v62  ;;  %v10774_v59 = vld [vmem:[#allocation6 + $0x118] sm:$0xff]   ;;  %v10775_v35 = vld [vmem:[#allocation6 + $0x188] sm:$0xff]  }
 0x525   :  { %v7374_v29 = vadd.f32 %v14336_v6, %v7334_v50  ;;  %8402 = vmatmul.mubr.bf16.vlgmr.msra.gmra.mrb[168].mxu0 %v7424_v25  ;;  %v7400_v57 = vmax.f32 %v7372_v0, 0.0  ;;  %v10771_v25 = vld [vmem:[#allocation6 + $0x180] sm:$0xff]  }
 0x526   :  { %v7375_v37 = vadd.f32 %v14341_v16, %v7335_v11  ;;  %9668 = vmatpush3.bf16.msra.mxu0 %v10763_v3  ;;  %v7064_v58 = vpop.f32.mrb[148].mxu0  ;;  %v7167_v21 = vpop.f32.mrb[148].mxu1  ;;  %v7401_v18 = vmax.f32 %v7373_v46, 0.0  ;;  %v10776_v46 = vld [vmem:[#allocation6 + $0x160] sm:$0xff]   ;;  %v10777_v11 = vld [vmem:[#allocation6 + $0x1d0] sm:$0xff]  }
 0x527   :  { %v7402_v31 = vmax.f32 %v7374_v29, 0.0  ;;  %v7288_v47 = vmax.f32 %v13904_v49, %v7064_v58  ;;  %v7290_v45 = vmax.f32 %v13906_v42, %v7167_v21  ;;  %v7066_v22 = vpop.f32.mrb[149].mxu0  ;;  %v7169_v52 = vpop.f32.mrb[149].mxu1  ;;  %9669 = vmatprep.subr.bf16.mxu0 %v10765_v56 }
 0x528   :  { %v7403_v51 = vmax.f32 %v7375_v37, 0.0  ;;  %v7289_v4 = vmax.f32 %v13910_v38, %v7066_v22  ;;  %v7291_v48 = vmax.f32 %v13912_v36, %v7169_v52  ;;  %v7068_v8 = vpop.f32.mrb[150].mxu0  ;;  %v7171_v17 = vpop.f32.mrb[150].mxu1  ;;  %v10770_v38 = vld [vmem:[#allocation6 + $0x110] sm:$0xff]  }
 0x529   :  { %v7426_v28 = vpack.c.bf16 %v7402_v31, %v7400_v57  ;;  %v7336_v43 = vmax.f32 %v7288_v47, %v7290_v45  ;;  %v7292_v1 = vmax.f32 %v13920_v19, %v7068_v8  ;;  %v7294_v49 = vmax.f32 %v13922_v12, %v7171_v17  ;;  %v7070_v44 = vpop.f32.mrb[151].mxu0  ;;  %v7173_v42 = vpop.f32.mrb[151].mxu1  ;;  %v10781_v17 = vld [vmem:[#allocation6 + $0x1d8] sm:$0xff]  }
 0x52a   :  { %v7337_v10 = vmax.f32 %v7289_v4, %v7291_v48  ;;  %v7293_v15 = vmax.f32 %v13930_v54, %v7070_v44  ;;  %v7295_v63 = vmax.f32 %v13932_v14, %v7173_v42  ;;  %9670 = vmatpush3.bf16.msra.mxu0 %v10767_v53  ;;  %v7427_v5 = vpack.c.bf16 %v7403_v51, %v7401_v18  ;;  %v14571_v18 = vld [vmem:[#allocation16_spill] sm:$0xff]  ;;  %v10782_v44 = vld [vmem:[#allocation6 + $0x128] sm:$0xff]   ;;  %v10783_v42 = vld [vmem:[#allocation6 + $0x198] sm:$0xff]  }
 0x52b   :  { %v7376_v36 = vadd.f32 %v14336_v6, %v7336_v43  ;;  %v7338_v55 = vmax.f32 %v7292_v1, %v7294_v49  ;;  %9671 = vmatprep.subr.bf16.mxu0 %v10768_v60 }
 0x52c   :  { %v7377_v19 = vadd.f32 %v14341_v16, %v7337_v10  ;;  %v7339_v12 = vmax.f32 %v7293_v15, %v7295_v63  ;;  %8442 = vmatprep.mubr.bf16.mxu1 %v7427_v5  ;;  %v14572_v63 = vld [vmem:[#allocation17_spill] sm:$0xff] }
 0x52d   :  { %v7378_v26 = vadd.f32 %v14336_v6, %v7338_v55  ;;  %8443 = vmatmul.mubr.bf16.vlgmr.msra.gmra.mrb[168].mxu1 %v7426_v28  ;;  %v7404_v41 = vmax.f32 %v7376_v36, 0.0 }
 0x52e   :  { %v7379_v54 = vadd.f32 %v14341_v16, %v7339_v12  ;;  %9672 = vmatpush3.bf16.msra.mxu0 %v10770_v38  ;;  %9690 = vmatpush3.bf16.msra.mxu1 %v10771_v25  ;;  %v7074_v14 = vpop.f32.mrb[152].mxu0  ;;  %v7177_v9 = vpop.f32.mrb[152].mxu1  ;;  %v7405_v29 = vmax.f32 %v7377_v19, 0.0  ;;  %v14573_v38 = vld [vmem:[#allocation18_spill] sm:$0xff] }
 0x52f   :  { %v7406_v62 = vmax.f32 %v7378_v26, 0.0  ;;  %v7296_v3 = vmax.f32 %v13948_v33, %v7074_v14  ;;  %v7298_v0 = vmax.f32 %v13950_v7, %v7177_v9  ;;  %v7076_v50 = vpop.f32.mrb[153].mxu0  ;;  %v7179_v56 = vpop.f32.mrb[153].mxu1  ;;  %9673 = vmatprep.subr.bf16.mxu0 %v10772_v24  ;;  %9691 = vmatprep.subr.bf16.mxu1 %v10773_v13  ;;  %v10784_v24 = vld [vmem:[#allocation6 + $0x170] sm:$0xff]   ;;  %v10785_v13 = vld [vmem:[#allocation6 + $0x1e0] sm:$0xff]   ;;  %v14574_v26 = vld [vmem:[#allocation19_spill] sm:$0xff] }
 0x530   :  { %v7407_v37 = vmax.f32 %v7379_v54, 0.0  ;;  %v7297_v58 = vmax.f32 %v13954_v27, %v7076_v50  ;;  %v7299_v21 = vmax.f32 %v13956_v23, %v7179_v56  ;;  %v7078_v53 = vpop.f32.mrb[154].mxu0  ;;  %v7181_v57 = vpop.f32.mrb[154].mxu1  ;;  %v10778_v27 = vld [vmem:[#allocation6 + $0x120] sm:$0xff]   ;;  %v10779_v23 = vld [vmem:[#allocation6 + $0x190] sm:$0xff]   ;;  %v14577_v50 = vld [vmem:[#allocation31_spill] sm:$0xff] }
 0x531   :  { %v14379_v31 = vpack.c.bf16 %v7406_v62, %v7404_v41  ;;  %v7340_v47 = vmax.f32 %v7296_v3, %v7298_v0  ;;  %v7300_v33 = vmax.f32 %v13964_v61, %v7078_v53  ;;  %v7302_v7 = vmax.f32 %v13966_v32, %v7181_v57  ;;  %v7080_v45 = vpop.f32.mrb[155].mxu0  ;;  %v7183_v22 = vpop.f32.mrb[155].mxu1  ;;  %v10780_v61 = vld [vmem:[#allocation6 + $0x168] sm:$0xff]   ;;  %v14575_v14 = vld [vmem:[#allocation20_spill] sm:$0xff]  ;;  %v14576_v3 = vld [vmem:[#allocation21_spill] sm:$0xff] }
 0x532   :  { %v7341_v52 = vmax.f32 %v7297_v58, %v7299_v21  ;;  %v7301_v60 = vmax.f32 %v13974_v2, %v7080_v45  ;;  %v7303_v51 = vmax.f32 %v14571_v18, %v7183_v22  ;;  %9674 = vmatpush3.bf16.msra.mxu0 %v10774_v59  ;;  %9692 = vmatpush3.bf16.msra.mxu1 %v10775_v35  ;;  %v14579_v21 = vld [vmem:[#allocation33_spill] sm:$0xff]  ;;  %v10786_v57 = vld [vmem:[#allocation6 + $0x130] sm:$0xff]  }
 0x533   :  { %v7380_v4 = vadd.f32 %v14336_v6, %v7340_v47  ;;  %v7342_v48 = vmax.f32 %v7300_v33, %v7302_v7  ;;  %9675 = vmatprep.subr.bf16.mxu0 %v10776_v46  ;;  %v7429_v8 = vpack.c.bf16 %v7407_v37, %v7405_v29  ;;  %9693 = vmatprep.subr.bf16.mxu1 %v10777_v11  ;;  %v14578_v37 = vld [vmem:[#allocation32_spill] sm:$0xff]  ;;  %v10787_v47 = vld [vmem:[#allocation6 + $0x1a0] sm:$0xff]   ;;  %v10788_v22 = vld [vmem:[#allocation6 + $0x178] sm:$0xff]  }
 0x534   :  { %v7381_v32 = vadd.f32 %v14341_v16, %v7341_v52  ;;  %v7343_v28 = vmax.f32 %v7301_v60, %v7303_v51  ;;  %v10789_v52 = vld [vmem:[#allocation6 + $0x1e8] sm:$0xff]  }
 0x535   :  { %v7382_v43 = vadd.f32 %v14336_v6, %v7342_v48  ;;  %8483 = vmatprep.mubr.bf16.mxu0 %v7429_v8  ;;  %v7408_v10 = vmax.f32 %v7380_v4, 0.0  ;;  %v10790_v48 = vld [vmem:[#allocation6 + $0x138] sm:$0xff]   ;;  %v10791_v8 = vld [vmem:[#allocation6 + $0x1a8] sm:$0xff]  }
 0x536   :  { %v7383_v2 = vadd.f32 %v14341_v16, %v7343_v28  ;;  %9676 = vmatpush3.bf16.msra.mxu0 %v10778_v27  ;;  %9694 = vmatpush3.bf16.msra.mxu1 %v10779_v23  ;;  %v7084_v1 = vpop.f32.mrb[156].mxu0  ;;  %v7187_v49 = vpop.f32.mrb[156].mxu1  ;;  %v7409_v19 = vmax.f32 %v7381_v32, 0.0  ;;  %v14580_v28 = vld [vmem:[#allocation34_spill] sm:$0xff] }
 0x537   :  { %v7410_v15 = vmax.f32 %v7382_v43, 0.0  ;;  %v7304_v5 = vmax.f32 %v14572_v63, %v7084_v1  ;;  %v7306_v25 = vmax.f32 %v14573_v38, %v7187_v49  ;;  %v7086_v36 = vpop.f32.mrb[157].mxu0  ;;  %v7189_v55 = vpop.f32.mrb[157].mxu1  ;;  %9677 = vmatprep.subr.bf16.mxu0 %v10780_v61  ;;  %9695 = vmatprep.subr.bf16.mxu1 %v10781_v17  ;;  %v10792_v49 = vld [vmem:[#allocation6 + $0x1f0] sm:$0xff]  }
 0x538   :  { %v7411_v12 = vmax.f32 %v7383_v2, 0.0  ;;  %v7305_v54 = vmax.f32 %v14574_v26, %v7086_v36  ;;  %v7307_v9 = vmax.f32 %v14575_v14, %v7189_v55  ;;  %v7088_v59 = vpop.f32.mrb[158].mxu0  ;;  %v7191_v35 = vpop.f32.mrb[158].mxu1 }
 0x539   :  { %v14393_v41 = vpack.c.bf16 %v7410_v15, %v7408_v10  ;;  %v7344_v62 = vmax.f32 %v7304_v5, %v7306_v25  ;;  %v7308_v0 = vmax.f32 %v14576_v3, %v7088_v59  ;;  %v7310_v56 = vmax.f32 %v14577_v50, %v7191_v35  ;;  %v7090_v46 = vpop.f32.mrb[159].mxu0  ;;  %v7193_v11 = vpop.f32.mrb[159].mxu1  ;;  %v14581_v15 = vld [vmem:[#allocation24_spill] sm:$0xff]  ;;  %v14582_v5 = vld [vmem:[#allocation23_spill] sm:$0xff] }
 0x53a   :  { %v7345_v29 = vmax.f32 %v7305_v54, %v7307_v9  ;;  %v7309_v58 = vmax.f32 %v14578_v37, %v7090_v46  ;;  %v7311_v53 = vmax.f32 %v14579_v21, %v7193_v11  ;;  %9678 = vmatpush3.bf16.msra.mxu0 %v10782_v44  ;;  %9696 = vmatpush3.bf16.msra.mxu1 %v10783_v42  ;;  %v10793_v44 = vld [vmem:[#allocation6 + $0x240] sm:$0xff]   ;;  %v14585_v9 = vld [vmem:[#allocation28_spill] sm:$0xff]  ;;  %v14586_v35 = vld [vmem:[#allocation27_spill] sm:$0xff] }
 0x53b   :  { %v7384_v33 = vadd.f32 %v14336_v6, %v7344_v62  ;;  %v7346_v7 = vmax.f32 %v7308_v0, %v7310_v56  ;;  %9679 = vmatprep.subr.bf16.mxu0 %v10784_v24  ;;  %9697 = vmatprep.subr.bf16.mxu1 %v10785_v13  ;;  %v7431_v45 = vpack.c.bf16 %v7411_v12, %v7409_v19  ;;  %v14584_v19 = vld [vmem:[#allocation25_spill] sm:$0xff]  ;;  %v10794_v3 = vld [vmem:[#allocation6 + $0x1b0] sm:$0xff]   ;;  %v10795_v0 = vld [vmem:[#allocation6 + $0x200] sm:$0xff]  }
 0x53c   :  { %v7385_v60 = vadd.f32 %v14341_v16, %v7345_v29  ;;  %v7347_v18 = vmax.f32 %v7309_v58, %v7311_v53  ;;  %v10796_v11 = vld [vmem:[#allocation6 + $0x1f8] sm:$0xff]   ;;  %v10797_v58 = vld [vmem:[#allocation6 + $0x248] sm:$0xff]  }
 0x53d   :  { %v7386_v51 = vadd.f32 %v14336_v6, %v7346_v7  ;;  %8524 = vmatprep.mubr.bf16.mxu1 %v7431_v45  ;;  %v7412_v61 = vmax.f32 %v7384_v33, 0.0  ;;  %v10798_v33 = vld [vmem:[#allocation6 + $0x1b8] sm:$0xff]   ;;  %v10799_v7 = vld [vmem:[#allocation6 + $0x208] sm:$0xff]  }
 0x53e   :  { %v7387_v27 = vadd.f32 %v14341_v16, %v7347_v18  ;;  %9680 = vmatpush3.bf16.msra.mxu0 %v10786_v57  ;;  %9698 = vmatpush3.bf16.msra.mxu1 %v10787_v47  ;;  %v7094_v23 = vpop.f32.mrb[160].mxu0  ;;  %v7197_v4 = vpop.f32.mrb[160].mxu1  ;;  %v7413_v42 = vmax.f32 %v7385_v60, 0.0 }
 0x53f   :  { %v7414_v17 = vmax.f32 %v7386_v51, 0.0  ;;  %v7312_v32 = vmax.f32 %v14034_v20, %v7094_v23  ;;  %v7314_v43 = vmax.f32 %v14580_v28, %v7197_v4  ;;  %v7096_v2 = vpop.f32.mrb[161].mxu0  ;;  %v7199_v1 = vpop.f32.mrb[161].mxu1  ;;  %9681 = vmatprep.subr.bf16.mxu0 %v10788_v22  ;;  %9699 = vmatprep.subr.bf16.mxu1 %v10789_v52  ;;  %v14583_v20 = vld [vmem:[#allocation26_spill] sm:$0xff] }
 0x540   :  { %v7415_v10 = vmax.f32 %v7387_v27, 0.0  ;;  %v7313_v63 = vmax.f32 %v14581_v15, %v7096_v2  ;;  %v7315_v38 = vmax.f32 %v14582_v5, %v7199_v1  ;;  %v7098_v25 = vpop.f32.mrb[162].mxu0  ;;  %v7201_v36 = vpop.f32.mrb[162].mxu1  ;;  %v10800_v27 = vld [vmem:[#allocation6 + $0x250] sm:$0xff]   ;;  %v14590_v15 = vld [vmem:[#allocation10_spill] sm:$0xff] }
 0x541   :  { %v14407_v55 = vpack.c.bf16 %v7414_v17, %v7412_v61  ;;  %v7348_v24 = vmax.f32 %v7312_v32, %v7314_v43  ;;  %v7316_v13 = vmax.f32 %v14583_v20, %v7098_v25  ;;  %v7318_v12 = vmax.f32 %v14584_v19, %v7201_v36  ;;  %v7100_v26 = vpop.f32.mrb[163].mxu0  ;;  %v7203_v54 = vpop.f32.mrb[163].mxu1  ;;  %v14588_v61 = vld [vmem:[#allocation29_spill] sm:$0xff]  ;;  %v10802_v5 = vld [vmem:[#allocation6 + $0x210] sm:$0xff]   ;;  %v10805_v19 = vld [vmem:[#allocation6 + $0x2c8] sm:$0xff]  }
 0x542   :  { %v7349_v14 = vmax.f32 %v7313_v63, %v7315_v38  ;;  %v7317_v59 = vmax.f32 %v14585_v9, %v7100_v26  ;;  %v7319_v62 = vmax.f32 %v14586_v35, %v7203_v54  ;;  %9682 = vmatpush3.bf16.msra.mxu0 %v10790_v48  ;;  %9700 = vmatpush3.bf16.msra.mxu1 %v10791_v8  ;;  %v14587_v48 = vld [vmem:[#allocation30_spill] sm:$0xff]  ;;  %v10806_v26 = vld [vmem:[#allocation6 + $0x218] sm:$0xff]   ;;  %v10807_v54 = vld [vmem:[#allocation6 + $0x288] sm:$0xff]  }
 0x543   :  { %v7388_v50 = vadd.f32 %v14336_v6, %v7348_v24  ;;  %v7350_v56 = vmax.f32 %v7316_v13, %v7318_v12  ;;  %9701 = vmatprep.subr.bf16.mxu1 %v10792_v49  ;;  %9711 = vmatprep.subr.bf16.mxu0 %v10793_v44  ;;  %v7433_v46 = vpack.c.bf16 %v7415_v10, %v7413_v42  ;;  %v10803_v38 = vld [vmem:[#allocation6 + $0x280] sm:$0xff]   ;;  %v10809_v35 = vld [vmem:[#allocation6 + $0x2d0] sm:$0xff]  }
 0x544   :  { %v7389_v29 = vadd.f32 %v14341_v16, %v7349_v14  ;;  %v7351_v37 = vmax.f32 %v7317_v59, %v7319_v62  ;;  %v10808_v59 = vld [vmem:[#allocation6 + $0x260] sm:$0xff]  }
 0x545   :  { %v7390_v21 = vadd.f32 %v14336_v6, %v7350_v56  ;;  %8484 = vmatmul.mubr.bf16.vlgmr.msra.gmra.mrb[172].mxu0 %v14379_v31  ;;  %v7416_v45 = vmax.f32 %v7388_v50, 0.0  ;;  %v10801_v31 = vld [vmem:[#allocation6 + $0x2c0] sm:$0xff]   ;;  %v10812_v50 = vld [vmem:[#allocation6 + $0x268] sm:$0xff]   ;;  %v10813_v56 = vld [vmem:[#allocation6 + $0x2d8] sm:$0xff]  }
 0x546   :  { %v7391_v53 = vadd.f32 %v14341_v16, %v7351_v37  ;;  %9702 = vmatpush3.bf16.msra.mxu1 %v10794_v3  ;;  %9712 = vmatpush3.bf16.msra.mxu0 %v10795_v0  ;;  %v7104_v57 = vpop.f32.mrb[164].mxu0  ;;  %v7207_v47 = vpop.f32.mrb[164].mxu1  ;;  %v7417_v23 = vmax.f32 %v7389_v29, 0.0  ;;  %v10816_v29 = vld [vmem:[#allocation6 + $0x270] sm:$0xff]   ;;  %v10817_v37 = vld [vmem:[#allocation6 + $0x2e0] sm:$0xff]  }
 0x547   :  { %v7418_v22 = vmax.f32 %v7390_v21, 0.0  ;;  %8565 = vmatprep.mubr.bf16.mxu0 %v7433_v46  ;;  %v7320_v52 = vmax.f32 %v14074_v30, %v7104_v57  ;;  %v7322_v60 = vmax.f32 %v14076_v40, %v7207_v47  ;;  %v7106_v18 = vpop.f32.mrb[165].mxu0  ;;  %v7209_v51 = vpop.f32.mrb[165].mxu1  ;;  %9703 = vmatprep.subr.bf16.mxu1 %v10796_v11  ;;  %v14589_v40 = vld [vmem:[#allocation11_spill] sm:$0xff]  ;;  %v10815_v11 = vld [vmem:[#allocation6 + $0x298] sm:$0xff]   ;;  %v10819_v21 = vld [vmem:[#allocation6 + $0x2a0] sm:$0xff]  }
 0x548   :  { %v7419_v4 = vmax.f32 %v7391_v53, 0.0  ;;  %v7321_v8 = vmax.f32 %v14587_v48, %v7106_v18  ;;  %v7323_v17 = vmax.f32 %v14588_v61, %v7209_v51  ;;  %v7108_v32 = vpop.f32.mrb[166].mxu0  ;;  %v7211_v28 = vpop.f32.mrb[166].mxu1  ;;  %9713 = vmatprep.subr.bf16.mxu0 %v10797_v58  ;;  %v10814_v46 = vld [vmem:[#allocation6 + $0x228] sm:$0xff]   ;;  %v10818_v58 = vld [vmem:[#allocation6 + $0x230] sm:$0xff]   ;;  %v10820_v53 = vld [vmem:[#allocation6 + $0x278] sm:$0xff]  }
 0x549   :  { %v14422_v43 = vpack.c.bf16 %v7418_v22, %v7416_v45  ;;  %v7352_v2 = vmax.f32 %v7320_v52, %v7322_v60  ;;  %v7324_v30 = vmax.f32 %v14086_v39, %v7108_v32  ;;  %v7326_v1 = vmax.f32 %v14589_v40, %v7211_v28  ;;  %v7110_v49 = vpop.f32.mrb[167].mxu0  ;;  %v7213_v44 = vpop.f32.mrb[167].mxu1  ;;  %v10804_v39 = vld [vmem:[#allocation6 + $0x258] sm:$0xff]   ;;  %v10821_v57 = vld [vmem:[#allocation6 + $0x2e8] sm:$0xff]   ;;  %v10825_v45 = vld [vmem:[#allocation6 + $0x340] sm:$0xff]  }
 0x54a   :  { %v7353_v42 = vmax.f32 %v7321_v8, %v7323_v17  ;;  %v7325_v10 = vmax.f32 %v14096_v34, %v7110_v49  ;;  %v7327_v63 = vmax.f32 %v14590_v15, %v7213_v44  ;;  %9704 = vmatpush3.bf16.msra.mxu1 %v10798_v33  ;;  %9714 = vmatpush3.bf16.msra.mxu0 %v10799_v7  ;;  %v10822_v47 = vld [vmem:[#allocation6 + $0x238] sm:$0xff]   ;;  %v10823_v33 = vld [vmem:[#allocation6 + $0x2a8] sm:$0xff]   ;;  %v10824_v7 = vld [vmem:[#allocation6 + $0x2f0] sm:$0xff]  }
 0x54b   :  { %v7392_v25 = vadd.f32 %v14336_v6, %v7352_v2  ;;  %v7354_v36 = vmax.f32 %v7324_v30, %v7326_v1  ;;  %9715 = vmatprep.subr.bf16.mxu0 %v10800_v27  ;;  %9733 = vmatprep.subr.bf16.mxu1 %v10801_v31  ;;  %v7435_v24 = vpack.c.bf16 %v7419_v4, %v7417_v23  ;;  %v10826_v22 = vld [vmem:[#allocation6 + $0x2b0] sm:$0xff]   ;;  %v10827_v52 = vld [vmem:[#allocation6 + $0x300] sm:$0xff]   ;;  %v10828_v60 = vld [vmem:[#allocation6 + $0x2f8] sm:$0xff]  }
 0x54c   :  { %v7393_v20 = vadd.f32 %v14341_v16, %v7353_v42  ;;  %v7355_v13 = vmax.f32 %v7325_v10, %v7327_v63  ;;  %v10829_v18 = vld [vmem:[#allocation6 + $0x348] sm:$0xff]   ;;  %v10830_v51 = vld [vmem:[#allocation6 + $0x2b8] sm:$0xff]   ;;  %v10832_v31 = vld [vmem:[#allocation6 + $0x350] sm:$0xff]  }
 0x54d   :  { %v7394_v12 = vadd.f32 %v14336_v6, %v7354_v36  ;;  %8525 = vmatmul.mubr.bf16.vlgmr.msra.gmra.mrb[172].mxu1 %v14393_v41  ;;  %v7420_v14 = vmax.f32 %v7392_v25, 0.0  ;;  %v10810_v6 = vld [vmem:[#allocation6 + $0x220] sm:$0xff]   ;;  %v10811_v41 = vld [vmem:[#allocation6 + $0x290] sm:$0xff]   ;;  %v10831_v27 = vld [vmem:[#allocation6 + $0x308] sm:$0xff]  }
 0x54e   :  { %v7395_v34 = vadd.f32 %v14341_v16, %v7355_v13  ;;  %9716 = vmatpush3.bf16.msra.mxu0 %v10802_v5  ;;  %9734 = vmatpush3.bf16.msra.mxu1 %v10803_v38  ;;  %v7421_v62 = vmax.f32 %v7393_v20, 0.0  ;;  %v10833_v23 = vld [vmem:[#allocation6 + $0x310] sm:$0xff]   ;;  %v10834_v4 = vld [vmem:[#allocation6 + $0x358] sm:$0xff]   ;;  %v10836_v8 = vld [vmem:[#allocation6 + $0x360] sm:$0xff]  }
 0x54f   :  { %v7422_v9 = vmax.f32 %v7394_v12, 0.0  ;;  %8606 = vmatprep.mubr.bf16.mxu1 %v7435_v24  ;;  %9717 = vmatprep.subr.bf16.mxu0 %v10804_v39  ;;  %v10835_v48 = vld [vmem:[#allocation6 + $0x318] sm:$0xff]   ;;  %v10838_v61 = vld [vmem:[#allocation6 + $0x368] sm:$0xff]   ;;  %v10840_v32 = vld [vmem:[#allocation6 + $0x370] sm:$0xff]  }
 0x550   :  { %v7423_v3 = vmax.f32 %v7395_v34, 0.0  ;;  %9735 = vmatprep.subr.bf16.mxu1 %v10805_v19  ;;  %v10839_v17 = vld [vmem:[#allocation6 + $0x328] sm:$0xff]   ;;  %v10841_v28 = vld [vmem:[#allocation6 + $0x330] sm:$0xff]   ;;  %v10842_v2 = vld [vmem:[#allocation6 + $0x378] sm:$0xff]  }
 0x551   :  { %v14433_v0 = vpack.c.bf16 %v7422_v9, %v7420_v14  ;;  %v10843_v30 = vld [vmem:[#allocation6 + $0x338] sm:$0xff]   ;;  %v9510_v10 = vld [vmem:[%s14453_s6] ss:$0 sm:$0xff] }
 0x552   :  { %9718 = vmatpush3.bf16.msra.mxu0 %v10806_v26  ;;  %9736 = vmatpush3.bf16.msra.mxu1 %v10807_v54  ;;  %v7437_v16 = vpack.c.bf16 %v7423_v3, %v7421_v62 }
 0x553   :  { %9719 = vmatprep.subr.bf16.mxu0 %v10808_v59  ;;  %9737 = vmatprep.subr.bf16.mxu1 %v10809_v35 }
 0x556   :  { %9720 = vmatpush3.bf16.msra.mxu0 %v10810_v6  ;;  %9738 = vmatpush3.bf16.msra.mxu1 %v10811_v41 }
 0x557   :  { %9721 = vmatprep.subr.bf16.mxu0 %v10812_v50  ;;  %9739 = vmatprep.subr.bf16.mxu1 %v10813_v56 }
 0x55a   :  { %9722 = vmatpush3.bf16.msra.mxu0 %v10814_v46  ;;  %9740 = vmatpush3.bf16.msra.mxu1 %v10815_v11 }
 0x55b   :  { %9723 = vmatprep.subr.bf16.mxu0 %v10816_v29  ;;  %9741 = vmatprep.subr.bf16.mxu1 %v10817_v37 }
 0x55e   :  { %9724 = vmatpush3.bf16.msra.mxu0 %v10818_v58  ;;  %9742 = vmatpush3.bf16.msra.mxu1 %v10819_v21 }
 0x55f   :  { %9725 = vmatprep.subr.bf16.mxu0 %v10820_v53  ;;  %9743 = vmatprep.subr.bf16.mxu1 %v10821_v57 }
 0x562   :  { %9726 = vmatpush3.bf16.msra.mxu0 %v10822_v47  ;;  %9744 = vmatpush3.bf16.msra.mxu1 %v10823_v33 }
 0x563   :  { %9745 = vmatprep.subr.bf16.mxu1 %v10824_v7  ;;  %9755 = vmatprep.subr.bf16.mxu0 %v10825_v45 }
 0x565   :  { %8566 = vmatmul.mubr.bf16.vlgmr.msra.gmra.mrb[176].mxu0 %v14407_v55  ;;  %v10837_v55 = vld [vmem:[#allocation6 + $0x320] sm:$0xff]  }
 0x566   :  { %9746 = vmatpush3.bf16.msra.mxu1 %v10826_v22  ;;  %9756 = vmatpush3.bf16.msra.mxu0 %v10827_v52 }
 0x567   :  { %8647 = vmatprep.mubr.bf16.mxu0 %v7437_v16  ;;  %9747 = vmatprep.subr.bf16.mxu1 %v10828_v60 }
 0x568   :  { %9757 = vmatprep.subr.bf16.mxu0 %v10829_v18 }
 0x56a   :  { %9748 = vmatpush3.bf16.msra.mxu1 %v10830_v51  ;;  %9758 = vmatpush3.bf16.msra.mxu0 %v10831_v27 }
 0x56b   :  { %9759 = vmatprep.subr.bf16.mxu0 %v10832_v31 }
 0x56d   :  { %8607 = vmatmul.mubr.bf16.vlgmr.msra.gmra.mrb[176].mxu1 %v14422_v43 }
 0x56e   :  { %9760 = vmatpush3.bf16.msra.mxu0 %v10833_v23 }
 0x56f   :  { %9761 = vmatprep.subr.bf16.mxu0 %v10834_v4 }
 0x572   :  { %9762 = vmatpush3.bf16.msra.mxu0 %v10835_v48 }
 0x573   :  { %9763 = vmatprep.subr.bf16.mxu0 %v10836_v8 }
 0x576   :  { %9764 = vmatpush3.bf16.msra.mxu0 %v10837_v55 }
 0x577   :  { %9765 = vmatprep.subr.bf16.mxu0 %v10838_v61 }
 0x57a   :  { %9766 = vmatpush3.bf16.msra.mxu0 %v10839_v17 }
 0x57b   :  { %9767 = vmatprep.subr.bf16.mxu0 %v10840_v32 }
 0x57e   :  { %9768 = vmatpush3.bf16.msra.mxu0 %v10841_v28 }
 0x57f   :  { %9769 = vmatprep.subr.bf16.mxu0 %v10842_v2 }
 0x582   :  { %9770 = vmatpush3.bf16.msra.mxu0 %v10843_v30 }
 0x585   :  { %8648 = vmatmul.mubr.bf16.vlgmr.msra.gmra.mrb[180].mxu0 %v14433_v0 }
 0x5f8   :  { %v9639_v43 = vpop.f32.mrb[168].mxu0 }
 0x5f9   :  { %v9640_v40 = vpop.f32.mrb[169].mxu0 }
 0x5fa   :  { %v9641_v1 = vadd.f32 %v9640_v40, %v9639_v43  ;;  %v9642_v49 = vpop.f32.mrb[170].mxu0 }
 0x5fb   :  { %v9643_v44 = vpop.f32.mrb[171].mxu0 }
 0x5fc   :  { %v9644_v42 = vadd.f32 %v9643_v44, %v9642_v49  ;;  %v8404_v5 = vadd.f32 %v9641_v1, %v9510_v10 }
 0x5fe   :  { %v8407_v24 = vadd.f32 %v9644_v42, %v9510_v10 }
 0x600   :  { %v9661_v15 = vpop.f32.mrb[168].mxu1 }
 0x601   :  { %v9662_v63 = vpop.f32.mrb[169].mxu1 }
 0x602   :  { %v9663_v38 = vadd.f32 %v9662_v63, %v9661_v15  ;;  %v9664_v25 = vpop.f32.mrb[170].mxu1 }
 0x603   :  { %v9665_v36 = vpop.f32.mrb[171].mxu1 }
 0x604   :  { %v8445_v39 = vadd.f32 %v9663_v38, %v8404_v5  ;;  %v9666_v20 = vadd.f32 %v9665_v36, %v9664_v25 }
 0x606   :  { %v8448_v13 = vadd.f32 %v9666_v20, %v8407_v24 }
 0x618   :  { %v9683_v19 = vpop.f32.mrb[172].mxu0 }
 0x619   :  { %v9684_v12 = vpop.f32.mrb[173].mxu0 }
 0x61a   :  { %v9685_v34 = vadd.f32 %v9684_v12, %v9683_v19  ;;  %v9686_v26 = vpop.f32.mrb[174].mxu0 }
 0x61b   :  { %v9687_v54 = vpop.f32.mrb[175].mxu0 }
 0x61c   :  { %v8486_v14 = vadd.f32 %v9685_v34, %v8445_v39  ;;  %v9688_v9 = vadd.f32 %v9687_v54, %v9686_v26 }
 0x61e   :  { %v8489_v59 = vadd.f32 %v9688_v9, %v8448_v13 }
 0x620   :  { %v9705_v35 = vpop.f32.mrb[172].mxu1 }
 0x621   :  { %v9706_v62 = vpop.f32.mrb[173].mxu1 }
 0x622   :  { %v9707_v3 = vadd.f32 %v9706_v62, %v9705_v35  ;;  %v9708_v0 = vpop.f32.mrb[174].mxu1 }
 0x623   :  { %v9709_v6 = vpop.f32.mrb[175].mxu1 }
 0x624   :  { %v8527_v41 = vadd.f32 %v9707_v3, %v8486_v14  ;;  %v9710_v16 = vadd.f32 %v9709_v6, %v9708_v0 }
 0x626   :  { %v8530_v50 = vadd.f32 %v9710_v16, %v8489_v59 }
 0x638   :  { %v9727_v56 = vpop.f32.mrb[176].mxu0 }
 0x639   :  { %v9728_v46 = vpop.f32.mrb[177].mxu0 }
 0x63a   :  { %v9729_v11 = vadd.f32 %v9728_v46, %v9727_v56  ;;  %v9730_v29 = vpop.f32.mrb[178].mxu0 }
 0x63b   :  { %v9731_v37 = vpop.f32.mrb[179].mxu0 }
 0x63c   :  { %v8568_v58 = vadd.f32 %v9729_v11, %v8527_v41  ;;  %v9732_v21 = vadd.f32 %v9731_v37, %v9730_v29 }
 0x63e   :  { %v8571_v53 = vadd.f32 %v9732_v21, %v8530_v50 }
 0x640   :  { %v9749_v57 = vpop.f32.mrb[176].mxu1 }
 0x641   :  { %v9750_v47 = vpop.f32.mrb[177].mxu1 }
 0x642   :  { %v9751_v33 = vadd.f32 %v9750_v47, %v9749_v57  ;;  %v9752_v7 = vpop.f32.mrb[178].mxu1 }
 0x643   :  { %v9753_v45 = vpop.f32.mrb[179].mxu1 }
 0x644   :  { %v8609_v22 = vadd.f32 %v9751_v33, %v8568_v58  ;;  %v9754_v52 = vadd.f32 %v9753_v45, %v9752_v7 }
 0x646   :  { %v8612_v60 = vadd.f32 %v9754_v52, %v8571_v53 }
 0x658   :  { %v9771_v18 = vpop.f32.mrb[180].mxu0 }
 0x659   :  { %v9772_v51 = vpop.f32.mrb[181].mxu0 }
 0x65a   :  { %v9773_v27 = vadd.f32 %v9772_v51, %v9771_v18  ;;  %v9774_v31 = vpop.f32.mrb[182].mxu0 }
 0x65b   :  { %v9775_v23 = vpop.f32.mrb[183].mxu0 }
 0x65c   :  { %v8650_v4 = vadd.f32 %v9773_v27, %v8609_v22  ;;  %v9776_v48 = vadd.f32 %v9775_v23, %v9774_v31 }
 0x65e   :  { %8656 = vst [vmem:[%s14454_s7] sm:$0xff] %v8650_v4  ;;  %v8653_v8 = vadd.f32 %v9776_v48, %v8612_v60 }
 0x660   :  { %8657 = vst [vmem:[%s14454_s7 + $0x8] sm:$0xff] %v8653_v8 }
 0x661   :  { %8662 = vsyncpa [#allocation5], 1 }
 0x662   :  { %8663 = vsyncpa [#allocation7], 1 }

</bundles_post_ra>
